<compile_context>
chip_gen: v7x
topology: tpu7x:2x2x1
jax: 0.10.0
libtpu: 0.0.40
codegen_flags: <defaults>
</compile_context>

<pallas_src>
import math

import jax
import jax.numpy as jnp
from jax import lax
from jax.experimental import pallas as pl
from jax.experimental.pallas import tpu as pltpu

DIM = 256                     # embed dim (module default)
NUM_HEADS = 8
HEAD_DIM = DIM // NUM_HEADS   # 32


def _make_attention_kernel(L, nb):
    """Kernel processing `nb` batch elements (seq-len L each) per grid step."""

    def kernel(tgt_ref, ref_ref, vecs_ref, w_ref, out_ref,
               q_s, k_s, v_s, heads_s):
        # tgt_ref / ref_ref / out_ref : (nb*L, C) f32   (raw, pre-BN rows)
        # vecs_ref : (8, C) f32 rows = [tgt_scale, tgt_shift, ref_scale,
        #                               ref_shift, bq(scaled), bk, bv, bo]
        # w_ref    : (C, 4C) bf16 = [Wq | Wk | Wv | Wo] (pre-transposed,
        #            q-scale folded into Wq)
        # q_s/k_s/v_s/heads_s : (nb*L, C) bf16 VMEM scratch
        tsc = vecs_ref[0:1, :]
        tsh = vecs_ref[1:2, :]
        rsc = vecs_ref[2:3, :]
        rsh = vecs_ref[3:4, :]
        bq = vecs_ref[4:5, :]
        bk = vecs_ref[5:6, :]
        bv = vecs_ref[6:7, :]
        bo = vecs_ref[7:8, :]

        # In-kernel BatchNorm apply (VPU), bf16 operands for the MXU.
        x_t = (tgt_ref[...] * tsc + tsh).astype(jnp.bfloat16)   # (BL, C)
        x_r = (ref_ref[...] * rsc + rsh).astype(jnp.bfloat16)

        # Batch-flattened projections: M = nb*L rows per matmul, f32 accum.
        q_s[...] = (jnp.dot(x_t, w_ref[:, 0 * DIM:1 * DIM],
                            preferred_element_type=jnp.float32) + bq
                    ).astype(jnp.bfloat16)
        k_s[...] = (jnp.dot(x_r, w_ref[:, 1 * DIM:2 * DIM],
                            preferred_element_type=jnp.float32) + bk
                    ).astype(jnp.bfloat16)
        v_s[...] = (jnp.dot(x_r, w_ref[:, 2 * DIM:3 * DIM],
                            preferred_element_type=jnp.float32) + bv
                    ).astype(jnp.bfloat16)

        # Per-(batch, head) attention.  Head outputs land in the columns of
        # heads_s so the output projection below is a single K=256 matmul.
        for b in range(nb):
            rows = slice(b * L, (b + 1) * L)
            for hd in range(NUM_HEADS):
                cols = slice(hd * HEAD_DIM, (hd + 1) * HEAD_DIM)
                qh = q_s[rows, cols]                               # (L, hd) bf16
                kh = k_s[rows, cols]
                vh = v_s[rows, cols]

                # scores: contract on the head dim of both operands (q @ k^T)
                s = lax.dot_general(qh, kh, (((1,), (1,)), ((), ())),
                                    preferred_element_type=jnp.float32)  # (L, L)
                s = s - jnp.max(s, axis=-1, keepdims=True)
                p = jnp.exp(s)
                # normalize AFTER P@V on the small (L, hd) tile, in f32
                inv = pl.reciprocal(jnp.sum(p, axis=-1, keepdims=True),
                                    approx=True)
                ho = jnp.dot(p.astype(jnp.bfloat16), vh,
                             preferred_element_type=jnp.float32)         # (L, hd)
                heads_s[rows, cols] = (ho * inv).astype(jnp.bfloat16)

        # Single fused output projection (K=256), residual on RAW tgt, ReLU.
        o = jnp.dot(heads_s[...], w_ref[:, 3 * DIM:4 * DIM],
                    preferred_element_type=jnp.float32) + bo
        out_ref[...] = jnp.maximum(o + tgt_ref[...], 0.0)

    return kernel


def attention_module_forward(tgt, ref, params, batch_parallel=None):
    """Equivalent of AttentionModule.forward((tgt, ref)) -> (relu(fused), ref)."""
    bs, c, h, w = tgt.shape
    L = h * w
    eps = 1e-5

    if batch_parallel is None:
        # Dual-TensorCore chips: shard the batch across cores; single-TC chips:
        # batch-flatten into one grid step so projections run at M = bs*L.
        kind = (getattr(jax.devices()[0], "device_kind", "") or "").lower()
        batch_parallel = "v7" in kind

    # --- BatchNorm2d (training-mode batch stats) folded to scale/shift -------
    # Needs a global reduction over the whole batch, so it is done in plain JAX
    # and only the folded per-channel (scale, shift) enters the kernel.
    def bn_fold(x, gamma, beta):
        mean = jnp.mean(x, axis=(0, 2, 3))
        var = jnp.mean((x - mean.reshape(1, -1, 1, 1)) ** 2, axis=(0, 2, 3))
        scale = gamma * lax.rsqrt(var + eps)
        shift = beta - mean * scale
        return scale.reshape(1, c), shift.reshape(1, c)

    tsc, tsh = bn_fold(tgt, params["bn_tgt_w"], params["bn_tgt_b"])
    rsc, rsh = bn_fold(ref, params["bn_ref_w"], params["bn_ref_b"])

    # One packed (8, C) array for all small vector operands -> one DMA.
    vecs = jnp.concatenate(
        [tsc, tsh, rsc, rsh,
         params["bq"], params["bk"], params["bv"], params["bo"]], axis=0)

    # NCHW -> (bs*L, C) rows: [batch0 positions..., batch1 positions...]
    def to_rows(x):
        return jnp.transpose(x.reshape(bs, c, L), (0, 2, 1)).reshape(bs * L, c)

    tgt_rows = to_rows(tgt)
    ref_rows = to_rows(ref)

    num_blocks = bs if batch_parallel else 1
    nb = bs // num_blocks
    blrows = nb * L

    row_spec = pl.BlockSpec((blrows, c), lambda i: (i, 0))
    vec_spec = pl.BlockSpec((8, c), lambda i: (0, 0))
    w_spec = pl.BlockSpec((c, 4 * c), lambda i: (0, 0))

    fused_rows = pl.pallas_call(
        _make_attention_kernel(L, nb),
        out_shape=jax.ShapeDtypeStruct((bs * L, c), jnp.float32),
        grid_spec=pltpu.PrefetchScalarGridSpec(
            num_scalar_prefetch=0,
            grid=(num_blocks,),
            in_specs=[row_spec, row_spec, vec_spec, w_spec],
            out_specs=row_spec,
            scratch_shapes=[pltpu.VMEM((blrows, c), jnp.bfloat16)] * 4,
        ),
        compiler_params=pltpu.CompilerParams(
            dimension_semantics=("parallel",)),
    )(tgt_rows, ref_rows, vecs, params["w_packed"])

    # (bs*L, C) -> NCHW
    fused_nchw = jnp.transpose(
        fused_rows.reshape(bs, L, c), (0, 2, 1)).reshape(bs, c, h, w)
    return fused_nchw, ref


def make_params(key):
    """Deterministic synthetic parameters matching PyTorch MultiheadAttention/BatchNorm2d."""
    k_in, k_out = jax.random.split(key, 2)
    # in_proj_weight: (3*dim, dim); out_proj.weight: (dim, dim); biases zero-init.
    in_proj = jax.random.normal(k_in, (3 * DIM, DIM), jnp.float32) * (1.0 / math.sqrt(DIM))
    out_proj = jax.random.normal(k_out, (DIM, DIM), jnp.float32) * (1.0 / math.sqrt(DIM))
    wq, wk, wv = in_proj[:DIM], in_proj[DIM:2 * DIM], in_proj[2 * DIM:]
    scale = 1.0 / math.sqrt(HEAD_DIM)

    # Kernel computes x @ W (== x @ W_pytorch.T); Q scale folded into Wq/bq;
    # all four weights packed into one (C, 4C) bf16 array: [Wq | Wk | Wv | Wo].
    w_packed = jnp.concatenate(
        [wq.T * scale, wk.T, wv.T, out_proj.T], axis=1).astype(jnp.bfloat16)

    zeros = jnp.zeros((1, DIM), jnp.float32)
    return {
        "w_packed": w_packed,
        "bq": zeros * scale,      # q-scale folded (zero-init anyway)
        "bk": zeros,
        "bv": zeros,
        "bo": zeros,
        # BatchNorm2d default init: weight=1, bias=0
        "bn_tgt_w": jnp.ones((DIM,), jnp.float32),
        "bn_tgt_b": jnp.zeros((DIM,), jnp.float32),
        "bn_ref_w": jnp.ones((DIM,), jnp.float32),
        "bn_ref_b": jnp.zeros((DIM,), jnp.float32),
    }


if __name__ == "__main__":
    key = jax.random.PRNGKey(0)
    k_tgt, k_ref, k_par = jax.random.split(key, 3)

    bs, h, w = 2, 8, 8          # small spatial; channel dim = 256 (module default)
    tgt = jax.random.normal(k_tgt, (bs, DIM, h, w), jnp.float32)
    ref = jax.random.normal(k_ref, (bs, DIM, h, w), jnp.float32)
    params = make_params(k_par)

    fwd = jax.jit(attention_module_forward)
    out, ref_out = fwd(tgt, ref, params)
    jax.block_until_ready(out)
    jax.block_until_ready(ref_out)

    assert out.shape == (bs, DIM, h, w) and ref_out.shape == (bs, DIM, h, w)
    assert bool(jnp.all(out >= 0.0))    # ReLU output
    print("KERNEL_OK")
</pallas_src>

<mosaic_0001>
module attributes {stable_mosaic.version = 11 : i64} {
  func.func @kernel(%arg0: i32, %arg1: memref<128x256xf32, #tpu.memory_space<vmem>>, %arg2: memref<128x256xf32, #tpu.memory_space<vmem>>, %arg3: memref<8x256xf32, #tpu.memory_space<vmem>>, %arg4: memref<256x1024xbf16, #tpu.memory_space<vmem>>, %arg5: memref<128x256xf32, #tpu.memory_space<vmem>>, %arg6: memref<128x256xbf16, #tpu.memory_space<vmem>>, %arg7: memref<128x256xbf16, #tpu.memory_space<vmem>>, %arg8: memref<128x256xbf16, #tpu.memory_space<vmem>>, %arg9: memref<128x256xbf16, #tpu.memory_space<vmem>>) attributes {dimension_semantics = [#tpu.dimension_semantics<parallel>], iteration_bounds = array<i64: 1>, scalar_prefetch = 0 : i64, scratch_operands = 4 : i64, tpu.core_type = #tpu.core_type<tc>, window_params = [{transform_indices = @transform_0, window_bounds = array<i64: 128, 256>}, {transform_indices = @transform_1, window_bounds = array<i64: 128, 256>}, {pipeline_mode = #tpu.pipeline_mode<synchronous>, transform_indices = @transform_2, window_bounds = array<i64: 8, 256>}, {pipeline_mode = #tpu.pipeline_mode<synchronous>, transform_indices = @transform_3, window_bounds = array<i64: 256, 1024>}, {transform_indices = @transform_4, window_bounds = array<i64: 128, 256>}]} {
    %c0 = arith.constant 0 : index
    %c0_0 = arith.constant 0 : index
    %0 = vector.load %arg3[%c0, %c0_0] : memref<8x256xf32, #tpu.memory_space<vmem>>, vector<1x256xf32>
    %c1 = arith.constant 1 : index
    %c0_1 = arith.constant 0 : index
    %1 = vector.load %arg3[%c1, %c0_1] : memref<8x256xf32, #tpu.memory_space<vmem>>, vector<1x256xf32>
    %c2 = arith.constant 2 : index
    %c0_2 = arith.constant 0 : index
    %2 = vector.load %arg3[%c2, %c0_2] : memref<8x256xf32, #tpu.memory_space<vmem>>, vector<1x256xf32>
    %c3 = arith.constant 3 : index
    %c0_3 = arith.constant 0 : index
    %3 = vector.load %arg3[%c3, %c0_3] : memref<8x256xf32, #tpu.memory_space<vmem>>, vector<1x256xf32>
    %c4 = arith.constant 4 : index
    %c0_4 = arith.constant 0 : index
    %4 = vector.load %arg3[%c4, %c0_4] : memref<8x256xf32, #tpu.memory_space<vmem>>, vector<1x256xf32>
    %c5 = arith.constant 5 : index
    %c0_5 = arith.constant 0 : index
    %5 = vector.load %arg3[%c5, %c0_5] : memref<8x256xf32, #tpu.memory_space<vmem>>, vector<1x256xf32>
    %c6 = arith.constant 6 : index
    %c0_6 = arith.constant 0 : index
    %6 = vector.load %arg3[%c6, %c0_6] : memref<8x256xf32, #tpu.memory_space<vmem>>, vector<1x256xf32>
    %c7 = arith.constant 7 : index
    %c0_7 = arith.constant 0 : index
    %7 = vector.load %arg3[%c7, %c0_7] : memref<8x256xf32, #tpu.memory_space<vmem>>, vector<1x256xf32>
    %c0_8 = arith.constant 0 : index
    %c0_9 = arith.constant 0 : index
    %8 = vector.load %arg1[%c0_8, %c0_9] : memref<128x256xf32, #tpu.memory_space<vmem>>, vector<128x256xf32>
    %9 = vector.broadcast %0 : vector<1x256xf32> to vector<128x256xf32>
    %10 = arith.mulf %8, %9 : vector<128x256xf32>
    %11 = vector.broadcast %1 : vector<1x256xf32> to vector<128x256xf32>
    %12 = arith.addf %10, %11 : vector<128x256xf32>
    %13 = arith.truncf %12 : vector<128x256xf32> to vector<128x256xbf16>
    %c0_10 = arith.constant 0 : index
    %c0_11 = arith.constant 0 : index
    %14 = vector.load %arg2[%c0_10, %c0_11] : memref<128x256xf32, #tpu.memory_space<vmem>>, vector<128x256xf32>
    %15 = vector.broadcast %2 : vector<1x256xf32> to vector<128x256xf32>
    %16 = arith.mulf %14, %15 : vector<128x256xf32>
    %17 = vector.broadcast %3 : vector<1x256xf32> to vector<128x256xf32>
    %18 = arith.addf %16, %17 : vector<128x256xf32>
    %19 = arith.truncf %18 : vector<128x256xf32> to vector<128x256xbf16>
    %c0_12 = arith.constant 0 : index
    %c0_13 = arith.constant 0 : index
    %20 = vector.load %arg4[%c0_12, %c0_13] : memref<256x1024xbf16, #tpu.memory_space<vmem>>, vector<256x256xbf16>
    %cst = arith.constant dense<0.000000e+00> : vector<128x256xf32>
    %21 = tpu.matmul %13, %20, %cst {dimension_numbers = #tpu.dot_dimension_numbers<[1], [0], [0], [1], [0, 0, 1, 1], [], []>} : vector<128x256xbf16>, vector<256x256xbf16>, vector<128x256xf32> -> vector<128x256xf32>
    %22 = vector.broadcast %4 : vector<1x256xf32> to vector<128x256xf32>
    %23 = arith.addf %21, %22 : vector<128x256xf32>
    %24 = arith.truncf %23 : vector<128x256xf32> to vector<128x256xbf16>
    %c0_14 = arith.constant 0 : index
    %c0_15 = arith.constant 0 : index
    %25 = vector.load %arg6[%c0_14, %c0_15] : memref<128x256xbf16, #tpu.memory_space<vmem>>, vector<128x256xbf16>
    tpu.vector_store %arg6[%c0_14, %c0_15], %24 {strides = array<i32>} : memref<128x256xbf16, #tpu.memory_space<vmem>>, vector<128x256xbf16>,
    %c0_16 = arith.constant 0 : index
    %c256 = arith.constant 256 : index
    %26 = vector.load %arg4[%c0_16, %c256] : memref<256x1024xbf16, #tpu.memory_space<vmem>>, vector<256x256xbf16>
    %cst_17 = arith.constant dense<0.000000e+00> : vector<128x256xf32>
    %27 = tpu.matmul %19, %26, %cst_17 {dimension_numbers = #tpu.dot_dimension_numbers<[1], [0], [0], [1], [0, 0, 1, 1], [], []>} : vector<128x256xbf16>, vector<256x256xbf16>, vector<128x256xf32> -> vector<128x256xf32>
    %28 = vector.broadcast %5 : vector<1x256xf32> to vector<128x256xf32>
    %29 = arith.addf %27, %28 : vector<128x256xf32>
    %30 = arith.truncf %29 : vector<128x256xf32> to vector<128x256xbf16>
    %c0_18 = arith.constant 0 : index
    %c0_19 = arith.constant 0 : index
    %31 = vector.load %arg7[%c0_18, %c0_19] : memref<128x256xbf16, #tpu.memory_space<vmem>>, vector<128x256xbf16>
    tpu.vector_store %arg7[%c0_18, %c0_19], %30 {strides = array<i32>} : memref<128x256xbf16, #tpu.memory_space<vmem>>, vector<128x256xbf16>,
    %c0_20 = arith.constant 0 : index
    %c512 = arith.constant 512 : index
    %32 = vector.load %arg4[%c0_20, %c512] : memref<256x1024xbf16, #tpu.memory_space<vmem>>, vector<256x256xbf16>
    %cst_21 = arith.constant dense<0.000000e+00> : vector<128x256xf32>
    %33 = tpu.matmul %19, %32, %cst_21 {dimension_numbers = #tpu.dot_dimension_numbers<[1], [0], [0], [1], [0, 0, 1, 1], [], []>} : vector<128x256xbf16>, vector<256x256xbf16>, vector<128x256xf32> -> vector<128x256xf32>
    %34 = vector.broadcast %6 : vector<1x256xf32> to vector<128x256xf32>
    %35 = arith.addf %33, %34 : vector<128x256xf32>
    %36 = arith.truncf %35 : vector<128x256xf32> to vector<128x256xbf16>
    %c0_22 = arith.constant 0 : index
    %c0_23 = arith.constant 0 : index
    %37 = vector.load %arg8[%c0_22, %c0_23] : memref<128x256xbf16, #tpu.memory_space<vmem>>, vector<128x256xbf16>
    tpu.vector_store %arg8[%c0_22, %c0_23], %36 {strides = array<i32>} : memref<128x256xbf16, #tpu.memory_space<vmem>>, vector<128x256xbf16>,
    %c0_24 = arith.constant 0 : index
    %c0_25 = arith.constant 0 : index
    %38 = vector.load %arg6[%c0_24, %c0_25] : memref<128x256xbf16, #tpu.memory_space<vmem>>, vector<64x32xbf16>
    %c0_26 = arith.constant 0 : index
    %c0_27 = arith.constant 0 : index
    %39 = vector.load %arg7[%c0_26, %c0_27] : memref<128x256xbf16, #tpu.memory_space<vmem>>, vector<64x32xbf16>
    %c0_28 = arith.constant 0 : index
    %c0_29 = arith.constant 0 : index
    %40 = vector.load %arg8[%c0_28, %c0_29] : memref<128x256xbf16, #tpu.memory_space<vmem>>, vector<64x32xbf16>
    %cst_30 = arith.constant dense<0.000000e+00> : vector<64x64xf32>
    %41 = tpu.matmul %38, %39, %cst_30 {dimension_numbers = #tpu.dot_dimension_numbers<[1], [1], [0], [0], [0, 0, 1, 0], [], []>} : vector<64x32xbf16>, vector<64x32xbf16>, vector<64x64xf32> -> vector<64x64xf32>
    %cst_31 = arith.constant dense<0xFF800000> : vector<64xf32>
    %42 = vector.multi_reduction <maximumf>, %41, %cst_31 [1] : vector<64x64xf32> to vector<64xf32>
    %43 = vector.shape_cast %42 : vector<64xf32> to vector<64x1xf32>
    %44 = vector.broadcast %43 : vector<64x1xf32> to vector<64x64xf32>
    %45 = arith.subf %41, %44 : vector<64x64xf32>
    %46 = math.exp %45 : vector<64x64xf32>
    %cst_32 = arith.constant dense<0.000000e+00> : vector<64xf32>
    %47 = vector.multi_reduction <add>, %46, %cst_32 [1] : vector<64x64xf32> to vector<64xf32>
    %48 = vector.shape_cast %47 : vector<64xf32> to vector<64x1xf32>
    %49 = tpu.reciprocal %48 {approx = true} : vector<64x1xf32> -> vector<64x1xf32>
    %50 = arith.truncf %46 : vector<64x64xf32> to vector<64x64xbf16>
    %cst_33 = arith.constant dense<0.000000e+00> : vector<64x32xf32>
    %51 = tpu.matmul %50, %40, %cst_33 {dimension_numbers = #tpu.dot_dimension_numbers<[1], [0], [0], [1], [0, 0, 1, 1], [], []>} : vector<64x64xbf16>, vector<64x32xbf16>, vector<64x32xf32> -> vector<64x32xf32>
    %52 = vector.broadcast %49 : vector<64x1xf32> to vector<64x32xf32>
    %53 = arith.mulf %51, %52 : vector<64x32xf32>
    %54 = arith.truncf %53 : vector<64x32xf32> to vector<64x32xbf16>
    %c0_34 = arith.constant 0 : index
    %c0_35 = arith.constant 0 : index
    %55 = vector.load %arg9[%c0_34, %c0_35] : memref<128x256xbf16, #tpu.memory_space<vmem>>, vector<64x32xbf16>
    tpu.vector_store %arg9[%c0_34, %c0_35], %54 {strides = array<i32>} : memref<128x256xbf16, #tpu.memory_space<vmem>>, vector<64x32xbf16>,
    %c0_36 = arith.constant 0 : index
    %c32 = arith.constant 32 : index
    %56 = vector.load %arg6[%c0_36, %c32] : memref<128x256xbf16, #tpu.memory_space<vmem>>, vector<64x32xbf16>
    %c0_37 = arith.constant 0 : index
    %c32_38 = arith.constant 32 : index
    %57 = vector.load %arg7[%c0_37, %c32_38] : memref<128x256xbf16, #tpu.memory_space<vmem>>, vector<64x32xbf16>
    %c0_39 = arith.constant 0 : index
    %c32_40 = arith.constant 32 : index
    %58 = vector.load %arg8[%c0_39, %c32_40] : memref<128x256xbf16, #tpu.memory_space<vmem>>, vector<64x32xbf16>
    %cst_41 = arith.constant dense<0.000000e+00> : vector<64x64xf32>
    %59 = tpu.matmul %56, %57, %cst_41 {dimension_numbers = #tpu.dot_dimension_numbers<[1], [1], [0], [0], [0, 0, 1, 0], [], []>} : vector<64x32xbf16>, vector<64x32xbf16>, vector<64x64xf32> -> vector<64x64xf32>
    %cst_42 = arith.constant dense<0xFF800000> : vector<64xf32>
    %60 = vector.multi_reduction <maximumf>, %59, %cst_42 [1] : vector<64x64xf32> to vector<64xf32>
    %61 = vector.shape_cast %60 : vector<64xf32> to vector<64x1xf32>
    %62 = vector.broadcast %61 : vector<64x1xf32> to vector<64x64xf32>
    %63 = arith.subf %59, %62 : vector<64x64xf32>
    %64 = math.exp %63 : vector<64x64xf32>
    %cst_43 = arith.constant dense<0.000000e+00> : vector<64xf32>
    %65 = vector.multi_reduction <add>, %64, %cst_43 [1] : vector<64x64xf32> to vector<64xf32>
    %66 = vector.shape_cast %65 : vector<64xf32> to vector<64x1xf32>
    %67 = tpu.reciprocal %66 {approx = true} : vector<64x1xf32> -> vector<64x1xf32>
    %68 = arith.truncf %64 : vector<64x64xf32> to vector<64x64xbf16>
    %cst_44 = arith.constant dense<0.000000e+00> : vector<64x32xf32>
    %69 = tpu.matmul %68, %58, %cst_44 {dimension_numbers = #tpu.dot_dimension_numbers<[1], [0], [0], [1], [0, 0, 1, 1], [], []>} : vector<64x64xbf16>, vector<64x32xbf16>, vector<64x32xf32> -> vector<64x32xf32>
    %70 = vector.broadcast %67 : vector<64x1xf32> to vector<64x32xf32>
    %71 = arith.mulf %69, %70 : vector<64x32xf32>
    %72 = arith.truncf %71 : vector<64x32xf32> to vector<64x32xbf16>
    %c0_45 = arith.constant 0 : index
    %c32_46 = arith.constant 32 : index
    %73 = vector.load %arg9[%c0_45, %c32_46] : memref<128x256xbf16, #tpu.memory_space<vmem>>, vector<64x32xbf16>
    tpu.vector_store %arg9[%c0_45, %c32_46], %72 {strides = array<i32>} : memref<128x256xbf16, #tpu.memory_space<vmem>>, vector<64x32xbf16>,
    %c0_47 = arith.constant 0 : index
    %c64 = arith.constant 64 : index
    %74 = vector.load %arg6[%c0_47, %c64] : memref<128x256xbf16, #tpu.memory_space<vmem>>, vector<64x32xbf16>
    %c0_48 = arith.constant 0 : index
    %c64_49 = arith.constant 64 : index
    %75 = vector.load %arg7[%c0_48, %c64_49] : memref<128x256xbf16, #tpu.memory_space<vmem>>, vector<64x32xbf16>
    %c0_50 = arith.constant 0 : index
    %c64_51 = arith.constant 64 : index
    %76 = vector.load %arg8[%c0_50, %c64_51] : memref<128x256xbf16, #tpu.memory_space<vmem>>, vector<64x32xbf16>
    %cst_52 = arith.constant dense<0.000000e+00> : vector<64x64xf32>
    %77 = tpu.matmul %74, %75, %cst_52 {dimension_numbers = #tpu.dot_dimension_numbers<[1], [1], [0], [0], [0, 0, 1, 0], [], []>} : vector<64x32xbf16>, vector<64x32xbf16>, vector<64x64xf32> -> vector<64x64xf32>
    %cst_53 = arith.constant dense<0xFF800000> : vector<64xf32>
    %78 = vector.multi_reduction <maximumf>, %77, %cst_53 [1] : vector<64x64xf32> to vector<64xf32>
    %79 = vector.shape_cast %78 : vector<64xf32> to vector<64x1xf32>
    %80 = vector.broadcast %79 : vector<64x1xf32> to vector<64x64xf32>
    %81 = arith.subf %77, %80 : vector<64x64xf32>
    %82 = math.exp %81 : vector<64x64xf32>
    %cst_54 = arith.constant dense<0.000000e+00> : vector<64xf32>
    %83 = vector.multi_reduction <add>, %82, %cst_54 [1] : vector<64x64xf32> to vector<64xf32>
    %84 = vector.shape_cast %83 : vector<64xf32> to vector<64x1xf32>
    %85 = tpu.reciprocal %84 {approx = true} : vector<64x1xf32> -> vector<64x1xf32>
    %86 = arith.truncf %82 : vector<64x64xf32> to vector<64x64xbf16>
    %cst_55 = arith.constant dense<0.000000e+00> : vector<64x32xf32>
    %87 = tpu.matmul %86, %76, %cst_55 {dimension_numbers = #tpu.dot_dimension_numbers<[1], [0], [0], [1], [0, 0, 1, 1], [], []>} : vector<64x64xbf16>, vector<64x32xbf16>, vector<64x32xf32> -> vector<64x32xf32>
    %88 = vector.broadcast %85 : vector<64x1xf32> to vector<64x32xf32>
    %89 = arith.mulf %87, %88 : vector<64x32xf32>
    %90 = arith.truncf %89 : vector<64x32xf32> to vector<64x32xbf16>
    %c0_56 = arith.constant 0 : index
    %c64_57 = arith.constant 64 : index
    %91 = vector.load %arg9[%c0_56, %c64_57] : memref<128x256xbf16, #tpu.memory_space<vmem>>, vector<64x32xbf16>
    tpu.vector_store %arg9[%c0_56, %c64_57], %90 {strides = array<i32>} : memref<128x256xbf16, #tpu.memory_space<vmem>>, vector<64x32xbf16>,
    %c0_58 = arith.constant 0 : index
    %c96 = arith.constant 96 : index
    %92 = vector.load %arg6[%c0_58, %c96] : memref<128x256xbf16, #tpu.memory_space<vmem>>, vector<64x32xbf16>
    %c0_59 = arith.constant 0 : index
    %c96_60 = arith.constant 96 : index
    %93 = vector.load %arg7[%c0_59, %c96_60] : memref<128x256xbf16, #tpu.memory_space<vmem>>, vector<64x32xbf16>
    %c0_61 = arith.constant 0 : index
    %c96_62 = arith.constant 96 : index
    %94 = vector.load %arg8[%c0_61, %c96_62] : memref<128x256xbf16, #tpu.memory_space<vmem>>, vector<64x32xbf16>
    %cst_63 = arith.constant dense<0.000000e+00> : vector<64x64xf32>
    %95 = tpu.matmul %92, %93, %cst_63 {dimension_numbers = #tpu.dot_dimension_numbers<[1], [1], [0], [0], [0, 0, 1, 0], [], []>} : vector<64x32xbf16>, vector<64x32xbf16>, vector<64x64xf32> -> vector<64x64xf32>
    %cst_64 = arith.constant dense<0xFF800000> : vector<64xf32>
    %96 = vector.multi_reduction <maximumf>, %95, %cst_64 [1] : vector<64x64xf32> to vector<64xf32>
    %97 = vector.shape_cast %96 : vector<64xf32> to vector<64x1xf32>
    %98 = vector.broadcast %97 : vector<64x1xf32> to vector<64x64xf32>
    %99 = arith.subf %95, %98 : vector<64x64xf32>
    %100 = math.exp %99 : vector<64x64xf32>
    %cst_65 = arith.constant dense<0.000000e+00> : vector<64xf32>
    %101 = vector.multi_reduction <add>, %100, %cst_65 [1] : vector<64x64xf32> to vector<64xf32>
    %102 = vector.shape_cast %101 : vector<64xf32> to vector<64x1xf32>
    %103 = tpu.reciprocal %102 {approx = true} : vector<64x1xf32> -> vector<64x1xf32>
    %104 = arith.truncf %100 : vector<64x64xf32> to vector<64x64xbf16>
    %cst_66 = arith.constant dense<0.000000e+00> : vector<64x32xf32>
    %105 = tpu.matmul %104, %94, %cst_66 {dimension_numbers = #tpu.dot_dimension_numbers<[1], [0], [0], [1], [0, 0, 1, 1], [], []>} : vector<64x64xbf16>, vector<64x32xbf16>, vector<64x32xf32> -> vector<64x32xf32>
    %106 = vector.broadcast %103 : vector<64x1xf32> to vector<64x32xf32>
    %107 = arith.mulf %105, %106 : vector<64x32xf32>
    %108 = arith.truncf %107 : vector<64x32xf32> to vector<64x32xbf16>
    %c0_67 = arith.constant 0 : index
    %c96_68 = arith.constant 96 : index
    %109 = vector.load %arg9[%c0_67, %c96_68] : memref<128x256xbf16, #tpu.memory_space<vmem>>, vector<64x32xbf16>
    tpu.vector_store %arg9[%c0_67, %c96_68], %108 {strides = array<i32>} : memref<128x256xbf16, #tpu.memory_space<vmem>>, vector<64x32xbf16>,
    %c0_69 = arith.constant 0 : index
    %c128 = arith.constant 128 : index
    %110 = vector.load %arg6[%c0_69, %c128] : memref<128x256xbf16, #tpu.memory_space<vmem>>, vector<64x32xbf16>
    %c0_70 = arith.constant 0 : index
    %c128_71 = arith.constant 128 : index
    %111 = vector.load %arg7[%c0_70, %c128_71] : memref<128x256xbf16, #tpu.memory_space<vmem>>, vector<64x32xbf16>
    %c0_72 = arith.constant 0 : index
    %c128_73 = arith.constant 128 : index
    %112 = vector.load %arg8[%c0_72, %c128_73] : memref<128x256xbf16, #tpu.memory_space<vmem>>, vector<64x32xbf16>
    %cst_74 = arith.constant dense<0.000000e+00> : vector<64x64xf32>
    %113 = tpu.matmul %110, %111, %cst_74 {dimension_numbers = #tpu.dot_dimension_numbers<[1], [1], [0], [0], [0, 0, 1, 0], [], []>} : vector<64x32xbf16>, vector<64x32xbf16>, vector<64x64xf32> -> vector<64x64xf32>
    %cst_75 = arith.constant dense<0xFF800000> : vector<64xf32>
    %114 = vector.multi_reduction <maximumf>, %113, %cst_75 [1] : vector<64x64xf32> to vector<64xf32>
    %115 = vector.shape_cast %114 : vector<64xf32> to vector<64x1xf32>
    %116 = vector.broadcast %115 : vector<64x1xf32> to vector<64x64xf32>
    %117 = arith.subf %113, %116 : vector<64x64xf32>
    %118 = math.exp %117 : vector<64x64xf32>
    %cst_76 = arith.constant dense<0.000000e+00> : vector<64xf32>
    %119 = vector.multi_reduction <add>, %118, %cst_76 [1] : vector<64x64xf32> to vector<64xf32>
    %120 = vector.shape_cast %119 : vector<64xf32> to vector<64x1xf32>
    %121 = tpu.reciprocal %120 {approx = true} : vector<64x1xf32> -> vector<64x1xf32>
    %122 = arith.truncf %118 : vector<64x64xf32> to vector<64x64xbf16>
    %cst_77 = arith.constant dense<0.000000e+00> : vector<64x32xf32>
    %123 = tpu.matmul %122, %112, %cst_77 {dimension_numbers = #tpu.dot_dimension_numbers<[1], [0], [0], [1], [0, 0, 1, 1], [], []>} : vector<64x64xbf16>, vector<64x32xbf16>, vector<64x32xf32> -> vector<64x32xf32>
    %124 = vector.broadcast %121 : vector<64x1xf32> to vector<64x32xf32>
    %125 = arith.mulf %123, %124 : vector<64x32xf32>
    %126 = arith.truncf %125 : vector<64x32xf32> to vector<64x32xbf16>
    %c0_78 = arith.constant 0 : index
    %c128_79 = arith.constant 128 : index
    %127 = vector.load %arg9[%c0_78, %c128_79] : memref<128x256xbf16, #tpu.memory_space<vmem>>, vector<64x32xbf16>
    tpu.vector_store %arg9[%c0_78, %c128_79], %126 {strides = array<i32>} : memref<128x256xbf16, #tpu.memory_space<vmem>>, vector<64x32xbf16>,
    %c0_80 = arith.constant 0 : index
    %c160 = arith.constant 160 : index
    %128 = vector.load %arg6[%c0_80, %c160] : memref<128x256xbf16, #tpu.memory_space<vmem>>, vector<64x32xbf16>
    %c0_81 = arith.constant 0 : index
    %c160_82 = arith.constant 160 : index
    %129 = vector.load %arg7[%c0_81, %c160_82] : memref<128x256xbf16, #tpu.memory_space<vmem>>, vector<64x32xbf16>
    %c0_83 = arith.constant 0 : index
    %c160_84 = arith.constant 160 : index
    %130 = vector.load %arg8[%c0_83, %c160_84] : memref<128x256xbf16, #tpu.memory_space<vmem>>, vector<64x32xbf16>
    %cst_85 = arith.constant dense<0.000000e+00> : vector<64x64xf32>
    %131 = tpu.matmul %128, %129, %cst_85 {dimension_numbers = #tpu.dot_dimension_numbers<[1], [1], [0], [0], [0, 0, 1, 0], [], []>} : vector<64x32xbf16>, vector<64x32xbf16>, vector<64x64xf32> -> vector<64x64xf32>
    %cst_86 = arith.constant dense<0xFF800000> : vector<64xf32>
    %132 = vector.multi_reduction <maximumf>, %131, %cst_86 [1] : vector<64x64xf32> to vector<64xf32>
    %133 = vector.shape_cast %132 : vector<64xf32> to vector<64x1xf32>
    %134 = vector.broadcast %133 : vector<64x1xf32> to vector<64x64xf32>
    %135 = arith.subf %131, %134 : vector<64x64xf32>
    %136 = math.exp %135 : vector<64x64xf32>
    %cst_87 = arith.constant dense<0.000000e+00> : vector<64xf32>
    %137 = vector.multi_reduction <add>, %136, %cst_87 [1] : vector<64x64xf32> to vector<64xf32>
    %138 = vector.shape_cast %137 : vector<64xf32> to vector<64x1xf32>
    %139 = tpu.reciprocal %138 {approx = true} : vector<64x1xf32> -> vector<64x1xf32>
    %140 = arith.truncf %136 : vector<64x64xf32> to vector<64x64xbf16>
    %cst_88 = arith.constant dense<0.000000e+00> : vector<64x32xf32>
    %141 = tpu.matmul %140, %130, %cst_88 {dimension_numbers = #tpu.dot_dimension_numbers<[1], [0], [0], [1], [0, 0, 1, 1], [], []>} : vector<64x64xbf16>, vector<64x32xbf16>, vector<64x32xf32> -> vector<64x32xf32>
    %142 = vector.broadcast %139 : vector<64x1xf32> to vector<64x32xf32>
    %143 = arith.mulf %141, %142 : vector<64x32xf32>
    %144 = arith.truncf %143 : vector<64x32xf32> to vector<64x32xbf16>
    %c0_89 = arith.constant 0 : index
    %c160_90 = arith.constant 160 : index
    %145 = vector.load %arg9[%c0_89, %c160_90] : memref<128x256xbf16, #tpu.memory_space<vmem>>, vector<64x32xbf16>
    tpu.vector_store %arg9[%c0_89, %c160_90], %144 {strides = array<i32>} : memref<128x256xbf16, #tpu.memory_space<vmem>>, vector<64x32xbf16>,
    %c0_91 = arith.constant 0 : index
    %c192 = arith.constant 192 : index
    %146 = vector.load %arg6[%c0_91, %c192] : memref<128x256xbf16, #tpu.memory_space<vmem>>, vector<64x32xbf16>
    %c0_92 = arith.constant 0 : index
    %c192_93 = arith.constant 192 : index
    %147 = vector.load %arg7[%c0_92, %c192_93] : memref<128x256xbf16, #tpu.memory_space<vmem>>, vector<64x32xbf16>
    %c0_94 = arith.constant 0 : index
    %c192_95 = arith.constant 192 : index
    %148 = vector.load %arg8[%c0_94, %c192_95] : memref<128x256xbf16, #tpu.memory_space<vmem>>, vector<64x32xbf16>
    %cst_96 = arith.constant dense<0.000000e+00> : vector<64x64xf32>
    %149 = tpu.matmul %146, %147, %cst_96 {dimension_numbers = #tpu.dot_dimension_numbers<[1], [1], [0], [0], [0, 0, 1, 0], [], []>} : vector<64x32xbf16>, vector<64x32xbf16>, vector<64x64xf32> -> vector<64x64xf32>
    %cst_97 = arith.constant dense<0xFF800000> : vector<64xf32>
    %150 = vector.multi_reduction <maximumf>, %149, %cst_97 [1] : vector<64x64xf32> to vector<64xf32>
    %151 = vector.shape_cast %150 : vector<64xf32> to vector<64x1xf32>
    %152 = vector.broadcast %151 : vector<64x1xf32> to vector<64x64xf32>
    %153 = arith.subf %149, %152 : vector<64x64xf32>
    %154 = math.exp %153 : vector<64x64xf32>
    %cst_98 = arith.constant dense<0.000000e+00> : vector<64xf32>
    %155 = vector.multi_reduction <add>, %154, %cst_98 [1] : vector<64x64xf32> to vector<64xf32>
    %156 = vector.shape_cast %155 : vector<64xf32> to vector<64x1xf32>
    %157 = tpu.reciprocal %156 {approx = true} : vector<64x1xf32> -> vector<64x1xf32>
    %158 = arith.truncf %154 : vector<64x64xf32> to vector<64x64xbf16>
    %cst_99 = arith.constant dense<0.000000e+00> : vector<64x32xf32>
    %159 = tpu.matmul %158, %148, %cst_99 {dimension_numbers = #tpu.dot_dimension_numbers<[1], [0], [0], [1], [0, 0, 1, 1], [], []>} : vector<64x64xbf16>, vector<64x32xbf16>, vector<64x32xf32> -> vector<64x32xf32>
    %160 = vector.broadcast %157 : vector<64x1xf32> to vector<64x32xf32>
    %161 = arith.mulf %159, %160 : vector<64x32xf32>
    %162 = arith.truncf %161 : vector<64x32xf32> to vector<64x32xbf16>
    %c0_100 = arith.constant 0 : index
    %c192_101 = arith.constant 192 : index
    %163 = vector.load %arg9[%c0_100, %c192_101] : memref<128x256xbf16, #tpu.memory_space<vmem>>, vector<64x32xbf16>
    tpu.vector_store %arg9[%c0_100, %c192_101], %162 {strides = array<i32>} : memref<128x256xbf16, #tpu.memory_space<vmem>>, vector<64x32xbf16>,
    %c0_102 = arith.constant 0 : index
    %c224 = arith.constant 224 : index
    %164 = vector.load %arg6[%c0_102, %c224] : memref<128x256xbf16, #tpu.memory_space<vmem>>, vector<64x32xbf16>
    %c0_103 = arith.constant 0 : index
    %c224_104 = arith.constant 224 : index
    %165 = vector.load %arg7[%c0_103, %c224_104] : memref<128x256xbf16, #tpu.memory_space<vmem>>, vector<64x32xbf16>
    %c0_105 = arith.constant 0 : index
    %c224_106 = arith.constant 224 : index
    %166 = vector.load %arg8[%c0_105, %c224_106] : memref<128x256xbf16, #tpu.memory_space<vmem>>, vector<64x32xbf16>
    %cst_107 = arith.constant dense<0.000000e+00> : vector<64x64xf32>
    %167 = tpu.matmul %164, %165, %cst_107 {dimension_numbers = #tpu.dot_dimension_numbers<[1], [1], [0], [0], [0, 0, 1, 0], [], []>} : vector<64x32xbf16>, vector<64x32xbf16>, vector<64x64xf32> -> vector<64x64xf32>
    %cst_108 = arith.constant dense<0xFF800000> : vector<64xf32>
    %168 = vector.multi_reduction <maximumf>, %167, %cst_108 [1] : vector<64x64xf32> to vector<64xf32>
    %169 = vector.shape_cast %168 : vector<64xf32> to vector<64x1xf32>
    %170 = vector.broadcast %169 : vector<64x1xf32> to vector<64x64xf32>
    %171 = arith.subf %167, %170 : vector<64x64xf32>
    %172 = math.exp %171 : vector<64x64xf32>
    %cst_109 = arith.constant dense<0.000000e+00> : vector<64xf32>
    %173 = vector.multi_reduction <add>, %172, %cst_109 [1] : vector<64x64xf32> to vector<64xf32>
    %174 = vector.shape_cast %173 : vector<64xf32> to vector<64x1xf32>
    %175 = tpu.reciprocal %174 {approx = true} : vector<64x1xf32> -> vector<64x1xf32>
    %176 = arith.truncf %172 : vector<64x64xf32> to vector<64x64xbf16>
    %cst_110 = arith.constant dense<0.000000e+00> : vector<64x32xf32>
    %177 = tpu.matmul %176, %166, %cst_110 {dimension_numbers = #tpu.dot_dimension_numbers<[1], [0], [0], [1], [0, 0, 1, 1], [], []>} : vector<64x64xbf16>, vector<64x32xbf16>, vector<64x32xf32> -> vector<64x32xf32>
    %178 = vector.broadcast %175 : vector<64x1xf32> to vector<64x32xf32>
    %179 = arith.mulf %177, %178 : vector<64x32xf32>
    %180 = arith.truncf %179 : vector<64x32xf32> to vector<64x32xbf16>
    %c0_111 = arith.constant 0 : index
    %c224_112 = arith.constant 224 : index
    %181 = vector.load %arg9[%c0_111, %c224_112] : memref<128x256xbf16, #tpu.memory_space<vmem>>, vector<64x32xbf16>
    tpu.vector_store %arg9[%c0_111, %c224_112], %180 {strides = array<i32>} : memref<128x256xbf16, #tpu.memory_space<vmem>>, vector<64x32xbf16>,
    %c64_113 = arith.constant 64 : index
    %c0_114 = arith.constant 0 : index
    %182 = vector.load %arg6[%c64_113, %c0_114] : memref<128x256xbf16, #tpu.memory_space<vmem>>, vector<64x32xbf16>
    %c64_115 = arith.constant 64 : index
    %c0_116 = arith.constant 0 : index
    %183 = vector.load %arg7[%c64_115, %c0_116] : memref<128x256xbf16, #tpu.memory_space<vmem>>, vector<64x32xbf16>
    %c64_117 = arith.constant 64 : index
    %c0_118 = arith.constant 0 : index
    %184 = vector.load %arg8[%c64_117, %c0_118] : memref<128x256xbf16, #tpu.memory_space<vmem>>, vector<64x32xbf16>
    %cst_119 = arith.constant dense<0.000000e+00> : vector<64x64xf32>
    %185 = tpu.matmul %182, %183, %cst_119 {dimension_numbers = #tpu.dot_dimension_numbers<[1], [1], [0], [0], [0, 0, 1, 0], [], []>} : vector<64x32xbf16>, vector<64x32xbf16>, vector<64x64xf32> -> vector<64x64xf32>
    %cst_120 = arith.constant dense<0xFF800000> : vector<64xf32>
    %186 = vector.multi_reduction <maximumf>, %185, %cst_120 [1] : vector<64x64xf32> to vector<64xf32>
    %187 = vector.shape_cast %186 : vector<64xf32> to vector<64x1xf32>
    %188 = vector.broadcast %187 : vector<64x1xf32> to vector<64x64xf32>
    %189 = arith.subf %185, %188 : vector<64x64xf32>
    %190 = math.exp %189 : vector<64x64xf32>
    %cst_121 = arith.constant dense<0.000000e+00> : vector<64xf32>
    %191 = vector.multi_reduction <add>, %190, %cst_121 [1] : vector<64x64xf32> to vector<64xf32>
    %192 = vector.shape_cast %191 : vector<64xf32> to vector<64x1xf32>
    %193 = tpu.reciprocal %192 {approx = true} : vector<64x1xf32> -> vector<64x1xf32>
    %194 = arith.truncf %190 : vector<64x64xf32> to vector<64x64xbf16>
    %cst_122 = arith.constant dense<0.000000e+00> : vector<64x32xf32>
    %195 = tpu.matmul %194, %184, %cst_122 {dimension_numbers = #tpu.dot_dimension_numbers<[1], [0], [0], [1], [0, 0, 1, 1], [], []>} : vector<64x64xbf16>, vector<64x32xbf16>, vector<64x32xf32> -> vector<64x32xf32>
    %196 = vector.broadcast %193 : vector<64x1xf32> to vector<64x32xf32>
    %197 = arith.mulf %195, %196 : vector<64x32xf32>
    %198 = arith.truncf %197 : vector<64x32xf32> to vector<64x32xbf16>
    %c64_123 = arith.constant 64 : index
    %c0_124 = arith.constant 0 : index
    %199 = vector.load %arg9[%c64_123, %c0_124] : memref<128x256xbf16, #tpu.memory_space<vmem>>, vector<64x32xbf16>
    tpu.vector_store %arg9[%c64_123, %c0_124], %198 {strides = array<i32>} : memref<128x256xbf16, #tpu.memory_space<vmem>>, vector<64x32xbf16>,
    %c64_125 = arith.constant 64 : index
    %c32_126 = arith.constant 32 : index
    %200 = vector.load %arg6[%c64_125, %c32_126] : memref<128x256xbf16, #tpu.memory_space<vmem>>, vector<64x32xbf16>
    %c64_127 = arith.constant 64 : index
    %c32_128 = arith.constant 32 : index
    %201 = vector.load %arg7[%c64_127, %c32_128] : memref<128x256xbf16, #tpu.memory_space<vmem>>, vector<64x32xbf16>
    %c64_129 = arith.constant 64 : index
    %c32_130 = arith.constant 32 : index
    %202 = vector.load %arg8[%c64_129, %c32_130] : memref<128x256xbf16, #tpu.memory_space<vmem>>, vector<64x32xbf16>
    %cst_131 = arith.constant dense<0.000000e+00> : vector<64x64xf32>
    %203 = tpu.matmul %200, %201, %cst_131 {dimension_numbers = #tpu.dot_dimension_numbers<[1], [1], [0], [0], [0, 0, 1, 0], [], []>} : vector<64x32xbf16>, vector<64x32xbf16>, vector<64x64xf32> -> vector<64x64xf32>
    %cst_132 = arith.constant dense<0xFF800000> : vector<64xf32>
    %204 = vector.multi_reduction <maximumf>, %203, %cst_132 [1] : vector<64x64xf32> to vector<64xf32>
    %205 = vector.shape_cast %204 : vector<64xf32> to vector<64x1xf32>
    %206 = vector.broadcast %205 : vector<64x1xf32> to vector<64x64xf32>
    %207 = arith.subf %203, %206 : vector<64x64xf32>
    %208 = math.exp %207 : vector<64x64xf32>
    %cst_133 = arith.constant dense<0.000000e+00> : vector<64xf32>
    %209 = vector.multi_reduction <add>, %208, %cst_133 [1] : vector<64x64xf32> to vector<64xf32>
    %210 = vector.shape_cast %209 : vector<64xf32> to vector<64x1xf32>
    %211 = tpu.reciprocal %210 {approx = true} : vector<64x1xf32> -> vector<64x1xf32>
    %212 = arith.truncf %208 : vector<64x64xf32> to vector<64x64xbf16>
    %cst_134 = arith.constant dense<0.000000e+00> : vector<64x32xf32>
    %213 = tpu.matmul %212, %202, %cst_134 {dimension_numbers = #tpu.dot_dimension_numbers<[1], [0], [0], [1], [0, 0, 1, 1], [], []>} : vector<64x64xbf16>, vector<64x32xbf16>, vector<64x32xf32> -> vector<64x32xf32>
    %214 = vector.broadcast %211 : vector<64x1xf32> to vector<64x32xf32>
    %215 = arith.mulf %213, %214 : vector<64x32xf32>
    %216 = arith.truncf %215 : vector<64x32xf32> to vector<64x32xbf16>
    %c64_135 = arith.constant 64 : index
    %c32_136 = arith.constant 32 : index
    %217 = vector.load %arg9[%c64_135, %c32_136] : memref<128x256xbf16, #tpu.memory_space<vmem>>, vector<64x32xbf16>
    tpu.vector_store %arg9[%c64_135, %c32_136], %216 {strides = array<i32>} : memref<128x256xbf16, #tpu.memory_space<vmem>>, vector<64x32xbf16>,
    %c64_137 = arith.constant 64 : index
    %c64_138 = arith.constant 64 : index
    %218 = vector.load %arg6[%c64_137, %c64_138] : memref<128x256xbf16, #tpu.memory_space<vmem>>, vector<64x32xbf16>
    %c64_139 = arith.constant 64 : index
    %c64_140 = arith.constant 64 : index
    %219 = vector.load %arg7[%c64_139, %c64_140] : memref<128x256xbf16, #tpu.memory_space<vmem>>, vector<64x32xbf16>
    %c64_141 = arith.constant 64 : index
    %c64_142 = arith.constant 64 : index
    %220 = vector.load %arg8[%c64_141, %c64_142] : memref<128x256xbf16, #tpu.memory_space<vmem>>, vector<64x32xbf16>
    %cst_143 = arith.constant dense<0.000000e+00> : vector<64x64xf32>
    %221 = tpu.matmul %218, %219, %cst_143 {dimension_numbers = #tpu.dot_dimension_numbers<[1], [1], [0], [0], [0, 0, 1, 0], [], []>} : vector<64x32xbf16>, vector<64x32xbf16>, vector<64x64xf32> -> vector<64x64xf32>
    %cst_144 = arith.constant dense<0xFF800000> : vector<64xf32>
    %222 = vector.multi_reduction <maximumf>, %221, %cst_144 [1] : vector<64x64xf32> to vector<64xf32>
    %223 = vector.shape_cast %222 : vector<64xf32> to vector<64x1xf32>
    %224 = vector.broadcast %223 : vector<64x1xf32> to vector<64x64xf32>
    %225 = arith.subf %221, %224 : vector<64x64xf32>
    %226 = math.exp %225 : vector<64x64xf32>
    %cst_145 = arith.constant dense<0.000000e+00> : vector<64xf32>
    %227 = vector.multi_reduction <add>, %226, %cst_145 [1] : vector<64x64xf32> to vector<64xf32>
    %228 = vector.shape_cast %227 : vector<64xf32> to vector<64x1xf32>
    %229 = tpu.reciprocal %228 {approx = true} : vector<64x1xf32> -> vector<64x1xf32>
    %230 = arith.truncf %226 : vector<64x64xf32> to vector<64x64xbf16>
    %cst_146 = arith.constant dense<0.000000e+00> : vector<64x32xf32>
    %231 = tpu.matmul %230, %220, %cst_146 {dimension_numbers = #tpu.dot_dimension_numbers<[1], [0], [0], [1], [0, 0, 1, 1], [], []>} : vector<64x64xbf16>, vector<64x32xbf16>, vector<64x32xf32> -> vector<64x32xf32>
    %232 = vector.broadcast %229 : vector<64x1xf32> to vector<64x32xf32>
    %233 = arith.mulf %231, %232 : vector<64x32xf32>
    %234 = arith.truncf %233 : vector<64x32xf32> to vector<64x32xbf16>
    %c64_147 = arith.constant 64 : index
    %c64_148 = arith.constant 64 : index
    %235 = vector.load %arg9[%c64_147, %c64_148] : memref<128x256xbf16, #tpu.memory_space<vmem>>, vector<64x32xbf16>
    tpu.vector_store %arg9[%c64_147, %c64_148], %234 {strides = array<i32>} : memref<128x256xbf16, #tpu.memory_space<vmem>>, vector<64x32xbf16>,
    %c64_149 = arith.constant 64 : index
    %c96_150 = arith.constant 96 : index
    %236 = vector.load %arg6[%c64_149, %c96_150] : memref<128x256xbf16, #tpu.memory_space<vmem>>, vector<64x32xbf16>
    %c64_151 = arith.constant 64 : index
    %c96_152 = arith.constant 96 : index
    %237 = vector.load %arg7[%c64_151, %c96_152] : memref<128x256xbf16, #tpu.memory_space<vmem>>, vector<64x32xbf16>
    %c64_153 = arith.constant 64 : index
    %c96_154 = arith.constant 96 : index
    %238 = vector.load %arg8[%c64_153, %c96_154] : memref<128x256xbf16, #tpu.memory_space<vmem>>, vector<64x32xbf16>
    %cst_155 = arith.constant dense<0.000000e+00> : vector<64x64xf32>
    %239 = tpu.matmul %236, %237, %cst_155 {dimension_numbers = #tpu.dot_dimension_numbers<[1], [1], [0], [0], [0, 0, 1, 0], [], []>} : vector<64x32xbf16>, vector<64x32xbf16>, vector<64x64xf32> -> vector<64x64xf32>
    %cst_156 = arith.constant dense<0xFF800000> : vector<64xf32>
    %240 = vector.multi_reduction <maximumf>, %239, %cst_156 [1] : vector<64x64xf32> to vector<64xf32>
    %241 = vector.shape_cast %240 : vector<64xf32> to vector<64x1xf32>
    %242 = vector.broadcast %241 : vector<64x1xf32> to vector<64x64xf32>
    %243 = arith.subf %239, %242 : vector<64x64xf32>
    %244 = math.exp %243 : vector<64x64xf32>
    %cst_157 = arith.constant dense<0.000000e+00> : vector<64xf32>
    %245 = vector.multi_reduction <add>, %244, %cst_157 [1] : vector<64x64xf32> to vector<64xf32>
    %246 = vector.shape_cast %245 : vector<64xf32> to vector<64x1xf32>
    %247 = tpu.reciprocal %246 {approx = true} : vector<64x1xf32> -> vector<64x1xf32>
    %248 = arith.truncf %244 : vector<64x64xf32> to vector<64x64xbf16>
    %cst_158 = arith.constant dense<0.000000e+00> : vector<64x32xf32>
    %249 = tpu.matmul %248, %238, %cst_158 {dimension_numbers = #tpu.dot_dimension_numbers<[1], [0], [0], [1], [0, 0, 1, 1], [], []>} : vector<64x64xbf16>, vector<64x32xbf16>, vector<64x32xf32> -> vector<64x32xf32>
    %250 = vector.broadcast %247 : vector<64x1xf32> to vector<64x32xf32>
    %251 = arith.mulf %249, %250 : vector<64x32xf32>
    %252 = arith.truncf %251 : vector<64x32xf32> to vector<64x32xbf16>
    %c64_159 = arith.constant 64 : index
    %c96_160 = arith.constant 96 : index
    %253 = vector.load %arg9[%c64_159, %c96_160] : memref<128x256xbf16, #tpu.memory_space<vmem>>, vector<64x32xbf16>
    tpu.vector_store %arg9[%c64_159, %c96_160], %252 {strides = array<i32>} : memref<128x256xbf16, #tpu.memory_space<vmem>>, vector<64x32xbf16>,
    %c64_161 = arith.constant 64 : index
    %c128_162 = arith.constant 128 : index
    %254 = vector.load %arg6[%c64_161, %c128_162] : memref<128x256xbf16, #tpu.memory_space<vmem>>, vector<64x32xbf16>
    %c64_163 = arith.constant 64 : index
    %c128_164 = arith.constant 128 : index
    %255 = vector.load %arg7[%c64_163, %c128_164] : memref<128x256xbf16, #tpu.memory_space<vmem>>, vector<64x32xbf16>
    %c64_165 = arith.constant 64 : index
    %c128_166 = arith.constant 128 : index
    %256 = vector.load %arg8[%c64_165, %c128_166] : memref<128x256xbf16, #tpu.memory_space<vmem>>, vector<64x32xbf16>
    %cst_167 = arith.constant dense<0.000000e+00> : vector<64x64xf32>
    %257 = tpu.matmul %254, %255, %cst_167 {dimension_numbers = #tpu.dot_dimension_numbers<[1], [1], [0], [0], [0, 0, 1, 0], [], []>} : vector<64x32xbf16>, vector<64x32xbf16>, vector<64x64xf32> -> vector<64x64xf32>
    %cst_168 = arith.constant dense<0xFF800000> : vector<64xf32>
    %258 = vector.multi_reduction <maximumf>, %257, %cst_168 [1] : vector<64x64xf32> to vector<64xf32>
    %259 = vector.shape_cast %258 : vector<64xf32> to vector<64x1xf32>
    %260 = vector.broadcast %259 : vector<64x1xf32> to vector<64x64xf32>
    %261 = arith.subf %257, %260 : vector<64x64xf32>
    %262 = math.exp %261 : vector<64x64xf32>
    %cst_169 = arith.constant dense<0.000000e+00> : vector<64xf32>
    %263 = vector.multi_reduction <add>, %262, %cst_169 [1] : vector<64x64xf32> to vector<64xf32>
    %264 = vector.shape_cast %263 : vector<64xf32> to vector<64x1xf32>
    %265 = tpu.reciprocal %264 {approx = true} : vector<64x1xf32> -> vector<64x1xf32>
    %266 = arith.truncf %262 : vector<64x64xf32> to vector<64x64xbf16>
    %cst_170 = arith.constant dense<0.000000e+00> : vector<64x32xf32>
    %267 = tpu.matmul %266, %256, %cst_170 {dimension_numbers = #tpu.dot_dimension_numbers<[1], [0], [0], [1], [0, 0, 1, 1], [], []>} : vector<64x64xbf16>, vector<64x32xbf16>, vector<64x32xf32> -> vector<64x32xf32>
    %268 = vector.broadcast %265 : vector<64x1xf32> to vector<64x32xf32>
    %269 = arith.mulf %267, %268 : vector<64x32xf32>
    %270 = arith.truncf %269 : vector<64x32xf32> to vector<64x32xbf16>
    %c64_171 = arith.constant 64 : index
    %c128_172 = arith.constant 128 : index
    %271 = vector.load %arg9[%c64_171, %c128_172] : memref<128x256xbf16, #tpu.memory_space<vmem>>, vector<64x32xbf16>
    tpu.vector_store %arg9[%c64_171, %c128_172], %270 {strides = array<i32>} : memref<128x256xbf16, #tpu.memory_space<vmem>>, vector<64x32xbf16>,
    %c64_173 = arith.constant 64 : index
    %c160_174 = arith.constant 160 : index
    %272 = vector.load %arg6[%c64_173, %c160_174] : memref<128x256xbf16, #tpu.memory_space<vmem>>, vector<64x32xbf16>
    %c64_175 = arith.constant 64 : index
    %c160_176 = arith.constant 160 : index
    %273 = vector.load %arg7[%c64_175, %c160_176] : memref<128x256xbf16, #tpu.memory_space<vmem>>, vector<64x32xbf16>
    %c64_177 = arith.constant 64 : index
    %c160_178 = arith.constant 160 : index
    %274 = vector.load %arg8[%c64_177, %c160_178] : memref<128x256xbf16, #tpu.memory_space<vmem>>, vector<64x32xbf16>
    %cst_179 = arith.constant dense<0.000000e+00> : vector<64x64xf32>
    %275 = tpu.matmul %272, %273, %cst_179 {dimension_numbers = #tpu.dot_dimension_numbers<[1], [1], [0], [0], [0, 0, 1, 0], [], []>} : vector<64x32xbf16>, vector<64x32xbf16>, vector<64x64xf32> -> vector<64x64xf32>
    %cst_180 = arith.constant dense<0xFF800000> : vector<64xf32>
    %276 = vector.multi_reduction <maximumf>, %275, %cst_180 [1] : vector<64x64xf32> to vector<64xf32>
    %277 = vector.shape_cast %276 : vector<64xf32> to vector<64x1xf32>
    %278 = vector.broadcast %277 : vector<64x1xf32> to vector<64x64xf32>
    %279 = arith.subf %275, %278 : vector<64x64xf32>
    %280 = math.exp %279 : vector<64x64xf32>
    %cst_181 = arith.constant dense<0.000000e+00> : vector<64xf32>
    %281 = vector.multi_reduction <add>, %280, %cst_181 [1] : vector<64x64xf32> to vector<64xf32>
    %282 = vector.shape_cast %281 : vector<64xf32> to vector<64x1xf32>
    %283 = tpu.reciprocal %282 {approx = true} : vector<64x1xf32> -> vector<64x1xf32>
    %284 = arith.truncf %280 : vector<64x64xf32> to vector<64x64xbf16>
    %cst_182 = arith.constant dense<0.000000e+00> : vector<64x32xf32>
    %285 = tpu.matmul %284, %274, %cst_182 {dimension_numbers = #tpu.dot_dimension_numbers<[1], [0], [0], [1], [0, 0, 1, 1], [], []>} : vector<64x64xbf16>, vector<64x32xbf16>, vector<64x32xf32> -> vector<64x32xf32>
    %286 = vector.broadcast %283 : vector<64x1xf32> to vector<64x32xf32>
    %287 = arith.mulf %285, %286 : vector<64x32xf32>
    %288 = arith.truncf %287 : vector<64x32xf32> to vector<64x32xbf16>
    %c64_183 = arith.constant 64 : index
    %c160_184 = arith.constant 160 : index
    %289 = vector.load %arg9[%c64_183, %c160_184] : memref<128x256xbf16, #tpu.memory_space<vmem>>, vector<64x32xbf16>
    tpu.vector_store %arg9[%c64_183, %c160_184], %288 {strides = array<i32>} : memref<128x256xbf16, #tpu.memory_space<vmem>>, vector<64x32xbf16>,
    %c64_185 = arith.constant 64 : index
    %c192_186 = arith.constant 192 : index
    %290 = vector.load %arg6[%c64_185, %c192_186] : memref<128x256xbf16, #tpu.memory_space<vmem>>, vector<64x32xbf16>
    %c64_187 = arith.constant 64 : index
    %c192_188 = arith.constant 192 : index
    %291 = vector.load %arg7[%c64_187, %c192_188] : memref<128x256xbf16, #tpu.memory_space<vmem>>, vector<64x32xbf16>
    %c64_189 = arith.constant 64 : index
    %c192_190 = arith.constant 192 : index
    %292 = vector.load %arg8[%c64_189, %c192_190] : memref<128x256xbf16, #tpu.memory_space<vmem>>, vector<64x32xbf16>
    %cst_191 = arith.constant dense<0.000000e+00> : vector<64x64xf32>
    %293 = tpu.matmul %290, %291, %cst_191 {dimension_numbers = #tpu.dot_dimension_numbers<[1], [1], [0], [0], [0, 0, 1, 0], [], []>} : vector<64x32xbf16>, vector<64x32xbf16>, vector<64x64xf32> -> vector<64x64xf32>
    %cst_192 = arith.constant dense<0xFF800000> : vector<64xf32>
    %294 = vector.multi_reduction <maximumf>, %293, %cst_192 [1] : vector<64x64xf32> to vector<64xf32>
    %295 = vector.shape_cast %294 : vector<64xf32> to vector<64x1xf32>
    %296 = vector.broadcast %295 : vector<64x1xf32> to vector<64x64xf32>
    %297 = arith.subf %293, %296 : vector<64x64xf32>
    %298 = math.exp %297 : vector<64x64xf32>
    %cst_193 = arith.constant dense<0.000000e+00> : vector<64xf32>
    %299 = vector.multi_reduction <add>, %298, %cst_193 [1] : vector<64x64xf32> to vector<64xf32>
    %300 = vector.shape_cast %299 : vector<64xf32> to vector<64x1xf32>
    %301 = tpu.reciprocal %300 {approx = true} : vector<64x1xf32> -> vector<64x1xf32>
    %302 = arith.truncf %298 : vector<64x64xf32> to vector<64x64xbf16>
    %cst_194 = arith.constant dense<0.000000e+00> : vector<64x32xf32>
    %303 = tpu.matmul %302, %292, %cst_194 {dimension_numbers = #tpu.dot_dimension_numbers<[1], [0], [0], [1], [0, 0, 1, 1], [], []>} : vector<64x64xbf16>, vector<64x32xbf16>, vector<64x32xf32> -> vector<64x32xf32>
    %304 = vector.broadcast %301 : vector<64x1xf32> to vector<64x32xf32>
    %305 = arith.mulf %303, %304 : vector<64x32xf32>
    %306 = arith.truncf %305 : vector<64x32xf32> to vector<64x32xbf16>
    %c64_195 = arith.constant 64 : index
    %c192_196 = arith.constant 192 : index
    %307 = vector.load %arg9[%c64_195, %c192_196] : memref<128x256xbf16, #tpu.memory_space<vmem>>, vector<64x32xbf16>
    tpu.vector_store %arg9[%c64_195, %c192_196], %306 {strides = array<i32>} : memref<128x256xbf16, #tpu.memory_space<vmem>>, vector<64x32xbf16>,
    %c64_197 = arith.constant 64 : index
    %c224_198 = arith.constant 224 : index
    %308 = vector.load %arg6[%c64_197, %c224_198] : memref<128x256xbf16, #tpu.memory_space<vmem>>, vector<64x32xbf16>
    %c64_199 = arith.constant 64 : index
    %c224_200 = arith.constant 224 : index
    %309 = vector.load %arg7[%c64_199, %c224_200] : memref<128x256xbf16, #tpu.memory_space<vmem>>, vector<64x32xbf16>
    %c64_201 = arith.constant 64 : index
    %c224_202 = arith.constant 224 : index
    %310 = vector.load %arg8[%c64_201, %c224_202] : memref<128x256xbf16, #tpu.memory_space<vmem>>, vector<64x32xbf16>
    %cst_203 = arith.constant dense<0.000000e+00> : vector<64x64xf32>
    %311 = tpu.matmul %308, %309, %cst_203 {dimension_numbers = #tpu.dot_dimension_numbers<[1], [1], [0], [0], [0, 0, 1, 0], [], []>} : vector<64x32xbf16>, vector<64x32xbf16>, vector<64x64xf32> -> vector<64x64xf32>
    %cst_204 = arith.constant dense<0xFF800000> : vector<64xf32>
    %312 = vector.multi_reduction <maximumf>, %311, %cst_204 [1] : vector<64x64xf32> to vector<64xf32>
    %313 = vector.shape_cast %312 : vector<64xf32> to vector<64x1xf32>
    %314 = vector.broadcast %313 : vector<64x1xf32> to vector<64x64xf32>
    %315 = arith.subf %311, %314 : vector<64x64xf32>
    %316 = math.exp %315 : vector<64x64xf32>
    %cst_205 = arith.constant dense<0.000000e+00> : vector<64xf32>
    %317 = vector.multi_reduction <add>, %316, %cst_205 [1] : vector<64x64xf32> to vector<64xf32>
    %318 = vector.shape_cast %317 : vector<64xf32> to vector<64x1xf32>
    %319 = tpu.reciprocal %318 {approx = true} : vector<64x1xf32> -> vector<64x1xf32>
    %320 = arith.truncf %316 : vector<64x64xf32> to vector<64x64xbf16>
    %cst_206 = arith.constant dense<0.000000e+00> : vector<64x32xf32>
    %321 = tpu.matmul %320, %310, %cst_206 {dimension_numbers = #tpu.dot_dimension_numbers<[1], [0], [0], [1], [0, 0, 1, 1], [], []>} : vector<64x64xbf16>, vector<64x32xbf16>, vector<64x32xf32> -> vector<64x32xf32>
    %322 = vector.broadcast %319 : vector<64x1xf32> to vector<64x32xf32>
    %323 = arith.mulf %321, %322 : vector<64x32xf32>
    %324 = arith.truncf %323 : vector<64x32xf32> to vector<64x32xbf16>
    %c64_207 = arith.constant 64 : index
    %c224_208 = arith.constant 224 : index
    %325 = vector.load %arg9[%c64_207, %c224_208] : memref<128x256xbf16, #tpu.memory_space<vmem>>, vector<64x32xbf16>
    tpu.vector_store %arg9[%c64_207, %c224_208], %324 {strides = array<i32>} : memref<128x256xbf16, #tpu.memory_space<vmem>>, vector<64x32xbf16>,
    %c0_209 = arith.constant 0 : index
    %c0_210 = arith.constant 0 : index
    %326 = vector.load %arg9[%c0_209, %c0_210] : memref<128x256xbf16, #tpu.memory_space<vmem>>, vector<128x256xbf16>
    %c0_211 = arith.constant 0 : index
    %c768 = arith.constant 768 : index
    %327 = vector.load %arg4[%c0_211, %c768] : memref<256x1024xbf16, #tpu.memory_space<vmem>>, vector<256x256xbf16>
    %cst_212 = arith.constant dense<0.000000e+00> : vector<128x256xf32>
    %328 = tpu.matmul %326, %327, %cst_212 {dimension_numbers = #tpu.dot_dimension_numbers<[1], [0], [0], [1], [0, 0, 1, 1], [], []>} : vector<128x256xbf16>, vector<256x256xbf16>, vector<128x256xf32> -> vector<128x256xf32>
    %329 = vector.broadcast %7 : vector<1x256xf32> to vector<128x256xf32>
    %330 = arith.addf %328, %329 : vector<128x256xf32>
    %c0_213 = arith.constant 0 : index
    %c0_214 = arith.constant 0 : index
    %331 = vector.load %arg1[%c0_213, %c0_214] : memref<128x256xf32, #tpu.memory_space<vmem>>, vector<128x256xf32>
    %332 = arith.addf %330, %331 : vector<128x256xf32>
    %cst_215 = arith.constant 0.000000e+00 : f32
    %333 = vector.broadcast %cst_215 : f32 to vector<128x256xf32>
    %334 = arith.maximumf %332, %333 : vector<128x256xf32>
    %c0_216 = arith.constant 0 : index
    %c0_217 = arith.constant 0 : index
    %335 = vector.load %arg5[%c0_216, %c0_217] : memref<128x256xf32, #tpu.memory_space<vmem>>, vector<128x256xf32>
    tpu.vector_store %arg5[%c0_216, %c0_217], %334 {strides = array<i32>} : memref<128x256xf32, #tpu.memory_space<vmem>>, vector<128x256xf32>,
    return
  }
  func.func @transform_0(%arg0: i32) -> (i32, i32) {
    %c0_i32 = arith.constant 0 : i32
    %c0_i32_0 = arith.constant 0 : i32
    return %arg0, %c0_i32 : i32, i32
  }
  func.func @transform_1(%arg0: i32) -> (i32, i32) {
    %c0_i32 = arith.constant 0 : i32
    %c0_i32_0 = arith.constant 0 : i32
    return %arg0, %c0_i32 : i32, i32
  }
  func.func @transform_2(%arg0: i32) -> (i32, i32) {
    %c0_i32 = arith.constant 0 : i32
    %c0_i32_0 = arith.constant 0 : i32
    %c0_i32_1 = arith.constant 0 : i32
    return %c0_i32, %c0_i32_0 : i32, i32
  }
  func.func @transform_3(%arg0: i32) -> (i32, i32) {
    %c0_i32 = arith.constant 0 : i32
    %c0_i32_0 = arith.constant 0 : i32
    %c0_i32_1 = arith.constant 0 : i32
    return %c0_i32, %c0_i32_0 : i32, i32
  }
  func.func @transform_4(%arg0: i32) -> (i32, i32) {
    %c0_i32 = arith.constant 0 : i32
    %c0_i32_0 = arith.constant 0 : i32
    return %arg0, %c0_i32 : i32, i32
  }
}

</mosaic_0001>

<bundles_post_ra>
// kernel: attention_module_forward.1
= control target key start
LH: loop header
LB: loop body
LE: loop exit
PB: predicated region body
PF: predicated region fallthrough
CT: control target
= control target key end

     0   :  { %9 = vsyncpa [#allocation7], 0  ;;  %s12105_s0 = inlined_call_operand.vmem [shape: f32[128,256], index: 0, kind: input, shape index: {}]   ;;  %s12106_s1 = inlined_call_operand.vmem [shape: f32[128,256], index: 1, kind: input, shape index: {}]   ;;  %s12107_s2 = inlined_call_operand.vmem [shape: f32[8,256], index: 2, kind: input, shape index: {}]   ;;  %s12108_s3 = inlined_call_operand.hbm [shape: bf16[256,1024], index: 3, kind: input, shape index: {}]   ;;  %s12109_s4 = inlined_call_operand.hbm [shape: f32[128,256], index: 4, kind: output, shape index: {}]  }
   0x1   :  { %10 = vsyncpa [#allocation8], 0  ;;  %s8625_s15 = smov [#allocation6]   ;;  %s8577_s19 = scalar_lea.hbm %s12108_s3, 16384 }
   0x2   :  { %s22_s16 = sshll.u32 %s8625_s15, 4  ;;  %p8578_p0 = scmp.ne.s32.totalorder %s12108_s3, %s8577_s19  ;;  %s23_s16 = int_to_ptr.vmem [resolvable:$true] %s22_s16 }
   0x3   :  { %p8581_p1 = scmp.lt.u32.totalorder %s8577_s19, %s12108_s3 }
   0x5   :  { %p8583_p2 = pnand %p8581_p1, %p8578_p0 }
   0x7   :  { %8586 = shalt.err (!%p8583_p2)
}
   0x8   :  { %s8587_s24 = scalar_lea.vmem %s23_s16, 16384  ;;  %p8592_p4 = scmp.lt.s32.totalorder %s23_s16, %s23_s16 }
   0x9   :  { %p8588_p3 = scmp.ne.s32.totalorder %s23_s16, %s8587_s24  ;;  %p8593_p5 = scmp.lt.s32.totalorder %s8587_s24, %s8587_s24 }
   0xb   :  { %p8594_p6 = por %p8593_p5, %p8592_p4 }
   0xd   :  { %p8595_p7 = pnand %p8594_p6, %p8588_p3 }
   0xf   :  { %8598 = shalt.err (!%p8595_p7)
}
  0x10   :  { %s8626_s25 = smov 512   ;;  %s8627_s26 = smov 32  }
  0x11   :  { %28 = dma.hbm_to_vmem [thread:$0]  %s12108_s3, 16384, %s23_s16, [#allocation7], %s8626_s25, %s8626_s25, %s8627_s26  }
  0x12   :  { %8621 = dma.done.wait [#allocation7], 16384  }
  0x13   :  { %8622 = vsyncadd [#allocation7], 4294950912  ;;  %v81_v0 = vlaneseq  ;;  %v316_v1 = vld [vmem:[#allocation6] sm:$0xff]  ;;  %v49_v22 = vld [vmem:[%s12105_s0 + $0x8] sm:$0xff]  ;;  %vm1372_vm0 = vcmask 261120   ;;  %vm1462_vm1 = vcmask 523264  }
  0x14   :  { %v317_v2 = vld [vmem:[#allocation6 + $0x20] sm:$0xff]  ;;  %v51_v23 = vld [vmem:[%s12105_s0 + $0x18] sm:$0xff]  ;;  %v61_v40 = vld [vmem:[%s12105_s0 + $0x68] sm:$0xff]  ;;  %s8628_s13 = smov 96   ;;  %s8629_s14 = smov 64   ;;  %vm1970_vm2 = vcmask 523520  }
  0x15   :  { %v318_v3 = vld [vmem:[#allocation6 + $0x40] sm:$0xff]  ;;  %v6970_v4 = vcombine.high %v316_v1, %v317_v2  ;;  %v6969_v5 = vcombine.low %v316_v1, %v317_v2  ;;  %v8671_v10 = vshrl.u32 %v81_v0, 7  ;;  %v63_v41 = vld [vmem:[%s12105_s0 + $0x78] sm:$0xff]  ;;  %v65_v47 = vld [vmem:[%s12105_s0 + $0x88] sm:$0xff]  ;;  %vm2305_vm3 = vcmask 785920   ;;  %s8630_s21 = smov [#allocation9]  }
  0x16   :  { %v319_v6 = vld [vmem:[#allocation6 + $0x60] sm:$0xff]  ;;  %v67_v48 = vld [vmem:[%s12105_s0 + $0x98] sm:$0xff]  ;;  %v69_v58 = vld [vmem:[%s12105_s0 + $0xa8] sm:$0xff]  ;;  %vm2640_vm4 = vcmask 1048320   ;;  %s6950_s22 = sshll.u32 %s8630_s21, 4  ;;  %s6951_s22 = int_to_ptr.vmem [resolvable:$true] %s6950_s22 }
  0x17   :  { %v6972_v7 = vcombine.high %v318_v3, %v319_v6  ;;  %v320_v8 = vld [vmem:[#allocation6 + $0x80] sm:$0xff]  ;;  %519 = vmatprep.subr.bf16.mxu0 %v6970_v4  ;;  %v6971_v11 = vcombine.low %v318_v3, %v319_v6  ;;  %v8674_v15 = vsub.s32 1, %v8671_v10  ;;  %v71_v59 = vld [vmem:[%s12105_s0 + $0xb8] sm:$0xff]  ;;  %s8599_s23 = scalar_lea.vmem %s6951_s22, 4096  ;;  %p8604_p9 = scmp.lt.s32.totalorder %s6951_s22, %s6951_s22 }
  0x18   :  { %v321_v9 = vld [vmem:[#allocation6 + $0xa0] sm:$0xff]  ;;  %520 = vmatpush1.bf16.msra.mxu0 %v6969_v5  ;;  %v73_v5 = vld [vmem:[%s12105_s0 + $0xc8] sm:$0xff]  ;;  %v75_v6 = vld [vmem:[%s12105_s0 + $0xd8] sm:$0xff]  ;;  %p8600_p8 = scmp.ne.s32.totalorder %s6951_s22, %s8599_s23  ;;  %p8605_p10 = scmp.lt.s32.totalorder %s8599_s23, %s8599_s23 }
  0x19   :  { %521 = vmatprep.subr.bf16.mxu0 %v6972_v7  ;;  %v6974_v12 = vcombine.high %v320_v8, %v321_v9  ;;  %v322_v13 = vld [vmem:[#allocation6 + $0xc0] sm:$0xff]  ;;  %12221 = vst [vmem:[#allocation12_spill] sm:$0xff] %v8674_v15  ;;  %v6973_v16 = vcombine.low %v320_v8, %v321_v9 }
  0x1a   :  { %v323_v14 = vld [vmem:[#allocation6 + $0xe0] sm:$0xff]  ;;  %p8606_p11 = por %p8605_p10, %p8604_p9 }
  0x1b   :  { %v6976_v17 = vcombine.high %v322_v13, %v323_v14  ;;  %v324_v18 = vld [vmem:[#allocation6 + $0x100] sm:$0xff]  ;;  %v6975_v25 = vcombine.low %v322_v13, %v323_v14 }
  0x1c   :  { %522 = vmatpush1.bf16.msra.mxu0 %v6971_v11  ;;  %v325_v19 = vld [vmem:[#allocation6 + $0x120] sm:$0xff]  ;;  %p8607_p12 = pnand %p8606_p11, %p8600_p8 }
  0x1d   :  { %523 = vmatprep.subr.bf16.mxu0 %v6974_v12  ;;  %v8679_v20 = vld [vmem:[%s12107_s2] ss:$8 sm:$0x3]  ;;  %v8684_v21 = vld [vmem:[%s12107_s2 + $0x1] ss:$8 sm:$0x3]  ;;  %v6978_v27 = vcombine.high %v324_v18, %v325_v19  ;;  %v6977_v34 = vcombine.low %v324_v18, %v325_v19 }
  0x1e   :  { %v8694_v24 = vrot.slane %v8679_v20, %v8674_v15  ;;  %v8698_v26 = vrot.slane %v8684_v21, %v8674_v15  ;;  %v326_v30 = vld [vmem:[#allocation6 + $0x140] sm:$0xff]  ;;  %v77_v18 = vld [vmem:[%s12105_s0 + $0xe8] sm:$0xff]  ;;  %v79_v19 = vld [vmem:[%s12105_s0 + $0xf8] sm:$0xff] }
  0x1f   :  { %v327_v31 = vld [vmem:[#allocation6 + $0x160] sm:$0xff] }
  0x20   :  { %524 = vmatpush1.bf16.msra.mxu0 %v6973_v16  ;;  %v92_v28 = vmul.f32 %v8694_v24, %v49_v22  ;;  %v94_v29 = vmul.f32 %v8694_v24, %v51_v23  ;;  %v6980_v35 = vcombine.high %v326_v30, %v327_v31  ;;  %v328_v37 = vld [vmem:[#allocation6 + $0x180] sm:$0xff]  ;;  %v6979_v39 = vcombine.low %v326_v30, %v327_v31 }
  0x21   :  { %525 = vmatprep.subr.bf16.mxu0 %v6976_v17  ;;  %v329_v38 = vld [vmem:[#allocation6 + $0x1a0] sm:$0xff]  ;;  %v104_v45 = vmul.f32 %v8694_v24, %v61_v40  ;;  %v106_v46 = vmul.f32 %v8694_v24, %v63_v41  ;;  %v108_v55 = vmul.f32 %v8694_v24, %v65_v47  ;;  %v110_v56 = vmul.f32 %v8694_v24, %v67_v48 }
  0x22   :  { %v135_v32 = vadd.f32 %v8698_v26, %v92_v28  ;;  %v137_v33 = vadd.f32 %v8698_v26, %v94_v29  ;;  %v6982_v42 = vcombine.high %v328_v37, %v329_v38  ;;  %v330_v43 = vld [vmem:[#allocation6 + $0x1c0] sm:$0xff]  ;;  %v6981_v49 = vcombine.low %v328_v37, %v329_v38 }
  0x23   :  { %v331_v44 = vld [vmem:[#allocation6 + $0x1e0] sm:$0xff]  ;;  %v8719_v51 = vadd.f32 %v8698_v26, %v104_v45  ;;  %v8722_v52 = vadd.f32 %v8698_v26, %v106_v46  ;;  %v8735_v61 = vadd.f32 %v8698_v26, %v108_v55  ;;  %v8738_v62 = vadd.f32 %v8698_v26, %v110_v56  ;;  %v53_v55 = vld [vmem:[%s12105_s0 + $0x28] sm:$0xff] }
  0x24   :  { %526 = vmatpush1.bf16.msra.mxu0 %v6975_v25  ;;  %v167_v36 = vpack.c.bf16 %v137_v33, %v135_v32  ;;  %v6984_v50 = vcombine.high %v330_v43, %v331_v44  ;;  %v332_v53 = vld [vmem:[#allocation6 + $0x200] sm:$0xff]  ;;  %v6983_v60 = vcombine.low %v330_v43, %v331_v44  ;;  %v112_v3 = vmul.f32 %v8694_v24, %v69_v58 }
  0x25   :  { %527 = vmatprep.subr.bf16.mxu0 %v6978_v27  ;;  %v333_v54 = vld [vmem:[#allocation6 + $0x220] sm:$0xff]  ;;  %v173_v57 = vpack.c.bf16 %v8722_v52, %v8719_v51  ;;  %v175_v2 = vpack.c.bf16 %v8738_v62, %v8735_v61  ;;  %v114_v4 = vmul.f32 %v8694_v24, %v71_v59  ;;  %v116_v13 = vmul.f32 %v8694_v24, %v73_v5  ;;  %v664_v5 = vld [vmem:[#allocation6 + $0x8] sm:$0xff] }
  0x26   :  { %551 = vmatprep.mubr.bf16.mxu0 %v167_v36  ;;  %v6986_v63 = vcombine.high %v332_v53, %v333_v54  ;;  %v334_v0 = vld [vmem:[#allocation6 + $0x240] sm:$0xff]  ;;  %v6985_v7 = vcombine.low %v332_v53, %v333_v54  ;;  %v8751_v8 = vadd.f32 %v8698_v26, %v112_v3  ;;  %v118_v14 = vmul.f32 %v8694_v24, %v75_v6  ;;  %v665_v6 = vld [vmem:[#allocation6 + $0x28] sm:$0xff] }
  0x27   :  { %v335_v1 = vld [vmem:[#allocation6 + $0x260] sm:$0xff]  ;;  %v8754_v9 = vadd.f32 %v8698_v26, %v114_v4  ;;  %v8767_v22 = vadd.f32 %v8698_v26, %v116_v13  ;;  %v120_v29 = vmul.f32 %v8694_v24, %v77_v18  ;;  %v122_v30 = vmul.f32 %v8694_v24, %v79_v19  ;;  %v57_v19 = vld [vmem:[%s12105_s0 + $0x48] sm:$0xff] }
  0x28   :  { %528 = vmatpush1.bf16.msra.mxu0 %v6977_v34  ;;  %v6988_v11 = vcombine.high %v334_v0, %v335_v1  ;;  %v336_v12 = vld [vmem:[#allocation6 + $0x280] sm:$0xff]  ;;  %v8770_v23 = vadd.f32 %v8698_v26, %v118_v14  ;;  %v6987_v25 = vcombine.low %v334_v0, %v335_v1  ;;  %v8785_v44 = vsub.s32 0, %v8671_v10  ;;  %v50_v10 = vld [vmem:[%s12105_s0 + $0x10] sm:$0xff] }
  0x29   :  { %529 = vmatprep.subr.bf16.mxu0 %v6980_v35  ;;  %v337_v16 = vld [vmem:[#allocation6 + $0x2a0] sm:$0xff]  ;;  %v177_v17 = vpack.c.bf16 %v8754_v9, %v8751_v8  ;;  %v8777_v33 = vadd.f32 %v8698_v26, %v120_v29  ;;  %v8780_v34 = vadd.f32 %v8698_v26, %v122_v30  ;;  %v96_v1 = vmul.f32 %v8694_v24, %v53_v55  ;;  %v667_v29 = vld [vmem:[#allocation6 + $0x68] sm:$0xff] }
  0x2a   :  { %v6990_v27 = vcombine.high %v336_v12, %v337_v16  ;;  %v179_v28 = vpack.c.bf16 %v8770_v23, %v8767_v22  ;;  %v338_v31 = vld [vmem:[#allocation6 + $0x2c0] sm:$0xff]  ;;  %v6989_v35 = vcombine.low %v336_v12, %v337_v16  ;;  %12222 = vst [vmem:[#allocation13_spill] sm:$0xff] %v8785_v44  ;;  %v8805_v59 = vrot.slane %v8684_v21, %v8785_v44  ;;  %v54_v16 = vld [vmem:[%s12105_s0 + $0x30] sm:$0xff]  ;;  %v183_v22 = vld [vmem:[%s12106_s1 + $0x8] sm:$0xff] }
  0x2b   :  { %v339_v32 = vld [vmem:[#allocation6 + $0x2e0] sm:$0xff]  ;;  %v181_v37 = vpack.c.bf16 %v8780_v34, %v8777_v33  ;;  %v139_v12 = vadd.f32 %v8698_v26, %v96_v1  ;;  %v7002_v18 = vcombine.high %v664_v5, %v665_v6  ;;  %v185_v23 = vld [vmem:[%s12106_s1 + $0x18] sm:$0xff]  ;;  %v694_v34 = vld [vmem:[#allocation6 + $0x3c8] sm:$0xff] }
  0x2c   :  { %530 = vmatpush1.bf16.msra.mxu0 %v6979_v39  ;;  %v6992_v36 = vcombine.high %v338_v31, %v339_v32  ;;  %v340_v38 = vld [vmem:[#allocation6 + $0x300] sm:$0xff]  ;;  %v6991_v40 = vcombine.low %v338_v31, %v339_v32  ;;  %v189_v33 = vld [vmem:[%s12106_s1 + $0x38] sm:$0xff] }
  0x2d   :  { %531 = vmatprep.subr.bf16.mxu0 %v6982_v42  ;;  %v341_v39 = vld [vmem:[#allocation6 + $0x320] sm:$0xff] }
  0x2e   :  { %v6994_v41 = vcombine.high %v340_v38, %v341_v39  ;;  %v342_v42 = vld [vmem:[#allocation6 + $0x340] sm:$0xff]  ;;  %v6993_v45 = vcombine.low %v340_v38, %v341_v39  ;;  %v100_v38 = vmul.f32 %v8694_v24, %v57_v19  ;;  %v676_v19 = vld [vmem:[#allocation6 + $0x188] sm:$0xff] }
  0x2f   :  { %v343_v43 = vld [vmem:[#allocation6 + $0x360] sm:$0xff] }
  0x30   :  { %532 = vmatpush1.bf16.msra.mxu0 %v6981_v49  ;;  %v6996_v46 = vcombine.high %v342_v42, %v343_v43  ;;  %v344_v47 = vld [vmem:[#allocation6 + $0x380] sm:$0xff]  ;;  %v8789_v49 = vrot.slane %v8679_v20, %v8785_v44  ;;  %v55_v20 = vld [vmem:[%s12105_s0 + $0x38] sm:$0xff] }
  0x31   :  { %533 = vmatprep.subr.bf16.mxu0 %v6984_v50  ;;  %v345_v48 = vld [vmem:[#allocation6 + $0x3a0] sm:$0xff]  ;;  %v6995_v50 = vcombine.low %v342_v42, %v343_v43  ;;  %v98_v3 = vmul.f32 %v8694_v24, %v55_v20  ;;  %v669_v42 = vld [vmem:[#allocation6 + $0xa8] sm:$0xff] }
  0x32   :  { %v48_v53 = vld [vmem:[%s12105_s0] sm:$0xff]  ;;  %v6998_v54 = vcombine.high %v344_v47, %v345_v48  ;;  %v6997_v0 = vcombine.low %v344_v47, %v345_v48  ;;  %v97_v32 = vmul.f32 %v8789_v49, %v54_v16  ;;  %v143_v47 = vadd.f32 %v8698_v26, %v100_v38  ;;  %v679_v38 = vld [vmem:[#allocation6 + $0x1e8] sm:$0xff] }
  0x33   :  { %v346_v56 = vld [vmem:[#allocation6 + $0x3c0] sm:$0xff]  ;;  %v141_v13 = vadd.f32 %v8698_v26, %v98_v3 }
  0x34   :  { %534 = vmatpush1.bf16.msra.mxu0 %v6983_v60  ;;  %v347_v58 = vld [vmem:[#allocation6 + $0x3e0] sm:$0xff]  ;;  %v91_v60 = vmul.f32 %v8789_v49, %v48_v53 }
  0x35   :  { %535 = vmatprep.subr.bf16.mxu0 %v6986_v63  ;;  %v93_v63 = vmul.f32 %v8789_v49, %v50_v10  ;;  %v7000_v4 = vcombine.high %v346_v56, %v347_v58  ;;  %v6999_v21 = vcombine.low %v346_v56, %v347_v58  ;;  %v52_v14 = vld [vmem:[%s12105_s0 + $0x20] sm:$0xff]  ;;  %v670_v10 = vld [vmem:[#allocation6 + $0xc8] sm:$0xff] }
  0x36   :  { %v95_v31 = vmul.f32 %v8789_v49, %v52_v14 }
  0x38   :  { %536 = vmatpush1.bf16.msra.mxu0 %v6985_v7  ;;  %v134_v7 = vadd.f32 %v8805_v59, %v91_v60  ;;  %v138_v43 = vadd.f32 %v8805_v59, %v95_v31  ;;  %v64_v31 = vld [vmem:[%s12105_s0 + $0x80] sm:$0xff] }
  0x39   :  { %537 = vmatprep.subr.bf16.mxu0 %v6988_v11  ;;  %v136_v11 = vadd.f32 %v8805_v59, %v93_v63  ;;  %v672_v63 = vld [vmem:[#allocation6 + $0x108] sm:$0xff] }
  0x3b   :  { %v166_v30 = vpack.c.bf16 %v136_v11, %v134_v7  ;;  %v674_v11 = vld [vmem:[#allocation6 + $0x148] sm:$0xff] }
  0x3c   :  { %538 = vmatpush1.bf16.msra.mxu0 %v6987_v25  ;;  %v59_v25 = vld [vmem:[%s12105_s0 + $0x58] sm:$0xff] }
  0x3d   :  { %539 = vmatprep.subr.bf16.mxu0 %v6990_v27  ;;  %v666_v27 = vld [vmem:[#allocation6 + $0x48] sm:$0xff]  ;;  %v102_v39 = vmul.f32 %v8694_v24, %v59_v25  ;;  %v56_v24 = vld [vmem:[%s12105_s0 + $0x40] sm:$0xff] }
  0x3e   :  { %v99_v20 = vmul.f32 %v8789_v49, %v56_v24  ;;  %v677_v25 = vld [vmem:[#allocation6 + $0x1a8] sm:$0xff] }
  0x3f   :  { %v145_v48 = vadd.f32 %v8698_v26, %v102_v39  ;;  %v7013_v51 = vcombine.low %v676_v19, %v677_v25 }
  0x40   :  { %540 = vmatpush1.bf16.msra.mxu0 %v6989_v35  ;;  %v7001_v35 = vcombine.low %v664_v5, %v665_v6  ;;  %v142_v1 = vadd.f32 %v8805_v59, %v99_v20  ;;  %v60_v5 = vld [vmem:[%s12105_s0 + $0x60] sm:$0xff]  ;;  %v62_v6 = vld [vmem:[%s12105_s0 + $0x70] sm:$0xff]  ;;  %v685_v20 = vld [vmem:[#allocation6 + $0x2a8] sm:$0xff] }
  0x41   :  { %541 = vmatprep.subr.bf16.mxu0 %v6992_v36  ;;  %v169_v36 = vpack.c.bf16 %v141_v13, %v139_v12  ;;  %v171_v26 = vpack.c.bf16 %v145_v48, %v143_v47  ;;  %v103_v13 = vmul.f32 %v8789_v49, %v60_v5  ;;  %v105_v14 = vmul.f32 %v8789_v49, %v62_v6  ;;  %v68_v47 = vld [vmem:[%s12105_s0 + $0xa0] sm:$0xff]  ;;  %v70_v48 = vld [vmem:[%s12105_s0 + $0xb0] sm:$0xff] }
  0x44   :  { %542 = vmatpush1.bf16.msra.mxu0 %v6991_v40  ;;  %v7004_v40 = vcombine.high %v666_v27, %v667_v29 }
  0x45   :  { %543 = vmatprep.subr.bf16.mxu0 %v6994_v41  ;;  %v668_v41 = vld [vmem:[#allocation6 + $0x88] sm:$0xff] }
  0x46   :  { %v7006_v53 = vcombine.high %v668_v41, %v669_v42  ;;  %v7005_v58 = vcombine.low %v668_v41, %v669_v42  ;;  %v681_v42 = vld [vmem:[#allocation6 + $0x228] sm:$0xff] }
  0x48   :  { %544 = vmatpush1.bf16.msra.mxu0 %v6993_v45  ;;  %v140_v45 = vadd.f32 %v8805_v59, %v97_v32  ;;  %v66_v32 = vld [vmem:[%s12105_s0 + $0x90] sm:$0xff] }
  0x49   :  { %545 = vmatprep.subr.bf16.mxu0 %v6996_v46  ;;  %v7003_v46 = vcombine.low %v666_v27, %v667_v29  ;;  %v146_v27 = vadd.f32 %v8805_v59, %v103_v13  ;;  %v148_v29 = vadd.f32 %v8805_v59, %v105_v14  ;;  %v109_v41 = vmul.f32 %v8789_v49, %v66_v32  ;;  %v76_v14 = vld [vmem:[%s12105_s0 + $0xe0] sm:$0xff] }
  0x4a   :  { %v168_v55 = vpack.c.bf16 %v140_v45, %v138_v43 }
  0x4b   :  { %v172_v39 = vpack.c.bf16 %v148_v29, %v146_v27  ;;  %v152_v45 = vadd.f32 %v8805_v59, %v109_v41  ;;  %v691_v27 = vld [vmem:[#allocation6 + $0x368] sm:$0xff] }
  0x4c   :  { %546 = vmatpush1.bf16.msra.mxu0 %v6995_v50  ;;  %v58_v50 = vld [vmem:[%s12105_s0 + $0x50] sm:$0xff]  ;;  %v693_v41 = vld [vmem:[#allocation6 + $0x3a8] sm:$0xff] }
  0x4d   :  { %547 = vmatprep.subr.bf16.mxu0 %v6998_v54  ;;  %v671_v54 = vld [vmem:[#allocation6 + $0xe8] sm:$0xff]  ;;  %v101_v56 = vmul.f32 %v8789_v49, %v58_v50 }
  0x4e   :  { %v7008_v60 = vcombine.high %v670_v10, %v671_v54  ;;  %v682_v50 = vld [vmem:[#allocation6 + $0x248] sm:$0xff] }
  0x4f   :  { %v144_v3 = vadd.f32 %v8805_v59, %v101_v56 }
  0x50   :  { %548 = vmatpush1.bf16.msra.mxu0 %v6997_v0  ;;  %v673_v0 = vld [vmem:[#allocation6 + $0x128] sm:$0xff] }
  0x51   :  { %549 = vmatprep.subr.bf16.mxu0 %v7000_v4  ;;  %v7007_v4 = vcombine.low %v670_v10, %v671_v54  ;;  %v7010_v7 = vcombine.high %v672_v63, %v673_v0  ;;  %v170_v12 = vpack.c.bf16 %v144_v3, %v142_v1  ;;  %v7009_v16 = vcombine.low %v672_v63, %v673_v0  ;;  %v74_v63 = vld [vmem:[%s12105_s0 + $0xd0] sm:$0xff]  ;;  %v686_v1 = vld [vmem:[#allocation6 + $0x2c8] sm:$0xff] }
  0x52   :  { %v111_v54 = vmul.f32 %v8789_v49, %v68_v47  ;;  %v687_v3 = vld [vmem:[#allocation6 + $0x2e8] sm:$0xff]  ;;  %v117_v6 = vmul.f32 %v8789_v49, %v74_v63  ;;  %v188_v63 = vld [vmem:[%s12106_s1 + $0x30] sm:$0xff] }
  0x53   :  { %v7024_v9 = vcombine.high %v686_v1, %v687_v3  ;;  %v7023_v13 = vcombine.low %v686_v1, %v687_v3  ;;  %v187_v47 = vld [vmem:[%s12106_s1 + $0x28] sm:$0xff]  ;;  %v193_v1 = vld [vmem:[%s12106_s1 + $0x58] sm:$0xff] }
  0x54   :  { %550 = vmatpush1.bf16.msra.mxu0 %v6999_v21  ;;  %v675_v21 = vld [vmem:[#allocation6 + $0x168] sm:$0xff]  ;;  %v154_v56 = vadd.f32 %v8805_v59, %v111_v54 }
  0x55   :  { %867 = vmatprep.subr.bf16.mxu0 %v7002_v18  ;;  %v7012_v18 = vcombine.high %v674_v11, %v675_v21 }
  0x57   :  { %552 = vmatmul.mubr.bf16.vlgmr.msra.gmra.mrb[0].mxu0 %v166_v30  ;;  %v7011_v30 = vcombine.low %v674_v11, %v675_v21  ;;  %v689_v11 = vld [vmem:[#allocation6 + $0x328] sm:$0xff] }
  0x58   :  { %868 = vmatpush1.bf16.msra.mxu0 %v7001_v35  ;;  %561 = vmatprep.mubr.bf16.mxu0 %v169_v36  ;;  %v7014_v35 = vcombine.high %v676_v19, %v677_v25  ;;  %v678_v36 = vld [vmem:[#allocation6 + $0x1c8] sm:$0xff] }
  0x59   :  { %869 = vmatprep.subr.bf16.mxu0 %v7004_v40  ;;  %v107_v40 = vmul.f32 %v8789_v49, %v64_v31  ;;  %v7016_v52 = vcombine.high %v678_v36, %v679_v38  ;;  %v6964_v25 = vld [vmem:[%s12107_s2 + $0x3] ss:$8 sm:$0x3] }
  0x5b   :  { %v150_v43 = vadd.f32 %v8805_v59, %v107_v40  ;;  %v692_v40 = vld [vmem:[#allocation6 + $0x388] sm:$0xff] }
  0x5c   :  { %870 = vmatpush1.bf16.msra.mxu0 %v7003_v46  ;;  %v7015_v46 = vcombine.low %v678_v36, %v679_v38  ;;  %v8923_v38 = vrot.slane %v6964_v25, %v8674_v15 }
  0x5d   :  { %871 = vmatprep.subr.bf16.mxu0 %v7006_v53  ;;  %v683_v53 = vld [vmem:[#allocation6 + $0x268] sm:$0xff]  ;;  %v174_v10 = vpack.c.bf16 %v152_v45, %v150_v43  ;;  %v182_v45 = vld [vmem:[%s12106_s1] sm:$0xff] }
  0x5e   :  { %v7020_v62 = vcombine.high %v682_v50, %v683_v53 }
  0x5f   :  { %562 = vmatmul.mubr.bf16.gmra.mrb[4].mxu0 %v168_v55  ;;  %v113_v55 = vmul.f32 %v8789_v49, %v70_v48 }
  0x60   :  { %872 = vmatpush1.bf16.msra.mxu0 %v7005_v58  ;;  %571 = vmatprep.mubr.bf16.mxu0 %v171_v26  ;;  %v7019_v26 = vcombine.low %v682_v50, %v683_v53 }
  0x61   :  { %873 = vmatprep.subr.bf16.mxu0 %v7008_v60  ;;  %v156_v58 = vadd.f32 %v8805_v59, %v113_v55  ;;  %v72_v60 = vld [vmem:[%s12105_s0 + $0xc0] sm:$0xff] }
  0x62   :  { %v115_v5 = vmul.f32 %v8789_v49, %v72_v60  ;;  %v186_v60 = vld [vmem:[%s12106_s1 + $0x20] sm:$0xff] }
  0x64   :  { %874 = vmatpush1.bf16.msra.mxu0 %v7007_v4  ;;  %v176_v4 = vpack.c.bf16 %v156_v58, %v154_v56  ;;  %v158_v21 = vadd.f32 %v8805_v59, %v115_v5 }
  0x65   :  { %875 = vmatprep.subr.bf16.mxu0 %v7010_v7  ;;  %v688_v7 = vld [vmem:[#allocation6 + $0x308] sm:$0xff] }
  0x66   :  { %v7026_v19 = vcombine.high %v688_v7, %v689_v11  ;;  %v7025_v32 = vcombine.low %v688_v7, %v689_v11 }
  0x67   :  { %572 = vmatmul.mubr.bf16.gmra.mrb[8].mxu0 %v170_v12  ;;  %v160_v12 = vadd.f32 %v8805_v59, %v117_v6 }
  0x68   :  { %876 = vmatpush1.bf16.msra.mxu0 %v7009_v16  ;;  %581 = vmatprep.mubr.bf16.mxu0 %v173_v57  ;;  %v680_v57 = vld [vmem:[#allocation6 + $0x208] sm:$0xff]  ;;  %v78_v16 = vld [vmem:[%s12105_s0 + $0xf0] sm:$0xff] }
  0x69   :  { %877 = vmatprep.subr.bf16.mxu0 %v7012_v18  ;;  %v7018_v24 = vcombine.high %v680_v57, %v681_v42  ;;  %v7017_v61 = vcombine.low %v680_v57, %v681_v42  ;;  %v178_v29 = vpack.c.bf16 %v160_v12, %v158_v21  ;;  %v121_v31 = vmul.f32 %v8789_v49, %v78_v16  ;;  %v190_v12 = vld [vmem:[%s12106_s1 + $0x40] sm:$0xff]  ;;  %v197_v16 = vld [vmem:[%s12106_s1 + $0x78] sm:$0xff] }
  0x6c   :  { %878 = vmatpush1.bf16.msra.mxu0 %v7011_v30  ;;  %v119_v30 = vmul.f32 %v8789_v49, %v76_v14  ;;  %v195_v14 = vld [vmem:[%s12106_s1 + $0x68] sm:$0xff] }
  0x6d   :  { %879 = vmatprep.subr.bf16.mxu0 %v7014_v35 }
  0x6f   :  { %582 = vmatmul.mubr.bf16.gmra.mrb[12].mxu0 %v172_v39 }
  0x70   :  { %880 = vmatpush1.bf16.msra.mxu0 %v7013_v51  ;;  %591 = vmatprep.mubr.bf16.mxu0 %v175_v2  ;;  %v684_v2 = vld [vmem:[#allocation6 + $0x288] sm:$0xff]  ;;  %v162_v51 = vadd.f32 %v8805_v59, %v119_v30 }
  0x71   :  { %881 = vmatprep.subr.bf16.mxu0 %v7016_v52  ;;  %v7022_v0 = vcombine.high %v684_v2, %v685_v20  ;;  %v7021_v8 = vcombine.low %v684_v2, %v685_v20  ;;  %v164_v52 = vadd.f32 %v8805_v59, %v121_v31  ;;  %v184_v59 = vld [vmem:[%s12106_s1 + $0x10] sm:$0xff] }
  0x73   :  { %v180_v48 = vpack.c.bf16 %v164_v52, %v162_v51 }
  0x74   :  { %882 = vmatpush1.bf16.msra.mxu0 %v7015_v46  ;;  %v7030_v46 = vcombine.high %v692_v40, %v693_v41 }
  0x75   :  { %883 = vmatprep.subr.bf16.mxu0 %v7018_v24  ;;  %v8948_v24 = vrot.slane %v6964_v25, %v8785_v44 }
  0x77   :  { %592 = vmatmul.mubr.bf16.gmra.mrb[16].mxu0 %v174_v10  ;;  %v7029_v10 = vcombine.low %v692_v40, %v693_v41 }
  0x78   :  { %884 = vmatpush1.bf16.msra.mxu0 %v7017_v61  ;;  %601 = vmatprep.mubr.bf16.mxu0 %v177_v17  ;;  %v6963_v17 = vld [vmem:[%s12107_s2 + $0x2] ss:$8 sm:$0x3] }
  0x79   :  { %885 = vmatprep.subr.bf16.mxu0 %v7020_v62  ;;  %v8907_v18 = vrot.slane %v6963_v17, %v8674_v15  ;;  %v8928_v49 = vrot.slane %v6963_v17, %v8785_v44 }
  0x7b   :  { %v226_v35 = vmul.f32 %v8907_v18, %v183_v22  ;;  %v228_v36 = vmul.f32 %v8907_v18, %v185_v23  ;;  %v225_v50 = vmul.f32 %v8928_v49, %v182_v45  ;;  %v227_v53 = vmul.f32 %v8928_v49, %v184_v59  ;;  %v1013_v45 = vld [vmem:[#allocation6 + $0x30] sm:$0xff] }
  0x7c   :  { %886 = vmatpush1.bf16.msra.mxu0 %v7019_v26  ;;  %v230_v55 = vmul.f32 %v8907_v18, %v187_v47  ;;  %v232_v61 = vmul.f32 %v8907_v18, %v189_v33  ;;  %v231_v5 = vmul.f32 %v8928_v49, %v188_v63  ;;  %v233_v25 = vmul.f32 %v8928_v49, %v190_v12  ;;  %v1014_v59 = vld [vmem:[#allocation6 + $0x50] sm:$0xff] }
  0x7d   :  { %887 = vmatprep.subr.bf16.mxu0 %v7022_v0  ;;  %v269_v42 = vadd.f32 %v8923_v38, %v226_v35  ;;  %v271_v43 = vadd.f32 %v8923_v38, %v228_v36  ;;  %v268_v2 = vadd.f32 %v8948_v24, %v225_v50  ;;  %v270_v20 = vadd.f32 %v8948_v24, %v227_v53  ;;  %v191_v0 = vld [vmem:[%s12106_s1 + $0x48] sm:$0xff]  ;;  %v194_v35 = vld [vmem:[%s12106_s1 + $0x60] sm:$0xff]  ;;  %v196_v36 = vld [vmem:[%s12106_s1 + $0x70] sm:$0xff] }
  0x7e   :  { %v273_v58 = vadd.f32 %v8923_v38, %v230_v55  ;;  %v275_v26 = vadd.f32 %v8923_v38, %v232_v61  ;;  %v274_v7 = vadd.f32 %v8948_v24, %v231_v5  ;;  %v237_v40 = vmul.f32 %v8928_v49, %v194_v35  ;;  %v1015_v33 = vld [vmem:[#allocation6 + $0x70] sm:$0xff]  ;;  %v199_v55 = vld [vmem:[%s12106_s1 + $0x88] sm:$0xff]  ;;  %v201_v61 = vld [vmem:[%s12106_s1 + $0x98] sm:$0xff] }
  0x7f   :  { %602 = vmatmul.mubr.bf16.gmra.mrb[20].mxu0 %v176_v4  ;;  %v8952_v54 = vpack.c.bf16 %v271_v43, %v269_v42  ;;  %v8973_v3 = vpack.c.bf16 %v270_v20, %v268_v2  ;;  %v229_v4 = vmul.f32 %v8928_v49, %v186_v60  ;;  %v239_v41 = vmul.f32 %v8928_v49, %v196_v36  ;;  %v1012_v43 = vld [vmem:[#allocation6 + $0x10] sm:$0xff]  ;;  %v205_v5 = vld [vmem:[%s12106_s1 + $0xb8] sm:$0xff] }
  0x80   :  { %888 = vmatpush1.bf16.msra.mxu0 %v7021_v8  ;;  %611 = vmatprep.mubr.bf16.mxu0 %v179_v28  ;;  %v690_v28 = vld [vmem:[#allocation6 + $0x348] sm:$0xff]  ;;  %v8977_v6 = vpack.c.bf16 %v275_v26, %v273_v58  ;;  %v234_v8 = vmul.f32 %v8907_v18, %v191_v0  ;;  %v280_v52 = vadd.f32 %v8948_v24, %v237_v40  ;;  %v200_v58 = vld [vmem:[%s12106_s1 + $0x90] sm:$0xff] }
  0x81   :  { %889 = vmatprep.subr.bf16.mxu0 %v7024_v9  ;;  %v7028_v39 = vcombine.high %v690_v28, %v691_v27  ;;  %v7027_v57 = vcombine.low %v690_v28, %v691_v27  ;;  %v236_v9 = vmul.f32 %v8907_v18, %v193_v1  ;;  %v272_v17 = vadd.f32 %v8948_v24, %v229_v4  ;;  %v203_v4 = vld [vmem:[%s12106_s1 + $0xa8] sm:$0xff]  ;;  %v1021_v12 = vld [vmem:[#allocation6 + $0x130] sm:$0xff] }
  0x82   :  { %v277_v11 = vadd.f32 %v8923_v38, %v234_v8  ;;  %v238_v28 = vmul.f32 %v8907_v18, %v195_v14  ;;  %v240_v27 = vmul.f32 %v8907_v18, %v197_v16  ;;  %v7034_v47 = vcombine.high %v1012_v43, %v1013_v45  ;;  %v202_v8 = vld [vmem:[%s12106_s1 + $0xa0] sm:$0xff] }
  0x83   :  { %v279_v21 = vadd.f32 %v8923_v38, %v236_v9  ;;  %v7035_v50 = vcombine.low %v1014_v59, %v1015_v33  ;;  %v242_v2 = vmul.f32 %v8907_v18, %v199_v55  ;;  %v244_v20 = vmul.f32 %v8907_v18, %v201_v61 }
  0x84   :  { %890 = vmatpush1.bf16.msra.mxu0 %v7023_v13  ;;  %v192_v13 = vld [vmem:[%s12106_s1 + $0x50] sm:$0xff]  ;;  %v281_v31 = vadd.f32 %v8923_v38, %v238_v28  ;;  %v243_v60 = vmul.f32 %v8928_v49, %v200_v58  ;;  %v246_v14 = vmul.f32 %v8907_v18, %v203_v4  ;;  %v248_v16 = vmul.f32 %v8907_v18, %v205_v5 }
  0x85   :  { %891 = vmatprep.subr.bf16.mxu0 %v7026_v19  ;;  %v8999_v19 = vpack.c.bf16 %v274_v7, %v272_v17  ;;  %v235_v22 = vmul.f32 %v8928_v49, %v192_v13  ;;  %v9003_v23 = vpack.c.bf16 %v279_v21, %v277_v11  ;;  %v285_v0 = vadd.f32 %v8923_v38, %v242_v2  ;;  %v204_v11 = vld [vmem:[%s12106_s1 + $0xb0] sm:$0xff] }
  0x86   :  { %v287_v1 = vadd.f32 %v8923_v38, %v244_v20  ;;  %v286_v7 = vadd.f32 %v8948_v24, %v243_v60  ;;  %v1020_v21 = vld [vmem:[#allocation6 + $0x110] sm:$0xff]  ;;  %v247_v28 = vmul.f32 %v8928_v49, %v204_v11  ;;  %v291_v35 = vadd.f32 %v8923_v38, %v248_v16 }
  0x87   :  { %612 = vmatmul.mubr.bf16.gmra.mrb[24].mxu0 %v178_v29  ;;  %v276_v29 = vadd.f32 %v8948_v24, %v233_v25  ;;  %v278_v30 = vadd.f32 %v8948_v24, %v235_v22  ;;  %v245_v25 = vmul.f32 %v8928_v49, %v202_v8  ;;  %v7042_v36 = vcombine.high %v1020_v21, %v1021_v12  ;;  %v1024_v2 = vld [vmem:[#allocation6 + $0x190] sm:$0xff] }
  0x88   :  { %892 = vmatpush1.bf16.msra.mxu0 %v7025_v32  ;;  %621 = vmatprep.mubr.bf16.mxu0 %v181_v37  ;;  %v695_v37 = vld [vmem:[#allocation6 + $0x3e8] sm:$0xff]  ;;  %v283_v32 = vadd.f32 %v8923_v38, %v240_v27  ;;  %v9064_v13 = vpack.c.bf16 %v287_v1, %v285_v0  ;;  %v1025_v20 = vld [vmem:[#allocation6 + $0x1b0] sm:$0xff] }
  0x89   :  { %893 = vmatprep.subr.bf16.mxu0 %v7028_v39  ;;  %v7032_v62 = vcombine.high %v694_v34, %v695_v37  ;;  %v7031_v56 = vcombine.low %v694_v34, %v695_v37  ;;  %v9019_v39 = vpack.c.bf16 %v278_v30, %v276_v29  ;;  %v7036_v34 = vcombine.high %v1014_v59, %v1015_v33  ;;  %v1016_v37 = vld [vmem:[#allocation6 + $0x90] sm:$0xff]  ;;  %v207_v27 = vld [vmem:[%s12106_s1 + $0xc8] sm:$0xff]  ;;  %v209_v29 = vld [vmem:[%s12106_s1 + $0xd8] sm:$0xff] }
  0x8a   :  { %v9023_v51 = vpack.c.bf16 %v283_v32, %v281_v31  ;;  %v6965_v30 = vld [vmem:[%s12107_s2 + $0x4] ss:$8 sm:$0x3]  ;;  %v289_v32 = vadd.f32 %v8923_v38, %v246_v14  ;;  %v288_v40 = vadd.f32 %v8948_v24, %v245_v25  ;;  %v250_v59 = vmul.f32 %v8907_v18, %v207_v27  ;;  %v1026_v16 = vld [vmem:[#allocation6 + $0x1d0] sm:$0xff] }
  0x8b   :  { %v9098_v33 = vrot.slane %v6965_v30, %v8785_v44  ;;  %v9111_v61 = vrot.slane %v6965_v30, %v8674_v15  ;;  %v1027_v25 = vld [vmem:[#allocation6 + $0x1f0] sm:$0xff] }
  0x8c   :  { %894 = vmatpush1.bf16.msra.mxu0 %v7027_v57  ;;  %v282_v57 = vadd.f32 %v8948_v24, %v239_v41  ;;  %v290_v41 = vadd.f32 %v8948_v24, %v247_v28 }
  0x8d   :  { %895 = vmatprep.subr.bf16.mxu0 %v7030_v46  ;;  %v7033_v46 = vcombine.low %v1012_v43, %v1013_v45  ;;  %v1023_v43 = vld [vmem:[#allocation6 + $0x170] sm:$0xff]  ;;  %v9090_v45 = vpack.c.bf16 %v291_v35, %v289_v32 }
  0x8e   :  { %v9029_v42 = vpack.c.bf16 %v282_v57, %v280_v52  ;;  %v206_v52 = vld [vmem:[%s12106_s1 + $0xc0] sm:$0xff]  ;;  %v1022_v57 = vld [vmem:[#allocation6 + $0x150] sm:$0xff] }
  0x8f   :  { %622 = vmatmul.mubr.bf16.gmra.mrb[28].mxu0 %v180_v48  ;;  %v1017_v48 = vld [vmem:[#allocation6 + $0xb0] sm:$0xff]  ;;  %v7043_v4 = vcombine.low %v1022_v57, %v1023_v43 }
  0x90   :  { %896 = vmatpush1.bf16.msra.mxu0 %v7029_v10  ;;  %899 = vmatprep.mubr.bf16.mxu0 %v8952_v54  ;;  %v7038_v53 = vcombine.high %v1016_v37, %v1017_v48  ;;  %v1018_v10 = vld [vmem:[#allocation6 + $0xd0] sm:$0xff]  ;;  %v7037_v63 = vcombine.low %v1016_v37, %v1017_v48  ;;  %v211_v37 = vld [vmem:[%s12106_s1 + $0xe8] sm:$0xff]  ;;  %v213_v48 = vld [vmem:[%s12106_s1 + $0xf8] sm:$0xff] }
  0x91   :  { %897 = vmatprep.subr.bf16.mxu0 %v7032_v62  ;;  %v1019_v62 = vld [vmem:[#allocation6 + $0xf0] sm:$0xff]  ;;  %v256_v0 = vmul.f32 %v8907_v18, %v213_v48 }
  0x92   :  { %v7040_v9 = vcombine.high %v1018_v10, %v1019_v62  ;;  %v7039_v31 = vcombine.low %v1018_v10, %v1019_v62  ;;  %v249_v10 = vmul.f32 %v8928_v49, %v206_v52  ;;  %v7044_v62 = vcombine.high %v1022_v57, %v1023_v43 }
  0x93   :  { %v299_v27 = vadd.f32 %v8923_v38, %v256_v0 }
  0x94   :  { %898 = vmatpush1.bf16.msra.mxu0 %v7031_v56  ;;  %v198_v56 = vld [vmem:[%s12106_s1 + $0x80] sm:$0xff] }
  0x95   :  { %1215 = vmatprep.subr.bf16.mxu0 %v7034_v47  ;;  %v241_v26 = vmul.f32 %v8928_v49, %v198_v56  ;;  %v208_v47 = vld [vmem:[%s12106_s1 + $0xd0] sm:$0xff]  ;;  %v9113_v56 = vpack.c.bf16 %v290_v41, %v288_v40 }
  0x96   :  { %v251_v58 = vmul.f32 %v8928_v49, %v208_v47  ;;  %v1028_v40 = vld [vmem:[#allocation6 + $0x210] sm:$0xff] }
  0x97   :  { %900 = vmatmul.mubr.bf16.vlgmr.msra.gmra.mrb[32].mxu0 %v8973_v3  ;;  %v284_v17 = vadd.f32 %v8948_v24, %v241_v26  ;;  %v1029_v41 = vld [vmem:[#allocation6 + $0x230] sm:$0xff] }
  0x98   :  { %909 = vmatprep.mubr.bf16.mxu0 %v8977_v6  ;;  %1216 = vmatpush1.bf16.msra.mxu0 %v7033_v46  ;;  %v252_v46 = vmul.f32 %v8907_v18, %v209_v29  ;;  %v212_v29 = vld [vmem:[%s12106_s1 + $0xf0] sm:$0xff]  ;;  %v7050_v48 = vcombine.high %v1028_v40, %v1029_v41 }
  0x99   :  { %1217 = vmatprep.subr.bf16.mxu0 %v7036_v34  ;;  %v9069_v22 = vpack.c.bf16 %v286_v7, %v284_v17  ;;  %v7041_v34 = vcombine.low %v1020_v21, %v1021_v12  ;;  %v7046_v17 = vcombine.high %v1024_v2, %v1025_v20  ;;  %v292_v7 = vadd.f32 %v8948_v24, %v249_v10  ;;  %v210_v12 = vld [vmem:[%s12106_s1 + $0xe0] sm:$0xff] }
  0x9a   :  { %v253_v32 = vmul.f32 %v8928_v49, %v210_v12 }
  0x9c   :  { %1218 = vmatpush1.bf16.msra.mxu0 %v7035_v50  ;;  %v293_v50 = vadd.f32 %v8923_v38, %v250_v59 }
  0x9d   :  { %1219 = vmatprep.subr.bf16.mxu0 %v7038_v53  ;;  %v295_v53 = vadd.f32 %v8923_v38, %v252_v46 }
  0x9f   :  { %910 = vmatmul.mubr.bf16.gmra.mrb[36].mxu0 %v8999_v19  ;;  %v9116_v60 = vpack.c.bf16 %v295_v53, %v293_v50  ;;  %v296_v50 = vadd.f32 %v8948_v24, %v253_v32 }
  0xa0   :  { %919 = vmatprep.mubr.bf16.mxu0 %v9003_v23  ;;  %1220 = vmatpush1.bf16.msra.mxu0 %v7037_v63  ;;  %v254_v63 = vmul.f32 %v8907_v18, %v211_v37  ;;  %v294_v18 = vadd.f32 %v8948_v24, %v251_v58  ;;  %v7047_v37 = vcombine.low %v1026_v16, %v1027_v25 }
  0xa1   :  { %1221 = vmatprep.subr.bf16.mxu0 %v7040_v9  ;;  %v7049_v58 = vcombine.low %v1028_v40, %v1029_v41  ;;  %v1037_v40 = vld [vmem:[#allocation6 + $0x330] sm:$0xff] }
  0xa2   :  { %v297_v28 = vadd.f32 %v8923_v38, %v254_v63  ;;  %v9143_v52 = vpack.c.bf16 %v294_v18, %v292_v7  ;;  %v255_v38 = vmul.f32 %v8928_v49, %v212_v29 }
  0xa4   :  { %1222 = vmatpush1.bf16.msra.mxu0 %v7039_v31  ;;  %v7045_v31 = vcombine.low %v1024_v2, %v1025_v20  ;;  %v9147_v59 = vpack.c.bf16 %v299_v27, %v297_v28  ;;  %v298_v49 = vadd.f32 %v8948_v24, %v255_v38  ;;  %v1031_v2 = vld [vmem:[#allocation6 + $0x270] sm:$0xff] }
  0xa5   :  { %1223 = vmatprep.subr.bf16.mxu0 %v7042_v36  ;;  %v7048_v36 = vcombine.high %v1026_v16, %v1027_v25  ;;  %v1033_v24 = vld [vmem:[#allocation6 + $0x2b0] sm:$0xff] }
  0xa6   :  { %v9160_v0 = vpack.c.bf16 %v298_v49, %v296_v50  ;;  %v1034_v16 = vld [vmem:[#allocation6 + $0x2d0] sm:$0xff] }
  0xa7   :  { %920 = vmatmul.mubr.bf16.gmra.mrb[40].mxu0 %v9019_v39  ;;  %v1035_v25 = vld [vmem:[#allocation6 + $0x2f0] sm:$0xff] }
  0xa8   :  { %929 = vmatprep.mubr.bf16.mxu0 %v9023_v51  ;;  %1224 = vmatpush1.bf16.msra.mxu0 %v7041_v34 }
  0xa9   :  { %1225 = vmatprep.subr.bf16.mxu0 %v7044_v62  ;;  %v1030_v62 = vld [vmem:[#allocation6 + $0x250] sm:$0xff] }
  0xaa   :  { %v7052_v63 = vcombine.high %v1030_v62, %v1031_v2  ;;  %v7051_v7 = vcombine.low %v1030_v62, %v1031_v2 }
  0xac   :  { %1226 = vmatpush1.bf16.msra.mxu0 %v7043_v4 }
  0xad   :  { %1227 = vmatprep.subr.bf16.mxu0 %v7046_v17 }
  0xaf   :  { %930 = vmatmul.mubr.bf16.gmra.mrb[44].mxu0 %v9029_v42 }
  0xb0   :  { %939 = vmatprep.mubr.bf16.mxu0 %v9064_v13  ;;  %1228 = vmatpush1.bf16.msra.mxu0 %v7045_v31  ;;  %v7056_v31 = vcombine.high %v1034_v16, %v1035_v25 }
  0xb1   :  { %1229 = vmatprep.subr.bf16.mxu0 %v7048_v36  ;;  %v1036_v36 = vld [vmem:[#allocation6 + $0x310] sm:$0xff] }
  0xb4   :  { %1230 = vmatpush1.bf16.msra.mxu0 %v7047_v37  ;;  %v1038_v37 = vld [vmem:[#allocation6 + $0x350] sm:$0xff] }
  0xb5   :  { %1231 = vmatprep.subr.bf16.mxu0 %v7050_v48  ;;  %v1039_v48 = vld [vmem:[#allocation6 + $0x370] sm:$0xff] }
  0xb6   :  { %v7060_v49 = vcombine.high %v1038_v37, %v1039_v48 }
  0xb7   :  { %940 = vmatmul.mubr.bf16.gmra.mrb[48].mxu0 %v9069_v22 }
  0xb8   :  { %949 = vmatprep.mubr.bf16.mxu0 %v9090_v45  ;;  %1232 = vmatpush1.bf16.msra.mxu0 %v7049_v58  ;;  %v1040_v58 = vld [vmem:[#allocation6 + $0x390] sm:$0xff] }
  0xb9   :  { %1233 = vmatprep.subr.bf16.mxu0 %v7052_v63 }
  0xbc   :  { %1234 = vmatpush1.bf16.msra.mxu0 %v7051_v7  ;;  %v1042_v7 = vld [vmem:[#allocation6 + $0x3d0] sm:$0xff] }
  0xbf   :  { %950 = vmatmul.mubr.bf16.gmra.mrb[52].mxu0 %v9113_v56 }
  0xc0   :  { %959 = vmatprep.mubr.bf16.mxu0 %v9116_v60 }
  0xc7   :  { %960 = vmatmul.mubr.bf16.gmra.mrb[56].mxu0 %v9143_v52 }
  0xc8   :  { %969 = vmatprep.mubr.bf16.mxu0 %v9147_v59 }
  0xcf   :  { %970 = vmatmul.mubr.bf16.gmra.mrb[60].mxu0 %v9160_v0 }
  0xd0   :  { %1247 = vmatprep.mubr.bf16.mxu0 %v8952_v54 }
 0x12a   :  { %v553_v55 = vpop.f32.mrb[0].mxu0 }
 0x12b   :  { %v555_v26 = vpop.f32.mrb[1].mxu0  ;;  %v554_v5 = vadd.f32 %v553_v55, %v9098_v33 }
 0x12c   :  { %v557_v1 = vpop.f32.mrb[2].mxu0  ;;  %v556_v11 = vadd.f32 %v555_v26, %v9111_v61 }
 0x12d   :  { %v558_v8 = vadd.f32 %v557_v1, %v9098_v33  ;;  %v559_v9 = vpop.f32.mrb[3].mxu0 }
 0x12e   :  { %v560_v21 = vadd.f32 %v559_v9, %v9111_v61 }
 0x12f   :  { %v9130_v14 = vpack.c.bf16 %v558_v8, %v554_v5  ;;  %v1032_v5 = vld [vmem:[#allocation6 + $0x290] sm:$0xff] }
 0x130   :  { %v9138_v30 = vpack.c.bf16 %v560_v21, %v556_v11  ;;  %v7054_v18 = vcombine.high %v1032_v5, %v1033_v24  ;;  %v7053_v27 = vcombine.low %v1032_v5, %v1033_v24  ;;  %v7059_v24 = vcombine.low %v1038_v37, %v1039_v48 }
 0x131   :  { %7489 = vmatprep.mubr.msk.bf16.mxu1 %vm1372_vm0, %v9130_v14 }
 0x132   :  { %v563_v35 = vpop.f32.mrb[4].mxu0  ;;  %1235 = vmatprep.subr.bf16.mxu0 %v7054_v18 }
 0x133   :  { %v564_v57 = vadd.f32 %v563_v35, %v9098_v33  ;;  %v565_v43 = vpop.f32.mrb[5].mxu0  ;;  %1236 = vmatpush1.bf16.msra.mxu0 %v7053_v27 }
 0x134   :  { %v567_v46 = vpop.f32.mrb[6].mxu0  ;;  %v566_v53 = vadd.f32 %v565_v43, %v9111_v61  ;;  %v7055_v43 = vcombine.low %v1034_v16, %v1035_v25  ;;  %1237 = vmatprep.subr.bf16.mxu0 %v7056_v31 }
 0x135   :  { %v568_v47 = vadd.f32 %v567_v46, %v9098_v33  ;;  %v569_v34 = vpop.f32.mrb[7].mxu0 }
 0x136   :  { %v570_v10 = vadd.f32 %v569_v34, %v9111_v61 }
 0x137   :  { %v9155_v55 = vpack.c.bf16 %v568_v47, %v564_v57  ;;  %v7058_v47 = vcombine.high %v1036_v36, %v1037_v40  ;;  %1238 = vmatpush1.bf16.msra.mxu0 %v7055_v43 }
 0x138   :  { %v9158_v20 = vpack.c.bf16 %v570_v10, %v566_v53  ;;  %v7057_v53 = vcombine.low %v1036_v36, %v1037_v40 }
 0x139   :  { %1239 = vmatprep.subr.bf16.mxu0 %v7058_v47 }
 0x13a   :  { %v573_v26 = vpop.f32.mrb[8].mxu0 }
 0x13b   :  { %v574_v1 = vadd.f32 %v573_v26, %v9098_v33  ;;  %v575_v4 = vpop.f32.mrb[9].mxu0  ;;  %v1041_v26 = vld [vmem:[#allocation6 + $0x3b0] sm:$0xff]  ;;  %1240 = vmatpush1.bf16.msra.mxu0 %v7057_v53 }
 0x13c   :  { %v577_v8 = vpop.f32.mrb[10].mxu0  ;;  %v576_v11 = vadd.f32 %v575_v4, %v9111_v61  ;;  %1241 = vmatprep.subr.bf16.mxu0 %v7060_v49  ;;  %v7061_v18 = vcombine.low %v1040_v58, %v1041_v26 }
 0x13d   :  { %v578_v9 = vadd.f32 %v577_v8, %v9098_v33  ;;  %v579_v17 = vpop.f32.mrb[11].mxu0 }
 0x13e   :  { %v580_v21 = vadd.f32 %v579_v17, %v9111_v61 }
 0x13f   :  { %v9167_v12 = vpack.c.bf16 %v578_v9, %v574_v1  ;;  %v7062_v9 = vcombine.high %v1040_v58, %v1041_v26  ;;  %1242 = vmatpush1.bf16.msra.mxu0 %v7059_v24 }
 0x140   :  { %v9170_v28 = vpack.c.bf16 %v580_v21, %v576_v11  ;;  %v1043_v11 = vld [vmem:[#allocation6 + $0x3f0] sm:$0xff] }
 0x141   :  { %1243 = vmatprep.subr.bf16.mxu0 %v7062_v9  ;;  %v7064_v25 = vcombine.high %v1042_v7, %v1043_v11  ;;  %v7063_v40 = vcombine.low %v1042_v7, %v1043_v11 }
 0x142   :  { %v583_v29 = vpop.f32.mrb[12].mxu0 }
 0x143   :  { %v584_v32 = vadd.f32 %v583_v29, %v9098_v33  ;;  %v585_v35 = vpop.f32.mrb[13].mxu0  ;;  %1244 = vmatpush1.bf16.msra.mxu0 %v7061_v18 }
 0x144   :  { %v587_v41 = vpop.f32.mrb[14].mxu0  ;;  %v586_v54 = vadd.f32 %v585_v35, %v9111_v61  ;;  %1245 = vmatprep.subr.bf16.mxu0 %v7064_v25 }
 0x145   :  { %v588_v38 = vadd.f32 %v587_v41, %v9098_v33  ;;  %v589_v57 = vpop.f32.mrb[15].mxu0 }
 0x146   :  { %v590_v46 = vadd.f32 %v589_v57, %v9111_v61 }
 0x147   :  { %v9176_v34 = vpack.c.bf16 %v588_v38, %v584_v32  ;;  %1246 = vmatpush1.bf16.msra.mxu0 %v7063_v40 }
 0x148   :  { %v9178_v50 = vpack.c.bf16 %v590_v46, %v586_v54 }
 0x14a   :  { %v593_v10 = vpop.f32.mrb[16].mxu0  ;;  %1248 = vmatmul.mubr.bf16.vlgmr.msra.gmra.mrb[64].mxu0 %v8973_v3 }
 0x14b   :  { %v594_v62 = vadd.f32 %v593_v10, %v9098_v33  ;;  %v595_v2 = vpop.f32.mrb[17].mxu0  ;;  %1257 = vmatprep.mubr.bf16.mxu0 %v8977_v6 }
 0x14c   :  { %v596_v63 = vadd.f32 %v595_v2, %v9111_v61  ;;  %v597_v1 = vpop.f32.mrb[18].mxu0 }
 0x14d   :  { %v598_v4 = vadd.f32 %v597_v1, %v9098_v33  ;;  %v599_v5 = vpop.f32.mrb[19].mxu0 }
 0x14e   :  { %v600_v8 = vadd.f32 %v599_v5, %v9111_v61  ;;  %v6966_v5 = vld [vmem:[%s12107_s2 + $0x5] ss:$8 sm:$0x3] }
 0x14f   :  { %v9184_v17 = vpack.c.bf16 %v598_v4, %v594_v62  ;;  %v9220_v9 = vrot.slane %v6966_v5, %v8785_v44 }
 0x150   :  { %v9186_v21 = vpack.c.bf16 %v600_v8, %v596_v63 }
 0x152   :  { %12223 = vst [vmem:[#allocation14_spill] sm:$0xff] %v9186_v21  ;;  %v603_v16 = vpop.f32.mrb[20].mxu0  ;;  %1258 = vmatmul.mubr.bf16.gmra.mrb[68].mxu0 %v8999_v19  ;;  %v9223_v19 = vrot.slane %v6966_v5, %v8674_v15 }
 0x153   :  { %v604_v27 = vadd.f32 %v603_v16, %v9098_v33  ;;  %v605_v29 = vpop.f32.mrb[21].mxu0  ;;  %1267 = vmatprep.mubr.bf16.mxu0 %v9003_v23 }
 0x154   :  { %v606_v31 = vadd.f32 %v605_v29, %v9111_v61  ;;  %v607_v32 = vpop.f32.mrb[22].mxu0 }
 0x155   :  { %v608_v35 = vadd.f32 %v607_v32, %v9098_v33  ;;  %v609_v36 = vpop.f32.mrb[23].mxu0 }
 0x156   :  { %v610_v41 = vadd.f32 %v609_v36, %v9111_v61 }
 0x157   :  { %v9192_v38 = vpack.c.bf16 %v608_v35, %v604_v27 }
 0x158   :  { %v9194_v57 = vpack.c.bf16 %v610_v41, %v606_v31 }
 0x15a   :  { %12224 = vst [vmem:[#allocation15_spill] sm:$0xff] %v9194_v57  ;;  %v613_v43 = vpop.f32.mrb[24].mxu0  ;;  %1268 = vmatmul.mubr.bf16.gmra.mrb[72].mxu0 %v9019_v39 }
 0x15b   :  { %v614_v54 = vadd.f32 %v613_v43, %v9098_v33  ;;  %v615_v46 = vpop.f32.mrb[25].mxu0  ;;  %1277 = vmatprep.mubr.bf16.mxu0 %v9023_v51 }
 0x15c   :  { %v616_v47 = vadd.f32 %v615_v46, %v9111_v61  ;;  %v617_v37 = vpop.f32.mrb[26].mxu0 }
 0x15d   :  { %v618_v48 = vadd.f32 %v617_v37, %v9098_v33  ;;  %v619_v53 = vpop.f32.mrb[27].mxu0 }
 0x15e   :  { %v620_v10 = vadd.f32 %v619_v53, %v9111_v61 }
 0x15f   :  { %v9202_v49 = vpack.c.bf16 %v618_v48, %v614_v54 }
 0x160   :  { %v9204_v62 = vpack.c.bf16 %v620_v10, %v616_v47 }
 0x162   :  { %12225 = vst [vmem:[#allocation16_spill] sm:$0xff] %v9204_v62  ;;  %v623_v2 = vpop.f32.mrb[28].mxu0  ;;  %1278 = vmatmul.mubr.bf16.gmra.mrb[76].mxu0 %v9029_v42 }
 0x163   :  { %v624_v58 = vadd.f32 %v623_v2, %v9098_v33  ;;  %v625_v26 = vpop.f32.mrb[29].mxu0  ;;  %1287 = vmatprep.mubr.bf16.mxu0 %v9064_v13 }
 0x164   :  { %v626_v63 = vadd.f32 %v625_v26, %v9111_v61  ;;  %v627_v1 = vpop.f32.mrb[30].mxu0 }
 0x165   :  { %v628_v3 = vadd.f32 %v627_v1, %v9098_v33  ;;  %v629_v4 = vpop.f32.mrb[31].mxu0 }
 0x166   :  { %v630_v6 = vadd.f32 %v629_v4, %v9111_v61 }
 0x167   :  { %v9215_v24 = vpack.c.bf16 %v628_v3, %v624_v58 }
 0x168   :  { %v9217_v8 = vpack.c.bf16 %v630_v6, %v626_v63 }
 0x169   :  { %12226 = vst [vmem:[#allocation17_spill] sm:$0xff] %v9215_v24 }
 0x16a   :  { %12227 = vst [vmem:[#allocation18_spill] sm:$0xff] %v9217_v8  ;;  %v901_v7 = vpop.f32.mrb[32].mxu0  ;;  %1288 = vmatmul.mubr.bf16.gmra.mrb[80].mxu0 %v9069_v22 }
 0x16b   :  { %v903_v33 = vpop.f32.mrb[33].mxu0  ;;  %v902_v23 = vadd.f32 %v901_v7, %v9220_v9  ;;  %1297 = vmatprep.mubr.bf16.mxu0 %v9090_v45 }
 0x16c   :  { %v905_v11 = vpop.f32.mrb[34].mxu0  ;;  %v904_v16 = vadd.f32 %v903_v33, %v9223_v19 }
 0x16d   :  { %v906_v61 = vadd.f32 %v905_v11, %v9220_v9  ;;  %v907_v18 = vpop.f32.mrb[35].mxu0 }
 0x16e   :  { %v908_v25 = vadd.f32 %v907_v18, %v9223_v19 }
 0x16f   :  { %v9231_v27 = vpack.c.bf16 %v906_v61, %v902_v23 }
 0x170   :  { %v9233_v29 = vpack.c.bf16 %v908_v25, %v904_v16 }
 0x171   :  { %7993 = vmatprep.subr.msk.bf16.mxu1 %vm1372_vm0, %v9231_v27  ;;  %v1386_v39 = vsel %vm1372_vm0, %v9231_v27, 0 }
 0x172   :  { %v911_v31 = vpop.f32.mrb[36].mxu0  ;;  %7482 = vmatpush3.bf16.xpose.msra.mxu1 %v1386_v39  ;;  %1298 = vmatmul.mubr.bf16.gmra.mrb[84].mxu0 %v9113_v56 }
 0x173   :  { %v913_v32 = vpop.f32.mrb[37].mxu0  ;;  %v912_v51 = vadd.f32 %v911_v31, %v9220_v9  ;;  %1307 = vmatprep.mubr.bf16.mxu0 %v9116_v60 }
 0x174   :  { %v915_v35 = vpop.f32.mrb[38].mxu0  ;;  %v914_v41 = vadd.f32 %v913_v32, %v9223_v19 }
 0x175   :  { %v916_v36 = vadd.f32 %v915_v35, %v9220_v9  ;;  %v917_v40 = vpop.f32.mrb[39].mxu0 }
 0x176   :  { %v918_v43 = vadd.f32 %v917_v40, %v9223_v19 }
 0x177   :  { %v9245_v54 = vpack.c.bf16 %v916_v36, %v912_v51 }
 0x178   :  { %v9247_v46 = vpack.c.bf16 %v918_v43, %v914_v41 }
 0x179   :  { %7994 = vmatprep.subr.msk.bf16.mxu1 %vm1372_vm0, %v9245_v54  ;;  %v1389_v42 = vsel %vm1372_vm0, %v9245_v54, 0 }
 0x17a   :  { %v921_v47 = vpop.f32.mrb[40].mxu0  ;;  %7484 = vmatpush3.bf16.xpose.msra.mxu1 %v1389_v42  ;;  %1308 = vmatmul.mubr.bf16.gmra.mrb[88].mxu0 %v9143_v52 }
 0x17b   :  { %v923_v37 = vpop.f32.mrb[41].mxu0  ;;  %v922_v13 = vadd.f32 %v921_v47, %v9220_v9  ;;  %1317 = vmatprep.mubr.bf16.mxu0 %v9147_v59 }
 0x17c   :  { %v925_v48 = vpop.f32.mrb[42].mxu0  ;;  %v924_v2 = vadd.f32 %v923_v37, %v9223_v19 }
 0x17d   :  { %v926_v53 = vadd.f32 %v925_v48, %v9220_v9  ;;  %v927_v10 = vpop.f32.mrb[43].mxu0 }
 0x17e   :  { %v928_v58 = vadd.f32 %v927_v10, %v9223_v19 }
 0x17f   :  { %v9259_v26 = vpack.c.bf16 %v926_v53, %v922_v13 }
 0x180   :  { %v9261_v63 = vpack.c.bf16 %v928_v58, %v924_v2 }
 0x181   :  { %7995 = vmatprep.subr.msk.bf16.mxu1 %vm1372_vm0, %v9259_v26  ;;  %v1392_v22 = vsel %vm1372_vm0, %v9259_v26, 0 }
 0x182   :  { %v931_v1 = vpop.f32.mrb[44].mxu0  ;;  %7486 = vmatpush3.bf16.xpose.msra.mxu1 %v1392_v22  ;;  %1318 = vmatmul.mubr.bf16.gmra.mrb[92].mxu0 %v9160_v0 }
 0x183   :  { %v933_v3 = vpop.f32.mrb[45].mxu0  ;;  %v932_v45 = vadd.f32 %v931_v1, %v9220_v9 }
 0x184   :  { %v935_v4 = vpop.f32.mrb[46].mxu0  ;;  %v934_v7 = vadd.f32 %v933_v3, %v9223_v19 }
 0x185   :  { %v936_v6 = vadd.f32 %v935_v4, %v9220_v9  ;;  %v937_v5 = vpop.f32.mrb[47].mxu0 }
 0x186   :  { %v938_v33 = vadd.f32 %v937_v5, %v9223_v19 }
 0x187   :  { %v9273_v11 = vpack.c.bf16 %v936_v6, %v932_v45  ;;  %v6967_v6 = vld [vmem:[%s12107_s2 + $0x6] ss:$8 sm:$0x3] }
 0x188   :  { %v9275_v23 = vpack.c.bf16 %v938_v33, %v934_v7 }
 0x189   :  { %7996 = vmatprep.subr.msk.bf16.mxu1 %vm1372_vm0, %v9273_v11  ;;  %v1395_v56 = vsel %vm1372_vm0, %v9273_v11, 0 }
 0x18a   :  { %7488 = vmatpush3.bf16.xpose.msra.mxu1 %v1395_v56  ;;  %v941_v60 = vpop.f32.mrb[48].mxu0 }
 0x18b   :  { %v942_v61 = vadd.f32 %v941_v60, %v9220_v9  ;;  %v943_v18 = vpop.f32.mrb[49].mxu0 }
 0x18c   :  { %v945_v16 = vpop.f32.mrb[50].mxu0  ;;  %v944_v52 = vadd.f32 %v943_v18, %v9223_v19 }
 0x18d   :  { %v946_v59 = vadd.f32 %v945_v16, %v9220_v9  ;;  %v947_v25 = vpop.f32.mrb[51].mxu0 }
 0x18e   :  { %v948_v31 = vadd.f32 %v947_v25, %v9223_v19 }
 0x18f   :  { %v9293_v39 = vpack.c.bf16 %v946_v59, %v942_v61  ;;  %v9333_v59 = vrot.slane %v6967_v6, %v8785_v44 }
 0x190   :  { %v9297_v51 = vpack.c.bf16 %v948_v31, %v944_v52 }
 0x191   :  { %7490 = vmatmul.mubr.msk.bf16.vlgmr.msra.gmra.mrb[0].mxu1 %vm1372_vm0, %v9155_v55 }
 0x192   :  { %7493 = vmatprep.mubr.msk.bf16.mxu1 %vm1372_vm0, %v9167_v12  ;;  %v951_v32 = vpop.f32.mrb[52].mxu0  ;;  %12228 = vst [vmem:[#allocation19_spill] sm:$0xff] %v9297_v51 }
 0x193   :  { %v952_v0 = vadd.f32 %v951_v32, %v9220_v9  ;;  %v953_v35 = vpop.f32.mrb[53].mxu0 }
 0x194   :  { %v954_v36 = vadd.f32 %v953_v35, %v9223_v19  ;;  %v955_v40 = vpop.f32.mrb[54].mxu0 }
 0x195   :  { %v956_v43 = vadd.f32 %v955_v40, %v9220_v9  ;;  %v957_v42 = vpop.f32.mrb[55].mxu0 }
 0x196   :  { %v958_v48 = vadd.f32 %v957_v42, %v9223_v19 }
 0x197   :  { %v9312_v2 = vpack.c.bf16 %v956_v43, %v952_v0  ;;  %v9339_v0 = vrot.slane %v6967_v6, %v8674_v15 }
 0x198   :  { %v9317_v3 = vpack.c.bf16 %v958_v48, %v954_v36 }
 0x199   :  { %7494 = vmatmul.mubr.msk.bf16.gmra.mrb[4].mxu1 %vm1372_vm0, %v9176_v34 }
 0x19a   :  { %v961_v13 = vpop.f32.mrb[56].mxu0  ;;  %12229 = vst [vmem:[#allocation20_spill] sm:$0xff] %v9317_v3 }
 0x19b   :  { %v962_v58 = vadd.f32 %v961_v13, %v9220_v9  ;;  %v963_v22 = vpop.f32.mrb[57].mxu0 }
 0x19c   :  { %v964_v4 = vadd.f32 %v963_v22, %v9223_v19  ;;  %v965_v45 = vpop.f32.mrb[58].mxu0 }
 0x19d   :  { %v966_v5 = vadd.f32 %v965_v45, %v9220_v9  ;;  %v967_v7 = vpop.f32.mrb[59].mxu0 }
 0x19e   :  { %v968_v56 = vadd.f32 %v967_v7, %v9223_v19 }
 0x19f   :  { %v9329_v18 = vpack.c.bf16 %v966_v5, %v962_v58 }
 0x1a0   :  { %v9335_v25 = vpack.c.bf16 %v968_v56, %v964_v4 }
 0x1a2   :  { %v971_v60 = vpop.f32.mrb[60].mxu0  ;;  %12230 = vst [vmem:[#allocation21_spill] sm:$0xff] %v9335_v25 }
 0x1a3   :  { %v972_v16 = vadd.f32 %v971_v60, %v9220_v9  ;;  %v973_v52 = vpop.f32.mrb[61].mxu0 }
 0x1a4   :  { %v974_v31 = vadd.f32 %v973_v52, %v9223_v19  ;;  %v975_v32 = vpop.f32.mrb[62].mxu0 }
 0x1a5   :  { %v976_v36 = vadd.f32 %v975_v32, %v9220_v9  ;;  %v977_v40 = vpop.f32.mrb[63].mxu0 }
 0x21d   :  { %v1249_v48 = vpop.f32.mrb[64].mxu0 }
 0x21e   :  { %v1250_v58 = vadd.f32 %v1249_v48, %v9333_v59  ;;  %v1251_v22 = vpop.f32.mrb[65].mxu0 }
 0x21f   :  { %v1252_v45 = vadd.f32 %v1251_v22, %v9339_v0  ;;  %v1253_v6 = vpop.f32.mrb[66].mxu0 }
 0x220   :  { %v1254_v5 = vadd.f32 %v1253_v6, %v9333_v59  ;;  %v1255_v7 = vpop.f32.mrb[67].mxu0 }
 0x222   :  { %v9363_v60 = vpack.c.bf16 %v1254_v5, %v1250_v58 }
 0x224   :  { %7497 = vmatprep.subr.bf16.mxu1 %v9363_v60 }
 0x225   :  { %7498 = vmatpush3.bf16.msra.mxu1 %v9363_v60 }
 0x264   :  { %v9300_v41 = vpop.f32.mrb[0].mxu1 }
 0x265   :  { %v9303_v47 = vpop.f32.mrb[1].mxu1  ;;  %v1469_v37 = vsel %vm1462_vm1, %v9300_v41, -inf }
 0x266   :  { %1470 = vmax.xlane.f32.xlu1 %v1469_v37  ;;  %v9308_v53 = vpop.f32.mrb[2].mxu1  ;;  %v1463_v10 = vsel %vm1462_vm1, %v9303_v47, -inf  ;;  %v978_v37 = vadd.f32 %v977_v40, %v9223_v19  ;;  %v1256_v19 = vadd.f32 %v1255_v7, %v9339_v0 }
 0x267   :  { %1464 = vmax.xlane.f32.xlu0 %v1463_v10  ;;  %v9315_v1 = vpop.f32.mrb[3].mxu1  ;;  %v1472_v33 = vsel %vm1462_vm1, %v9308_v53, -inf  ;;  %v9351_v10 = vpack.c.bf16 %v976_v36, %v972_v16 }
 0x268   :  { %v1466_v61 = vsel %vm1462_vm1, %v9315_v1, -inf  ;;  %v9356_v9 = vpack.c.bf16 %v978_v37, %v974_v31  ;;  %v9365_v16 = vpack.c.bf16 %v1256_v19, %v1252_v45 }
 0x26a   :  { %1473 = vmax.xlane.f32.xlu1 %v1472_v33  ;;  %12231 = vst [vmem:[#allocation22_spill] sm:$0xff] %v9356_v9  ;;  %v1259_v33 = vpop.f32.mrb[68].mxu0 }
 0x26b   :  { %1467 = vmax.xlane.f32.xlu0 %v1466_v61  ;;  %v1261_v61 = vpop.f32.mrb[69].mxu0  ;;  %v1260_v52 = vadd.f32 %v1259_v33, %v9333_v59 }
 0x26c   :  { %v9341_v35 = vpop.f32.mrb[4].mxu1  ;;  %v1263_v31 = vpop.f32.mrb[70].mxu0 }
 0x26d   :  { %v9344_v43 = vpop.f32.mrb[5].mxu1  ;;  %v1481_v42 = vsel %vm1462_vm1, %v9341_v35, -inf  ;;  %v1264_v32 = vadd.f32 %v1263_v31, %v9333_v59  ;;  %v1265_v36 = vpop.f32.mrb[71].mxu0 }
 0x26e   :  { %v9349_v13 = vpop.f32.mrb[6].mxu1  ;;  %v1475_v56 = vsel %vm1462_vm1, %v9344_v43, -inf  ;;  %v1269_v40 = vpop.f32.mrb[72].mxu0  ;;  %v1266_v22 = vadd.f32 %v1265_v36, %v9339_v0 }
 0x26f   :  { %1482 = vmax.xlane.f32.xlu0 %v1481_v42  ;;  %v9354_v4 = vpop.f32.mrb[7].mxu1  ;;  %v1262_v42 = vadd.f32 %v1261_v61, %v9339_v0  ;;  %v9372_v37 = vpack.c.bf16 %v1264_v32, %v1260_v52  ;;  %v1271_v48 = vpop.f32.mrb[73].mxu0  ;;  %v1270_v45 = vadd.f32 %v1269_v40, %v9333_v59 }
 0x270   :  { %v1273_v58 = vpop.f32.mrb[74].mxu0  ;;  %v1272_v36 = vadd.f32 %v1271_v48, %v9339_v0 }
 0x271   :  { %v1274_v6 = vadd.f32 %v1273_v58, %v9333_v59  ;;  %v1275_v5 = vpop.f32.mrb[75].mxu0  ;;  %7499 = vmatprep.subr.bf16.mxu1 %v9372_v37  ;;  %v9381_v19 = vpack.c.bf16 %v1266_v22, %v1262_v42 }
 0x272   :  { %v1279_v7 = vpop.f32.mrb[76].mxu0  ;;  %7500 = vmatpush3.bf16.msra.mxu1 %v9372_v37  ;;  %v1276_v40 = vadd.f32 %v1275_v5, %v9339_v0  ;;  %v1478_v5 = vsel %vm1462_vm1, %v9354_v4, -inf }
 0x273   :  { %1476 = vmax.xlane.f32.xlu0 %v1475_v56  ;;  %v9383_v33 = vpack.c.bf16 %v1274_v6, %v1270_v45  ;;  %v1281_v56 = vpop.f32.mrb[77].mxu0  ;;  %v1280_v52 = vadd.f32 %v1279_v7, %v9333_v59  ;;  %v1484_v6 = vsel %vm1462_vm1, %v9349_v13, -inf }
 0x274   :  { %v1283_v61 = vpop.f32.mrb[78].mxu0  ;;  %v9399_v42 = vpack.c.bf16 %v1276_v40, %v1272_v36  ;;  %v1282_v48 = vadd.f32 %v1281_v56, %v9339_v0 }
 0x275   :  { %v1284_v31 = vadd.f32 %v1283_v61, %v9333_v59  ;;  %7501 = vmatprep.subr.bf16.mxu1 %v9383_v33  ;;  %v1285_v58 = vpop.f32.mrb[79].mxu0 }
 0x276   :  { %7502 = vmatpush3.bf16.msra.mxu1 %v9383_v33  ;;  %v1286_v22 = vadd.f32 %v1285_v58, %v9339_v0 }
 0x277   :  { %v9391_v32 = vpack.c.bf16 %v1284_v31, %v1280_v52 }
 0x278   :  { %v9413_v45 = vpack.c.bf16 %v1286_v22, %v1282_v48 }
 0x279   :  { %7503 = vmatprep.subr.bf16.mxu1 %v9391_v32 }
 0x27a   :  { %7504 = vmatpush3.bf16.msra.mxu1 %v9391_v32 }
 0x27b   :  { %1670 = vrot.lane.b32.xlu1 %v9245_v54, %s8628_s13 }
 0x27f   :  { %1672 = vrot.lane.b32.xlu1 %v9259_v26, %s8628_s13 }
 0x289   :  { %1668 = vrot.lane.b32.xlu0 %v9231_v27, %s8628_s13 }
 0x28d   :  { %1656 = vrot.lane.b32.xlu0 %v9130_v14, %s8628_s13 }
 0x291   :  { %1658 = vrot.lane.b32.xlu0 %v9155_v55, %s8628_s13 }
 0x295   :  { %2007 = vrot.lane.b32.xlu0 %v9259_v26, %s8629_s14 }
 0x299   :  { %2009 = vrot.lane.b32.xlu0 %v9273_v11, %s8629_s14 }
 0x29d   :  { %1991 = vrot.lane.b32.xlu0 %v9130_v14, %s8629_s14 }
 0x2a1   :  { %1993 = vrot.lane.b32.xlu0 %v9155_v55, %s8629_s14 }
 0x2a3   :  { %1485 = vmax.xlane.f32.xlu1 %v1484_v6 }
 0x2a5   :  { %2342 = vrot.lane.b32.xlu0 %v9259_v26, %s8627_s26 }
 0x2a7   :  { %1479 = vmax.xlane.f32.xlu1 %v1478_v5 }
 0x2a9   :  { %1997 = vrot.lane.b32.xlu0 %v9176_v34, %s8629_s14 }
 0x2ad   :  { %2326 = vrot.lane.b32.xlu0 %v9130_v14, %s8627_s26 }
 0x2b1   :  { %2330 = vrot.lane.b32.xlu0 %v9167_v12, %s8627_s26 }
 0x2b8   :  { %1674 = vrot.lane.b32.xlu1 %v9273_v11, %s8628_s13 }
 0x2bc   :  { %2003 = vrot.lane.b32.xlu1 %v9231_v27, %s8629_s14 }
 0x2c0   :  { %2005 = vrot.lane.b32.xlu1 %v9245_v54, %s8629_s14 }
 0x2c4   :  { %1660 = vrot.lane.b32.xlu1 %v9167_v12, %s8628_s13 }
 0x2c8   :  { %1662 = vrot.lane.b32.xlu1 %v9176_v34, %s8628_s13 }
 0x2cc   :  { %2338 = vrot.lane.b32.xlu1 %v9231_v27, %s8627_s26 }
 0x2d0   :  { %2340 = vrot.lane.b32.xlu1 %v9245_v54, %s8627_s26 }
 0x2d4   :  { %1995 = vrot.lane.b32.xlu1 %v9167_v12, %s8629_s14 }
 0x2d8   :  { %2344 = vrot.lane.b32.xlu1 %v9273_v11, %s8627_s26 }
 0x2dc   :  { %2328 = vrot.lane.b32.xlu1 %v9155_v55, %s8627_s26 }
 0x2e0   :  { %2332 = vrot.lane.b32.xlu1 %v9176_v34, %s8627_s26 }
 0x2e4   :  { %2525 = vrot.lane.b32.xlu1 %v9372_v37, %s8627_s26 }
 0x2e8   :  { %2527 = vrot.lane.b32.xlu1 %v9383_v33, %s8627_s26 }
 0x2f3   :  { %v1471_v14 = vpop.xlane.xlu1 %1470 }
 0x2f4   :  { %v1489_v27 = vsub.f32 %v9300_v41, %v1471_v14  ;;  %v1465_v54 = vpop.xlane.xlu0 %1464 }
 0x2f5   :  { %v1487_v12 = vsub.f32 %v9303_v47, %v1465_v54 }
 0x2f6   :  { %v1499_v26 = vmul.f32 1.442695, %v1489_v27 }
 0x2f7   :  { %v1495_v11 = vmul.f32 1.442695, %v1487_v12  ;;  %v1474_v7 = vpop.xlane.xlu1 %1473 }
 0x2f8   :  { %v1490_v55 = vsub.f32 %v9308_v53, %v1474_v7  ;;  %v1468_v56 = vpop.xlane.xlu0 %1467  ;;  %8065 = vpow2.f32 %v1499_v26 }
 0x2f9   :  { %v1488_v34 = vsub.f32 %v9315_v1, %v1468_v56  ;;  %8067 = vpow2.f32 %v1495_v11 }
 0x2fa   :  { %v1501_v61 = vmul.f32 1.442695, %v1490_v55 }
 0x2fb   :  { %v1497_v52 = vmul.f32 1.442695, %v1488_v34  ;;  %v1671_v6 = vpop.permute.xlu1 %1670 }
 0x2fc   :  { %8069 = vpow2.f32 %v1501_v61  ;;  %v1483_v31 = vpop.xlane.xlu0 %1482  ;;  %v1692_v5 = vsel %vm1372_vm0, %v1671_v6, 0 }
 0x2fd   :  { %8071 = vpow2.f32 %v1497_v52  ;;  %v1493_v54 = vsub.f32 %v9341_v35, %v1483_v31 }
 0x2ff   :  { %v1673_v14 = vpop.permute.xlu1 %1672  ;;  %v1507_v12 = vmul.f32 1.442695, %v1493_v54 }
 0x300   :  { %v1477_v36 = vpop.xlane.xlu0 %1476  ;;  %v1695_v27 = vsel %vm1372_vm0, %v1673_v14, 0 }
 0x301   :  { %v1491_v26 = vsub.f32 %v9344_v43, %v1477_v36  ;;  %8073 = vpow2.f32 %v1507_v12 }
 0x302   :  { %v9459_v41 = vpop.eup %8065 }
 0x303   :  { %12232 = vst [vmem:[#allocation23_spill] sm:$0xff] %v9459_v41  ;;  %v9461_v47 = vpop.eup %8067  ;;  %v1503_v56 = vmul.f32 1.442695, %v1491_v26 }
 0x304   :  { %v1669_v40 = vpop.permute.xlu0 %1668  ;;  %12233 = vst [vmem:[#allocation24_spill] sm:$0xff] %v9461_v47 }
 0x305   :  { %7997 = vmatprep.subr.msk.bf16.mxu1 %vm1372_vm0, %v1669_v40  ;;  %v1689_v22 = vsel %vm1372_vm0, %v1669_v40, 0 }
 0x306   :  { %v9464_v48 = vpop.eup %8069 }
 0x307   :  { %12234 = vst [vmem:[#allocation25_spill] sm:$0xff] %v9464_v48  ;;  %v9466_v53 = vpop.eup %8071  ;;  %v1544_v1 = vpack.c.bf16 %v9464_v48, %v9459_v41 }
 0x308   :  { %12235 = vst [vmem:[#allocation26_spill] sm:$0xff] %v9466_v53  ;;  %v1543_v58 = vpack.c.bf16 %v9466_v53, %v9461_v47  ;;  %v1657_v36 = vpop.permute.xlu0 %1656 }
 0x30a   :  { %7505 = vmatprep.mubr.msk.bf16.mxu1 %vm1462_vm1, %v1543_v58 }
 0x30b   :  { %7506 = vmatmul.mubr.msk.bf16.vlgmr.msra.gmra.mrb[8].mxu1 %vm1462_vm1, %v1544_v1 }
 0x30c   :  { %7514 = vmatpush3.bf16.xpose.msra.mxu1 %v1689_v22 }
 0x30d   :  { %7998 = vmatprep.subr.msk.bf16.mxu1 %vm1372_vm0, %v1671_v6  ;;  %v1659_v6 = vpop.permute.xlu0 %1658 }
 0x314   :  { %7516 = vmatpush3.bf16.xpose.msra.mxu1 %v1692_v5 }
 0x315   :  { %7999 = vmatprep.subr.msk.bf16.mxu1 %vm1372_vm0, %v1673_v14  ;;  %v2008_v14 = vpop.permute.xlu0 %2007 }
 0x319   :  { %v2010_v12 = vpop.permute.xlu0 %2009 }
 0x31c   :  { %7518 = vmatpush3.bf16.xpose.msra.mxu1 %v1695_v27 }
 0x330   :  { %v1486_v11 = vpop.xlane.xlu1 %1485 }
 0x331   :  { %v1494_v7 = vsub.f32 %v9349_v13, %v1486_v11  ;;  %v9486_v13 = vpop.eup %8073  ;;  %v1992_v11 = vpop.permute.xlu0 %1991 }
 0x332   :  { %12236 = vst [vmem:[#allocation27_spill] sm:$0xff] %v9486_v13 }
 0x333   :  { %v1509_v55 = vmul.f32 1.442695, %v1494_v7 }
 0x334   :  { %v1480_v34 = vpop.xlane.xlu1 %1479 }
 0x335   :  { %8075 = vpow2.f32 %v1509_v55  ;;  %v1492_v61 = vsub.f32 %v9354_v4, %v1480_v34  ;;  %v2030_v55 = vsel %vm1372_vm0, %v2008_v14, 0  ;;  %v1994_v34 = vpop.permute.xlu0 %1993 }
 0x336   :  { %8077 = vpow2.f32 %v1503_v56 }
 0x337   :  { %v1505_v52 = vmul.f32 1.442695, %v1492_v61  ;;  %v2033_v61 = vsel %vm1372_vm0, %v2010_v12, 0 }
 0x338   :  { %v1675_v40 = vpop.permute.xlu1 %1674 }
 0x339   :  { %8079 = vpow2.f32 %v1505_v52  ;;  %8000 = vmatprep.subr.msk.bf16.mxu1 %vm1372_vm0, %v1675_v40  ;;  %v1698_v35 = vsel %vm1372_vm0, %v1675_v40, 0  ;;  %v2343_v40 = vpop.permute.xlu0 %2342 }
 0x33a   :  { %7520 = vmatpush3.bf16.xpose.msra.mxu1 %v1698_v35 }
 0x33c   :  { %v2004_v43 = vpop.permute.xlu1 %2003 }
 0x33d   :  { %8001 = vmatprep.subr.msk.bf16.mxu1 %vm1372_vm0, %v2004_v43  ;;  %v2024_v54 = vsel %vm1372_vm0, %v2004_v43, 0 }
 0x33f   :  { %v9488_v31 = vpop.eup %8075 }
 0x340   :  { %12237 = vst [vmem:[#allocation28_spill] sm:$0xff] %v9488_v31  ;;  %v1546_v4 = vpack.c.bf16 %v9488_v31, %v9486_v13  ;;  %v9492_v1 = vpop.eup %8077  ;;  %v2006_v5 = vpop.permute.xlu1 %2005 }
 0x341   :  { %12238 = vst [vmem:[#allocation29_spill] sm:$0xff] %v9492_v1  ;;  %v2027_v7 = vsel %vm1372_vm0, %v2006_v5, 0 }
 0x343   :  { %v9494_v58 = vpop.eup %8079 }
 0x344   :  { %12239 = vst [vmem:[#allocation30_spill] sm:$0xff] %v9494_v58  ;;  %v1545_v22 = vpack.c.bf16 %v9494_v58, %v9492_v1  ;;  %v1661_v27 = vpop.permute.xlu1 %1660 }
 0x346   :  { %7509 = vmatprep.mubr.msk.bf16.mxu1 %vm1462_vm1, %v1545_v22 }
 0x347   :  { %7510 = vmatmul.mubr.msk.bf16.gmra.mrb[12].mxu1 %vm1462_vm1, %v1546_v4 }
 0x348   :  { %7521 = vmatprep.mubr.msk.bf16.mxu1 %vm1372_vm0, %v1657_v36  ;;  %v1663_v26 = vpop.permute.xlu1 %1662  ;;  %v1998_v36 = vpop.permute.xlu0 %1997 }
 0x34c   :  { %v2339_v56 = vpop.permute.xlu1 %2338  ;;  %v2327_v4 = vpop.permute.xlu0 %2326 }
 0x34d   :  { %v2359_v43 = vsel %vm1372_vm0, %v2339_v56, 0 }
 0x34f   :  { %7522 = vmatmul.mubr.msk.bf16.vlgmr.msra.gmra.mrb[16].mxu1 %vm1372_vm0, %v1659_v6  ;;  %v2365_v6 = vsel %vm1372_vm0, %v2343_v40, 0 }
 0x350   :  { %7546 = vmatpush3.bf16.xpose.msra.mxu1 %v2024_v54  ;;  %7525 = vmatprep.mubr.msk.bf16.mxu1 %vm1372_vm0, %v1661_v27  ;;  %v2341_v52 = vpop.permute.xlu1 %2340  ;;  %v2331_v54 = vpop.permute.xlu0 %2330 }
 0x351   :  { %8002 = vmatprep.subr.msk.bf16.mxu1 %vm1372_vm0, %v2006_v5  ;;  %v2362_v22 = vsel %vm1372_vm0, %v2341_v52, 0 }
 0x354   :  { %v1996_v35 = vpop.permute.xlu1 %1995 }
 0x357   :  { %7526 = vmatmul.mubr.msk.bf16.gmra.mrb[20].mxu1 %vm1372_vm0, %v1663_v26 }
 0x358   :  { %7548 = vmatpush3.bf16.xpose.msra.mxu1 %v2027_v7  ;;  %7553 = vmatprep.mubr.msk.bf16.mxu1 %vm1372_vm0, %v1992_v11  ;;  %v2345_v5 = vpop.permute.xlu1 %2344 }
 0x359   :  { %8003 = vmatprep.subr.msk.bf16.mxu1 %vm1372_vm0, %v2008_v14  ;;  %v2368_v14 = vsel %vm1372_vm0, %v2345_v5, 0 }
 0x35c   :  { %v2329_v27 = vpop.permute.xlu1 %2328 }
 0x360   :  { %7550 = vmatpush3.bf16.xpose.msra.mxu1 %v2030_v55 }
 0x361   :  { %8004 = vmatprep.subr.msk.bf16.mxu1 %vm1372_vm0, %v2010_v12  ;;  %v2333_v12 = vpop.permute.xlu1 %2332 }
 0x368   :  { %7552 = vmatpush3.bf16.xpose.msra.mxu1 %v2033_v61 }
 0x369   :  { %8005 = vmatprep.subr.msk.bf16.mxu1 %vm1372_vm0, %v2339_v56 }
 0x36f   :  { %7554 = vmatmul.mubr.msk.bf16.vlgmr.msra.gmra.mrb[24].mxu1 %vm1372_vm0, %v1994_v34 }
 0x370   :  { %7557 = vmatprep.mubr.msk.bf16.mxu1 %vm1372_vm0, %v1996_v35  ;;  %7578 = vmatpush3.bf16.xpose.msra.mxu1 %v2359_v43 }
 0x371   :  { %8006 = vmatprep.subr.msk.bf16.mxu1 %vm1372_vm0, %v2341_v52 }
 0x377   :  { %7558 = vmatmul.mubr.msk.bf16.gmra.mrb[28].mxu1 %vm1372_vm0, %v1998_v36 }
 0x378   :  { %7580 = vmatpush3.bf16.xpose.msra.mxu1 %v2362_v22  ;;  %7585 = vmatprep.mubr.msk.bf16.mxu1 %vm1372_vm0, %v2327_v4 }
 0x379   :  { %8007 = vmatprep.subr.msk.bf16.mxu1 %vm1372_vm0, %v2343_v40 }
 0x380   :  { %7582 = vmatpush3.bf16.xpose.msra.mxu1 %v2365_v6 }
 0x381   :  { %8008 = vmatprep.subr.msk.bf16.mxu1 %vm1372_vm0, %v2345_v5 }
 0x388   :  { %7584 = vmatpush3.bf16.xpose.msra.mxu1 %v2368_v14 }
 0x38f   :  { %7586 = vmatmul.mubr.msk.bf16.vlgmr.msra.gmra.mrb[32].mxu1 %vm1372_vm0, %v2329_v27 }
 0x390   :  { %7589 = vmatprep.mubr.msk.bf16.mxu1 %vm1372_vm0, %v2331_v54 }
 0x397   :  { %7590 = vmatmul.mubr.msk.bf16.gmra.mrb[36].mxu1 %vm1372_vm0, %v2333_v12 }
 0x3de   :  { %v9527_v26 = vpop.f32.mrb[8].mxu1 }
 0x3df   :  { %12240 = vst [vmem:[#allocation31_spill] sm:$0xff] %v9527_v26  ;;  %v9529_v11 = vpop.f32.mrb[9].mxu1 }
 0x3e0   :  { %12241 = vst [vmem:[#allocation32_spill] sm:$0xff] %v9529_v11  ;;  %v9531_v7 = vpop.f32.mrb[10].mxu1 }
 0x3e1   :  { %12242 = vst [vmem:[#allocation33_spill] sm:$0xff] %v9531_v7  ;;  %v9533_v55 = vpop.f32.mrb[11].mxu1 }
 0x3e2   :  { %12243 = vst [vmem:[#allocation34_spill] sm:$0xff] %v9533_v55 }
 0x41a   :  { %v9535_v56 = vpop.f32.mrb[12].mxu1 }
 0x41b   :  { %12244 = vst [vmem:[#allocation35_spill] sm:$0xff] %v9535_v56  ;;  %v9537_v34 = vpop.f32.mrb[13].mxu1 }
 0x41c   :  { %12245 = vst [vmem:[#allocation36_spill] sm:$0xff] %v9537_v34  ;;  %v9539_v61 = vpop.f32.mrb[14].mxu1 }
 0x41d   :  { %12246 = vst [vmem:[#allocation37_spill] sm:$0xff] %v9539_v61  ;;  %v9541_v52 = vpop.f32.mrb[15].mxu1 }
 0x41e   :  { %12247 = vst [vmem:[#allocation38_spill] sm:$0xff] %v9541_v52 }
 0x422   :  { %v9543_v40 = vpop.f32.mrb[16].mxu1 }
 0x423   :  { %v9545_v35 = vpop.f32.mrb[17].mxu1 }
 0x424   :  { %v9547_v43 = vpop.f32.mrb[18].mxu1 }
 0x425   :  { %v9549_v36 = vpop.f32.mrb[19].mxu1  ;;  %v1774_v47 = vsel %vm1462_vm1, %v9547_v43, -inf }
 0x42a   :  { %v9551_v4 = vpop.f32.mrb[20].mxu1 }
 0x42b   :  { %v9553_v22 = vpop.f32.mrb[21].mxu1 }
 0x42c   :  { %v9555_v6 = vpop.f32.mrb[22].mxu1 }
 0x42d   :  { %v9557_v5 = vpop.f32.mrb[23].mxu1 }
 0x42e   :  { %v1780_v53 = vsel %vm1462_vm1, %v9557_v5, -inf }
 0x442   :  { %v9559_v14 = vpop.f32.mrb[24].mxu1 }
 0x443   :  { %v9561_v27 = vpop.f32.mrb[25].mxu1 }
 0x444   :  { %v9563_v54 = vpop.f32.mrb[26].mxu1 }
 0x445   :  { %v9565_v12 = vpop.f32.mrb[27].mxu1 }
 0x44a   :  { %v9567_v15 = vpop.f32.mrb[28].mxu1 }
 0x44b   :  { %v9569_v44 = vpop.f32.mrb[29].mxu1  ;;  %v2118_v24 = vsel %vm1462_vm1, %v9567_v15, -inf }
 0x44c   :  { %v9571_v56 = vpop.f32.mrb[30].mxu1  ;;  %v2112_v57 = vsel %vm1462_vm1, %v9569_v44, -inf }
 0x44d   :  { %v9573_v61 = vpop.f32.mrb[31].mxu1 }
 0x462   :  { %v9575_v34 = vpop.f32.mrb[32].mxu1 }
 0x463   :  { %v9577_v52 = vpop.f32.mrb[33].mxu1  ;;  %v2441_v26 = vsel %vm1462_vm1, %v9575_v34, -inf }
 0x464   :  { %2442 = vmax.xlane.f32.xlu0 %v2441_v26  ;;  %v9581_v7 = vpop.f32.mrb[34].mxu1  ;;  %v2435_v13 = vsel %vm1462_vm1, %v9577_v52, -inf }
 0x465   :  { %v2407_v11 = vpop.f32.mrb[35].mxu1  ;;  %v2444_v31 = vsel %vm1462_vm1, %v9581_v7, -inf }
 0x466   :  { %v2438_v55 = vsel %vm1462_vm1, %v2407_v11, -inf }
 0x467   :  { %2439 = vmax.xlane.f32.xlu1 %v2438_v55  ;;  %v1768_v55 = vsel %vm1462_vm1, %v9549_v36, -inf }
 0x468   :  { %2436 = vmax.xlane.f32.xlu0 %v2435_v13 }
 0x46a   :  { %v9586_v1 = vpop.f32.mrb[36].mxu1 }
 0x46b   :  { %v9588_v41 = vpop.f32.mrb[37].mxu1  ;;  %v2453_v48 = vsel %vm1462_vm1, %v9586_v1, -inf }
 0x46c   :  { %2445 = vmax.xlane.f32.xlu0 %v2444_v31  ;;  %v9592_v58 = vpop.f32.mrb[38].mxu1  ;;  %v2447_v31 = vsel %vm1462_vm1, %v9588_v41, -inf }
 0x46d   :  { %v9594_v26 = vpop.f32.mrb[39].mxu1 }
 0x46e   :  { %v2450_v13 = vsel %vm1462_vm1, %v9594_v26, -inf }
 0x478   :  { %2529 = vrot.lane.b32.xlu1 %v9391_v32, %s8627_s26 }
 0x482   :  { %2523 = vrot.lane.b32.xlu0 %v9363_v60, %s8627_s26 }
 0x49c   :  { %2451 = vmax.xlane.f32.xlu1 %v2450_v13  ;;  %v2456_v13 = vsel %vm1462_vm1, %v9592_v58, -inf }
 0x4a0   :  { %1769 = vmax.xlane.f32.xlu1 %v1768_v55  ;;  %v1786_v55 = vsel %vm1462_vm1, %v9555_v6, -inf }
 0x4a1   :  { %2448 = vmax.xlane.f32.xlu0 %v2447_v31  ;;  %v1765_v31 = vsel %vm1462_vm1, %v9545_v35, -inf }
 0x4a4   :  { %1775 = vmax.xlane.f32.xlu1 %v1774_v47  ;;  %v2100_v47 = vsel %vm1462_vm1, %v9561_v27, -inf }
 0x4a5   :  { %2454 = vmax.xlane.f32.xlu0 %v2453_v48  ;;  %v1771_v48 = vsel %vm1462_vm1, %v9543_v40, -inf }
 0x4a8   :  { %1781 = vmax.xlane.f32.xlu1 %v1780_v53  ;;  %v2103_v53 = vsel %vm1462_vm1, %v9565_v12, -inf }
 0x4a9   :  { %2457 = vmax.xlane.f32.xlu0 %v2456_v13  ;;  %v1777_v13 = vsel %vm1462_vm1, %v9553_v22, -inf }
 0x4ac   :  { %1787 = vmax.xlane.f32.xlu1 %v1786_v55  ;;  %v2106_v55 = vsel %vm1462_vm1, %v9559_v14, -inf }
 0x4ad   :  { %1766 = vmax.xlane.f32.xlu0 %v1765_v31  ;;  %v1783_v31 = vsel %vm1462_vm1, %v9551_v4, -inf }
 0x4b0   :  { %2101 = vmax.xlane.f32.xlu1 %v2100_v47  ;;  %v2109_v47 = vsel %vm1462_vm1, %v9563_v54, -inf }
 0x4b1   :  { %1772 = vmax.xlane.f32.xlu0 %v1771_v48  ;;  %v2526_v48 = vpop.permute.xlu1 %2525 }
 0x4b4   :  { %2104 = vmax.xlane.f32.xlu1 %v2103_v53 }
 0x4b5   :  { %1778 = vmax.xlane.f32.xlu0 %v1777_v13  ;;  %v2528_v53 = vpop.permute.xlu1 %2527  ;;  %v2115_v13 = vsel %vm1462_vm1, %v9573_v61, -inf }
 0x4b8   :  { %2107 = vmax.xlane.f32.xlu1 %v2106_v55 }
 0x4b9   :  { %1784 = vmax.xlane.f32.xlu0 %v1783_v31 }
 0x4bc   :  { %2110 = vmax.xlane.f32.xlu1 %v2109_v47 }
 0x4cd   :  { %1855 = vrot.lane.b32.xlu1 %v9372_v37, %s8628_s13 }
 0x4cf   :  { %1853 = vrot.lane.b32.xlu0 %v9363_v60, %s8628_s13 }
 0x4d3   :  { %1857 = vrot.lane.b32.xlu0 %v9383_v33, %s8628_s13 }
 0x4d7   :  { %1859 = vrot.lane.b32.xlu0 %v9391_v32, %s8628_s13 }
 0x4f1   :  { %v2443_v55 = vpop.xlane.xlu0 %2442  ;;  %2116 = vmax.xlane.f32.xlu1 %v2115_v13 }
 0x4f2   :  { %v2461_v47 = vsub.f32 %v9575_v34, %v2443_v55  ;;  %v2121_v55 = vsel %vm1462_vm1, %v9571_v56, -inf }
 0x4f4   :  { %v2440_v31 = vpop.xlane.xlu1 %2439  ;;  %v2471_v3 = vmul.f32 1.442695, %v2461_v47 }
 0x4f5   :  { %v2460_v8 = vsub.f32 %v2407_v11, %v2440_v31  ;;  %v2437_v62 = vpop.xlane.xlu0 %2436 }
 0x4f6   :  { %v2459_v21 = vsub.f32 %v9577_v52, %v2437_v62  ;;  %2113 = vmax.xlane.f32.xlu0 %v2112_v57 }
 0x4f7   :  { %v2469_v9 = vmul.f32 1.442695, %v2460_v8 }
 0x4f8   :  { %v2467_v25 = vmul.f32 1.442695, %v2459_v21  ;;  %v2530_v8 = vpop.permute.xlu1 %2529 }
 0x4f9   :  { %8081 = vpow2.f32 %v2469_v9  ;;  %v2446_v51 = vpop.xlane.xlu0 %2445  ;;  %v2673_v9 = vsel %vm1372_vm0, %v9247_v46, 0 }
 0x4fa   :  { %8083 = vpow2.f32 %v2467_v25  ;;  %v2462_v13 = vsub.f32 %v9581_v7, %v2446_v51  ;;  %2119 = vmax.xlane.f32.xlu0 %v2118_v24  ;;  %v2670_v25 = vsel %vm1372_vm0, %v9233_v29, 0 }
 0x4fb   :  { %8085 = vpow2.f32 %v2471_v3 }
 0x4fc   :  { %v2473_v11 = vmul.f32 1.442695, %v2462_v13 }
 0x4fd   :  { %v2524_v34 = vpop.permute.xlu0 %2523 }
 0x4fe   :  { %8087 = vpow2.f32 %v2473_v11  ;;  %7593 = vmatprep.subr.bf16.mxu1 %v2524_v34  ;;  %2122 = vmax.xlane.f32.xlu0 %v2121_v55 }
 0x4ff   :  { %7594 = vmatpush3.bf16.msra.mxu1 %v2524_v34 }
 0x500   :  { %7595 = vmatprep.subr.bf16.mxu1 %v2526_v48 }
 0x502   :  { %2190 = vrot.lane.b32.xlu1 %v9372_v37, %s8629_s14  ;;  %v2676_v37 = vsel %vm1372_vm0, %v9261_v63, 0 }
 0x503   :  { %v9653_v21 = vpop.eup %8081  ;;  %7596 = vmatpush3.bf16.msra.mxu1 %v2526_v48 }
 0x504   :  { %v9655_v57 = vpop.eup %8083  ;;  %7597 = vmatprep.subr.bf16.mxu1 %v2528_v53 }
 0x505   :  { %v2515_v62 = vpack.c.bf16 %v9653_v21, %v9655_v57  ;;  %v9661_v24 = vpop.eup %8085 }
 0x506   :  { %2194 = vrot.lane.b32.xlu1 %v9391_v32, %s8629_s14  ;;  %12248 = vst [vmem:[#allocation39_spill] sm:$0xff] %v9661_v24 }
 0x507   :  { %7598 = vmatpush3.bf16.msra.mxu1 %v2528_v53  ;;  %7601 = vmatprep.mubr.msk.bf16.mxu1 %vm1462_vm1, %v2515_v62 }
 0x508   :  { %v9664_v51 = vpop.eup %8087  ;;  %7599 = vmatprep.subr.bf16.mxu1 %v2530_v8 }
 0x509   :  { %v2516_v3 = vpack.c.bf16 %v9664_v51, %v9661_v24 }
 0x50b   :  { %7600 = vmatpush3.bf16.msra.mxu1 %v2530_v8 }
 0x50c   :  { %8009 = vmatprep.subr.msk.bf16.mxu1 %vm1372_vm0, %v9233_v29 }
 0x50e   :  { %7602 = vmatmul.mubr.msk.bf16.vlgmr.msra.gmra.mrb[40].mxu1 %vm1462_vm1, %v2516_v3 }
 0x514   :  { %2188 = vrot.lane.b32.xlu0 %v9363_v60, %s8629_s14  ;;  %7610 = vmatpush3.bf16.xpose.msra.mxu1 %v2670_v25 }
 0x515   :  { %8010 = vmatprep.subr.msk.bf16.mxu1 %vm1372_vm0, %v9247_v46 }
 0x518   :  { %2192 = vrot.lane.b32.xlu0 %v9383_v33, %s8629_s14  ;;  %v2679_v33 = vsel %vm1372_vm0, %v9275_v23, 0 }
 0x51c   :  { %7612 = vmatpush3.bf16.xpose.msra.mxu1 %v2673_v9 }
 0x51d   :  { %8011 = vmatprep.subr.msk.bf16.mxu1 %vm1372_vm0, %v9261_v63 }
 0x524   :  { %7614 = vmatpush3.bf16.xpose.msra.mxu1 %v2676_v37 }
 0x525   :  { %8012 = vmatprep.subr.msk.bf16.mxu1 %vm1372_vm0, %v9275_v23 }
 0x529   :  { %v2452_v60 = vpop.xlane.xlu1 %2451 }
 0x52a   :  { %v2464_v32 = vsub.f32 %v9594_v26, %v2452_v60 }
 0x52c   :  { %7616 = vmatpush3.bf16.xpose.msra.mxu1 %v2679_v33  ;;  %v2477_v52 = vmul.f32 1.442695, %v2464_v32 }
 0x52d   :  { %v1770_v7 = vpop.xlane.xlu1 %1769 }
 0x52e   :  { %v2449_v48 = vpop.xlane.xlu0 %2448  ;;  %8089 = vpow2.f32 %v2477_v52  ;;  %v1790_v55 = vsub.f32 %v9549_v36, %v1770_v7 }
 0x52f   :  { %v2463_v53 = vsub.f32 %v9588_v41, %v2449_v48 }
 0x530   :  { %v1799_v9 = vmul.f32 1.442695, %v1790_v55 }
 0x531   :  { %v2475_v31 = vmul.f32 1.442695, %v2463_v53  ;;  %v1776_v47 = vpop.xlane.xlu1 %1775 }
 0x532   :  { %v2455_v13 = vpop.xlane.xlu0 %2454  ;;  %v1792_v37 = vsub.f32 %v9547_v43, %v1776_v47 }
 0x533   :  { %8091 = vpow2.f32 %v2475_v31  ;;  %v2465_v11 = vsub.f32 %v9586_v1, %v2455_v13 }
 0x535   :  { %v1782_v34 = vpop.xlane.xlu1 %1781  ;;  %v2479_v26 = vmul.f32 1.442695, %v2465_v11 }
 0x536   :  { %v2458_v62 = vpop.xlane.xlu0 %2457  ;;  %v1794_v1 = vsub.f32 %v9557_v5, %v1782_v34 }
 0x537   :  { %v2466_v8 = vsub.f32 %v9592_v58, %v2458_v62  ;;  %8093 = vpow2.f32 %v2479_v26  ;;  %v1803_v58 = vmul.f32 1.442695, %v1792_v37 }
 0x538   :  { %v9696_v32 = vpop.eup %8089 }
 0x539   :  { %v2481_v3 = vmul.f32 1.442695, %v2466_v8  ;;  %v1788_v25 = vpop.xlane.xlu1 %1787  ;;  %12249 = vst [vmem:[#allocation40_spill] sm:$0xff] %v9696_v32 }
 0x53a   :  { %v1767_v41 = vpop.xlane.xlu0 %1766  ;;  %v1796_v13 = vsub.f32 %v9555_v6, %v1788_v25 }
 0x53b   :  { %8095 = vpow2.f32 %v2481_v3  ;;  %v1789_v60 = vsub.f32 %v9545_v35, %v1767_v41  ;;  %v1807_v35 = vmul.f32 1.442695, %v1794_v1 }
 0x53c   :  { %8097 = vpow2.f32 %v1799_v9  ;;  %v1811_v3 = vmul.f32 1.442695, %v1796_v13 }
 0x53d   :  { %v9699_v33 = vpop.eup %8091  ;;  %v1797_v36 = vmul.f32 1.442695, %v1789_v60  ;;  %v2102_v7 = vpop.xlane.xlu1 %2101 }
 0x53e   :  { %12250 = vst [vmem:[#allocation41_spill] sm:$0xff] %v9699_v33  ;;  %v2124_v52 = vsub.f32 %v9561_v27, %v2102_v7  ;;  %v1773_v48 = vpop.xlane.xlu0 %1772  ;;  %v2517_v43 = vpack.c.bf16 %v9696_v32, %v9699_v33 }
 0x53f   :  { %8099 = vpow2.f32 %v1797_v36  ;;  %v1791_v53 = vsub.f32 %v9543_v40, %v1773_v48 }
 0x540   :  { %7605 = vmatprep.mubr.msk.bf16.mxu1 %vm1462_vm1, %v2517_v43  ;;  %v2132_v31 = vmul.f32 1.442695, %v2124_v52  ;;  %8101 = vpow2.f32 %v1803_v58 }
 0x541   :  { %v1801_v5 = vmul.f32 1.442695, %v1791_v53  ;;  %v2105_v47 = vpop.xlane.xlu1 %2104  ;;  %v9709_v55 = vpop.eup %8093 }
 0x542   :  { %v2125_v11 = vsub.f32 %v9565_v12, %v2105_v47  ;;  %v1779_v34 = vpop.xlane.xlu0 %1778  ;;  %12251 = vst [vmem:[#allocation42_spill] sm:$0xff] %v9709_v55 }
 0x543   :  { %8103 = vpow2.f32 %v1801_v5  ;;  %v1793_v27 = vsub.f32 %v9553_v22, %v1779_v34 }
 0x544   :  { %8105 = vpow2.f32 %v1807_v35  ;;  %v2134_v26 = vmul.f32 1.442695, %v2125_v11 }
 0x545   :  { %v9711_v40 = vpop.eup %8095  ;;  %8107 = vpow2.f32 %v2132_v31  ;;  %v1805_v62 = vmul.f32 1.442695, %v1793_v27  ;;  %v2108_v8 = vpop.xlane.xlu1 %2107 }
 0x546   :  { %12252 = vst [vmem:[#allocation43_spill] sm:$0xff] %v9711_v40  ;;  %8109 = vpow2.f32 %v2134_v26  ;;  %v2126_v9 = vsub.f32 %v9559_v14, %v2108_v8  ;;  %v1785_v6 = vpop.xlane.xlu0 %1784  ;;  %v2518_v12 = vpack.c.bf16 %v9711_v40, %v9709_v55  ;;  %v9717_v25 = vpop.eup %8097 }
 0x547   :  { %8111 = vpow2.f32 %v1805_v62  ;;  %v1795_v22 = vsub.f32 %v9551_v4, %v1785_v6 }
 0x548   :  { %7606 = vmatmul.mubr.msk.bf16.gmra.mrb[44].mxu1 %vm1462_vm1, %v2518_v12  ;;  %v2136_v41 = vmul.f32 1.442695, %v2126_v9  ;;  %8113 = vpow2.f32 %v1811_v3 }
 0x549   :  { %v9720_v37 = vpop.eup %8099  ;;  %v1809_v60 = vmul.f32 1.442695, %v1795_v22  ;;  %7617 = vmatprep.mubr.msk.bf16.mxu1 %vm1372_vm0, %v9138_v30  ;;  %v2111_v1 = vpop.xlane.xlu1 %2110 }
 0x54a   :  { %v2127_v14 = vsub.f32 %v9563_v54, %v2111_v1  ;;  %v1854_v36 = vpop.permute.xlu0 %1853  ;;  %v1845_v7 = vpack.c.bf16 %v9717_v25, %v9720_v37  ;;  %v9727_v4 = vpop.eup %8101 }
 0x54b   :  { %8115 = vpow2.f32 %v1809_v60  ;;  %7529 = vmatprep.subr.bf16.mxu0 %v1854_v36 }
 0x54c   :  { %v2138_v58 = vmul.f32 1.442695, %v2127_v14  ;;  %7530 = vmatpush3.bf16.msra.mxu0 %v1854_v36  ;;  %7537 = vmatprep.mubr.msk.bf16.mxu0 %vm1462_vm1, %v1845_v7  ;;  %8117 = vpow2.f32 %v2136_v41 }
 0x54d   :  { %v9730_v52 = vpop.eup %8103  ;;  %v1856_v48 = vpop.permute.xlu1 %1855 }
 0x54e   :  { %v9732_v43 = vpop.eup %8105  ;;  %v1846_v54 = vpack.c.bf16 %v9727_v4, %v9730_v52  ;;  %8119 = vpow2.f32 %v2138_v58  ;;  %v1858_v53 = vpop.permute.xlu0 %1857  ;;  %7531 = vmatprep.subr.bf16.mxu0 %v1856_v48 }
 0x54f   :  { %v9736_v35 = vpop.eup %8107 }
 0x550   :  { %v9738_v31 = vpop.eup %8109  ;;  %7532 = vmatpush3.bf16.msra.mxu0 %v1856_v48  ;;  %7618 = vmatmul.mubr.msk.bf16.vlgmr.msra.gmra.mrb[48].mxu1 %vm1372_vm0, %v9158_v20 }
 0x551   :  { %v9742_v5 = vpop.eup %8111  ;;  %7533 = vmatprep.subr.bf16.mxu0 %v1858_v53  ;;  %7621 = vmatprep.mubr.msk.bf16.mxu1 %vm1372_vm0, %v9170_v28  ;;  %v2180_v47 = vpack.c.bf16 %v9738_v31, %v9736_v35 }
 0x552   :  { %12253 = vst [vmem:[#allocation44_spill] sm:$0xff] %v9742_v5  ;;  %v1847_v13 = vpack.c.bf16 %v9732_v43, %v9742_v5  ;;  %v9750_v11 = vpop.eup %8113  ;;  %v1860_v34 = vpop.permute.xlu0 %1859 }
 0x553   :  { %12254 = vst [vmem:[#allocation45_spill] sm:$0xff] %v9750_v11 }
 0x554   :  { %7534 = vmatpush3.bf16.msra.mxu0 %v1858_v53 }
 0x555   :  { %v9752_v27 = vpop.eup %8115  ;;  %7535 = vmatprep.subr.bf16.mxu0 %v1860_v34 }
 0x556   :  { %12255 = vst [vmem:[#allocation46_spill] sm:$0xff] %v9752_v27  ;;  %v1848_v26 = vpack.c.bf16 %v9750_v11, %v9752_v27  ;;  %v9756_v62 = vpop.eup %8117 }
 0x557   :  { %12256 = vst [vmem:[#allocation47_spill] sm:$0xff] %v9756_v62 }
 0x558   :  { %v9758_v8 = vpop.eup %8119  ;;  %7536 = vmatpush3.bf16.msra.mxu0 %v1860_v34  ;;  %7622 = vmatmul.mubr.msk.bf16.gmra.mrb[52].mxu1 %vm1372_vm0, %v9178_v50 }
 0x559   :  { %v2181_v3 = vpack.c.bf16 %v9758_v8, %v9756_v62 }
 0x55b   :  { %7538 = vmatmul.mubr.msk.bf16.vlgmr.msra.gmra.mrb[96].mxu0 %vm1462_vm1, %v1846_v54 }
 0x55c   :  { %7541 = vmatprep.mubr.msk.bf16.mxu0 %vm1462_vm1, %v1847_v13 }
 0x563   :  { %7542 = vmatmul.mubr.msk.bf16.gmra.mrb[100].mxu0 %vm1462_vm1, %v1848_v26 }
 0x564   :  { %7569 = vmatprep.mubr.msk.bf16.mxu0 %vm1462_vm1, %v2180_v47 }
 0x57e   :  { %v2117_v9 = vpop.xlane.xlu1 %2116 }
 0x57f   :  { %v2129_v6 = vsub.f32 %v9573_v61, %v2117_v9  ;;  %v1289_v9 = vpop.f32.mrb[80].mxu0 }
 0x581   :  { %v2142_v12 = vmul.f32 1.442695, %v2129_v6  ;;  %v1290_v6 = vadd.f32 %v1289_v9, %v9333_v59 }
 0x582   :  { %v2191_v53 = vpop.permute.xlu1 %2190 }
 0x583   :  { %v2114_v22 = vpop.xlane.xlu0 %2113  ;;  %8121 = vpow2.f32 %v2142_v12  ;;  %v1291_v12 = vpop.f32.mrb[81].mxu0 }
 0x584   :  { %v2128_v41 = vsub.f32 %v9569_v44, %v2114_v22  ;;  %v1292_v22 = vadd.f32 %v1291_v12, %v9339_v0 }
 0x586   :  { %v2140_v60 = vmul.f32 1.442695, %v2128_v41  ;;  %v1293_v41 = vpop.f32.mrb[82].mxu0 }
 0x587   :  { %v2120_v1 = vpop.xlane.xlu0 %2119 }
 0x588   :  { %8123 = vpow2.f32 %v2140_v60  ;;  %v2130_v14 = vsub.f32 %v9567_v15, %v2120_v1  ;;  %v1294_v60 = vadd.f32 %v1293_v41, %v9333_v59  ;;  %v1295_v1 = vpop.f32.mrb[83].mxu0 }
 0x58a   :  { %v2144_v36 = vmul.f32 1.442695, %v2130_v14  ;;  %v1296_v14 = vadd.f32 %v1295_v1, %v9339_v0 }
 0x58b   :  { %v2123_v7 = vpop.xlane.xlu0 %2122 }
 0x58c   :  { %v2131_v58 = vsub.f32 %v9571_v56, %v2123_v7  ;;  %8125 = vpow2.f32 %v2144_v36  ;;  %v2195_v56 = vpop.permute.xlu1 %2194  ;;  %v1299_v36 = vpop.f32.mrb[84].mxu0  ;;  %v9793_v7 = vpack.c.bf16 %v1294_v60, %v1290_v6 }
 0x58d   :  { %v9772_v61 = vpop.eup %8121 }
 0x58e   :  { %v2146_v48 = vmul.f32 1.442695, %v2131_v58  ;;  %12257 = vst [vmem:[#allocation48_spill] sm:$0xff] %v9772_v61  ;;  %v1300_v58 = vadd.f32 %v1299_v36, %v9333_v59 }
 0x58f   :  { %v2189_v54 = vpop.permute.xlu0 %2188 }
 0x590   :  { %8127 = vpow2.f32 %v2146_v48  ;;  %7561 = vmatprep.subr.bf16.mxu0 %v2189_v54  ;;  %v1301_v48 = vpop.f32.mrb[85].mxu0 }
 0x591   :  { %7562 = vmatpush3.bf16.msra.mxu0 %v2189_v54  ;;  %v9796_v54 = vpack.c.bf16 %v1296_v14, %v1292_v22 }
 0x592   :  { %v9774_v44 = vpop.eup %8123  ;;  %7563 = vmatprep.subr.bf16.mxu0 %v2191_v53 }
 0x593   :  { %12258 = vst [vmem:[#allocation49_spill] sm:$0xff] %v9774_v44  ;;  %v2182_v47 = vpack.c.bf16 %v9772_v61, %v9774_v44  ;;  %v2193_v15 = vpop.permute.xlu0 %2192 }
 0x595   :  { %7564 = vmatpush3.bf16.msra.mxu0 %v2191_v53  ;;  %v1303_v53 = vpop.f32.mrb[86].mxu0 }
 0x596   :  { %7565 = vmatprep.subr.bf16.mxu0 %v2193_v15  ;;  %v9778_v13 = vpop.eup %8125 }
 0x597   :  { %12259 = vst [vmem:[#allocation50_spill] sm:$0xff] %v9778_v13 }
 0x599   :  { %7566 = vmatpush3.bf16.msra.mxu0 %v2193_v15  ;;  %v1304_v15 = vadd.f32 %v1303_v53, %v9333_v59 }
 0x59a   :  { %v9780_v34 = vpop.eup %8127  ;;  %7567 = vmatprep.subr.bf16.mxu0 %v2195_v56 }
 0x59b   :  { %12260 = vst [vmem:[#allocation51_spill] sm:$0xff] %v9780_v34  ;;  %v2183_v26 = vpack.c.bf16 %v9780_v34, %v9778_v13  ;;  %v9803_v6 = vpack.c.bf16 %v1304_v15, %v1300_v58 }
 0x59d   :  { %7568 = vmatpush3.bf16.msra.mxu0 %v2195_v56 }
 0x59e   :  { %7625 = vmatprep.subr.bf16.mxu0 %v9365_v16 }
 0x5a0   :  { %7570 = vmatmul.mubr.msk.bf16.vlgmr.msra.gmra.mrb[104].mxu0 %vm1462_vm1, %v2181_v3  ;;  %v1302_v3 = vadd.f32 %v1301_v48, %v9339_v0 }
 0x5a1   :  { %7573 = vmatprep.mubr.msk.bf16.mxu0 %vm1462_vm1, %v2182_v47  ;;  %7626 = vmatpush3.bf16.msra.mxu0 %v9365_v16  ;;  %v1305_v47 = vpop.f32.mrb[87].mxu0 }
 0x5a2   :  { %7627 = vmatprep.subr.bf16.mxu0 %v9381_v19  ;;  %v1306_v56 = vadd.f32 %v1305_v47, %v9339_v0  ;;  %v1309_v9 = vpop.f32.mrb[88].mxu0 }
 0x5a3   :  { %v1310_v12 = vadd.f32 %v1309_v9, %v9333_v59  ;;  %v1311_v41 = vpop.f32.mrb[89].mxu0 }
 0x5a4   :  { %v9806_v22 = vpack.c.bf16 %v1306_v56, %v1302_v3  ;;  %v1312_v60 = vadd.f32 %v1311_v41, %v9339_v0  ;;  %v1313_v1 = vpop.f32.mrb[90].mxu0 }
 0x5a5   :  { %7628 = vmatpush3.bf16.msra.mxu0 %v9381_v19  ;;  %v1314_v14 = vadd.f32 %v1313_v1, %v9333_v59  ;;  %v1315_v36 = vpop.f32.mrb[91].mxu0 }
 0x5a6   :  { %7629 = vmatprep.subr.bf16.mxu0 %v9399_v42  ;;  %v1316_v48 = vadd.f32 %v1315_v36, %v9339_v0  ;;  %v1319_v53 = vpop.f32.mrb[92].mxu0 }
 0x5a7   :  { %v9814_v58 = vpack.c.bf16 %v1314_v14, %v1310_v12  ;;  %v1320_v3 = vadd.f32 %v1319_v53, %v9333_v59  ;;  %v1321_v15 = vpop.f32.mrb[93].mxu0 }
 0x5a8   :  { %7574 = vmatmul.mubr.msk.bf16.gmra.mrb[108].mxu0 %vm1462_vm1, %v2183_v26  ;;  %v9817_v47 = vpack.c.bf16 %v1316_v48, %v1312_v60  ;;  %v1322_v56 = vadd.f32 %v1321_v15, %v9339_v0  ;;  %v1323_v26 = vpop.f32.mrb[94].mxu0 }
 0x5a9   :  { %7630 = vmatpush3.bf16.msra.mxu0 %v9399_v42  ;;  %v1324_v9 = vadd.f32 %v1323_v26, %v9333_v59  ;;  %v1325_v41 = vpop.f32.mrb[95].mxu0 }
 0x5aa   :  { %7631 = vmatprep.subr.bf16.mxu0 %v9413_v45  ;;  %v1326_v1 = vadd.f32 %v1325_v41, %v9339_v0 }
 0x5ab   :  { %v9823_v36 = vpack.c.bf16 %v1324_v9, %v1320_v3 }
 0x5ac   :  { %v9825_v55 = vpack.c.bf16 %v1326_v1, %v1322_v56 }
 0x5ad   :  { %7632 = vmatpush3.bf16.msra.mxu0 %v9413_v45 }
 0x5e1   :  { %v9827_v12 = vpop.f32.mrb[40].mxu1 }
 0x5e2   :  { %12261 = vst [vmem:[#allocation52_spill] sm:$0xff] %v9827_v12  ;;  %v9829_v14 = vpop.f32.mrb[41].mxu1 }
 0x5e3   :  { %12262 = vst [vmem:[#allocation53_spill] sm:$0xff] %v9829_v14  ;;  %v9831_v60 = vpop.f32.mrb[42].mxu1 }
 0x5e4   :  { %12263 = vst [vmem:[#allocation54_spill] sm:$0xff] %v9831_v60  ;;  %v9833_v48 = vpop.f32.mrb[43].mxu1 }
 0x5e5   :  { %12264 = vst [vmem:[#allocation55_spill] sm:$0xff] %v9833_v48 }
 0x61b   :  { %v9835_v53 = vpop.f32.mrb[44].mxu1 }
 0x61c   :  { %12265 = vst [vmem:[#allocation56_spill] sm:$0xff] %v9835_v53  ;;  %v9837_v59 = vpop.f32.mrb[45].mxu1 }
 0x61d   :  { %12266 = vst [vmem:[#allocation57_spill] sm:$0xff] %v9837_v59  ;;  %v9839_v15 = vpop.f32.mrb[46].mxu1 }
 0x61e   :  { %12267 = vst [vmem:[#allocation58_spill] sm:$0xff] %v9839_v15  ;;  %v9841_v26 = vpop.f32.mrb[47].mxu1 }
 0x61f   :  { %12268 = vst [vmem:[#allocation59_spill] sm:$0xff] %v9841_v26 }
 0x623   :  { %v7619_v0 = vpop.f32.mrb[48].mxu1 }
 0x624   :  { %v2715_v3 = vpop.f32.mrb[49].mxu1  ;;  %v2752_v56 = vsel %vm1462_vm1, %v7619_v0, -inf }
 0x625   :  { %2753 = vmax.xlane.f32.xlu0 %v2752_v56  ;;  %v7620_v9 = vpop.f32.mrb[50].mxu1  ;;  %v2746_v41 = vsel %vm1462_vm1, %v2715_v3, -inf }
 0x626   :  { %2747 = vmax.xlane.f32.xlu1 %v2746_v41  ;;  %v2718_v1 = vpop.f32.mrb[51].mxu1  ;;  %v2755_v53 = vsel %vm1462_vm1, %v7620_v9, -inf }
 0x627   :  { %v2749_v60 = vsel %vm1462_vm1, %v2718_v1, -inf }
 0x629   :  { %2750 = vmax.xlane.f32.xlu0 %v2749_v60 }
 0x62a   :  { %2756 = vmax.xlane.f32.xlu1 %v2755_v53 }
 0x62b   :  { %v7623_v59 = vpop.f32.mrb[52].mxu1 }
 0x62c   :  { %v2731_v15 = vpop.f32.mrb[53].mxu1  ;;  %v2764_v26 = vsel %vm1462_vm1, %v7623_v59, -inf }
 0x62d   :  { %2765 = vmax.xlane.f32.xlu0 %v2764_v26  ;;  %v9848_v12 = vpop.f32.mrb[54].mxu1  ;;  %v2758_v56 = vsel %vm1462_vm1, %v2731_v15, -inf }
 0x62e   :  { %2759 = vmax.xlane.f32.xlu1 %v2758_v56  ;;  %v9851_v48 = vpop.f32.mrb[96].mxu0  ;;  %v2734_v41 = vpop.f32.mrb[55].mxu1  ;;  %v2767_v26 = vsel %vm1462_vm1, %v9848_v12, -inf }
 0x62f   :  { %12269 = vst [vmem:[#allocation60_spill] sm:$0xff] %v9851_v48  ;;  %v9853_v14 = vpop.f32.mrb[97].mxu0  ;;  %v2761_v60 = vsel %vm1462_vm1, %v2734_v41, -inf }
 0x630   :  { %12270 = vst [vmem:[#allocation61_spill] sm:$0xff] %v9853_v14  ;;  %v9856_v13 = vpop.f32.mrb[98].mxu0 }
 0x631   :  { %12271 = vst [vmem:[#allocation62_spill] sm:$0xff] %v9856_v13  ;;  %2762 = vmax.xlane.f32.xlu0 %v2761_v60  ;;  %v9858_v53 = vpop.f32.mrb[99].mxu0 }
 0x632   :  { %12272 = vst [vmem:[#allocation63_spill] sm:$0xff] %v9858_v53  ;;  %2768 = vmax.xlane.f32.xlu1 %v2767_v26 }
 0x636   :  { %v9862_v27 = vpop.f32.mrb[100].mxu0 }
 0x637   :  { %12273 = vst [vmem:[#allocation64_spill] sm:$0xff] %v9862_v27  ;;  %v9864_v40 = vpop.f32.mrb[101].mxu0 }
 0x638   :  { %12274 = vst [vmem:[#allocation65_spill] sm:$0xff] %v9864_v40  ;;  %v9866_v56 = vpop.f32.mrb[102].mxu0 }
 0x639   :  { %12275 = vst [vmem:[#allocation66_spill] sm:$0xff] %v9866_v56  ;;  %v9868_v48 = vpop.f32.mrb[103].mxu0 }
 0x63a   :  { %12276 = vst [vmem:[#allocation67_spill] sm:$0xff] %v9868_v48 }
 0x643   :  { %2953 = vrot.lane.b32.xlu1 %v9247_v46, %s8628_s13 }
 0x647   :  { %2955 = vrot.lane.b32.xlu1 %v9261_v63, %s8628_s13  ;;  %2951 = vrot.lane.b32.xlu0 %v9233_v29, %s8628_s13 }
 0x64b   :  { %2957 = vrot.lane.b32.xlu1 %v9275_v23, %s8628_s13  ;;  %2939 = vrot.lane.b32.xlu0 %v9138_v30, %s8628_s13 }
 0x64f   :  { %2941 = vrot.lane.b32.xlu1 %v9158_v20, %s8628_s13  ;;  %2943 = vrot.lane.b32.xlu0 %v9170_v28, %s8628_s13 }
 0x653   :  { %2945 = vrot.lane.b32.xlu1 %v9178_v50, %s8628_s13  ;;  %3136 = vrot.lane.b32.xlu0 %v9365_v16, %s8628_s13 }
 0x657   :  { %3138 = vrot.lane.b32.xlu1 %v9381_v19, %s8628_s13 }
 0x65b   :  { %3140 = vrot.lane.b32.xlu1 %v9399_v42, %s8628_s13 }
 0x65f   :  { %3142 = vrot.lane.b32.xlu1 %v9413_v45, %s8628_s13 }
 0x673   :  { %v9894_v60 = vpop.f32.mrb[104].mxu0 }
 0x674   :  { %12277 = vst [vmem:[#allocation68_spill] sm:$0xff] %v9894_v60  ;;  %v9896_v26 = vpop.f32.mrb[105].mxu0 }
 0x675   :  { %12278 = vst [vmem:[#allocation69_spill] sm:$0xff] %v9896_v26  ;;  %v9898_v56 = vpop.f32.mrb[106].mxu0 }
 0x676   :  { %12279 = vst [vmem:[#allocation70_spill] sm:$0xff] %v9898_v56  ;;  %v9900_v27 = vpop.f32.mrb[107].mxu0 }
 0x677   :  { %12280 = vst [vmem:[#allocation71_spill] sm:$0xff] %v9900_v27 }
 0x67b   :  { %v9902_v48 = vpop.f32.mrb[108].mxu0 }
 0x67c   :  { %12281 = vst [vmem:[#allocation72_spill] sm:$0xff] %v9902_v48  ;;  %v9904_v40 = vpop.f32.mrb[109].mxu0 }
 0x67d   :  { %12282 = vst [vmem:[#allocation73_spill] sm:$0xff] %v9904_v40  ;;  %v9906_v13 = vpop.f32.mrb[110].mxu0 }
 0x67e   :  { %12283 = vst [vmem:[#allocation74_spill] sm:$0xff] %v9906_v13  ;;  %v9908_v53 = vpop.f32.mrb[111].mxu0 }
 0x67f   :  { %12284 = vst [vmem:[#allocation75_spill] sm:$0xff] %v9908_v53 }
 0x6b2   :  { %v2754_v14 = vpop.xlane.xlu0 %2753 }
 0x6b3   :  { %v2772_v33 = vsub.f32 %v7619_v0, %v2754_v14  ;;  %v2748_v34 = vpop.xlane.xlu1 %2747 }
 0x6b4   :  { %v2770_v44 = vsub.f32 %v2715_v3, %v2748_v34 }
 0x6b5   :  { %v2782_v11 = vmul.f32 1.442695, %v2772_v33 }
 0x6b6   :  { %v2778_v60 = vmul.f32 1.442695, %v2770_v44  ;;  %v2751_v5 = vpop.xlane.xlu0 %2750 }
 0x6b7   :  { %v2771_v26 = vsub.f32 %v2718_v1, %v2751_v5  ;;  %v2757_v32 = vpop.xlane.xlu1 %2756  ;;  %8129 = vpow2.f32 %v2782_v11 }
 0x6b8   :  { %v2773_v56 = vsub.f32 %v7620_v9, %v2757_v32  ;;  %8131 = vpow2.f32 %v2778_v60 }
 0x6b9   :  { %v2780_v27 = vmul.f32 1.442695, %v2771_v26 }
 0x6ba   :  { %v2784_v48 = vmul.f32 1.442695, %v2773_v56  ;;  %v2766_v24 = vpop.xlane.xlu0 %2765 }
 0x6bb   :  { %8133 = vpow2.f32 %v2780_v27  ;;  %v2776_v40 = vsub.f32 %v7623_v59, %v2766_v24  ;;  %v2760_v13 = vpop.xlane.xlu1 %2759 }
 0x6bc   :  { %8135 = vpow2.f32 %v2784_v48  ;;  %v2774_v53 = vsub.f32 %v2731_v15, %v2760_v13 }
 0x6bd   :  { %v2790_v61 = vmul.f32 1.442695, %v2776_v40 }
 0x6be   :  { %v2786_v14 = vmul.f32 1.442695, %v2774_v53  ;;  %v2763_v0 = vpop.xlane.xlu0 %2762 }
 0x6bf   :  { %v2775_v34 = vsub.f32 %v2734_v41, %v2763_v0  ;;  %v2769_v33 = vpop.xlane.xlu1 %2768  ;;  %8137 = vpow2.f32 %v2790_v61 }
 0x6c0   :  { %v2777_v44 = vsub.f32 %v9848_v12, %v2769_v33  ;;  %8139 = vpow2.f32 %v2786_v14 }
 0x6c1   :  { %v2788_v5 = vmul.f32 1.442695, %v2775_v34  ;;  %v9911_v3 = vpop.eup %8129 }
 0x6c2   :  { %v2792_v32 = vmul.f32 1.442695, %v2777_v44  ;;  %v2952_v11 = vpop.permute.xlu0 %2951  ;;  %12285 = vst [vmem:[#allocation76_spill] sm:$0xff] %v9911_v3  ;;  %v9914_v27 = vpop.eup %8131 }
 0x6c3   :  { %8141 = vpow2.f32 %v2788_v5  ;;  %8013 = vmatprep.subr.msk.bf16.mxu0 %vm1372_vm0, %v2952_v11  ;;  %v2954_v24 = vpop.permute.xlu1 %2953  ;;  %12286 = vst [vmem:[#allocation77_spill] sm:$0xff] %v9914_v27  ;;  %v2972_v15 = vsel %vm1372_vm0, %v2952_v11, 0 }
 0x6c4   :  { %8143 = vpow2.f32 %v2792_v32  ;;  %v2975_v33 = vsel %vm1372_vm0, %v2954_v24, 0 }
 0x6c5   :  { %v9916_v40 = vpop.eup %8133 }
 0x6c6   :  { %12287 = vst [vmem:[#allocation78_spill] sm:$0xff] %v9916_v40  ;;  %v9918_v13 = vpop.eup %8135  ;;  %v2940_v48 = vpop.permute.xlu0 %2939  ;;  %v2826_v61 = vpack.c.bf16 %v9916_v40, %v9914_v27 }
 0x6c7   :  { %12288 = vst [vmem:[#allocation79_spill] sm:$0xff] %v9918_v13  ;;  %v2827_v12 = vpack.c.bf16 %v9918_v13, %v9911_v3  ;;  %v2956_v59 = vpop.permute.xlu1 %2955 }
 0x6c8   :  { %7633 = vmatprep.mubr.msk.bf16.mxu0 %vm1462_vm1, %v2826_v61  ;;  %v2978_v32 = vsel %vm1372_vm0, %v2956_v59, 0 }
 0x6c9   :  { %7634 = vmatmul.mubr.msk.bf16.vlgmr.msra.gmra.mrb[112].mxu0 %vm1462_vm1, %v2827_v12  ;;  %v9927_v1 = vpop.eup %8137 }
 0x6ca   :  { %7642 = vmatpush3.bf16.xpose.msra.mxu0 %v2972_v15  ;;  %v2944_v9 = vpop.permute.xlu0 %2943  ;;  %12289 = vst [vmem:[#allocation80_spill] sm:$0xff] %v9927_v1  ;;  %v9930_v53 = vpop.eup %8139 }
 0x6cb   :  { %8014 = vmatprep.subr.msk.bf16.mxu0 %vm1372_vm0, %v2954_v24  ;;  %v2958_v41 = vpop.permute.xlu1 %2957  ;;  %12290 = vst [vmem:[#allocation81_spill] sm:$0xff] %v9930_v53 }
 0x6cc   :  { %v2981_v24 = vsel %vm1372_vm0, %v2958_v41, 0 }
 0x6cd   :  { %v9932_v56 = vpop.eup %8141 }
 0x6ce   :  { %12291 = vst [vmem:[#allocation82_spill] sm:$0xff] %v9932_v56  ;;  %v9934_v60 = vpop.eup %8143  ;;  %v3137_v26 = vpop.permute.xlu0 %3136  ;;  %v2828_v14 = vpack.c.bf16 %v9932_v56, %v9930_v53 }
 0x6cf   :  { %12292 = vst [vmem:[#allocation83_spill] sm:$0xff] %v9934_v60  ;;  %7657 = vmatprep.subr.bf16.mxu1 %v3137_v26  ;;  %v2942_v0 = vpop.permute.xlu1 %2941  ;;  %v2829_v34 = vpack.c.bf16 %v9934_v60, %v9927_v1 }
 0x6d0   :  { %7637 = vmatprep.mubr.msk.bf16.mxu0 %vm1462_vm1, %v2828_v14  ;;  %7658 = vmatpush3.bf16.msra.mxu1 %v3137_v26 }
 0x6d1   :  { %7638 = vmatmul.mubr.msk.bf16.gmra.mrb[116].mxu0 %vm1462_vm1, %v2829_v34 }
 0x6d2   :  { %7644 = vmatpush3.bf16.xpose.msra.mxu0 %v2975_v33  ;;  %7649 = vmatprep.mubr.msk.bf16.mxu0 %vm1372_vm0, %v2940_v48 }
 0x6d3   :  { %8015 = vmatprep.subr.msk.bf16.mxu0 %vm1372_vm0, %v2956_v59  ;;  %v2946_v44 = vpop.permute.xlu1 %2945 }
 0x6d7   :  { %v3139_v5 = vpop.permute.xlu1 %3138 }
 0x6d8   :  { %7659 = vmatprep.subr.bf16.mxu1 %v3139_v5 }
 0x6d9   :  { %7660 = vmatpush3.bf16.msra.mxu1 %v3139_v5 }
 0x6da   :  { %7646 = vmatpush3.bf16.xpose.msra.mxu0 %v2978_v32 }
 0x6db   :  { %8016 = vmatprep.subr.msk.bf16.mxu0 %vm1372_vm0, %v2958_v41  ;;  %v3141_v11 = vpop.permute.xlu1 %3140 }
 0x6dc   :  { %7661 = vmatprep.subr.bf16.mxu1 %v3141_v11 }
 0x6dd   :  { %7662 = vmatpush3.bf16.msra.mxu1 %v3141_v11 }
 0x6df   :  { %v3143_v61 = vpop.permute.xlu1 %3142 }
 0x6e0   :  { %7663 = vmatprep.subr.bf16.mxu1 %v3143_v61 }
 0x6e1   :  { %7664 = vmatpush3.bf16.msra.mxu1 %v3143_v61 }
 0x6e2   :  { %7648 = vmatpush3.bf16.xpose.msra.mxu0 %v2981_v24 }
 0x6e9   :  { %7650 = vmatmul.mubr.msk.bf16.vlgmr.msra.gmra.mrb[120].mxu0 %vm1372_vm0, %v2942_v0 }
 0x6ea   :  { %7653 = vmatprep.mubr.msk.bf16.mxu0 %vm1372_vm0, %v2944_v9 }
 0x6f1   :  { %7654 = vmatmul.mubr.msk.bf16.gmra.mrb[124].mxu0 %vm1372_vm0, %v2946_v44 }
 0x79c   :  { %v9951_v48 = vpop.f32.mrb[112].mxu0 }
 0x79d   :  { %12293 = vst [vmem:[#allocation84_spill] sm:$0xff] %v9951_v48  ;;  %v9953_v12 = vpop.f32.mrb[113].mxu0 }
 0x79e   :  { %12294 = vst [vmem:[#allocation85_spill] sm:$0xff] %v9953_v12  ;;  %v9955_v59 = vpop.f32.mrb[114].mxu0 }
 0x79f   :  { %12295 = vst [vmem:[#allocation86_spill] sm:$0xff] %v9955_v59  ;;  %v9957_v15 = vpop.f32.mrb[115].mxu0 }
 0x7a0   :  { %12296 = vst [vmem:[#allocation87_spill] sm:$0xff] %v9957_v15 }
 0x7a4   :  { %v9959_v26 = vpop.f32.mrb[116].mxu0 }
 0x7a5   :  { %12297 = vst [vmem:[#allocation88_spill] sm:$0xff] %v9959_v26  ;;  %v9961_v14 = vpop.f32.mrb[117].mxu0 }
 0x7a6   :  { %12298 = vst [vmem:[#allocation89_spill] sm:$0xff] %v9961_v14  ;;  %v9963_v41 = vpop.f32.mrb[118].mxu0 }
 0x7a7   :  { %12299 = vst [vmem:[#allocation90_spill] sm:$0xff] %v9963_v41  ;;  %v9965_v34 = vpop.f32.mrb[119].mxu0 }
 0x7a8   :  { %12300 = vst [vmem:[#allocation91_spill] sm:$0xff] %v9965_v34 }
 0x7bc   :  { %v7651_v0 = vpop.f32.mrb[120].mxu0 }
 0x7bd   :  { %v3017_v9 = vpop.f32.mrb[121].mxu0  ;;  %v3054_v33 = vsel %vm1462_vm1, %v7651_v0, -inf }
 0x7be   :  { %3055 = vmax.xlane.f32.xlu0 %v3054_v33  ;;  %v7652_v44 = vpop.f32.mrb[122].mxu0  ;;  %v3048_v11 = vsel %vm1462_vm1, %v3017_v9, -inf }
 0x7bf   :  { %v3020_v5 = vpop.f32.mrb[123].mxu0  ;;  %v3057_v26 = vsel %vm1462_vm1, %v7652_v44, -inf }
 0x7c0   :  { %v3051_v32 = vsel %vm1462_vm1, %v3020_v5, -inf }
 0x7c1   :  { %3052 = vmax.xlane.f32.xlu1 %v3051_v32 }
 0x7c2   :  { %3049 = vmax.xlane.f32.xlu0 %v3048_v11 }
 0x7c4   :  { %v7655_v61 = vpop.f32.mrb[124].mxu0 }
 0x7c5   :  { %v9970_v24 = vpop.f32.mrb[125].mxu0  ;;  %v3066_v34 = vsel %vm1462_vm1, %v7655_v61, -inf }
 0x7c6   :  { %3058 = vmax.xlane.f32.xlu0 %v3057_v26  ;;  %v7656_v41 = vpop.f32.mrb[126].mxu0  ;;  %v3060_v33 = vsel %vm1462_vm1, %v9970_v24, -inf }
 0x7c7   :  { %v9973_v14 = vpop.f32.mrb[127].mxu0  ;;  %v3069_v32 = vsel %vm1462_vm1, %v7656_v41, -inf }
 0x7c8   :  { %v3063_v26 = vsel %vm1462_vm1, %v9973_v14, -inf }
 0x7ca   :  { %3067 = vmax.xlane.f32.xlu0 %v3066_v34 }
 0x7ce   :  { %3061 = vmax.xlane.f32.xlu0 %v3060_v33 }
 0x7d2   :  { %3287 = vrot.lane.b32.xlu1 %v9247_v46, %s8629_s14  ;;  %3070 = vmax.xlane.f32.xlu0 %v3069_v32 }
 0x7d6   :  { %3289 = vrot.lane.b32.xlu1 %v9261_v63, %s8629_s14 }
 0x7e8   :  { %3285 = vrot.lane.b32.xlu0 %v9233_v29, %s8629_s14 }
 0x7ec   :  { %3273 = vrot.lane.b32.xlu0 %v9138_v30, %s8629_s14 }
 0x7f0   :  { %3277 = vrot.lane.b32.xlu0 %v9170_v28, %s8629_s14 }
 0x7f4   :  { %3470 = vrot.lane.b32.xlu0 %v9365_v16, %s8629_s14 }
 0x7fa   :  { %3064 = vmax.xlane.f32.xlu1 %v3063_v26 }
 0x80b   :  { %3291 = vrot.lane.b32.xlu1 %v9275_v23, %s8629_s14 }
 0x80f   :  { %3275 = vrot.lane.b32.xlu1 %v9158_v20, %s8629_s14 }
 0x813   :  { %3279 = vrot.lane.b32.xlu1 %v9178_v50, %s8629_s14 }
 0x817   :  { %3472 = vrot.lane.b32.xlu1 %v9381_v19, %s8629_s14 }
 0x81b   :  { %3474 = vrot.lane.b32.xlu1 %v9399_v42, %s8629_s14 }
 0x81f   :  { %3476 = vrot.lane.b32.xlu1 %v9413_v45, %s8629_s14 }
 0x84b   :  { %v3056_v34 = vpop.xlane.xlu0 %3055 }
 0x84c   :  { %v3074_v33 = vsub.f32 %v7651_v0, %v3056_v34 }
 0x84e   :  { %v3053_v11 = vpop.xlane.xlu1 %3052  ;;  %v3084_v15 = vmul.f32 1.442695, %v3074_v33 }
 0x84f   :  { %v3073_v32 = vsub.f32 %v3020_v5, %v3053_v11  ;;  %v3050_v26 = vpop.xlane.xlu0 %3049 }
 0x850   :  { %v3072_v48 = vsub.f32 %v3017_v9, %v3050_v26 }
 0x851   :  { %v3082_v59 = vmul.f32 1.442695, %v3073_v32 }
 0x852   :  { %v3080_v12 = vmul.f32 1.442695, %v3072_v48 }
 0x853   :  { %8145 = vpow2.f32 %v3082_v59  ;;  %v3059_v1 = vpop.xlane.xlu0 %3058 }
 0x854   :  { %8147 = vpow2.f32 %v3080_v12  ;;  %v3075_v53 = vsub.f32 %v7652_v44, %v3059_v1  ;;  %v3288_v12 = vpop.permute.xlu1 %3287 }
 0x855   :  { %8149 = vpow2.f32 %v3084_v15 }
 0x856   :  { %v3086_v3 = vmul.f32 1.442695, %v3075_v53 }
 0x857   :  { %v3068_v60 = vpop.xlane.xlu0 %3067 }
 0x858   :  { %8151 = vpow2.f32 %v3086_v3  ;;  %v3078_v56 = vsub.f32 %v7655_v61, %v3068_v60  ;;  %v3309_v61 = vsel %vm1372_vm0, %v3288_v12, 0  ;;  %v3290_v11 = vpop.permute.xlu1 %3289 }
 0x859   :  { %v3312_v26 = vsel %vm1372_vm0, %v3290_v11, 0 }
 0x85a   :  { %v3092_v0 = vmul.f32 1.442695, %v3078_v56 }
 0x85b   :  { %v3062_v13 = vpop.xlane.xlu0 %3061 }
 0x85c   :  { %8153 = vpow2.f32 %v3092_v0  ;;  %v3076_v0 = vsub.f32 %v9970_v24, %v3062_v13 }
 0x85d   :  { %v10005_v27 = vpop.eup %8145 }
 0x85e   :  { %v10007_v40 = vpop.eup %8147 }
 0x85f   :  { %v3071_v5 = vpop.xlane.xlu0 %3070  ;;  %v3128_v48 = vpack.c.bf16 %v10005_v27, %v10007_v40  ;;  %v10011_v59 = vpop.eup %8149 }
 0x860   :  { %v3079_v9 = vsub.f32 %v7656_v41, %v3071_v5  ;;  %v3088_v5 = vmul.f32 1.442695, %v3076_v0 }
 0x861   :  { %7665 = vmatprep.mubr.msk.bf16.mxu1 %vm1462_vm1, %v3128_v48 }
 0x862   :  { %v10014_v1 = vpop.eup %8151  ;;  %v3094_v53 = vmul.f32 1.442695, %v3079_v9 }
 0x863   :  { %v3129_v3 = vpack.c.bf16 %v10014_v1, %v10011_v59  ;;  %v3286_v60 = vpop.permute.xlu0 %3285 }
 0x864   :  { %8155 = vpow2.f32 %v3094_v53  ;;  %8017 = vmatprep.subr.msk.bf16.mxu1 %vm1372_vm0, %v3286_v60  ;;  %v3306_v56 = vsel %vm1372_vm0, %v3286_v60, 0 }
 0x865   :  { %7666 = vmatmul.mubr.msk.bf16.vlgmr.msra.gmra.mrb[56].mxu1 %vm1462_vm1, %v3129_v3  ;;  %8157 = vpow2.f32 %v3088_v5 }
 0x866   :  { %7674 = vmatpush3.bf16.xpose.msra.mxu1 %v3306_v56  ;;  %v10022_v44 = vpop.eup %8153 }
 0x867   :  { %8018 = vmatprep.subr.msk.bf16.mxu1 %vm1372_vm0, %v3288_v12  ;;  %v3274_v15 = vpop.permute.xlu0 %3273  ;;  %12301 = vst [vmem:[#allocation92_spill] sm:$0xff] %v10022_v44 }
 0x86b   :  { %v3278_v41 = vpop.permute.xlu0 %3277 }
 0x86e   :  { %v10025_v34 = vpop.eup %8155  ;;  %7676 = vmatpush3.bf16.xpose.msra.mxu1 %v3309_v61 }
 0x86f   :  { %12302 = vst [vmem:[#allocation93_spill] sm:$0xff] %v10025_v34  ;;  %8019 = vmatprep.subr.msk.bf16.mxu1 %vm1372_vm0, %v3290_v11  ;;  %v3471_v33 = vpop.permute.xlu0 %3470  ;;  %v3131_v32 = vpack.c.bf16 %v10025_v34, %v10022_v44  ;;  %v10035_v61 = vpop.eup %8157 }
 0x870   :  { %7689 = vmatprep.subr.bf16.mxu0 %v3471_v33  ;;  %12303 = vst [vmem:[#allocation94_spill] sm:$0xff] %v10035_v61 }
 0x871   :  { %7690 = vmatpush3.bf16.msra.mxu0 %v3471_v33 }
 0x876   :  { %7678 = vmatpush3.bf16.xpose.msra.mxu1 %v3312_v26 }
 0x887   :  { %v3065_v48 = vpop.xlane.xlu1 %3064 }
 0x888   :  { %v3077_v9 = vsub.f32 %v9973_v14, %v3065_v48 }
 0x88a   :  { %v3090_v53 = vmul.f32 1.442695, %v3077_v9 }
 0x88b   :  { %v3292_v3 = vpop.permute.xlu1 %3291 }
 0x88c   :  { %8159 = vpow2.f32 %v3090_v53  ;;  %8020 = vmatprep.subr.msk.bf16.mxu1 %vm1372_vm0, %v3292_v3  ;;  %v3315_v60 = vsel %vm1372_vm0, %v3292_v3, 0 }
 0x88d   :  { %7680 = vmatpush3.bf16.xpose.msra.mxu1 %v3315_v60 }
 0x88f   :  { %v3276_v56 = vpop.permute.xlu1 %3275 }
 0x893   :  { %v3280_v12 = vpop.permute.xlu1 %3279 }
 0x896   :  { %v10037_v11 = vpop.eup %8159 }
 0x897   :  { %v3473_v13 = vpop.permute.xlu1 %3472  ;;  %v3130_v24 = vpack.c.bf16 %v10037_v11, %v10035_v61 }
 0x898   :  { %7691 = vmatprep.subr.bf16.mxu0 %v3473_v13 }
 0x899   :  { %7669 = vmatprep.mubr.msk.bf16.mxu1 %vm1462_vm1, %v3130_v24  ;;  %7692 = vmatpush3.bf16.msra.mxu0 %v3473_v13 }
 0x89a   :  { %7670 = vmatmul.mubr.msk.bf16.gmra.mrb[60].mxu1 %vm1462_vm1, %v3131_v32 }
 0x89b   :  { %7681 = vmatprep.mubr.msk.bf16.mxu1 %vm1372_vm0, %v3274_v15  ;;  %v3475_v14 = vpop.permute.xlu1 %3474 }
 0x89c   :  { %7693 = vmatprep.subr.bf16.mxu0 %v3475_v14 }
 0x89d   :  { %7694 = vmatpush3.bf16.msra.mxu0 %v3475_v14 }
 0x89f   :  { %v3477_v33 = vpop.permute.xlu1 %3476 }
 0x8a0   :  { %7695 = vmatprep.subr.bf16.mxu0 %v3477_v33 }
 0x8a1   :  { %7696 = vmatpush3.bf16.msra.mxu0 %v3477_v33 }
 0x8a2   :  { %7682 = vmatmul.mubr.msk.bf16.vlgmr.msra.gmra.mrb[64].mxu1 %vm1372_vm0, %v3276_v56 }
 0x8a3   :  { %7685 = vmatprep.mubr.msk.bf16.mxu1 %vm1372_vm0, %v3278_v41 }
 0x8aa   :  { %7686 = vmatmul.mubr.msk.bf16.gmra.mrb[68].mxu1 %vm1372_vm0, %v3280_v12 }
 0x938   :  { %v10047_v26 = vpop.f32.mrb[56].mxu1 }
 0x939   :  { %12304 = vst [vmem:[#allocation95_spill] sm:$0xff] %v10047_v26  ;;  %v10049_v0 = vpop.f32.mrb[57].mxu1 }
 0x93a   :  { %12305 = vst [vmem:[#allocation96_spill] sm:$0xff] %v10049_v0  ;;  %v10051_v5 = vpop.f32.mrb[58].mxu1 }
 0x93b   :  { %12306 = vst [vmem:[#allocation97_spill] sm:$0xff] %v10051_v5  ;;  %v10053_v32 = vpop.f32.mrb[59].mxu1 }
 0x93c   :  { %12307 = vst [vmem:[#allocation98_spill] sm:$0xff] %v10053_v32 }
 0x96d   :  { %v10055_v15 = vpop.f32.mrb[60].mxu1 }
 0x96e   :  { %12308 = vst [vmem:[#allocation99_spill] sm:$0xff] %v10055_v15  ;;  %v10057_v48 = vpop.f32.mrb[61].mxu1 }
 0x96f   :  { %12309 = vst [vmem:[#allocation100_spill] sm:$0xff] %v10057_v48  ;;  %v10059_v9 = vpop.f32.mrb[62].mxu1 }
 0x970   :  { %12310 = vst [vmem:[#allocation101_spill] sm:$0xff] %v10059_v9  ;;  %v10061_v53 = vpop.f32.mrb[63].mxu1 }
 0x971   :  { %12311 = vst [vmem:[#allocation102_spill] sm:$0xff] %v10061_v53 }
 0x975   :  { %v7683_v3 = vpop.f32.mrb[64].mxu1 }
 0x976   :  { %v3351_v41 = vpop.f32.mrb[65].mxu1  ;;  %v3388_v60 = vsel %vm1462_vm1, %v7683_v3, -inf }
 0x977   :  { %3389 = vmax.xlane.f32.xlu0 %v3388_v60  ;;  %v7684_v56 = vpop.f32.mrb[66].mxu1  ;;  %v3382_v24 = vsel %vm1462_vm1, %v3351_v41, -inf }
 0x978   :  { %v3354_v12 = vpop.f32.mrb[67].mxu1  ;;  %v3391_v9 = vsel %vm1462_vm1, %v7684_v56, -inf }
 0x979   :  { %v3385_v13 = vsel %vm1462_vm1, %v3354_v12, -inf }
 0x97a   :  { %3386 = vmax.xlane.f32.xlu1 %v3385_v13 }
 0x97b   :  { %3383 = vmax.xlane.f32.xlu0 %v3382_v24 }
 0x97d   :  { %v7687_v14 = vpop.f32.mrb[68].mxu1 }
 0x97e   :  { %v10066_v33 = vpop.f32.mrb[69].mxu1  ;;  %v3400_v48 = vsel %vm1462_vm1, %v7687_v14, -inf }
 0x97f   :  { %3392 = vmax.xlane.f32.xlu0 %v3391_v9  ;;  %v7688_v15 = vpop.f32.mrb[70].mxu1  ;;  %v3394_v60 = vsel %vm1462_vm1, %v10066_v33, -inf }
 0x980   :  { %v10069_v53 = vpop.f32.mrb[71].mxu1  ;;  %v3403_v13 = vsel %vm1462_vm1, %v7688_v15, -inf }
 0x983   :  { %3401 = vmax.xlane.f32.xlu0 %v3400_v48  ;;  %v3397_v48 = vsel %vm1462_vm1, %v10069_v53, -inf }
 0x987   :  { %3395 = vmax.xlane.f32.xlu0 %v3394_v60 }
 0x98b   :  { %3621 = vrot.lane.b32.xlu1 %v9247_v46, %s8627_s26  ;;  %3404 = vmax.xlane.f32.xlu0 %v3403_v13 }
 0x98f   :  { %3623 = vrot.lane.b32.xlu1 %v9261_v63, %s8627_s26 }
 0x9a1   :  { %3619 = vrot.lane.b32.xlu0 %v9233_v29, %s8627_s26 }
 0x9a5   :  { %3607 = vrot.lane.b32.xlu0 %v9138_v30, %s8627_s26 }
 0x9a9   :  { %3611 = vrot.lane.b32.xlu0 %v9170_v28, %s8627_s26 }
 0x9b3   :  { %3398 = vmax.xlane.f32.xlu1 %v3397_v48 }
 0x9c4   :  { %3625 = vrot.lane.b32.xlu1 %v9275_v23, %s8627_s26 }
 0x9c8   :  { %3609 = vrot.lane.b32.xlu1 %v9158_v20, %s8627_s26 }
 0x9cc   :  { %3613 = vrot.lane.b32.xlu1 %v9178_v50, %s8627_s26 }
 0x9d0   :  { %3806 = vrot.lane.b32.xlu1 %v9381_v19, %s8627_s26 }
 0x9d4   :  { %3808 = vrot.lane.b32.xlu1 %v9399_v42, %s8627_s26 }
 0xa04   :  { %v3390_v30 = vpop.xlane.xlu0 %3389 }
 0xa05   :  { %v3408_v29 = vsub.f32 %v7683_v3, %v3390_v30 }
 0xa07   :  { %v3387_v28 = vpop.xlane.xlu1 %3386  ;;  %v3418_v60 = vmul.f32 1.442695, %v3408_v29 }
 0xa08   :  { %v3407_v46 = vsub.f32 %v3354_v12, %v3387_v28  ;;  %v3384_v63 = vpop.xlane.xlu0 %3383 }
 0xa09   :  { %v3406_v9 = vsub.f32 %v3351_v41, %v3384_v63 }
 0xa0a   :  { %v3416_v24 = vmul.f32 1.442695, %v3407_v46 }
 0xa0b   :  { %v3414_v23 = vmul.f32 1.442695, %v3406_v9 }
 0xa0c   :  { %8161 = vpow2.f32 %v3416_v24  ;;  %v3393_v20 = vpop.xlane.xlu0 %3392 }
 0xa0d   :  { %8163 = vpow2.f32 %v3414_v23  ;;  %v3409_v13 = vsub.f32 %v7684_v56, %v3393_v20 }
 0xa0e   :  { %8165 = vpow2.f32 %v3418_v60 }
 0xa0f   :  { %v3420_v50 = vmul.f32 1.442695, %v3409_v13 }
 0xa10   :  { %v3402_v48 = vpop.xlane.xlu0 %3401 }
 0xa11   :  { %8167 = vpow2.f32 %v3420_v50  ;;  %v3412_v19 = vsub.f32 %v7687_v14, %v3402_v48 }
 0xa13   :  { %v3426_v3 = vmul.f32 1.442695, %v3412_v19 }
 0xa14   :  { %v3396_v5 = vpop.xlane.xlu0 %3395 }
 0xa15   :  { %8169 = vpow2.f32 %v3426_v3  ;;  %v3410_v50 = vsub.f32 %v10066_v33, %v3396_v5 }
 0xa16   :  { %v10097_v42 = vpop.eup %8161 }
 0xa17   :  { %v10099_v26 = vpop.eup %8163  ;;  %v3422_v48 = vmul.f32 1.442695, %v3410_v50 }
 0xa18   :  { %v3405_v12 = vpop.xlane.xlu0 %3404  ;;  %v3462_v41 = vpack.c.bf16 %v10097_v42, %v10099_v26  ;;  %v10103_v28 = vpop.eup %8165 }
 0xa19   :  { %v3413_v30 = vsub.f32 %v7688_v15, %v3405_v12  ;;  %v3622_v15 = vpop.permute.xlu1 %3621 }
 0xa1a   :  { %7697 = vmatprep.mubr.msk.bf16.mxu0 %vm1462_vm1, %v3462_v41  ;;  %v3643_v24 = vsel %vm1372_vm0, %v3622_v15, 0 }
 0xa1b   :  { %v10106_v56 = vpop.eup %8167  ;;  %v3428_v29 = vmul.f32 1.442695, %v3413_v30 }
 0xa1c   :  { %v3463_v14 = vpack.c.bf16 %v10106_v56, %v10103_v28  ;;  %v3620_v46 = vpop.permute.xlu0 %3619 }
 0xa1d   :  { %8171 = vpow2.f32 %v3428_v29  ;;  %8021 = vmatprep.subr.msk.bf16.mxu0 %vm1372_vm0, %v3620_v46  ;;  %v3640_v63 = vsel %vm1372_vm0, %v3620_v46, 0  ;;  %v3624_v60 = vpop.permute.xlu1 %3623 }
 0xa1e   :  { %7698 = vmatmul.mubr.msk.bf16.vlgmr.msra.gmra.mrb[128].mxu0 %vm1462_vm1, %v3463_v14  ;;  %v3646_v13 = vsel %vm1372_vm0, %v3624_v60, 0  ;;  %8173 = vpow2.f32 %v3422_v48 }
 0xa1f   :  { %7706 = vmatpush3.bf16.xpose.msra.mxu0 %v3640_v63  ;;  %v10114_v9 = vpop.eup %8169 }
 0xa20   :  { %8022 = vmatprep.subr.msk.bf16.mxu0 %vm1372_vm0, %v3622_v15  ;;  %12312 = vst [vmem:[#allocation103_spill] sm:$0xff] %v10114_v9 }
 0xa27   :  { %v10117_v23 = vpop.eup %8171  ;;  %7708 = vmatpush3.bf16.xpose.msra.mxu0 %v3643_v24 }
 0xa28   :  { %12313 = vst [vmem:[#allocation104_spill] sm:$0xff] %v10117_v23  ;;  %8023 = vmatprep.subr.msk.bf16.mxu0 %vm1372_vm0, %v3624_v60  ;;  %v3465_v20 = vpack.c.bf16 %v10117_v23, %v10114_v9  ;;  %v10128_v29 = vpop.eup %8173 }
 0xa29   :  { %12314 = vst [vmem:[#allocation105_spill] sm:$0xff] %v10128_v29 }
 0xa2f   :  { %7710 = vmatpush3.bf16.xpose.msra.mxu0 %v3646_v13 }
 0xa40   :  { %v3399_v19 = vpop.xlane.xlu1 %3398 }
 0xa41   :  { %v3411_v3 = vsub.f32 %v10069_v53, %v3399_v19  ;;  %v3608_v53 = vpop.permute.xlu0 %3607 }
 0xa43   :  { %v3424_v12 = vmul.f32 1.442695, %v3411_v3 }
 0xa44   :  { %v3626_v41 = vpop.permute.xlu1 %3625 }
 0xa45   :  { %8175 = vpow2.f32 %v3424_v12  ;;  %8024 = vmatprep.subr.msk.bf16.mxu0 %vm1372_vm0, %v3626_v41  ;;  %v3649_v30 = vsel %vm1372_vm0, %v3626_v41, 0  ;;  %v3612_v46 = vpop.permute.xlu0 %3611 }
 0xa46   :  { %7712 = vmatpush3.bf16.xpose.msra.mxu0 %v3649_v30 }
 0xa47   :  { %7753 = vmatprep.subr.bf16.mxu0 %v9793_v7 }
 0xa48   :  { %v3610_v33 = vpop.permute.xlu1 %3609 }
 0xa4c   :  { %v3614_v63 = vpop.permute.xlu1 %3613 }
 0xa4f   :  { %v10130_v14 = vpop.eup %8175 }
 0xa50   :  { %12315 = vst [vmem:[#allocation106_spill] sm:$0xff] %v10130_v14  ;;  %v3464_v5 = vpack.c.bf16 %v10130_v14, %v10128_v29 }
 0xa52   :  { %7701 = vmatprep.mubr.msk.bf16.mxu0 %vm1462_vm1, %v3464_v5 }
 0xa53   :  { %7702 = vmatmul.mubr.msk.bf16.gmra.mrb[132].mxu0 %vm1462_vm1, %v3465_v20 }
 0xa54   :  { %7713 = vmatprep.mubr.msk.bf16.mxu0 %vm1372_vm0, %v3608_v53 }
 0xa5b   :  { %7714 = vmatmul.mubr.msk.bf16.vlgmr.msra.gmra.mrb[136].mxu0 %vm1372_vm0, %v3610_v33 }
 0xa5c   :  { %7754 = vmatpush3.bf16.msra.mxu0 %v9793_v7  ;;  %7717 = vmatprep.mubr.msk.bf16.mxu0 %vm1372_vm0, %v3612_v46 }
 0xa5d   :  { %7755 = vmatprep.subr.bf16.mxu0 %v9803_v6 }
 0xa60   :  { %7756 = vmatpush3.bf16.msra.mxu0 %v9803_v6 }
 0xa61   :  { %7757 = vmatprep.subr.bf16.mxu0 %v9814_v58 }
 0xa63   :  { %7718 = vmatmul.mubr.msk.bf16.gmra.mrb[140].mxu0 %vm1372_vm0, %v3614_v63 }
 0xa64   :  { %7758 = vmatpush3.bf16.msra.mxu0 %v9814_v58 }
 0xa65   :  { %7759 = vmatprep.subr.bf16.mxu0 %v9823_v36 }
 0xa68   :  { %7760 = vmatpush3.bf16.msra.mxu0 %v9823_v36 }
 0xaf1   :  { %v10147_v15 = vpop.f32.mrb[128].mxu0 }
 0xaf2   :  { %12316 = vst [vmem:[#allocation107_spill] sm:$0xff] %v10147_v15  ;;  %v10149_v24 = vpop.f32.mrb[129].mxu0 }
 0xaf3   :  { %12317 = vst [vmem:[#allocation108_spill] sm:$0xff] %v10149_v24  ;;  %v10151_v60 = vpop.f32.mrb[130].mxu0 }
 0xaf4   :  { %12318 = vst [vmem:[#allocation109_spill] sm:$0xff] %v10151_v60  ;;  %v10153_v20 = vpop.f32.mrb[131].mxu0 }
 0xaf5   :  { %12319 = vst [vmem:[#allocation110_spill] sm:$0xff] %v10153_v20 }
 0xb26   :  { %v10155_v13 = vpop.f32.mrb[132].mxu0 }
 0xb27   :  { %12320 = vst [vmem:[#allocation111_spill] sm:$0xff] %v10155_v13  ;;  %v10157_v50 = vpop.f32.mrb[133].mxu0 }
 0xb28   :  { %12321 = vst [vmem:[#allocation112_spill] sm:$0xff] %v10157_v50  ;;  %v10159_v48 = vpop.f32.mrb[134].mxu0  ;;  %v3807_v50 = vpop.permute.xlu1 %3806 }
 0xb29   :  { %12322 = vst [vmem:[#allocation113_spill] sm:$0xff] %v10159_v48  ;;  %v10161_v19 = vpop.f32.mrb[135].mxu0 }
 0xb2a   :  { %12323 = vst [vmem:[#allocation114_spill] sm:$0xff] %v10161_v19 }
 0xb2e   :  { %v7715_v3 = vpop.f32.mrb[136].mxu0 }
 0xb2f   :  { %v3685_v12 = vpop.f32.mrb[137].mxu0  ;;  %v3722_v41 = vsel %vm1462_vm1, %v7715_v3, -inf }
 0xb30   :  { %3723 = vmax.xlane.f32.xlu0 %v3722_v41  ;;  %v7716_v30 = vpop.f32.mrb[138].mxu0  ;;  %v3716_v33 = vsel %vm1462_vm1, %v3685_v12, -inf }
 0xb31   :  { %v3688_v5 = vpop.f32.mrb[139].mxu0  ;;  %v3725_v48 = vsel %vm1462_vm1, %v7716_v30, -inf }
 0xb32   :  { %v3719_v53 = vsel %vm1462_vm1, %v3688_v5, -inf }
 0xb33   :  { %3720 = vmax.xlane.f32.xlu1 %v3719_v53 }
 0xb34   :  { %3717 = vmax.xlane.f32.xlu0 %v3716_v33 }
 0xb36   :  { %v10166_v46 = vpop.f32.mrb[140].mxu0 }
 0xb37   :  { %v10168_v63 = vpop.f32.mrb[141].mxu0  ;;  %v3734_v33 = vsel %vm1462_vm1, %v10166_v46, -inf }
 0xb38   :  { %3726 = vmax.xlane.f32.xlu0 %v3725_v48  ;;  %v10171_v13 = vpop.f32.mrb[142].mxu0  ;;  %v3728_v53 = vsel %vm1462_vm1, %v10168_v63, -inf }
 0xb39   :  { %v3704_v19 = vpop.f32.mrb[143].mxu0  ;;  %v3737_v48 = vsel %vm1462_vm1, %v10171_v13, -inf }
 0xb3a   :  { %v3731_v41 = vsel %vm1462_vm1, %v3704_v19, -inf }
 0xb44   :  { %3810 = vrot.lane.b32.xlu1 %v9413_v45, %s8627_s26  ;;  %v3809_v45 = vpop.permute.xlu1 %3808 }
 0xb4e   :  { %3804 = vrot.lane.b32.xlu0 %v9365_v16, %s8627_s26 }
 0xb68   :  { %3732 = vmax.xlane.f32.xlu1 %v3731_v41 }
 0xb6d   :  { %3729 = vmax.xlane.f32.xlu0 %v3728_v53 }
 0xb71   :  { %3735 = vmax.xlane.f32.xlu0 %v3734_v33 }
 0xb75   :  { %3738 = vmax.xlane.f32.xlu0 %v3737_v48 }
 0xbbd   :  { %v3724_v60 = vpop.xlane.xlu0 %3723 }
 0xbbe   :  { %v3742_v16 = vsub.f32 %v7715_v3, %v3724_v60  ;;  %v3953_v60 = vsel %vm1372_vm0, %v9312_v2, 0 }
 0xbc0   :  { %v3721_v15 = vpop.xlane.xlu1 %3720  ;;  %v3752_v9 = vmul.f32 1.442695, %v3742_v16 }
 0xbc1   :  { %v3741_v20 = vsub.f32 %v3688_v5, %v3721_v15  ;;  %v3718_v24 = vpop.xlane.xlu0 %3717 }
 0xbc2   :  { %v3740_v41 = vsub.f32 %v3685_v12, %v3718_v24  ;;  %v3959_v12 = vsel %vm1372_vm0, %v9351_v10, 0 }
 0xbc3   :  { %v3750_v32 = vmul.f32 1.442695, %v3741_v20  ;;  %v3956_v20 = vsel %vm1372_vm0, %v9329_v18, 0 }
 0xbc4   :  { %v3748_v0 = vmul.f32 1.442695, %v3740_v41 }
 0xbc5   :  { %8177 = vpow2.f32 %v3750_v32  ;;  %v3727_v53 = vpop.xlane.xlu0 %3726 }
 0xbc6   :  { %8179 = vpow2.f32 %v3748_v0  ;;  %v3743_v44 = vsub.f32 %v7716_v30, %v3727_v53  ;;  %v3811_v0 = vpop.permute.xlu1 %3810 }
 0xbc7   :  { %8181 = vpow2.f32 %v3752_v9 }
 0xbc8   :  { %v3754_v33 = vmul.f32 1.442695, %v3743_v44 }
 0xbc9   :  { %v3805_v23 = vpop.permute.xlu0 %3804 }
 0xbca   :  { %8183 = vpow2.f32 %v3754_v33  ;;  %7721 = vmatprep.subr.bf16.mxu1 %v3805_v23 }
 0xbcb   :  { %7722 = vmatpush3.bf16.msra.mxu1 %v3805_v23  ;;  %v3950_v23 = vsel %vm1372_vm0, %v9293_v39, 0 }
 0xbcc   :  { %7723 = vmatprep.subr.bf16.mxu1 %v3807_v50 }
 0xbcf   :  { %v10184_v48 = vpop.eup %8177  ;;  %7724 = vmatpush3.bf16.msra.mxu1 %v3807_v50 }
 0xbd0   :  { %v10186_v15 = vpop.eup %8179  ;;  %7725 = vmatprep.subr.bf16.mxu1 %v3809_v45 }
 0xbd1   :  { %v3796_v24 = vpack.c.bf16 %v10184_v48, %v10186_v15  ;;  %v10190_v32 = vpop.eup %8181 }
 0xbd2   :  { %12324 = vst [vmem:[#allocation115_spill] sm:$0xff] %v10190_v32 }
 0xbd3   :  { %7726 = vmatpush3.bf16.msra.mxu1 %v3809_v45  ;;  %7729 = vmatprep.mubr.msk.bf16.mxu1 %vm1462_vm1, %v3796_v24 }
 0xbd4   :  { %v10193_v44 = vpop.eup %8183  ;;  %7727 = vmatprep.subr.bf16.mxu1 %v3811_v0 }
 0xbd5   :  { %v3797_v9 = vpack.c.bf16 %v10193_v44, %v10190_v32 }
 0xbd7   :  { %7728 = vmatpush3.bf16.msra.mxu1 %v3811_v0 }
 0xbd8   :  { %8025 = vmatprep.subr.msk.bf16.mxu1 %vm1372_vm0, %v9293_v39 }
 0xbda   :  { %7730 = vmatmul.mubr.msk.bf16.vlgmr.msra.gmra.mrb[72].mxu1 %vm1462_vm1, %v3797_v9 }
 0xbe0   :  { %7738 = vmatpush3.bf16.xpose.msra.mxu1 %v3950_v23 }
 0xbe1   :  { %8026 = vmatprep.subr.msk.bf16.mxu1 %vm1372_vm0, %v9312_v2 }
 0xbe8   :  { %7740 = vmatpush3.bf16.xpose.msra.mxu1 %v3953_v60 }
 0xbe9   :  { %8027 = vmatprep.subr.msk.bf16.mxu1 %vm1372_vm0, %v9329_v18 }
 0xbf0   :  { %7742 = vmatpush3.bf16.xpose.msra.mxu1 %v3956_v20 }
 0xbf1   :  { %8028 = vmatprep.subr.msk.bf16.mxu1 %vm1372_vm0, %v9351_v10 }
 0xbf5   :  { %v3733_v50 = vpop.xlane.xlu1 %3732 }
 0xbf6   :  { %v3745_v3 = vsub.f32 %v3704_v19, %v3733_v50 }
 0xbf8   :  { %7744 = vmatpush3.bf16.xpose.msra.mxu1 %v3959_v12  ;;  %v3758_v30 = vmul.f32 1.442695, %v3745_v3 }
 0xbfa   :  { %v3730_v5 = vpop.xlane.xlu0 %3729  ;;  %8185 = vpow2.f32 %v3758_v30 }
 0xbfb   :  { %v3744_v45 = vsub.f32 %v10168_v63, %v3730_v5 }
 0xbfd   :  { %v3756_v16 = vmul.f32 1.442695, %v3744_v45 }
 0xbfe   :  { %v3736_v41 = vpop.xlane.xlu0 %3735 }
 0xbff   :  { %8187 = vpow2.f32 %v3756_v16  ;;  %v3746_v53 = vsub.f32 %v10166_v46, %v3736_v41 }
 0xc01   :  { %v3760_v33 = vmul.f32 1.442695, %v3746_v53 }
 0xc02   :  { %v3739_v24 = vpop.xlane.xlu0 %3738 }
 0xc03   :  { %v3747_v0 = vsub.f32 %v10171_v13, %v3739_v24  ;;  %8189 = vpow2.f32 %v3760_v33  ;;  %v12329_v13 = vld [vmem:[#allocation17_spill] sm:$0xff] }
 0xc04   :  { %v10217_v19 = vpop.eup %8185 }
 0xc05   :  { %v3762_v9 = vmul.f32 1.442695, %v3747_v0  ;;  %12325 = vst [vmem:[#allocation116_spill] sm:$0xff] %v10217_v19 }
 0xc07   :  { %8191 = vpow2.f32 %v3762_v9 }
 0xc09   :  { %v10219_v23 = vpop.eup %8187 }
 0xc0a   :  { %12326 = vst [vmem:[#allocation117_spill] sm:$0xff] %v10219_v23  ;;  %v3798_v63 = vpack.c.bf16 %v10217_v19, %v10219_v23 }
 0xc0c   :  { %7733 = vmatprep.mubr.msk.bf16.mxu1 %vm1462_vm1, %v3798_v63 }
 0xc0d   :  { %v10224_v60 = vpop.eup %8189 }
 0xc0e   :  { %12327 = vst [vmem:[#allocation118_spill] sm:$0xff] %v10224_v60 }
 0xc11   :  { %v10226_v20 = vpop.eup %8191 }
 0xc12   :  { %12328 = vst [vmem:[#allocation119_spill] sm:$0xff] %v10226_v20  ;;  %v3799_v46 = vpack.c.bf16 %v10226_v20, %v10224_v60 }
 0xc14   :  { %7734 = vmatmul.mubr.msk.bf16.gmra.mrb[76].mxu1 %vm1462_vm1, %v3799_v46 }
 0xc15   :  { %7745 = vmatprep.mubr.msk.bf16.mxu1 %vm1372_vm0, %v9184_v17 }
 0xc1c   :  { %7746 = vmatmul.mubr.msk.bf16.vlgmr.msra.gmra.mrb[80].mxu1 %vm1372_vm0, %v9192_v38 }
 0xc1d   :  { %7749 = vmatprep.mubr.msk.bf16.mxu1 %vm1372_vm0, %v9202_v49 }
 0xc24   :  { %7750 = vmatmul.mubr.msk.bf16.gmra.mrb[84].mxu1 %vm1372_vm0, %v12329_v13 }
 0xcad   :  { %v10239_v50 = vpop.f32.mrb[72].mxu1 }
 0xcae   :  { %12330 = vst [vmem:[#allocation17_spill] sm:$0xff] %v10239_v50  ;;  %v10241_v3 = vpop.f32.mrb[73].mxu1 }
 0xcaf   :  { %12331 = vst [vmem:[#allocation120_spill] sm:$0xff] %v10241_v3  ;;  %v10243_v12 = vpop.f32.mrb[74].mxu1 }
 0xcb0   :  { %12332 = vst [vmem:[#allocation121_spill] sm:$0xff] %v10243_v12  ;;  %v10245_v30 = vpop.f32.mrb[75].mxu1 }
 0xcb1   :  { %12333 = vst [vmem:[#allocation122_spill] sm:$0xff] %v10245_v30 }
 0xce7   :  { %v10247_v5 = vpop.f32.mrb[76].mxu1 }
 0xce8   :  { %12334 = vst [vmem:[#allocation123_spill] sm:$0xff] %v10247_v5  ;;  %v10249_v45 = vpop.f32.mrb[77].mxu1 }
 0xce9   :  { %12335 = vst [vmem:[#allocation124_spill] sm:$0xff] %v10249_v45  ;;  %v10251_v16 = vpop.f32.mrb[78].mxu1 }
 0xcea   :  { %12336 = vst [vmem:[#allocation125_spill] sm:$0xff] %v10251_v16  ;;  %v10253_v41 = vpop.f32.mrb[79].mxu1 }
 0xceb   :  { %12337 = vst [vmem:[#allocation126_spill] sm:$0xff] %v10253_v41 }
 0xcef   :  { %v7747_v53 = vpop.f32.mrb[80].mxu1 }
 0xcf0   :  { %v3995_v33 = vpop.f32.mrb[81].mxu1  ;;  %v4032_v24 = vsel %vm1462_vm1, %v7747_v53, -inf }
 0xcf1   :  { %4033 = vmax.xlane.f32.xlu0 %v4032_v24  ;;  %v7748_v0 = vpop.f32.mrb[82].mxu1  ;;  %v4026_v46 = vsel %vm1462_vm1, %v3995_v33, -inf }
 0xcf2   :  { %v3998_v9 = vpop.f32.mrb[83].mxu1  ;;  %v4035_v63 = vsel %vm1462_vm1, %v7748_v0, -inf }
 0xcf3   :  { %4036 = vmax.xlane.f32.xlu1 %v4035_v63  ;;  %v4029_v5 = vsel %vm1462_vm1, %v3998_v9, -inf }
 0xcf5   :  { %4027 = vmax.xlane.f32.xlu0 %v4026_v46 }
 0xcf7   :  { %4030 = vmax.xlane.f32.xlu1 %v4029_v5  ;;  %v10259_v45 = vpop.f32.mrb[84].mxu1 }
 0xcf8   :  { %v10261_v16 = vpop.f32.mrb[85].mxu1  ;;  %v4044_v41 = vsel %vm1462_vm1, %v10259_v45, -inf }
 0xcf9   :  { %4045 = vmax.xlane.f32.xlu0 %v4044_v41  ;;  %v10265_v24 = vpop.f32.mrb[86].mxu1  ;;  %v4038_v63 = vsel %vm1462_vm1, %v10261_v16, -inf }
 0xcfa   :  { %v10267_v12 = vpop.f32.mrb[87].mxu1  ;;  %v4047_v5 = vsel %vm1462_vm1, %v10265_v24, -inf }
 0xcfb   :  { %v4041_v41 = vsel %vm1462_vm1, %v10267_v12, -inf }
 0xcfd   :  { %4039 = vmax.xlane.f32.xlu0 %v4038_v63 }
 0xd08   :  { %4233 = vrot.lane.b32.xlu1 %v9312_v2, %s8628_s13 }
 0xd0c   :  { %4235 = vrot.lane.b32.xlu1 %v9329_v18, %s8628_s13 }
 0xd13   :  { %4231 = vrot.lane.b32.xlu0 %v9293_v39, %s8628_s13 }
 0xd17   :  { %4219 = vrot.lane.b32.xlu0 %v9184_v17, %s8628_s13 }
 0xd1b   :  { %4223 = vrot.lane.b32.xlu0 %v9202_v49, %s8628_s13 }
 0xd1f   :  { %4416 = vrot.lane.b32.xlu0 %v9793_v7, %s8628_s13 }
 0xd30   :  { %4048 = vmax.xlane.f32.xlu1 %v4047_v5 }
 0xd34   :  { %4042 = vmax.xlane.f32.xlu1 %v4041_v41 }
 0xd45   :  { %4237 = vrot.lane.b32.xlu1 %v9351_v10, %s8628_s13 }
 0xd49   :  { %4221 = vrot.lane.b32.xlu1 %v9192_v38, %s8628_s13 }
 0xd4d   :  { %4225 = vrot.lane.b32.xlu1 %v12329_v13, %s8628_s13 }
 0xd51   :  { %4418 = vrot.lane.b32.xlu1 %v9803_v6, %s8628_s13 }
 0xd55   :  { %4420 = vrot.lane.b32.xlu1 %v9814_v58, %s8628_s13 }
 0xd59   :  { %4422 = vrot.lane.b32.xlu1 %v9823_v36, %s8628_s13 }
 0xd7e   :  { %v4034_v46 = vpop.xlane.xlu0 %4033 }
 0xd7f   :  { %v4052_v63 = vsub.f32 %v7747_v53, %v4034_v46 }
 0xd80   :  { %v4037_v5 = vpop.xlane.xlu1 %4036 }
 0xd81   :  { %v4062_v41 = vmul.f32 1.442695, %v4052_v63  ;;  %v4053_v50 = vsub.f32 %v7748_v0, %v4037_v5 }
 0xd82   :  { %v4028_v30 = vpop.xlane.xlu0 %4027 }
 0xd83   :  { %v4064_v3 = vmul.f32 1.442695, %v4053_v50  ;;  %v4050_v60 = vsub.f32 %v3995_v33, %v4028_v30  ;;  %8193 = vpow2.f32 %v4062_v41 }
 0xd84   :  { %v4031_v20 = vpop.xlane.xlu1 %4030 }
 0xd85   :  { %8195 = vpow2.f32 %v4064_v3  ;;  %v4058_v23 = vmul.f32 1.442695, %v4050_v60  ;;  %v4051_v29 = vsub.f32 %v3998_v9, %v4031_v20 }
 0xd86   :  { %v4046_v34 = vpop.xlane.xlu0 %4045 }
 0xd87   :  { %v4060_v61 = vmul.f32 1.442695, %v4051_v29  ;;  %8197 = vpow2.f32 %v4058_v23  ;;  %v4056_v63 = vsub.f32 %v10259_v45, %v4046_v34 }
 0xd88   :  { %v4234_v20 = vpop.permute.xlu1 %4233 }
 0xd89   :  { %8199 = vpow2.f32 %v4060_v61  ;;  %v4255_v0 = vsel %vm1372_vm0, %v4234_v20, 0  ;;  %v4070_v5 = vmul.f32 1.442695, %v4056_v63 }
 0xd8a   :  { %v4040_v19 = vpop.xlane.xlu0 %4039 }
 0xd8b   :  { %8201 = vpow2.f32 %v4070_v5 }
 0xd8c   :  { %v4236_v9 = vpop.permute.xlu1 %4235 }
 0xd8d   :  { %v10299_v32 = vpop.eup %8193  ;;  %v4258_v46 = vsel %vm1372_vm0, %v4236_v9, 0 }
 0xd8e   :  { %12338 = vst [vmem:[#allocation127_spill] sm:$0xff] %v10299_v32  ;;  %v4232_v14 = vpop.permute.xlu0 %4231 }
 0xd8f   :  { %v10301_v53 = vpop.eup %8195  ;;  %8029 = vmatprep.subr.msk.bf16.mxu0 %vm1372_vm0, %v4232_v14  ;;  %v4252_v23 = vsel %vm1372_vm0, %v4232_v14, 0  ;;  %v4054_v14 = vsub.f32 %v10261_v16, %v4040_v19 }
 0xd90   :  { %12339 = vst [vmem:[#allocation128_spill] sm:$0xff] %v10301_v53  ;;  %v4107_v50 = vpack.c.bf16 %v10301_v53, %v10299_v32 }
 0xd91   :  { %v10306_v30 = vpop.eup %8197 }
 0xd92   :  { %12340 = vst [vmem:[#allocation129_spill] sm:$0xff] %v10306_v30  ;;  %v4220_v3 = vpop.permute.xlu0 %4219 }
 0xd93   :  { %v10308_v60 = vpop.eup %8199 }
 0xd94   :  { %12341 = vst [vmem:[#allocation130_spill] sm:$0xff] %v10308_v60  ;;  %v4106_v29 = vpack.c.bf16 %v10308_v60, %v10306_v30 }
 0xd95   :  { %v10325_v45 = vpop.eup %8201 }
 0xd96   :  { %7761 = vmatprep.mubr.msk.bf16.mxu0 %vm1462_vm1, %v4106_v29  ;;  %v4224_v61 = vpop.permute.xlu0 %4223  ;;  %12342 = vst [vmem:[#allocation131_spill] sm:$0xff] %v10325_v45 }
 0xd97   :  { %7762 = vmatmul.mubr.msk.bf16.vlgmr.msra.gmra.mrb[144].mxu0 %vm1462_vm1, %v4107_v50 }
 0xd98   :  { %7770 = vmatpush3.bf16.xpose.msra.mxu0 %v4252_v23  ;;  %v4066_v23 = vmul.f32 1.442695, %v4054_v14 }
 0xd99   :  { %8030 = vmatprep.subr.msk.bf16.mxu0 %vm1372_vm0, %v4234_v20 }
 0xd9a   :  { %v4417_v33 = vpop.permute.xlu0 %4416 }
 0xd9b   :  { %7785 = vmatprep.subr.bf16.mxu1 %v4417_v33 }
 0xd9c   :  { %7786 = vmatpush3.bf16.msra.mxu1 %v4417_v33 }
 0xda0   :  { %7772 = vmatpush3.bf16.xpose.msra.mxu0 %v4255_v0 }
 0xda1   :  { %8031 = vmatprep.subr.msk.bf16.mxu0 %vm1372_vm0, %v4236_v9 }
 0xda8   :  { %7774 = vmatpush3.bf16.xpose.msra.mxu0 %v4258_v46 }
 0xdbd   :  { %v4049_v41 = vpop.xlane.xlu1 %4048 }
 0xdbe   :  { %v4057_v50 = vsub.f32 %v10265_v24, %v4049_v41 }
 0xdc0   :  { %v4072_v29 = vmul.f32 1.442695, %v4057_v50 }
 0xdc1   :  { %v4043_v33 = vpop.xlane.xlu1 %4042 }
 0xdc2   :  { %8203 = vpow2.f32 %v4072_v29  ;;  %v4055_v20 = vsub.f32 %v10267_v12, %v4043_v33 }
 0xdc3   :  { %8205 = vpow2.f32 %v4066_v23 }
 0xdc4   :  { %v4068_v0 = vmul.f32 1.442695, %v4055_v20 }
 0xdc5   :  { %v4238_v53 = vpop.permute.xlu1 %4237 }
 0xdc6   :  { %8207 = vpow2.f32 %v4068_v0  ;;  %8032 = vmatprep.subr.msk.bf16.mxu0 %vm1372_vm0, %v4238_v53  ;;  %v4261_v34 = vsel %vm1372_vm0, %v4238_v53, 0 }
 0xdc7   :  { %7776 = vmatpush3.bf16.xpose.msra.mxu0 %v4261_v34 }
 0xdc9   :  { %v4222_v19 = vpop.permute.xlu1 %4221 }
 0xdcc   :  { %v10327_v16 = vpop.eup %8203 }
 0xdcd   :  { %12343 = vst [vmem:[#allocation132_spill] sm:$0xff] %v10327_v16  ;;  %v4226_v24 = vpop.permute.xlu1 %4225  ;;  %v4109_v9 = vpack.c.bf16 %v10327_v16, %v10325_v45  ;;  %v10331_v46 = vpop.eup %8205 }
 0xdce   :  { %12344 = vst [vmem:[#allocation133_spill] sm:$0xff] %v10331_v46 }
 0xdd0   :  { %v10333_v12 = vpop.eup %8207 }
 0xdd1   :  { %12345 = vst [vmem:[#allocation134_spill] sm:$0xff] %v10333_v12  ;;  %v4419_v63 = vpop.permute.xlu1 %4418  ;;  %v4108_v5 = vpack.c.bf16 %v10333_v12, %v10331_v46 }
 0xdd2   :  { %7787 = vmatprep.subr.bf16.mxu1 %v4419_v63 }
 0xdd3   :  { %7765 = vmatprep.mubr.msk.bf16.mxu0 %vm1462_vm1, %v4108_v5  ;;  %7788 = vmatpush3.bf16.msra.mxu1 %v4419_v63 }
 0xdd4   :  { %7766 = vmatmul.mubr.msk.bf16.gmra.mrb[148].mxu0 %vm1462_vm1, %v4109_v9 }
 0xdd5   :  { %7777 = vmatprep.mubr.msk.bf16.mxu0 %vm1372_vm0, %v4220_v3  ;;  %v4421_v53 = vpop.permute.xlu1 %4420 }
 0xdd6   :  { %7789 = vmatprep.subr.bf16.mxu1 %v4421_v53 }
 0xdd7   :  { %7790 = vmatpush3.bf16.msra.mxu1 %v4421_v53 }
 0xdd9   :  { %v4423_v14 = vpop.permute.xlu1 %4422 }
 0xdda   :  { %7791 = vmatprep.subr.bf16.mxu1 %v4423_v14 }
 0xddb   :  { %7792 = vmatpush3.bf16.msra.mxu1 %v4423_v14 }
 0xddc   :  { %7778 = vmatmul.mubr.msk.bf16.vlgmr.msra.gmra.mrb[152].mxu0 %vm1372_vm0, %v4222_v19 }
 0xddd   :  { %7781 = vmatprep.mubr.msk.bf16.mxu0 %vm1372_vm0, %v4224_v61 }
 0xde4   :  { %7782 = vmatmul.mubr.msk.bf16.gmra.mrb[156].mxu0 %vm1372_vm0, %v4226_v24 }
 0xe6a   :  { %v10343_v41 = vpop.f32.mrb[144].mxu0 }
 0xe6b   :  { %12346 = vst [vmem:[#allocation135_spill] sm:$0xff] %v10343_v41  ;;  %v10345_v50 = vpop.f32.mrb[145].mxu0 }
 0xe6c   :  { %12347 = vst [vmem:[#allocation136_spill] sm:$0xff] %v10345_v50  ;;  %v10347_v29 = vpop.f32.mrb[146].mxu0 }
 0xe6d   :  { %12348 = vst [vmem:[#allocation137_spill] sm:$0xff] %v10347_v29  ;;  %v10349_v23 = vpop.f32.mrb[147].mxu0 }
 0xe6e   :  { %12349 = vst [vmem:[#allocation138_spill] sm:$0xff] %v10349_v23 }
 0xea7   :  { %v10351_v3 = vpop.f32.mrb[148].mxu0 }
 0xea8   :  { %12350 = vst [vmem:[#allocation139_spill] sm:$0xff] %v10351_v3  ;;  %v10353_v33 = vpop.f32.mrb[149].mxu0 }
 0xea9   :  { %12351 = vst [vmem:[#allocation140_spill] sm:$0xff] %v10353_v33  ;;  %v10355_v20 = vpop.f32.mrb[150].mxu0 }
 0xeaa   :  { %12352 = vst [vmem:[#allocation141_spill] sm:$0xff] %v10355_v20  ;;  %v10357_v0 = vpop.f32.mrb[151].mxu0 }
 0xeab   :  { %12353 = vst [vmem:[#allocation142_spill] sm:$0xff] %v10357_v0 }
 0xeaf   :  { %v7779_v34 = vpop.f32.mrb[152].mxu0 }
 0xeb0   :  { %v4297_v61 = vpop.f32.mrb[153].mxu0  ;;  %v4334_v19 = vsel %vm1462_vm1, %v7779_v34, -inf }
 0xeb1   :  { %4335 = vmax.xlane.f32.xlu0 %v4334_v19  ;;  %v7780_v24 = vpop.f32.mrb[154].mxu0  ;;  %v4328_v5 = vsel %vm1462_vm1, %v4297_v61, -inf }
 0xeb2   :  { %v4300_v9 = vpop.f32.mrb[155].mxu0  ;;  %v4337_v20 = vsel %vm1462_vm1, %v7780_v24, -inf }
 0xeb3   :  { %v4331_v63 = vsel %vm1462_vm1, %v4300_v9, -inf }
 0xeb4   :  { %4332 = vmax.xlane.f32.xlu1 %v4331_v63 }
 0xeb5   :  { %4329 = vmax.xlane.f32.xlu0 %v4328_v5 }
 0xeb7   :  { %v7783_v53 = vpop.f32.mrb[156].mxu0 }
 0xeb8   :  { %v10362_v14 = vpop.f32.mrb[157].mxu0  ;;  %v4346_v33 = vsel %vm1462_vm1, %v7783_v53, -inf }
 0xeb9   :  { %4338 = vmax.xlane.f32.xlu0 %v4337_v20  ;;  %v7784_v3 = vpop.f32.mrb[158].mxu0  ;;  %v4340_v19 = vsel %vm1462_vm1, %v10362_v14, -inf }
 0xeba   :  { %v10365_v0 = vpop.f32.mrb[159].mxu0  ;;  %v4349_v63 = vsel %vm1462_vm1, %v7784_v3, -inf }
 0xebd   :  { %4347 = vmax.xlane.f32.xlu0 %v4346_v33  ;;  %v4343_v33 = vsel %vm1462_vm1, %v10365_v0, -inf }
 0xec1   :  { %4341 = vmax.xlane.f32.xlu0 %v4340_v19 }
 0xec5   :  { %4567 = vrot.lane.b32.xlu1 %v9312_v2, %s8629_s14  ;;  %4350 = vmax.xlane.f32.xlu0 %v4349_v63 }
 0xec9   :  { %4569 = vrot.lane.b32.xlu1 %v9329_v18, %s8629_s14 }
 0xedb   :  { %4565 = vrot.lane.b32.xlu0 %v9293_v39, %s8629_s14 }
 0xedf   :  { %4553 = vrot.lane.b32.xlu0 %v9184_v17, %s8629_s14 }
 0xee3   :  { %4557 = vrot.lane.b32.xlu0 %v9202_v49, %s8629_s14 }
 0xee7   :  { %4750 = vrot.lane.b32.xlu0 %v9793_v7, %s8629_s14 }
 0xeed   :  { %4344 = vmax.xlane.f32.xlu1 %v4343_v33 }
 0xefe   :  { %4571 = vrot.lane.b32.xlu1 %v9351_v10, %s8629_s14 }
 0xf02   :  { %4555 = vrot.lane.b32.xlu1 %v9192_v38, %s8629_s14 }
 0xf06   :  { %4559 = vrot.lane.b32.xlu1 %v12329_v13, %s8629_s14 }
 0xf0a   :  { %4752 = vrot.lane.b32.xlu1 %v9803_v6, %s8629_s14 }
 0xf0e   :  { %4754 = vrot.lane.b32.xlu1 %v9814_v58, %s8629_s14 }
 0xf12   :  { %4756 = vrot.lane.b32.xlu1 %v9823_v36, %s8629_s14 }
 0xf3e   :  { %v4336_v20 = vpop.xlane.xlu0 %4335 }
 0xf3f   :  { %v4354_v19 = vsub.f32 %v7779_v34, %v4336_v20 }
 0xf41   :  { %v4333_v5 = vpop.xlane.xlu1 %4332  ;;  %v4364_v41 = vmul.f32 1.442695, %v4354_v19 }
 0xf42   :  { %v4353_v63 = vsub.f32 %v4300_v9, %v4333_v5  ;;  %v4330_v33 = vpop.xlane.xlu0 %4329 }
 0xf43   :  { %v4352_v16 = vsub.f32 %v4297_v61, %v4330_v33 }
 0xf44   :  { %v4362_v45 = vmul.f32 1.442695, %v4353_v63 }
 0xf45   :  { %v4360_v29 = vmul.f32 1.442695, %v4352_v16 }
 0xf46   :  { %8209 = vpow2.f32 %v4362_v45  ;;  %v4339_v12 = vpop.xlane.xlu0 %4338 }
 0xf47   :  { %8211 = vpow2.f32 %v4360_v29  ;;  %v4355_v46 = vsub.f32 %v7780_v24, %v4339_v12  ;;  %v4568_v29 = vpop.permute.xlu1 %4567 }
 0xf48   :  { %8213 = vpow2.f32 %v4364_v41 }
 0xf49   :  { %v4366_v32 = vmul.f32 1.442695, %v4355_v46 }
 0xf4a   :  { %v4348_v23 = vpop.xlane.xlu0 %4347 }
 0xf4b   :  { %8215 = vpow2.f32 %v4366_v32  ;;  %v4358_v50 = vsub.f32 %v7783_v53, %v4348_v23  ;;  %v4589_v53 = vsel %vm1372_vm0, %v4568_v29, 0  ;;  %v4570_v5 = vpop.permute.xlu1 %4569 }
 0xf4c   :  { %v4592_v33 = vsel %vm1372_vm0, %v4570_v5, 0 }
 0xf4d   :  { %v4372_v34 = vmul.f32 1.442695, %v4358_v50 }
 0xf4e   :  { %v4342_v60 = vpop.xlane.xlu0 %4341 }
 0xf4f   :  { %8217 = vpow2.f32 %v4372_v34  ;;  %v4356_v34 = vsub.f32 %v10362_v14, %v4342_v60 }
 0xf50   :  { %v10397_v30 = vpop.eup %8209 }
 0xf51   :  { %v10399_v62 = vpop.eup %8211 }
 0xf52   :  { %v4351_v9 = vpop.xlane.xlu0 %4350  ;;  %v4408_v16 = vpack.c.bf16 %v10397_v30, %v10399_v62  ;;  %v10403_v45 = vpop.eup %8213 }
 0xf53   :  { %v4359_v61 = vsub.f32 %v7784_v3, %v4351_v9  ;;  %12354 = vst [vmem:[#allocation143_spill] sm:$0xff] %v10403_v45  ;;  %v4368_v9 = vmul.f32 1.442695, %v4356_v34 }
 0xf54   :  { %7793 = vmatprep.mubr.msk.bf16.mxu1 %vm1462_vm1, %v4408_v16 }
 0xf55   :  { %v10406_v46 = vpop.eup %8215  ;;  %v4374_v12 = vmul.f32 1.442695, %v4359_v61 }
 0xf56   :  { %v4409_v32 = vpack.c.bf16 %v10406_v46, %v10403_v45  ;;  %v4566_v41 = vpop.permute.xlu0 %4565 }
 0xf57   :  { %8219 = vpow2.f32 %v4374_v12  ;;  %8033 = vmatprep.subr.msk.bf16.mxu1 %vm1372_vm0, %v4566_v41  ;;  %v4586_v50 = vsel %vm1372_vm0, %v4566_v41, 0 }
 0xf58   :  { %7794 = vmatmul.mubr.msk.bf16.vlgmr.msra.gmra.mrb[88].mxu1 %vm1462_vm1, %v4409_v32  ;;  %8221 = vpow2.f32 %v4368_v9 }
 0xf59   :  { %7802 = vmatpush3.bf16.xpose.msra.mxu1 %v4586_v50  ;;  %v10414_v24 = vpop.eup %8217 }
 0xf5a   :  { %8034 = vmatprep.subr.msk.bf16.mxu1 %vm1372_vm0, %v4568_v29  ;;  %v4554_v23 = vpop.permute.xlu0 %4553  ;;  %12355 = vst [vmem:[#allocation144_spill] sm:$0xff] %v10414_v24 }
 0xf5e   :  { %v4558_v3 = vpop.permute.xlu0 %4557 }
 0xf61   :  { %v10417_v20 = vpop.eup %8219  ;;  %7804 = vmatpush3.bf16.xpose.msra.mxu1 %v4589_v53 }
 0xf62   :  { %12356 = vst [vmem:[#allocation145_spill] sm:$0xff] %v10417_v20  ;;  %8035 = vmatprep.subr.msk.bf16.mxu1 %vm1372_vm0, %v4570_v5  ;;  %v4751_v19 = vpop.permute.xlu0 %4750  ;;  %v4411_v63 = vpack.c.bf16 %v10417_v20, %v10414_v24  ;;  %v10427_v53 = vpop.eup %8221 }
 0xf63   :  { %7817 = vmatprep.subr.bf16.mxu0 %v4751_v19  ;;  %12357 = vst [vmem:[#allocation146_spill] sm:$0xff] %v10427_v53 }
 0xf64   :  { %7818 = vmatpush3.bf16.msra.mxu0 %v4751_v19 }
 0xf69   :  { %7806 = vmatpush3.bf16.xpose.msra.mxu1 %v4592_v33 }
 0xf7a   :  { %v4345_v16 = vpop.xlane.xlu1 %4344 }
 0xf7b   :  { %v4357_v61 = vsub.f32 %v10365_v0, %v4345_v16 }
 0xf7d   :  { %v4370_v12 = vmul.f32 1.442695, %v4357_v61 }
 0xf7e   :  { %v4572_v32 = vpop.permute.xlu1 %4571 }
 0xf7f   :  { %8223 = vpow2.f32 %v4370_v12  ;;  %8036 = vmatprep.subr.msk.bf16.mxu1 %vm1372_vm0, %v4572_v32  ;;  %v4595_v41 = vsel %vm1372_vm0, %v4572_v32, 0 }
 0xf80   :  { %7808 = vmatpush3.bf16.xpose.msra.mxu1 %v4595_v41 }
 0xf82   :  { %v4556_v50 = vpop.permute.xlu1 %4555 }
 0xf86   :  { %v4560_v29 = vpop.permute.xlu1 %4559 }
 0xf89   :  { %v10429_v5 = vpop.eup %8223 }
 0xf8a   :  { %12358 = vst [vmem:[#allocation147_spill] sm:$0xff] %v10429_v5  ;;  %v4753_v60 = vpop.permute.xlu1 %4752  ;;  %v4410_v14 = vpack.c.bf16 %v10429_v5, %v10427_v53 }
 0xf8b   :  { %7819 = vmatprep.subr.bf16.mxu0 %v4753_v60 }
 0xf8c   :  { %7797 = vmatprep.mubr.msk.bf16.mxu1 %vm1462_vm1, %v4410_v14  ;;  %7820 = vmatpush3.bf16.msra.mxu0 %v4753_v60 }
 0xf8d   :  { %7798 = vmatmul.mubr.msk.bf16.gmra.mrb[92].mxu1 %vm1462_vm1, %v4411_v63 }
 0xf8e   :  { %7809 = vmatprep.mubr.msk.bf16.mxu1 %vm1372_vm0, %v4554_v23  ;;  %v4755_v0 = vpop.permute.xlu1 %4754 }
 0xf8f   :  { %7821 = vmatprep.subr.bf16.mxu0 %v4755_v0 }
 0xf90   :  { %7822 = vmatpush3.bf16.msra.mxu0 %v4755_v0 }
 0xf92   :  { %v4757_v19 = vpop.permute.xlu1 %4756 }
 0xf93   :  { %7823 = vmatprep.subr.bf16.mxu0 %v4757_v19 }
 0xf94   :  { %7824 = vmatpush3.bf16.msra.mxu0 %v4757_v19 }
 0xf95   :  { %7810 = vmatmul.mubr.msk.bf16.vlgmr.msra.gmra.mrb[96].mxu1 %vm1372_vm0, %v4556_v50 }
 0xf96   :  { %7813 = vmatprep.mubr.msk.bf16.mxu1 %vm1372_vm0, %v4558_v3 }
 0xf9d   :  { %7814 = vmatmul.mubr.msk.bf16.gmra.mrb[100].mxu1 %vm1372_vm0, %v4560_v29 }
0x102b   :  { %v10439_v33 = vpop.f32.mrb[88].mxu1 }
0x102c   :  { %12359 = vst [vmem:[#allocation148_spill] sm:$0xff] %v10439_v33  ;;  %v10441_v34 = vpop.f32.mrb[89].mxu1 }
0x102d   :  { %12360 = vst [vmem:[#allocation149_spill] sm:$0xff] %v10441_v34  ;;  %v10443_v9 = vpop.f32.mrb[90].mxu1 }
0x102e   :  { %12361 = vst [vmem:[#allocation150_spill] sm:$0xff] %v10443_v9  ;;  %v10445_v63 = vpop.f32.mrb[91].mxu1 }
0x102f   :  { %12362 = vst [vmem:[#allocation151_spill] sm:$0xff] %v10445_v63 }
0x1060   :  { %v10447_v23 = vpop.f32.mrb[92].mxu1 }
0x1061   :  { %12363 = vst [vmem:[#allocation152_spill] sm:$0xff] %v10447_v23  ;;  %v10449_v16 = vpop.f32.mrb[93].mxu1 }
0x1062   :  { %12364 = vst [vmem:[#allocation153_spill] sm:$0xff] %v10449_v16  ;;  %v10451_v61 = vpop.f32.mrb[94].mxu1 }
0x1063   :  { %12365 = vst [vmem:[#allocation154_spill] sm:$0xff] %v10451_v61  ;;  %v10453_v12 = vpop.f32.mrb[95].mxu1 }
0x1064   :  { %12366 = vst [vmem:[#allocation155_spill] sm:$0xff] %v10453_v12 }
0x1068   :  { %v7811_v32 = vpop.f32.mrb[96].mxu1 }
0x1069   :  { %v4631_v3 = vpop.f32.mrb[97].mxu1  ;;  %v4668_v41 = vsel %vm1462_vm1, %v7811_v32, -inf }
0x106a   :  { %4669 = vmax.xlane.f32.xlu0 %v4668_v41  ;;  %v7812_v50 = vpop.f32.mrb[98].mxu1  ;;  %v4662_v14 = vsel %vm1462_vm1, %v4631_v3, -inf }
0x106b   :  { %v4634_v29 = vpop.f32.mrb[99].mxu1  ;;  %v4671_v61 = vsel %vm1462_vm1, %v7812_v50, -inf }
0x106c   :  { %v4665_v60 = vsel %vm1462_vm1, %v4634_v29, -inf }
0x106d   :  { %4666 = vmax.xlane.f32.xlu1 %v4665_v60 }
0x106e   :  { %4663 = vmax.xlane.f32.xlu0 %v4662_v14 }
0x1070   :  { %v7815_v0 = vpop.f32.mrb[100].mxu1 }
0x1071   :  { %v10458_v19 = vpop.f32.mrb[101].mxu1  ;;  %v4680_v16 = vsel %vm1462_vm1, %v7815_v0, -inf }
0x1072   :  { %4672 = vmax.xlane.f32.xlu0 %v4671_v61  ;;  %v7816_v23 = vpop.f32.mrb[102].mxu1  ;;  %v4674_v41 = vsel %vm1462_vm1, %v10458_v19, -inf }
0x1073   :  { %v10461_v12 = vpop.f32.mrb[103].mxu1  ;;  %v4683_v60 = vsel %vm1462_vm1, %v7816_v23, -inf }
0x1076   :  { %4681 = vmax.xlane.f32.xlu0 %v4680_v16  ;;  %v4677_v16 = vsel %vm1462_vm1, %v10461_v12, -inf }
0x107a   :  { %4675 = vmax.xlane.f32.xlu0 %v4674_v41 }
0x107e   :  { %4901 = vrot.lane.b32.xlu1 %v9312_v2, %s8627_s26  ;;  %4684 = vmax.xlane.f32.xlu0 %v4683_v60 }
0x1082   :  { %4903 = vrot.lane.b32.xlu1 %v9329_v18, %s8627_s26 }
0x1094   :  { %4899 = vrot.lane.b32.xlu0 %v9293_v39, %s8627_s26 }
0x1098   :  { %4887 = vrot.lane.b32.xlu0 %v9184_v17, %s8627_s26 }
0x109c   :  { %4891 = vrot.lane.b32.xlu0 %v9202_v49, %s8627_s26 }
0x10a6   :  { %4678 = vmax.xlane.f32.xlu1 %v4677_v16 }
0x10b7   :  { %4905 = vrot.lane.b32.xlu1 %v9351_v10, %s8627_s26 }
0x10bb   :  { %4889 = vrot.lane.b32.xlu1 %v9192_v38, %s8627_s26 }
0x10bf   :  { %4893 = vrot.lane.b32.xlu1 %v12329_v13, %s8627_s26 }
0x10c3   :  { %5086 = vrot.lane.b32.xlu1 %v9803_v6, %s8627_s26 }
0x10c7   :  { %5088 = vrot.lane.b32.xlu1 %v9814_v58, %s8627_s26 }
0x10f7   :  { %v4670_v17 = vpop.xlane.xlu0 %4669 }
0x10f8   :  { %v4688_v39 = vsub.f32 %v7811_v32, %v4670_v17 }
0x10fa   :  { %v4667_v49 = vpop.xlane.xlu1 %4666  ;;  %v4698_v41 = vmul.f32 1.442695, %v4688_v39 }
0x10fb   :  { %v4687_v2 = vsub.f32 %v4634_v29, %v4667_v49  ;;  %v4664_v18 = vpop.xlane.xlu0 %4663 }
0x10fc   :  { %v4686_v61 = vsub.f32 %v4631_v3, %v4664_v18 }
0x10fd   :  { %v4696_v14 = vmul.f32 1.442695, %v4687_v2 }
0x10fe   :  { %v4694_v10 = vmul.f32 1.442695, %v4686_v61 }
0x10ff   :  { %8225 = vpow2.f32 %v4696_v14  ;;  %v4673_v38 = vpop.xlane.xlu0 %4672 }
0x1100   :  { %8227 = vpow2.f32 %v4694_v10  ;;  %v4689_v60 = vsub.f32 %v7812_v50, %v4673_v38 }
0x1101   :  { %8229 = vpow2.f32 %v4698_v41 }
0x1102   :  { %v4700_v13 = vmul.f32 1.442695, %v4689_v60 }
0x1103   :  { %v4682_v16 = vpop.xlane.xlu0 %4681 }
0x1104   :  { %8231 = vpow2.f32 %v4700_v13  ;;  %v4692_v6 = vsub.f32 %v7815_v0, %v4682_v16 }
0x1106   :  { %v4706_v32 = vmul.f32 1.442695, %v4692_v6 }
0x1107   :  { %v4676_v9 = vpop.xlane.xlu0 %4675 }
0x1108   :  { %8233 = vpow2.f32 %v4706_v32  ;;  %v4690_v13 = vsub.f32 %v10458_v19, %v4676_v9 }
0x1109   :  { %v10489_v58 = vpop.eup %8225 }
0x110a   :  { %v10491_v33 = vpop.eup %8227  ;;  %v4702_v16 = vmul.f32 1.442695, %v4690_v13 }
0x110b   :  { %12367 = vst [vmem:[#allocation156_spill] sm:$0xff] %v10491_v33  ;;  %v4685_v29 = vpop.xlane.xlu0 %4684  ;;  %v4742_v3 = vpack.c.bf16 %v10489_v58, %v10491_v33  ;;  %v10495_v49 = vpop.eup %8229 }
0x110c   :  { %v4693_v17 = vsub.f32 %v7816_v23, %v4685_v29  ;;  %12368 = vst [vmem:[#allocation157_spill] sm:$0xff] %v10495_v49  ;;  %v4902_v23 = vpop.permute.xlu1 %4901 }
0x110d   :  { %7825 = vmatprep.mubr.msk.bf16.mxu0 %vm1462_vm1, %v4742_v3  ;;  %v4923_v14 = vsel %vm1372_vm0, %v4902_v23, 0 }
0x110e   :  { %v10498_v50 = vpop.eup %8231  ;;  %v4708_v39 = vmul.f32 1.442695, %v4693_v17 }
0x110f   :  { %12369 = vst [vmem:[#allocation158_spill] sm:$0xff] %v10498_v50  ;;  %v4743_v0 = vpack.c.bf16 %v10498_v50, %v10495_v49  ;;  %v4900_v2 = vpop.permute.xlu0 %4899 }
0x1110   :  { %8235 = vpow2.f32 %v4708_v39  ;;  %8037 = vmatprep.subr.msk.bf16.mxu0 %vm1372_vm0, %v4900_v2  ;;  %v4920_v18 = vsel %vm1372_vm0, %v4900_v2, 0  ;;  %v4904_v41 = vpop.permute.xlu1 %4903 }
0x1111   :  { %7826 = vmatmul.mubr.msk.bf16.vlgmr.msra.gmra.mrb[160].mxu0 %vm1462_vm1, %v4743_v0  ;;  %v4926_v60 = vsel %vm1372_vm0, %v4904_v41, 0  ;;  %8237 = vpow2.f32 %v4702_v16 }
0x1112   :  { %7834 = vmatpush3.bf16.xpose.msra.mxu0 %v4920_v18  ;;  %v10506_v61 = vpop.eup %8233 }
0x1113   :  { %8038 = vmatprep.subr.msk.bf16.mxu0 %vm1372_vm0, %v4902_v23  ;;  %12370 = vst [vmem:[#allocation159_spill] sm:$0xff] %v10506_v61 }
0x111a   :  { %v10509_v10 = vpop.eup %8235  ;;  %7836 = vmatpush3.bf16.xpose.msra.mxu0 %v4923_v14 }
0x111b   :  { %12371 = vst [vmem:[#allocation160_spill] sm:$0xff] %v10509_v10  ;;  %8039 = vmatprep.subr.msk.bf16.mxu0 %vm1372_vm0, %v4904_v41  ;;  %v4745_v38 = vpack.c.bf16 %v10509_v10, %v10506_v61  ;;  %v10520_v39 = vpop.eup %8237 }
0x111c   :  { %12372 = vst [vmem:[#allocation161_spill] sm:$0xff] %v10520_v39 }
0x1122   :  { %7838 = vmatpush3.bf16.xpose.msra.mxu0 %v4926_v60 }
0x1133   :  { %v4679_v6 = vpop.xlane.xlu1 %4678 }
0x1134   :  { %v4691_v32 = vsub.f32 %v10461_v12, %v4679_v6  ;;  %v4888_v12 = vpop.permute.xlu0 %4887 }
0x1136   :  { %v4704_v29 = vmul.f32 1.442695, %v4691_v32 }
0x1137   :  { %v4906_v3 = vpop.permute.xlu1 %4905 }
0x1138   :  { %8239 = vpow2.f32 %v4704_v29  ;;  %8040 = vmatprep.subr.msk.bf16.mxu0 %vm1372_vm0, %v4906_v3  ;;  %v4929_v17 = vsel %vm1372_vm0, %v4906_v3, 0  ;;  %v4892_v2 = vpop.permute.xlu0 %4891 }
0x1139   :  { %7840 = vmatpush3.bf16.xpose.msra.mxu0 %v4929_v17 }
0x113a   :  { %7881 = vmatprep.subr.bf16.mxu0 %v9796_v54 }
0x113b   :  { %v4890_v19 = vpop.permute.xlu1 %4889 }
0x113f   :  { %v4894_v18 = vpop.permute.xlu1 %4893 }
0x1142   :  { %v10522_v0 = vpop.eup %8239 }
0x1143   :  { %12373 = vst [vmem:[#allocation162_spill] sm:$0xff] %v10522_v0  ;;  %v4744_v9 = vpack.c.bf16 %v10522_v0, %v10520_v39 }
0x1145   :  { %7829 = vmatprep.mubr.msk.bf16.mxu0 %vm1462_vm1, %v4744_v9 }
0x1146   :  { %7830 = vmatmul.mubr.msk.bf16.gmra.mrb[164].mxu0 %vm1462_vm1, %v4745_v38 }
0x1147   :  { %7841 = vmatprep.mubr.msk.bf16.mxu0 %vm1372_vm0, %v4888_v12 }
0x114e   :  { %7842 = vmatmul.mubr.msk.bf16.vlgmr.msra.gmra.mrb[168].mxu0 %vm1372_vm0, %v4890_v19 }
0x114f   :  { %7882 = vmatpush3.bf16.msra.mxu0 %v9796_v54  ;;  %7845 = vmatprep.mubr.msk.bf16.mxu0 %vm1372_vm0, %v4892_v2 }
0x1150   :  { %7883 = vmatprep.subr.bf16.mxu0 %v9806_v22 }
0x1153   :  { %7884 = vmatpush3.bf16.msra.mxu0 %v9806_v22 }
0x1154   :  { %7885 = vmatprep.subr.bf16.mxu0 %v9817_v47 }
0x1156   :  { %7846 = vmatmul.mubr.msk.bf16.gmra.mrb[172].mxu0 %vm1372_vm0, %v4894_v18 }
0x1157   :  { %7886 = vmatpush3.bf16.msra.mxu0 %v9817_v47 }
0x1158   :  { %7887 = vmatprep.subr.bf16.mxu0 %v9825_v55 }
0x115b   :  { %7888 = vmatpush3.bf16.msra.mxu0 %v9825_v55 }
0x11e4   :  { %v10539_v23 = vpop.f32.mrb[160].mxu0 }
0x11e5   :  { %12374 = vst [vmem:[#allocation163_spill] sm:$0xff] %v10539_v23  ;;  %v10541_v14 = vpop.f32.mrb[161].mxu0 }
0x11e6   :  { %12375 = vst [vmem:[#allocation164_spill] sm:$0xff] %v10541_v14  ;;  %v10543_v41 = vpop.f32.mrb[162].mxu0 }
0x11e7   :  { %12376 = vst [vmem:[#allocation165_spill] sm:$0xff] %v10543_v41  ;;  %v10545_v38 = vpop.f32.mrb[163].mxu0 }
0x11e8   :  { %12377 = vst [vmem:[#allocation166_spill] sm:$0xff] %v10545_v38 }
0x1219   :  { %v10547_v60 = vpop.f32.mrb[164].mxu0 }
0x121a   :  { %12378 = vst [vmem:[#allocation167_spill] sm:$0xff] %v10547_v60  ;;  %v10549_v13 = vpop.f32.mrb[165].mxu0 }
0x121b   :  { %12379 = vst [vmem:[#allocation168_spill] sm:$0xff] %v10549_v13  ;;  %v10551_v16 = vpop.f32.mrb[166].mxu0  ;;  %v5087_v13 = vpop.permute.xlu1 %5086 }
0x121c   :  { %12380 = vst [vmem:[#allocation169_spill] sm:$0xff] %v10551_v16  ;;  %v10553_v6 = vpop.f32.mrb[167].mxu0 }
0x121d   :  { %12381 = vst [vmem:[#allocation170_spill] sm:$0xff] %v10553_v6 }
0x1221   :  { %v7843_v32 = vpop.f32.mrb[168].mxu0 }
0x1222   :  { %v4965_v29 = vpop.f32.mrb[169].mxu0  ;;  %v5002_v3 = vsel %vm1462_vm1, %v7843_v32, -inf }
0x1223   :  { %5003 = vmax.xlane.f32.xlu0 %v5002_v3  ;;  %v7844_v17 = vpop.f32.mrb[170].mxu0  ;;  %v4996_v19 = vsel %vm1462_vm1, %v4965_v29, -inf }
0x1224   :  { %v4968_v9 = vpop.f32.mrb[171].mxu0  ;;  %v5005_v16 = vsel %vm1462_vm1, %v7844_v17, -inf }
0x1225   :  { %v4999_v12 = vsel %vm1462_vm1, %v4968_v9, -inf }
0x1226   :  { %5000 = vmax.xlane.f32.xlu1 %v4999_v12 }
0x1227   :  { %4997 = vmax.xlane.f32.xlu0 %v4996_v19 }
0x1229   :  { %v10558_v2 = vpop.f32.mrb[172].mxu0 }
0x122a   :  { %v10560_v18 = vpop.f32.mrb[173].mxu0  ;;  %v5014_v19 = vsel %vm1462_vm1, %v10558_v2, -inf }
0x122b   :  { %5006 = vmax.xlane.f32.xlu0 %v5005_v16  ;;  %v10563_v60 = vpop.f32.mrb[174].mxu0  ;;  %v5008_v12 = vsel %vm1462_vm1, %v10560_v18, -inf }
0x122c   :  { %v4984_v6 = vpop.f32.mrb[175].mxu0  ;;  %v5017_v16 = vsel %vm1462_vm1, %v10563_v60, -inf }
0x122d   :  { %v5011_v3 = vsel %vm1462_vm1, %v4984_v6, -inf }
0x1237   :  { %5090 = vrot.lane.b32.xlu1 %v9823_v36, %s8627_s26  ;;  %v5089_v36 = vpop.permute.xlu1 %5088 }
0x1241   :  { %5084 = vrot.lane.b32.xlu0 %v9793_v7, %s8627_s26 }
0x125b   :  { %5012 = vmax.xlane.f32.xlu1 %v5011_v3 }
0x1260   :  { %5009 = vmax.xlane.f32.xlu0 %v5008_v12 }
0x1264   :  { %5015 = vmax.xlane.f32.xlu0 %v5014_v19 }
0x1268   :  { %5018 = vmax.xlane.f32.xlu0 %v5017_v16 }
0x12b0   :  { %v5004_v41 = vpop.xlane.xlu0 %5003 }
0x12b1   :  { %v5022_v7 = vsub.f32 %v7843_v32, %v5004_v41  ;;  %v12387_v32 = vld [vmem:[#allocation21_spill] sm:$0xff] }
0x12b3   :  { %v5001_v23 = vpop.xlane.xlu1 %5000  ;;  %v5032_v61 = vmul.f32 1.442695, %v5022_v7 }
0x12b4   :  { %v5021_v38 = vsub.f32 %v4968_v9, %v5001_v23  ;;  %v4998_v14 = vpop.xlane.xlu0 %4997 }
0x12b5   :  { %v5020_v3 = vsub.f32 %v4965_v29, %v4998_v14  ;;  %v5236_v29 = vsel %vm1372_vm0, %v12387_v32, 0 }
0x12b6   :  { %v5030_v63 = vmul.f32 1.442695, %v5021_v38  ;;  %v12386_v38 = vld [vmem:[#allocation20_spill] sm:$0xff] }
0x12b7   :  { %v5028_v34 = vmul.f32 1.442695, %v5020_v3 }
0x12b8   :  { %8241 = vpow2.f32 %v5030_v63  ;;  %v5007_v12 = vpop.xlane.xlu0 %5006 }
0x12b9   :  { %8243 = vpow2.f32 %v5028_v34  ;;  %v5023_v24 = vsub.f32 %v7844_v17, %v5007_v12  ;;  %v5091_v34 = vpop.permute.xlu1 %5090  ;;  %v12388_v17 = vld [vmem:[#allocation22_spill] sm:$0xff] }
0x12ba   :  { %8245 = vpow2.f32 %v5032_v61  ;;  %v5239_v7 = vsel %vm1372_vm0, %v12388_v17, 0 }
0x12bb   :  { %v5034_v19 = vmul.f32 1.442695, %v5023_v24 }
0x12bc   :  { %v5085_v10 = vpop.permute.xlu0 %5084 }
0x12bd   :  { %8247 = vpow2.f32 %v5034_v19  ;;  %7849 = vmatprep.subr.bf16.mxu1 %v5085_v10 }
0x12be   :  { %7850 = vmatpush3.bf16.msra.mxu1 %v5085_v10  ;;  %v12385_v10 = vld [vmem:[#allocation19_spill] sm:$0xff] }
0x12bf   :  { %7851 = vmatprep.subr.bf16.mxu1 %v5087_v13  ;;  %v5230_v41 = vsel %vm1372_vm0, %v12385_v10, 0 }
0x12c2   :  { %v10576_v16 = vpop.eup %8241  ;;  %7852 = vmatpush3.bf16.msra.mxu1 %v5087_v13  ;;  %v5233_v13 = vsel %vm1372_vm0, %v12386_v38, 0 }
0x12c3   :  { %v10578_v23 = vpop.eup %8243  ;;  %7853 = vmatprep.subr.bf16.mxu1 %v5089_v36 }
0x12c4   :  { %12382 = vst [vmem:[#allocation171_spill] sm:$0xff] %v10578_v23  ;;  %v5076_v14 = vpack.c.bf16 %v10576_v16, %v10578_v23  ;;  %v10582_v63 = vpop.eup %8245 }
0x12c5   :  { %12383 = vst [vmem:[#allocation172_spill] sm:$0xff] %v10582_v63 }
0x12c6   :  { %7854 = vmatpush3.bf16.msra.mxu1 %v5089_v36  ;;  %7857 = vmatprep.mubr.msk.bf16.mxu1 %vm1462_vm1, %v5076_v14 }
0x12c7   :  { %v10585_v24 = vpop.eup %8247  ;;  %7855 = vmatprep.subr.bf16.mxu1 %v5091_v34 }
0x12c8   :  { %12384 = vst [vmem:[#allocation173_spill] sm:$0xff] %v10585_v24  ;;  %v5077_v61 = vpack.c.bf16 %v10585_v24, %v10582_v63 }
0x12ca   :  { %7856 = vmatpush3.bf16.msra.mxu1 %v5091_v34 }
0x12cb   :  { %8041 = vmatprep.subr.msk.bf16.mxu1 %vm1372_vm0, %v12385_v10 }
0x12cd   :  { %7858 = vmatmul.mubr.msk.bf16.vlgmr.msra.gmra.mrb[104].mxu1 %vm1462_vm1, %v5077_v61 }
0x12d3   :  { %7866 = vmatpush3.bf16.xpose.msra.mxu1 %v5230_v41 }
0x12d4   :  { %8042 = vmatprep.subr.msk.bf16.mxu1 %vm1372_vm0, %v12386_v38 }
0x12db   :  { %7868 = vmatpush3.bf16.xpose.msra.mxu1 %v5233_v13 }
0x12dc   :  { %8043 = vmatprep.subr.msk.bf16.mxu1 %vm1372_vm0, %v12387_v32 }
0x12e3   :  { %7870 = vmatpush3.bf16.xpose.msra.mxu1 %v5236_v29 }
0x12e4   :  { %8044 = vmatprep.subr.msk.bf16.mxu1 %vm1372_vm0, %v12388_v17 }
0x12e8   :  { %v5013_v9 = vpop.xlane.xlu1 %5012 }
0x12e9   :  { %v5025_v36 = vsub.f32 %v4984_v6, %v5013_v9 }
0x12eb   :  { %7872 = vmatpush3.bf16.xpose.msra.mxu1 %v5239_v7  ;;  %v5038_v3 = vmul.f32 1.442695, %v5025_v36 }
0x12ed   :  { %v5010_v12 = vpop.xlane.xlu0 %5009  ;;  %8249 = vpow2.f32 %v5038_v3  ;;  %v12395_v3 = vld [vmem:[#allocation16_spill] sm:$0xff] }
0x12ee   :  { %v5024_v19 = vsub.f32 %v10560_v18, %v5010_v12  ;;  %v12396_v12 = vld [vmem:[#allocation18_spill] sm:$0xff] }
0x12f0   :  { %v5036_v14 = vmul.f32 1.442695, %v5024_v19 }
0x12f1   :  { %v5016_v34 = vpop.xlane.xlu0 %5015 }
0x12f2   :  { %8251 = vpow2.f32 %v5036_v14  ;;  %v5026_v61 = vsub.f32 %v10558_v2, %v5016_v34 }
0x12f4   :  { %v5040_v41 = vmul.f32 1.442695, %v5026_v61 }
0x12f5   :  { %v5019_v13 = vpop.xlane.xlu0 %5018 }
0x12f6   :  { %v5027_v29 = vsub.f32 %v10563_v60, %v5019_v13  ;;  %8253 = vpow2.f32 %v5040_v41  ;;  %v12393_v60 = vld [vmem:[#allocation14_spill] sm:$0xff] }
0x12f7   :  { %v10609_v6 = vpop.eup %8249 }
0x12f8   :  { %v5042_v39 = vmul.f32 1.442695, %v5027_v29  ;;  %12389 = vst [vmem:[#allocation19_spill] sm:$0xff] %v10609_v6 }
0x12fa   :  { %8255 = vpow2.f32 %v5042_v39  ;;  %v12394_v39 = vld [vmem:[#allocation15_spill] sm:$0xff] }
0x12fc   :  { %v10611_v9 = vpop.eup %8251 }
0x12fd   :  { %12390 = vst [vmem:[#allocation20_spill] sm:$0xff] %v10611_v9  ;;  %v5078_v18 = vpack.c.bf16 %v10609_v6, %v10611_v9 }
0x12ff   :  { %7861 = vmatprep.mubr.msk.bf16.mxu1 %vm1462_vm1, %v5078_v18 }
0x1300   :  { %v10616_v36 = vpop.eup %8253 }
0x1301   :  { %12391 = vst [vmem:[#allocation21_spill] sm:$0xff] %v10616_v36 }
0x1304   :  { %v10618_v7 = vpop.eup %8255 }
0x1305   :  { %12392 = vst [vmem:[#allocation22_spill] sm:$0xff] %v10618_v7  ;;  %v5079_v2 = vpack.c.bf16 %v10618_v7, %v10616_v36 }
0x1307   :  { %7862 = vmatmul.mubr.msk.bf16.gmra.mrb[108].mxu1 %vm1462_vm1, %v5079_v2 }
0x1308   :  { %7873 = vmatprep.mubr.msk.bf16.mxu1 %vm1372_vm0, %v12393_v60 }
0x130f   :  { %7874 = vmatmul.mubr.msk.bf16.vlgmr.msra.gmra.mrb[112].mxu1 %vm1372_vm0, %v12394_v39 }
0x1310   :  { %7877 = vmatprep.mubr.msk.bf16.mxu1 %vm1372_vm0, %v12395_v3 }
0x1317   :  { %7878 = vmatmul.mubr.msk.bf16.gmra.mrb[116].mxu1 %vm1372_vm0, %v12396_v12 }
0x13a0   :  { %v10631_v19 = vpop.f32.mrb[104].mxu1 }
0x13a1   :  { %12397 = vst [vmem:[#allocation14_spill] sm:$0xff] %v10631_v19  ;;  %v10633_v14 = vpop.f32.mrb[105].mxu1 }
0x13a2   :  { %12398 = vst [vmem:[#allocation15_spill] sm:$0xff] %v10633_v14  ;;  %v10635_v34 = vpop.f32.mrb[106].mxu1 }
0x13a3   :  { %12399 = vst [vmem:[#allocation16_spill] sm:$0xff] %v10635_v34  ;;  %v10637_v61 = vpop.f32.mrb[107].mxu1 }
0x13a4   :  { %12400 = vst [vmem:[#allocation18_spill] sm:$0xff] %v10637_v61 }
0x13da   :  { %v10639_v41 = vpop.f32.mrb[108].mxu1 }
0x13db   :  { %12401 = vst [vmem:[#allocation174_spill] sm:$0xff] %v10639_v41  ;;  %v10641_v13 = vpop.f32.mrb[109].mxu1 }
0x13dc   :  { %12402 = vst [vmem:[#allocation175_spill] sm:$0xff] %v10641_v13  ;;  %v10643_v29 = vpop.f32.mrb[110].mxu1 }
0x13dd   :  { %12403 = vst [vmem:[#allocation176_spill] sm:$0xff] %v10643_v29  ;;  %v10645_v18 = vpop.f32.mrb[111].mxu1 }
0x13de   :  { %12404 = vst [vmem:[#allocation177_spill] sm:$0xff] %v10645_v18 }
0x13e2   :  { %v7875_v2 = vpop.f32.mrb[112].mxu1 }
0x13e3   :  { %v5275_v36 = vpop.f32.mrb[113].mxu1  ;;  %v5312_v7 = vsel %vm1462_vm1, %v7875_v2, -inf }
0x13e4   :  { %5313 = vmax.xlane.f32.xlu0 %v5312_v7  ;;  %v7876_v19 = vpop.f32.mrb[114].mxu1  ;;  %v5306_v34 = vsel %vm1462_vm1, %v5275_v36, -inf }
0x13e5   :  { %v5278_v9 = vpop.f32.mrb[115].mxu1  ;;  %v5315_v14 = vsel %vm1462_vm1, %v7876_v19, -inf }
0x13e6   :  { %5316 = vmax.xlane.f32.xlu1 %v5315_v14  ;;  %v5309_v41 = vsel %vm1462_vm1, %v5278_v9, -inf }
0x13e8   :  { %5307 = vmax.xlane.f32.xlu0 %v5306_v34 }
0x13ea   :  { %5310 = vmax.xlane.f32.xlu1 %v5309_v41  ;;  %v10651_v13 = vpop.f32.mrb[116].mxu1 }
0x13eb   :  { %v10653_v29 = vpop.f32.mrb[117].mxu1  ;;  %v5324_v18 = vsel %vm1462_vm1, %v10651_v13, -inf }
0x13ec   :  { %5325 = vmax.xlane.f32.xlu0 %v5324_v18  ;;  %v10657_v7 = vpop.f32.mrb[118].mxu1  ;;  %v5318_v14 = vsel %vm1462_vm1, %v10653_v29, -inf }
0x13ed   :  { %v10659_v61 = vpop.f32.mrb[119].mxu1  ;;  %v5327_v34 = vsel %vm1462_vm1, %v10657_v7, -inf }
0x13ee   :  { %v5321_v41 = vsel %vm1462_vm1, %v10659_v61, -inf }
0x13f0   :  { %5319 = vmax.xlane.f32.xlu0 %v5318_v14 }
0x13fb   :  { %5513 = vrot.lane.b32.xlu1 %v12386_v38, %s8628_s13 }
0x13ff   :  { %5515 = vrot.lane.b32.xlu1 %v12387_v32, %s8628_s13 }
0x1406   :  { %5511 = vrot.lane.b32.xlu0 %v12385_v10, %s8628_s13 }
0x140a   :  { %5499 = vrot.lane.b32.xlu0 %v12393_v60, %s8628_s13 }
0x140e   :  { %5503 = vrot.lane.b32.xlu0 %v12395_v3, %s8628_s13 }
0x1412   :  { %5696 = vrot.lane.b32.xlu0 %v9796_v54, %s8628_s13 }
0x1423   :  { %5328 = vmax.xlane.f32.xlu1 %v5327_v34 }
0x1427   :  { %5322 = vmax.xlane.f32.xlu1 %v5321_v41 }
0x1438   :  { %5517 = vrot.lane.b32.xlu1 %v12388_v17, %s8628_s13 }
0x143c   :  { %5501 = vrot.lane.b32.xlu1 %v12394_v39, %s8628_s13 }
0x1440   :  { %5505 = vrot.lane.b32.xlu1 %v12396_v12, %s8628_s13 }
0x1444   :  { %5698 = vrot.lane.b32.xlu1 %v9806_v22, %s8628_s13 }
0x1448   :  { %5700 = vrot.lane.b32.xlu1 %v9817_v47, %s8628_s13 }
0x144c   :  { %5702 = vrot.lane.b32.xlu1 %v9825_v55, %s8628_s13 }
0x1471   :  { %v5314_v18 = vpop.xlane.xlu0 %5313 }
0x1472   :  { %v5332_v14 = vsub.f32 %v7875_v2, %v5314_v18 }
0x1473   :  { %v5317_v34 = vpop.xlane.xlu1 %5316 }
0x1474   :  { %v5342_v41 = vmul.f32 1.442695, %v5332_v14  ;;  %v5333_v20 = vsub.f32 %v7876_v19, %v5317_v34 }
0x1475   :  { %v5308_v53 = vpop.xlane.xlu0 %5307 }
0x1476   :  { %v5344_v63 = vmul.f32 1.442695, %v5333_v20  ;;  %v5330_v6 = vsub.f32 %v5275_v36, %v5308_v53  ;;  %8257 = vpow2.f32 %v5342_v41 }
0x1477   :  { %v5311_v49 = vpop.xlane.xlu1 %5310 }
0x1478   :  { %8259 = vpow2.f32 %v5344_v63  ;;  %v5338_v0 = vmul.f32 1.442695, %v5330_v6  ;;  %v5331_v45 = vsub.f32 %v5278_v9, %v5311_v49 }
0x1479   :  { %v5326_v5 = vpop.xlane.xlu0 %5325 }
0x147a   :  { %v5340_v23 = vmul.f32 1.442695, %v5331_v45  ;;  %8261 = vpow2.f32 %v5338_v0  ;;  %v5336_v14 = vsub.f32 %v10651_v13, %v5326_v5 }
0x147c   :  { %8263 = vpow2.f32 %v5340_v23  ;;  %v5514_v23 = vpop.permute.xlu1 %5513  ;;  %v5350_v34 = vmul.f32 1.442695, %v5336_v14 }
0x147d   :  { %v5320_v24 = vpop.xlane.xlu0 %5319  ;;  %v5535_v36 = vsel %vm1372_vm0, %v5514_v23, 0 }
0x147e   :  { %8265 = vpow2.f32 %v5350_v34 }
0x1480   :  { %v10691_v33 = vpop.eup %8257  ;;  %v5516_v19 = vpop.permute.xlu1 %5515 }
0x1481   :  { %12405 = vst [vmem:[#allocation178_spill] sm:$0xff] %v10691_v33  ;;  %v5512_v50 = vpop.permute.xlu0 %5511  ;;  %v5538_v18 = vsel %vm1372_vm0, %v5516_v19, 0 }
0x1482   :  { %v10693_v2 = vpop.eup %8259  ;;  %8045 = vmatprep.subr.msk.bf16.mxu0 %vm1372_vm0, %v5512_v50  ;;  %v5532_v0 = vsel %vm1372_vm0, %v5512_v50, 0  ;;  %v5334_v50 = vsub.f32 %v10653_v29, %v5320_v24 }
0x1483   :  { %12406 = vst [vmem:[#allocation179_spill] sm:$0xff] %v10693_v2  ;;  %v5387_v20 = vpack.c.bf16 %v10693_v2, %v10691_v33  ;;  %v3099_v33 = vsel %vm1462_vm1, %v10005_v27, 0.0  ;;  %v2151_v27 = vsel %vm1462_vm1, %v9738_v31, 0.0  ;;  %v2148_v31 = vsel %vm1462_vm1, %v9736_v35, 0.0 }
0x1484   :  { %v10698_v53 = vpop.eup %8261  ;;  %v1822_v35 = vsel %vm1462_vm1, %v9727_v4, 0.0 }
0x1485   :  { %v5500_v63 = vpop.permute.xlu0 %5499 }
0x1486   :  { %v10700_v6 = vpop.eup %8263 }
0x1487   :  { %v5386_v45 = vpack.c.bf16 %v10700_v6, %v10698_v53 }
0x1488   :  { %v10717_v13 = vpop.eup %8265 }
0x1489   :  { %7889 = vmatprep.mubr.msk.bf16.mxu0 %vm1462_vm1, %v5386_v45  ;;  %v5504_v49 = vpop.permute.xlu0 %5503  ;;  %12407 = vst [vmem:[#allocation180_spill] sm:$0xff] %v10717_v13 }
0x148a   :  { %7890 = vmatmul.mubr.msk.bf16.vlgmr.msra.gmra.mrb[176].mxu0 %vm1462_vm1, %v5387_v20 }
0x148b   :  { %7898 = vmatpush3.bf16.xpose.msra.mxu0 %v5532_v0  ;;  %v5346_v0 = vmul.f32 1.442695, %v5334_v50 }
0x148c   :  { %8046 = vmatprep.subr.msk.bf16.mxu0 %vm1372_vm0, %v5514_v23 }
0x148d   :  { %v5697_v9 = vpop.permute.xlu0 %5696 }
0x148e   :  { %7913 = vmatprep.subr.bf16.mxu1 %v5697_v9 }
0x148f   :  { %7914 = vmatpush3.bf16.msra.mxu1 %v5697_v9 }
0x1493   :  { %7900 = vmatpush3.bf16.xpose.msra.mxu0 %v5535_v36 }
0x1494   :  { %8047 = vmatprep.subr.msk.bf16.mxu0 %vm1372_vm0, %v5516_v19 }
0x149b   :  { %7902 = vmatpush3.bf16.xpose.msra.mxu0 %v5538_v18 }
0x14b0   :  { %v5329_v41 = vpop.xlane.xlu1 %5328 }
0x14b1   :  { %v5337_v20 = vsub.f32 %v10657_v7, %v5329_v41 }
0x14b3   :  { %v5352_v45 = vmul.f32 1.442695, %v5337_v20 }
0x14b4   :  { %v5323_v9 = vpop.xlane.xlu1 %5322 }
0x14b5   :  { %8267 = vpow2.f32 %v5352_v45  ;;  %v5335_v23 = vsub.f32 %v10659_v61, %v5323_v9 }
0x14b6   :  { %8269 = vpow2.f32 %v5346_v0 }
0x14b7   :  { %v5348_v36 = vmul.f32 1.442695, %v5335_v23 }
0x14b8   :  { %v5518_v2 = vpop.permute.xlu1 %5517 }
0x14b9   :  { %8271 = vpow2.f32 %v5348_v36  ;;  %8048 = vmatprep.subr.msk.bf16.mxu0 %vm1372_vm0, %v5518_v2  ;;  %v5541_v5 = vsel %vm1372_vm0, %v5518_v2, 0 }
0x14ba   :  { %7904 = vmatpush3.bf16.xpose.msra.mxu0 %v5541_v5 }
0x14bc   :  { %v5502_v24 = vpop.permute.xlu1 %5501 }
0x14bf   :  { %v10719_v29 = vpop.eup %8267 }
0x14c0   :  { %12408 = vst [vmem:[#allocation181_spill] sm:$0xff] %v10719_v29  ;;  %v5506_v7 = vpop.permute.xlu1 %5505  ;;  %v5389_v19 = vpack.c.bf16 %v10719_v29, %v10717_v13  ;;  %v10723_v18 = vpop.eup %8269 }
0x14c1   :  { %12409 = vst [vmem:[#allocation182_spill] sm:$0xff] %v10723_v18 }
0x14c3   :  { %v10725_v61 = vpop.eup %8271 }
0x14c4   :  { %12410 = vst [vmem:[#allocation183_spill] sm:$0xff] %v10725_v61  ;;  %v5699_v14 = vpop.permute.xlu1 %5698  ;;  %v5388_v34 = vpack.c.bf16 %v10725_v61, %v10723_v18 }
0x14c5   :  { %7915 = vmatprep.subr.bf16.mxu1 %v5699_v14 }
0x14c6   :  { %7893 = vmatprep.mubr.msk.bf16.mxu0 %vm1462_vm1, %v5388_v34  ;;  %7916 = vmatpush3.bf16.msra.mxu1 %v5699_v14 }
0x14c7   :  { %7894 = vmatmul.mubr.msk.bf16.gmra.mrb[180].mxu0 %vm1462_vm1, %v5389_v19 }
0x14c8   :  { %7905 = vmatprep.mubr.msk.bf16.mxu0 %vm1372_vm0, %v5500_v63  ;;  %v5701_v2 = vpop.permute.xlu1 %5700 }
0x14c9   :  { %7917 = vmatprep.subr.bf16.mxu1 %v5701_v2 }
0x14ca   :  { %7918 = vmatpush3.bf16.msra.mxu1 %v5701_v2 }
0x14cc   :  { %v5703_v50 = vpop.permute.xlu1 %5702 }
0x14cd   :  { %7919 = vmatprep.subr.bf16.mxu1 %v5703_v50 }
0x14ce   :  { %7920 = vmatpush3.bf16.msra.mxu1 %v5703_v50 }
0x14cf   :  { %7906 = vmatmul.mubr.msk.bf16.vlgmr.msra.gmra.mrb[184].mxu0 %vm1372_vm0, %v5502_v24 }
0x14d0   :  { %7909 = vmatprep.mubr.msk.bf16.mxu0 %vm1372_vm0, %v5504_v49 }
0x14d7   :  { %7910 = vmatmul.mubr.msk.bf16.gmra.mrb[188].mxu0 %vm1372_vm0, %v5506_v7 }
0x155d   :  { %v10735_v41 = vpop.f32.mrb[176].mxu0 }
0x155e   :  { %12411 = vst [vmem:[#allocation184_spill] sm:$0xff] %v10735_v41  ;;  %v10737_v20 = vpop.f32.mrb[177].mxu0 }
0x155f   :  { %12412 = vst [vmem:[#allocation185_spill] sm:$0xff] %v10737_v20  ;;  %v10739_v45 = vpop.f32.mrb[178].mxu0 }
0x1560   :  { %12413 = vst [vmem:[#allocation186_spill] sm:$0xff] %v10739_v45  ;;  %v10741_v0 = vpop.f32.mrb[179].mxu0 }
0x1561   :  { %12414 = vst [vmem:[#allocation187_spill] sm:$0xff] %v10741_v0 }
0x159a   :  { %v10743_v63 = vpop.f32.mrb[180].mxu0 }
0x159b   :  { %12415 = vst [vmem:[#allocation188_spill] sm:$0xff] %v10743_v63  ;;  %v10745_v9 = vpop.f32.mrb[181].mxu0 }
0x159c   :  { %12416 = vst [vmem:[#allocation189_spill] sm:$0xff] %v10745_v9  ;;  %v10747_v23 = vpop.f32.mrb[182].mxu0 }
0x159d   :  { %12417 = vst [vmem:[#allocation190_spill] sm:$0xff] %v10747_v23  ;;  %v10749_v36 = vpop.f32.mrb[183].mxu0 }
0x159e   :  { %12418 = vst [vmem:[#allocation191_spill] sm:$0xff] %v10749_v36 }
0x15a2   :  { %v7907_v5 = vpop.f32.mrb[184].mxu0 }
0x15a3   :  { %v5577_v49 = vpop.f32.mrb[185].mxu0  ;;  %v5614_v24 = vsel %vm1462_vm1, %v7907_v5, -inf }
0x15a4   :  { %5615 = vmax.xlane.f32.xlu0 %v5614_v24  ;;  %v7908_v7 = vpop.f32.mrb[186].mxu0  ;;  %v5608_v34 = vsel %vm1462_vm1, %v5577_v49, -inf }
0x15a5   :  { %v5580_v19 = vpop.f32.mrb[187].mxu0  ;;  %v5617_v23 = vsel %vm1462_vm1, %v7908_v7, -inf }
0x15a6   :  { %v5611_v14 = vsel %vm1462_vm1, %v5580_v19, -inf }
0x15a7   :  { %5612 = vmax.xlane.f32.xlu1 %v5611_v14 }
0x15a8   :  { %5609 = vmax.xlane.f32.xlu0 %v5608_v34 }
0x15aa   :  { %v7911_v2 = vpop.f32.mrb[188].mxu0 }
0x15ab   :  { %v10754_v50 = vpop.f32.mrb[189].mxu0  ;;  %v5626_v24 = vsel %vm1462_vm1, %v7911_v2, -inf }
0x15ac   :  { %5618 = vmax.xlane.f32.xlu0 %v5617_v23  ;;  %v10757_v63 = vpop.f32.mrb[190].mxu0  ;;  %v5620_v9 = vsel %vm1462_vm1, %v10754_v50, -inf }
0x15ad   :  { %v10759_v36 = vpop.f32.mrb[191].mxu0  ;;  %v5629_v14 = vsel %vm1462_vm1, %v10757_v63, -inf }
0x15b0   :  { %5627 = vmax.xlane.f32.xlu0 %v5626_v24 }
0x15b4   :  { %5621 = vmax.xlane.f32.xlu0 %v5620_v9  ;;  %v5623_v9 = vsel %vm1462_vm1, %v10759_v36, -inf }
0x15b8   :  { %5847 = vrot.lane.b32.xlu1 %v12386_v38, %s8629_s14  ;;  %5630 = vmax.xlane.f32.xlu0 %v5629_v14 }
0x15bc   :  { %5849 = vrot.lane.b32.xlu1 %v12387_v32, %s8629_s14 }
0x15ce   :  { %5845 = vrot.lane.b32.xlu0 %v12385_v10, %s8629_s14 }
0x15d2   :  { %5833 = vrot.lane.b32.xlu0 %v12393_v60, %s8629_s14 }
0x15d6   :  { %5837 = vrot.lane.b32.xlu0 %v12395_v3, %s8629_s14 }
0x15da   :  { %6030 = vrot.lane.b32.xlu0 %v9796_v54, %s8629_s14 }
0x15de   :  { %6179 = vrot.lane.b32.xlu0 %v12385_v10, %s8627_s26 }
0x15e0   :  { %5624 = vmax.xlane.f32.xlu1 %v5623_v9 }
0x15e2   :  { %6167 = vrot.lane.b32.xlu0 %v12393_v60, %s8627_s26 }
0x15e6   :  { %6171 = vrot.lane.b32.xlu0 %v12395_v3, %s8627_s26 }
0x15ea   :  { %6364 = vrot.lane.b32.xlu0 %v9796_v54, %s8627_s26  ;;  %v3096_v54 = vsel %vm1462_vm1, %v10007_v40, 0.0 }
0x15ee   :  { %6368 = vrot.lane.b32.xlu0 %v9817_v47, %s8627_s26 }
0x15f1   :  { %5851 = vrot.lane.b32.xlu1 %v12388_v17, %s8629_s14 }
0x15f5   :  { %5835 = vrot.lane.b32.xlu1 %v12394_v39, %s8629_s14 }
0x15f9   :  { %5839 = vrot.lane.b32.xlu1 %v12396_v12, %s8629_s14 }
0x15fd   :  { %6032 = vrot.lane.b32.xlu1 %v9806_v22, %s8629_s14 }
0x1601   :  { %6034 = vrot.lane.b32.xlu1 %v9817_v47, %s8629_s14 }
0x1605   :  { %6036 = vrot.lane.b32.xlu1 %v9825_v55, %s8629_s14 }
0x1609   :  { %6181 = vrot.lane.b32.xlu1 %v12386_v38, %s8627_s26 }
0x160d   :  { %3097 = vadd.xlane.f32.xlu0 %v3096_v54  ;;  %6183 = vrot.lane.b32.xlu1 %v12387_v32, %s8627_s26 }
0x1611   :  { %6185 = vrot.lane.b32.xlu1 %v12388_v17, %s8627_s26 }
0x1615   :  { %6169 = vrot.lane.b32.xlu1 %v12394_v39, %s8627_s26 }
0x1619   :  { %6173 = vrot.lane.b32.xlu1 %v12396_v12, %s8627_s26 }
0x161d   :  { %6366 = vrot.lane.b32.xlu1 %v9806_v22, %s8627_s26 }
0x1621   :  { %6370 = vrot.lane.b32.xlu1 %v9825_v55, %s8627_s26 }
0x1631   :  { %v5616_v47 = vpop.xlane.xlu0 %5615 }
0x1632   :  { %v5634_v10 = vsub.f32 %v7907_v5, %v5616_v47 }
0x1634   :  { %v5613_v40 = vpop.xlane.xlu1 %5612  ;;  %v5644_v23 = vmul.f32 1.442695, %v5634_v10 }
0x1635   :  { %v5633_v38 = vsub.f32 %v5580_v19, %v5613_v40  ;;  %v5610_v32 = vpop.xlane.xlu0 %5609 }
0x1636   :  { %v5632_v60 = vsub.f32 %v5577_v49, %v5610_v32 }
0x1637   :  { %v5642_v3 = vmul.f32 1.442695, %v5633_v38 }
0x1638   :  { %v5640_v17 = vmul.f32 1.442695, %v5632_v60 }
0x1639   :  { %8273 = vpow2.f32 %v5642_v3  ;;  %v5619_v39 = vpop.xlane.xlu0 %5618 }
0x163a   :  { %8275 = vpow2.f32 %v5640_v17  ;;  %v5635_v34 = vsub.f32 %v7908_v7, %v5619_v39 }
0x163b   :  { %8277 = vpow2.f32 %v5644_v23 }
0x163c   :  { %v5646_v12 = vmul.f32 1.442695, %v5635_v34 }
0x163d   :  { %v5628_v24 = vpop.xlane.xlu0 %5627 }
0x163e   :  { %8279 = vpow2.f32 %v5646_v12  ;;  %v5638_v22 = vsub.f32 %v7911_v2, %v5628_v24 }
0x1640   :  { %v5652_v5 = vmul.f32 1.442695, %v5638_v22 }
0x1641   :  { %v5622_v14 = vpop.xlane.xlu0 %5621 }
0x1642   :  { %8281 = vpow2.f32 %v5652_v5 }
0x1643   :  { %v10818_v55 = vpop.eup %8273 }
0x1644   :  { %v10820_v9 = vpop.eup %8275 }
0x1645   :  { %v5631_v19 = vpop.xlane.xlu0 %5630  ;;  %v5688_v49 = vpack.c.bf16 %v10818_v55, %v10820_v9  ;;  %v10825_v47 = vpop.eup %8277 }
0x1646   :  { %v5639_v54 = vsub.f32 %v10757_v63, %v5631_v19  ;;  %v5848_v63 = vpop.permute.xlu1 %5847  ;;  %v5636_v19 = vsub.f32 %v10754_v50, %v5622_v14 }
0x1647   :  { %7921 = vmatprep.mubr.msk.bf16.mxu1 %vm1462_vm1, %v5688_v49  ;;  %v5869_v17 = vsel %vm1372_vm0, %v5848_v63, 0 }
0x1648   :  { %v10828_v7 = vpop.eup %8279  ;;  %v5654_v40 = vmul.f32 1.442695, %v5639_v54  ;;  %v5648_v49 = vmul.f32 1.442695, %v5636_v19 }
0x1649   :  { %v5689_v2 = vpack.c.bf16 %v10828_v7, %v10825_v47  ;;  %v5846_v10 = vpop.permute.xlu0 %5845 }
0x164a   :  { %8283 = vpow2.f32 %v5654_v40  ;;  %8049 = vmatprep.subr.msk.bf16.mxu1 %vm1372_vm0, %v5846_v10  ;;  %v5866_v38 = vsel %vm1372_vm0, %v5846_v10, 0  ;;  %v5850_v39 = vpop.permute.xlu1 %5849 }
0x164b   :  { %7922 = vmatmul.mubr.msk.bf16.vlgmr.msra.gmra.mrb[120].mxu1 %vm1462_vm1, %v5689_v2  ;;  %v5872_v24 = vsel %vm1372_vm0, %v5850_v39, 0  ;;  %8285 = vpow2.f32 %v5648_v49 }
0x164c   :  { %7930 = vmatpush3.bf16.xpose.msra.mxu1 %v5866_v38  ;;  %v10836_v3 = vpop.eup %8281 }
0x164d   :  { %8050 = vmatprep.subr.msk.bf16.mxu1 %vm1372_vm0, %v5848_v63  ;;  %v5834_v32 = vpop.permute.xlu0 %5833 }
0x1651   :  { %v5838_v60 = vpop.permute.xlu0 %5837 }
0x1654   :  { %v10839_v23 = vpop.eup %8283  ;;  %7932 = vmatpush3.bf16.xpose.msra.mxu1 %v5869_v17 }
0x1655   :  { %8051 = vmatprep.subr.msk.bf16.mxu1 %vm1372_vm0, %v5850_v39  ;;  %v6031_v34 = vpop.permute.xlu0 %6030  ;;  %v5691_v12 = vpack.c.bf16 %v10839_v23, %v10836_v3  ;;  %v10855_v50 = vpop.eup %8285 }
0x1656   :  { %7945 = vmatprep.subr.bf16.mxu0 %v6031_v34 }
0x1657   :  { %7946 = vmatpush3.bf16.msra.mxu0 %v6031_v34 }
0x1659   :  { %v10845_v22 = vpop.permute.xlu0 %6179 }
0x165c   :  { %7934 = vmatpush3.bf16.xpose.msra.mxu1 %v5872_v24 }
0x165d   :  { %v10847_v5 = vpop.permute.xlu0 %6167 }
0x1661   :  { %v10850_v54 = vpop.permute.xlu0 %6171 }
0x1665   :  { %v6365_v17 = vpop.permute.xlu0 %6364 }
0x166d   :  { %v5625_v40 = vpop.xlane.xlu1 %5624 }
0x166e   :  { %v5637_v2 = vsub.f32 %v10759_v36, %v5625_v40 }
0x1670   :  { %v5650_v10 = vmul.f32 1.442695, %v5637_v2 }
0x1671   :  { %v5852_v38 = vpop.permute.xlu1 %5851 }
0x1672   :  { %8287 = vpow2.f32 %v5650_v10  ;;  %8052 = vmatprep.subr.msk.bf16.mxu1 %vm1372_vm0, %v5852_v38  ;;  %v5875_v63 = vsel %vm1372_vm0, %v5852_v38, 0 }
0x1673   :  { %7936 = vmatpush3.bf16.xpose.msra.mxu1 %v5875_v63  ;;  %v6369_v63 = vpop.permute.xlu0 %6368 }
0x1674   :  { %7977 = vmatprep.subr.bf16.mxu1 %v6365_v17 }
0x1675   :  { %v5836_v39 = vpop.permute.xlu1 %5835 }
0x1679   :  { %v5840_v34 = vpop.permute.xlu1 %5839 }
0x167c   :  { %v10857_v14 = vpop.eup %8287 }
0x167d   :  { %v6033_v24 = vpop.permute.xlu1 %6032  ;;  %v5690_v36 = vpack.c.bf16 %v10857_v14, %v10855_v50 }
0x167e   :  { %7947 = vmatprep.subr.bf16.mxu0 %v6033_v24 }
0x167f   :  { %7925 = vmatprep.mubr.msk.bf16.mxu1 %vm1462_vm1, %v5690_v36  ;;  %7948 = vmatpush3.bf16.msra.mxu0 %v6033_v24 }
0x1680   :  { %7926 = vmatmul.mubr.msk.bf16.gmra.mrb[124].mxu1 %vm1462_vm1, %v5691_v12 }
0x1681   :  { %7937 = vmatprep.mubr.msk.bf16.mxu1 %vm1372_vm0, %v5834_v32  ;;  %v6035_v19 = vpop.permute.xlu1 %6034 }
0x1682   :  { %7949 = vmatprep.subr.bf16.mxu0 %v6035_v19 }
0x1683   :  { %7950 = vmatpush3.bf16.msra.mxu0 %v6035_v19 }
0x1685   :  { %v6037_v49 = vpop.permute.xlu1 %6036 }
0x1686   :  { %7951 = vmatprep.subr.bf16.mxu0 %v6037_v49 }
0x1687   :  { %7952 = vmatpush3.bf16.msra.mxu0 %v6037_v49 }
0x1688   :  { %7938 = vmatmul.mubr.msk.bf16.vlgmr.msra.gmra.mrb[128].mxu1 %vm1372_vm0, %v5836_v39  ;;  %8053 = vmatprep.subr.msk.bf16.mxu0 %vm1372_vm0, %v10845_v22 }
0x1689   :  { %7978 = vmatpush3.bf16.msra.mxu1 %v6365_v17  ;;  %7941 = vmatprep.mubr.msk.bf16.mxu1 %vm1372_vm0, %v5838_v60  ;;  %v10868_v40 = vpop.permute.xlu1 %6181 }
0x168d   :  { %v10870_v2 = vpop.permute.xlu1 %6183 }
0x1690   :  { %7942 = vmatmul.mubr.msk.bf16.gmra.mrb[132].mxu1 %vm1372_vm0, %v5840_v34 }
0x1691   :  { %v10873_v32 = vpop.permute.xlu1 %6185 }
0x1695   :  { %v10875_v12 = vpop.permute.xlu1 %6169 }
0x1699   :  { %v10877_v10 = vpop.permute.xlu1 %6173 }
0x169d   :  { %v6367_v38 = vpop.permute.xlu1 %6366 }
0x169e   :  { %7979 = vmatprep.subr.bf16.mxu1 %v6367_v38 }
0x169f   :  { %7980 = vmatpush3.bf16.msra.mxu1 %v6367_v38 }
0x16a0   :  { %7981 = vmatprep.subr.bf16.mxu1 %v6369_v63 }
0x16a1   :  { %v6371_v17 = vpop.permute.xlu1 %6370 }
0x16a3   :  { %7982 = vmatpush3.bf16.msra.mxu1 %v6369_v63 }
0x16a4   :  { %7983 = vmatprep.subr.bf16.mxu1 %v6371_v17 }
0x16a7   :  { %7984 = vmatpush3.bf16.msra.mxu1 %v6371_v17 }
0x171e   :  { %v10879_v60 = vpop.f32.mrb[120].mxu1 }
0x171f   :  { %v10881_v39 = vpop.f32.mrb[121].mxu1 }
0x1720   :  { %v10883_v34 = vpop.f32.mrb[122].mxu1 }
0x1721   :  { %v10885_v24 = vpop.f32.mrb[123].mxu1 }
0x1753   :  { %v10887_v36 = vpop.f32.mrb[124].mxu1 }
0x1754   :  { %v10889_v19 = vpop.f32.mrb[125].mxu1 }
0x1755   :  { %v10891_v49 = vpop.f32.mrb[126].mxu1 }
0x1756   :  { %12419 = vst [vmem:[#allocation192_spill] sm:$0xff] %v10891_v49  ;;  %v10893_v38 = vpop.f32.mrb[127].mxu1 }
0x175b   :  { %v10895_v29 = vpop.f32.mrb[128].mxu1 }
0x175c   :  { %v10897_v63 = vpop.f32.mrb[129].mxu1  ;;  %v5948_v17 = vsel %vm1462_vm1, %v10895_v29, -inf }
0x175d   :  { %5949 = vmax.xlane.f32.xlu0 %v5948_v17  ;;  %v10901_v45 = vpop.f32.mrb[130].mxu1  ;;  %v5942_v61 = vsel %vm1462_vm1, %v10897_v63, -inf }
0x175e   :  { %v10903_v41 = vpop.f32.mrb[131].mxu1  ;;  %v5951_v17 = vsel %vm1462_vm1, %v10901_v45, -inf }
0x175f   :  { %v5945_v13 = vsel %vm1462_vm1, %v10903_v41, -inf }
0x1760   :  { %5946 = vmax.xlane.f32.xlu1 %v5945_v13  ;;  %v3433_v13 = vsel %vm1462_vm1, %v10097_v42, 0.0  ;;  %v3430_v42 = vsel %vm1462_vm1, %v10099_v26, 0.0  ;;  %v3105_v26 = vsel %vm1462_vm1, %v10014_v1, 0.0 }
0x1761   :  { %5943 = vmax.xlane.f32.xlu0 %v5942_v61  ;;  %v1813_v61 = vsel %vm1462_vm1, %v9720_v37, 0.0  ;;  %v2486_v37 = vsel %vm1462_vm1, %v9653_v21, 0.0  ;;  %v2483_v21 = vsel %vm1462_vm1, %v9655_v57, 0.0  ;;  %v2157_v57 = vsel %vm1462_vm1, %v9758_v8, 0.0 }
0x1762   :  { %v1819_v8 = vsel %vm1462_vm1, %v9730_v52, 0.0 }
0x1763   :  { %v10909_v18 = vpop.f32.mrb[132].mxu1 }
0x1764   :  { %3100 = vadd.xlane.f32.xlu1 %v3099_v33  ;;  %v10913_v0 = vpop.f32.mrb[133].mxu1  ;;  %v1816_v33 = vsel %vm1462_vm1, %v9717_v25, 0.0  ;;  %v5960_v1 = vsel %vm1462_vm1, %v10909_v18, -inf }
0x1765   :  { %5952 = vmax.xlane.f32.xlu0 %v5951_v17  ;;  %v10917_v20 = vpop.f32.mrb[134].mxu1  ;;  %v3767_v17 = vsel %vm1462_vm1, %v10184_v48, 0.0  ;;  %v3764_v48 = vsel %vm1462_vm1, %v10186_v15, 0.0  ;;  %v3439_v15 = vsel %vm1462_vm1, %v10106_v56, 0.0  ;;  %v5954_v4 = vsel %vm1462_vm1, %v10913_v0, -inf }
0x1766   :  { %v10919_v49 = vpop.f32.mrb[135].mxu1  ;;  %v5963_v56 = vsel %vm1462_vm1, %v10917_v20, -inf }
0x1767   :  { %v5957_v25 = vsel %vm1462_vm1, %v10919_v49, -inf }
0x1768   :  { %3434 = vadd.xlane.f32.xlu1 %v3433_v13  ;;  %v3102_v13 = vsel %vm1462_vm1, %v10011_v59, 0.0  ;;  %v3773_v59 = vsel %vm1462_vm1, %v10193_v44, 0.0  ;;  %v3436_v44 = vsel %vm1462_vm1, %v10103_v28, 0.0 }
0x1769   :  { %1814 = vadd.xlane.f32.xlu0 %v1813_v61  ;;  %v2492_v61 = vsel %vm1462_vm1, %v9664_v51, 0.0 }
0x176c   :  { %2152 = vadd.xlane.f32.xlu1 %v2151_v27  ;;  %v3111_v27 = vsel %vm1462_vm1, %v10037_v11, 0.0 }
0x176d   :  { %1817 = vadd.xlane.f32.xlu0 %v1816_v33  ;;  %v1828_v33 = vsel %vm1462_vm1, %v9732_v43, 0.0 }
0x1770   :  { %3768 = vadd.xlane.f32.xlu1 %v3767_v17  ;;  %v12420_v17 = vld [vmem:[#allocation47_spill] sm:$0xff] }
0x1771   :  { %3431 = vadd.xlane.f32.xlu0 %v3430_v42  ;;  %v2154_v51 = vsel %vm1462_vm1, %v12420_v17, 0.0  ;;  %v12421_v42 = vld [vmem:[#allocation106_spill] sm:$0xff]  ;;  %v12433_v17 = vld [vmem:[#allocation104_spill] sm:$0xff] }
0x1772   :  { %v3445_v52 = vsel %vm1462_vm1, %v12421_v42, 0.0  ;;  %v12434_v42 = vld [vmem:[#allocation117_spill] sm:$0xff] }
0x1774   :  { %2487 = vadd.xlane.f32.xlu1 %v2486_v37  ;;  %v12422_v37 = vld [vmem:[#allocation115_spill] sm:$0xff] }
0x1775   :  { %2149 = vadd.xlane.f32.xlu0 %v2148_v31  ;;  %v3770_v11 = vsel %vm1462_vm1, %v12422_v37, 0.0  ;;  %v12423_v31 = vld [vmem:[#allocation48_spill] sm:$0xff]  ;;  %v12435_v37 = vld [vmem:[#allocation51_spill] sm:$0xff] }
0x1776   :  { %v2163_v28 = vsel %vm1462_vm1, %v12423_v31, 0.0  ;;  %v12436_v31 = vld [vmem:[#allocation41_spill] sm:$0xff] }
0x1778   :  { %5958 = vmax.xlane.f32.xlu1 %v5957_v25  ;;  %v12424_v25 = vld [vmem:[#allocation39_spill] sm:$0xff] }
0x1779   :  { %3765 = vadd.xlane.f32.xlu0 %v3764_v48  ;;  %v2489_v43 = vsel %vm1462_vm1, %v12424_v25, 0.0  ;;  %v12425_v48 = vld [vmem:[#allocation116_spill] sm:$0xff]  ;;  %v12437_v25 = vld [vmem:[#allocation119_spill] sm:$0xff] }
0x177c   :  { %3106 = vadd.xlane.f32.xlu1 %v3105_v26  ;;  %v3779_v26 = vsel %vm1462_vm1, %v12425_v48, 0.0  ;;  %v12438_v48 = vld [vmem:[#allocation92_spill] sm:$0xff] }
0x177d   :  { %2484 = vadd.xlane.f32.xlu0 %v2483_v21  ;;  %v12426_v21 = vld [vmem:[#allocation94_spill] sm:$0xff] }
0x1780   :  { %1823 = vadd.xlane.f32.xlu1 %v1822_v35  ;;  %v3108_v35 = vsel %vm1462_vm1, %v12426_v21, 0.0  ;;  %v12439_v21 = vld [vmem:[#allocation43_spill] sm:$0xff] }
0x1781   :  { %3103 = vadd.xlane.f32.xlu0 %v3102_v13  ;;  %v12427_v13 = vld [vmem:[#allocation40_spill] sm:$0xff] }
0x1784   :  { %3440 = vadd.xlane.f32.xlu1 %v3439_v15  ;;  %v2498_v15 = vsel %vm1462_vm1, %v12427_v13, 0.0  ;;  %v12440_v13 = vld [vmem:[#allocation46_spill] sm:$0xff] }
0x1785   :  { %5961 = vmax.xlane.f32.xlu0 %v5960_v1  ;;  %v12428_v1 = vld [vmem:[#allocation44_spill] sm:$0xff] }
0x1788   :  { %2158 = vadd.xlane.f32.xlu1 %v2157_v57  ;;  %v1825_v57 = vsel %vm1462_vm1, %v12428_v1, 0.0  ;;  %v5659_v1 = vsel %vm1462_vm1, %v10818_v55, 0.0 }
0x1789   :  { %5955 = vmax.xlane.f32.xlu0 %v5954_v4  ;;  %v12429_v4 = vld [vmem:[#allocation93_spill] sm:$0xff] }
0x178c   :  { %3774 = vadd.xlane.f32.xlu1 %v3773_v59  ;;  %v3117_v59 = vsel %vm1462_vm1, %v12429_v4, 0.0 }
0x178d   :  { %5964 = vmax.xlane.f32.xlu0 %v5963_v56  ;;  %v12430_v56 = vld [vmem:[#allocation105_spill] sm:$0xff] }
0x1790   :  { %2493 = vadd.xlane.f32.xlu1 %v2492_v61  ;;  %v3442_v61 = vsel %vm1462_vm1, %v12430_v56, 0.0  ;;  %v12442_v56 = vld [vmem:[#allocation50_spill] sm:$0xff] }
0x1791   :  { %1820 = vadd.xlane.f32.xlu0 %v1819_v8  ;;  %v12431_v8 = vld [vmem:[#allocation45_spill] sm:$0xff] }
0x1794   :  { %3112 = vadd.xlane.f32.xlu1 %v3111_v27  ;;  %v1834_v27 = vsel %vm1462_vm1, %v12431_v8, 0.0  ;;  %v4713_v8 = vsel %vm1462_vm1, %v10489_v58, 0.0  ;;  %v5656_v58 = vsel %vm1462_vm1, %v10820_v9, 0.0 }
0x1795   :  { %3437 = vadd.xlane.f32.xlu0 %v3436_v44  ;;  %v12432_v44 = vld [vmem:[#allocation49_spill] sm:$0xff] }
0x1798   :  { %1829 = vadd.xlane.f32.xlu1 %v1828_v33  ;;  %v2160_v33 = vsel %vm1462_vm1, %v12432_v44, 0.0  ;;  %v5047_v44 = vsel %vm1462_vm1, %v10576_v16, 0.0  ;;  %v4376_v16 = vsel %vm1462_vm1, %v10399_v62, 0.0  ;;  %v5671_v62 = vsel %vm1462_vm1, %v10857_v14, 0.0  ;;  %v12452_v14 = vld [vmem:[#allocation157_spill] sm:$0xff] }
0x1799   :  { %2155 = vadd.xlane.f32.xlu0 %v2154_v51  ;;  %v3451_v51 = vsel %vm1462_vm1, %v12433_v17, 0.0  ;;  %v5665_v17 = vsel %vm1462_vm1, %v10828_v7, 0.0 }
0x179c   :  { %3446 = vadd.xlane.f32.xlu1 %v3445_v52  ;;  %v3776_v52 = vsel %vm1462_vm1, %v12434_v42, 0.0  ;;  %v12445_v42 = vld [vmem:[#allocation158_spill] sm:$0xff] }
0x179d   :  { %3771 = vadd.xlane.f32.xlu0 %v3770_v11  ;;  %v2169_v11 = vsel %vm1462_vm1, %v12435_v37, 0.0  ;;  %v12446_v37 = vld [vmem:[#allocation156_spill] sm:$0xff] }
0x179e   :  { %v4710_v7 = vsel %vm1462_vm1, %v12446_v37, 0.0 }
0x17a0   :  { %2164 = vadd.xlane.f32.xlu1 %v2163_v28  ;;  %v2495_v28 = vsel %vm1462_vm1, %v12436_v31, 0.0  ;;  %v12448_v31 = vld [vmem:[#allocation171_spill] sm:$0xff] }
0x17a1   :  { %2490 = vadd.xlane.f32.xlu0 %v2489_v43  ;;  %v3785_v43 = vsel %vm1462_vm1, %v12437_v25, 0.0  ;;  %v3098_v25 = vpop.xlane.xlu0 %3097 }
0x17a2   :  { %8289 = vrcp.f32 %v3098_v25 }
0x17a4   :  { %3780 = vadd.xlane.f32.xlu1 %v3779_v26  ;;  %v3114_v26 = vsel %vm1462_vm1, %v12438_v48, 0.0 }
0x17a5   :  { %3109 = vadd.xlane.f32.xlu0 %v3108_v35  ;;  %v2504_v35 = vsel %vm1462_vm1, %v12439_v21, 0.0 }
0x17a8   :  { %2499 = vadd.xlane.f32.xlu1 %v2498_v15  ;;  %v1831_v15 = vsel %vm1462_vm1, %v12440_v13, 0.0  ;;  %v12451_v13 = vld [vmem:[#allocation162_spill] sm:$0xff] }
0x17a9   :  { %1826 = vadd.xlane.f32.xlu0 %v1825_v57  ;;  %v12441_v57 = vld [vmem:[#allocation103_spill] sm:$0xff] }
0x17aa   :  { %v3448_v4 = vsel %vm1462_vm1, %v12441_v57, 0.0 }
0x17ac   :  { %3118 = vadd.xlane.f32.xlu1 %v3117_v59  ;;  %v4379_v59 = vsel %vm1462_vm1, %v10397_v30, 0.0 }
0x17ad   :  { %3443 = vadd.xlane.f32.xlu0 %v3442_v61  ;;  %v2166_v61 = vsel %vm1462_vm1, %v12442_v56, 0.0 }
0x17b0   :  { %1835 = vadd.xlane.f32.xlu1 %v1834_v27  ;;  %v12443_v27 = vld [vmem:[#allocation118_spill] sm:$0xff] }
0x17b1   :  { %2161 = vadd.xlane.f32.xlu0 %v2160_v33  ;;  %v3782_v55 = vsel %vm1462_vm1, %v12443_v27, 0.0  ;;  %v12444_v33 = vld [vmem:[#allocation42_spill] sm:$0xff] }
0x17b2   :  { %v2501_v30 = vsel %vm1462_vm1, %v12444_v33, 0.0 }
0x17b4   :  { %3452 = vadd.xlane.f32.xlu1 %v3451_v51  ;;  %v4385_v51 = vsel %vm1462_vm1, %v10406_v46, 0.0  ;;  %v5044_v46 = vsel %vm1462_vm1, %v12448_v31, 0.0 }
0x17b5   :  { %3777 = vadd.xlane.f32.xlu0 %v3776_v52  ;;  %v4719_v52 = vsel %vm1462_vm1, %v12445_v42, 0.0 }
0x17b8   :  { %2170 = vadd.xlane.f32.xlu1 %v2169_v11  ;;  %v12447_v11 = vld [vmem:[#allocation173_spill] sm:$0xff] }
0x17b9   :  { %2496 = vadd.xlane.f32.xlu0 %v2495_v28  ;;  %v5053_v9 = vsel %vm1462_vm1, %v12447_v11, 0.0  ;;  %v5662_v28 = vsel %vm1462_vm1, %v10825_v47, 0.0 }
0x17bc   :  { %3786 = vadd.xlane.f32.xlu1 %v3785_v43  ;;  %v12449_v43 = vld [vmem:[#allocation147_spill] sm:$0xff] }
0x17bd   :  { %3115 = vadd.xlane.f32.xlu0 %v3114_v26  ;;  %v4391_v48 = vsel %vm1462_vm1, %v12449_v43, 0.0  ;;  %v12450_v26 = vld [vmem:[#allocation143_spill] sm:$0xff] }
0x17be   :  { %v4382_v21 = vsel %vm1462_vm1, %v12450_v26, 0.0 }
0x17c0   :  { %2505 = vadd.xlane.f32.xlu1 %v2504_v35 }
0x17c1   :  { %1832 = vadd.xlane.f32.xlu0 %v1831_v15  ;;  %v4725_v15 = vsel %vm1462_vm1, %v12451_v13, 0.0 }
0x17c4   :  { %5660 = vadd.xlane.f32.xlu1 %v5659_v1  ;;  %v4716_v1 = vsel %vm1462_vm1, %v12452_v14, 0.0 }
0x17c5   :  { %3449 = vadd.xlane.f32.xlu0 %v3448_v4 }
0x17c8   :  { %4380 = vadd.xlane.f32.xlu1 %v4379_v59 }
0x17c9   :  { %2167 = vadd.xlane.f32.xlu0 %v2166_v61  ;;  %v12453_v61 = vld [vmem:[#allocation19_spill] sm:$0xff] }
0x17cc   :  { %4714 = vadd.xlane.f32.xlu1 %v4713_v8  ;;  %v5059_v8 = vsel %vm1462_vm1, %v12453_v61, 0.0 }
0x17cd   :  { %3783 = vadd.xlane.f32.xlu0 %v3782_v55  ;;  %v12454_v55 = vld [vmem:[#allocation172_spill] sm:$0xff] }
0x17d0   :  { %5048 = vadd.xlane.f32.xlu1 %v5047_v44  ;;  %v5050_v44 = vsel %vm1462_vm1, %v12454_v55, 0.0 }
0x17d1   :  { %2502 = vadd.xlane.f32.xlu0 %v2501_v30 }
0x17d4   :  { %5666 = vadd.xlane.f32.xlu1 %v5665_v17 }
0x17d5   :  { %5657 = vadd.xlane.f32.xlu0 %v5656_v58  ;;  %v5668_v58 = vsel %vm1462_vm1, %v10855_v50, 0.0  ;;  %v12457_v50 = vld [vmem:[#allocation145_spill] sm:$0xff] }
0x17d6   :  { %v4397_v31 = vsel %vm1462_vm1, %v12457_v50, 0.0 }
0x17d8   :  { %4386 = vadd.xlane.f32.xlu1 %v4385_v51 }
0x17d9   :  { %4377 = vadd.xlane.f32.xlu0 %v4376_v16 }
0x17dc   :  { %4720 = vadd.xlane.f32.xlu1 %v4719_v52  ;;  %v12455_v52 = vld [vmem:[#allocation78_spill] sm:$0xff] }
0x17dd   :  { %4711 = vadd.xlane.f32.xlu0 %v4710_v7  ;;  %v2797_v37 = vsel %vm1462_vm1, %v12455_v52, 0.0  ;;  %v12456_v7 = vld [vmem:[#allocation146_spill] sm:$0xff] }
0x17e0   :  { %5054 = vadd.xlane.f32.xlu1 %v5053_v9  ;;  %v8290_v9 = vpop.eup %8289 }
0x17e1   :  { %5045 = vadd.xlane.f32.xlu0 %v5044_v46 }
0x17e4   :  { %5672 = vadd.xlane.f32.xlu1 %v5671_v62  ;;  %v12458_v62 = vld [vmem:[#allocation161_spill] sm:$0xff] }
0x17e5   :  { %5663 = vadd.xlane.f32.xlu0 %v5662_v28  ;;  %v4722_v28 = vsel %vm1462_vm1, %v12458_v62, 0.0 }
0x17e8   :  { %4392 = vadd.xlane.f32.xlu1 %v4391_v48 }
0x17e9   :  { %4383 = vadd.xlane.f32.xlu0 %v4382_v21 }
0x17ea   :  { %v5950_v35 = vpop.xlane.xlu0 %5949 }
0x17eb   :  { %v5968_v57 = vsub.f32 %v10895_v29, %v5950_v35  ;;  %v12459_v35 = vld [vmem:[#allocation26_spill] sm:$0xff] }
0x17ec   :  { %4726 = vadd.xlane.f32.xlu1 %v4725_v15  ;;  %v1514_v13 = vsel %vm1462_vm1, %v12459_v35, 0.0  ;;  %v12460_v15 = vld [vmem:[#allocation96_spill] sm:$0xff]  ;;  %v6203_v35 = vsel %vm1372_vm0, %v10868_v40, 0 }
0x17ed   :  { %4717 = vadd.xlane.f32.xlu0 %v4716_v1  ;;  %v5947_v47 = vpop.xlane.xlu1 %5946  ;;  %v5978_v17 = vmul.f32 1.442695, %v5968_v57  ;;  %v11086_v14 = vmul.f32 %v8290_v9, %v12460_v15  ;;  %v12461_v1 = vld [vmem:[#allocation98_spill] sm:$0xff] }
0x17ee   :  { %v5967_v4 = vsub.f32 %v10903_v41, %v5947_v47  ;;  %v5944_v59 = vpop.xlane.xlu0 %5943 }
0x17ef   :  { %v5966_v56 = vsub.f32 %v10897_v63, %v5944_v59  ;;  %v5677_v63 = vsel %vm1462_vm1, %v10839_v23, 0.0 }
0x17f0   :  { %v5976_v27 = vmul.f32 1.442695, %v5967_v4  ;;  %5060 = vadd.xlane.f32.xlu1 %v5059_v8  ;;  %v12462_v4 = vld [vmem:[#allocation20_spill] sm:$0xff] }
0x17f1   :  { %v5974_v33 = vmul.f32 1.442695, %v5966_v56  ;;  %5051 = vadd.xlane.f32.xlu0 %v5050_v44  ;;  %v3101_v30 = vpop.xlane.xlu1 %3100  ;;  %v5056_v59 = vsel %vm1462_vm1, %v12462_v4, 0.0 }
0x17f2   :  { %8291 = vpow2.f32 %v5976_v27  ;;  %v5953_v29 = vpop.xlane.xlu0 %5952 }
0x17f3   :  { %8293 = vpow2.f32 %v5974_v33  ;;  %v5969_v41 = vsub.f32 %v10901_v45, %v5953_v29  ;;  %v4388_v45 = vsel %vm1462_vm1, %v12456_v7, 0.0  ;;  %v12463_v33 = vld [vmem:[#allocation160_spill] sm:$0xff]  ;;  %v5674_v29 = vsel %vm1462_vm1, %v10836_v3, 0.0  ;;  %v12467_v7 = vld [vmem:[#allocation77_spill] sm:$0xff] }
0x17f4   :  { %8295 = vrcp.f32 %v3101_v30  ;;  %5678 = vadd.xlane.f32.xlu1 %v5677_v63  ;;  %v4731_v30 = vsel %vm1462_vm1, %v12463_v33, 0.0 }
0x17f5   :  { %v5980_v51 = vmul.f32 1.442695, %v5969_v41  ;;  %5669 = vadd.xlane.f32.xlu0 %v5668_v58  ;;  %v3435_v16 = vpop.xlane.xlu1 %3434  ;;  %8297 = vpow2.f32 %v5978_v17  ;;  %v6200_v17 = vsel %vm1372_vm0, %v10845_v22, 0 }
0x17f6   :  { %v1815_v42 = vpop.xlane.xlu0 %1814 }
0x17f7   :  { %8299 = vpow2.f32 %v5980_v51  ;;  %v12464_v51 = vld [vmem:[#allocation61_spill] sm:$0xff] }
0x17f8   :  { %2798 = vadd.xlane.f32.xlu1 %v2797_v37  ;;  %8301 = vrcp.f32 %v1815_v42  ;;  %v12465_v42 = vld [vmem:[#allocation63_spill] sm:$0xff]  ;;  %v12466_v37 = vld [vmem:[#allocation22_spill] sm:$0xff] }
0x17f9   :  { %4389 = vadd.xlane.f32.xlu0 %v4388_v45  ;;  %v2153_v23 = vpop.xlane.xlu1 %2152  ;;  %v5065_v3 = vsel %vm1462_vm1, %v12466_v37, 0.0  ;;  %v2794_v45 = vsel %vm1462_vm1, %v12467_v7, 0.0 }
0x17fa   :  { %v1818_v11 = vpop.xlane.xlu0 %1817 }
0x17fb   :  { %8303 = vrcp.f32 %v1818_v11 }
0x17fc   :  { %v11075_v46 = vpop.eup %8291  ;;  %4398 = vadd.xlane.f32.xlu1 %v4397_v31  ;;  %8305 = vrcp.f32 %v3435_v16  ;;  %v12468_v31 = vld [vmem:[#allocation108_spill] sm:$0xff] }
0x17fd   :  { %v11079_v25 = vpop.eup %8293  ;;  %4723 = vadd.xlane.f32.xlu0 %v4722_v28  ;;  %v3769_v43 = vpop.xlane.xlu1 %3768  ;;  %v12469_v28 = vld [vmem:[#allocation110_spill] sm:$0xff] }
0x17fe   :  { %v8296_v48 = vpop.eup %8295  ;;  %v3432_v26 = vpop.xlane.xlu0 %3431  ;;  %v6022_v21 = vpack.c.bf16 %v11075_v46, %v11079_v25 }
0x17ff   :  { %8307 = vrcp.f32 %v3432_v26  ;;  %v11089_v47 = vmul.f32 %v8296_v48, %v12461_v1  ;;  %v11091_v57 = vpop.eup %8297  ;;  %v12470_v26 = vld [vmem:[#allocation79_spill] sm:$0xff] }
0x1800   :  { %7953 = vmatprep.mubr.msk.bf16.mxu0 %vm1462_vm1, %v6022_v21  ;;  %1515 = vadd.xlane.f32.xlu1 %v1514_v13  ;;  %8309 = vrcp.f32 %v2153_v23  ;;  %v2803_v21 = vsel %vm1462_vm1, %v12470_v26, 0.0  ;;  %v12471_v13 = vld [vmem:[#allocation144_spill] sm:$0xff] }
0x1801   :  { %v11096_v56 = vpop.eup %8299  ;;  %5057 = vadd.xlane.f32.xlu0 %v5056_v59  ;;  %v2488_v61 = vpop.xlane.xlu1 %2487  ;;  %v3233_v8 = vpack.c.bf16 %v11089_v47, %v11086_v14  ;;  %v4394_v15 = vsel %vm1462_vm1, %v12471_v13, 0.0 }
0x1802   :  { %v6023_v27 = vpack.c.bf16 %v11096_v56, %v11091_v57  ;;  %v2150_v55 = vpop.xlane.xlu0 %2149  ;;  %v8302_v44 = vpop.eup %8301 }
0x1803   :  { %8311 = vrcp.f32 %v2150_v55  ;;  %v11112_v16 = vmul.f32 %v8302_v44, %v12464_v51 }
0x1804   :  { %7954 = vmatmul.mubr.msk.bf16.vlgmr.msra.gmra.mrb[192].mxu0 %vm1462_vm1, %v6023_v27  ;;  %4732 = vadd.xlane.f32.xlu1 %v4731_v30  ;;  %8313 = vrcp.f32 %v3769_v43  ;;  %v12472_v27 = vld [vmem:[#allocation69_spill] sm:$0xff] }
0x1805   :  { %v8304_v41 = vpop.eup %8303  ;;  %7962 = vmatpush3.bf16.xpose.msra.mxu0 %v6200_v17  ;;  %5675 = vadd.xlane.f32.xlu0 %v5674_v29  ;;  %v5959_v63 = vpop.xlane.xlu1 %5958  ;;  %v12474_v30 = vld [vmem:[#allocation25_spill] sm:$0xff]  ;;  %v12475_v29 = vld [vmem:[#allocation24_spill] sm:$0xff] }
0x1806   :  { %8054 = vmatprep.subr.msk.bf16.mxu0 %vm1372_vm0, %v10868_v40  ;;  %v3766_v58 = vpop.xlane.xlu0 %3765  ;;  %v11115_v52 = vmul.f32 %v8304_v41, %v12465_v42  ;;  %v8306_v22 = vpop.eup %8305  ;;  %v12473_v40 = vld [vmem:[#allocation71_spill] sm:$0xff]  ;;  %v1520_v17 = vsel %vm1462_vm1, %v12474_v30, 0.0  ;;  %v1511_v41 = vsel %vm1462_vm1, %v12475_v29, 0.0  ;;  %v12483_v29 = vld [vmem:[#allocation21_spill] sm:$0xff] }
0x1807   :  { %8315 = vrcp.f32 %v3766_v58  ;;  %v11127_v43 = vmul.f32 %v8306_v22, %v12469_v28  ;;  %v5971_v22 = vsub.f32 %v10919_v49, %v5959_v63  ;;  %v6206_v28 = vsel %vm1372_vm0, %v10870_v2, 0  ;;  %v12482_v30 = vld [vmem:[#allocation55_spill] sm:$0xff] }
0x1808   :  { %5066 = vadd.xlane.f32.xlu1 %v5065_v3  ;;  %v1950_v23 = vpack.c.bf16 %v11115_v52, %v11112_v16  ;;  %8317 = vrcp.f32 %v2488_v61  ;;  %v12476_v3 = vld [vmem:[#allocation120_spill] sm:$0xff] }
0x1809   :  { %v8308_v11 = vpop.eup %8307  ;;  %2795 = vadd.xlane.f32.xlu0 %v2794_v45  ;;  %v3107_v9 = vpop.xlane.xlu1 %3106  ;;  %v12477_v45 = vld [vmem:[#allocation122_spill] sm:$0xff] }
0x180a   :  { %v2485_v50 = vpop.xlane.xlu0 %2484  ;;  %v11124_v62 = vmul.f32 %v8308_v11, %v12468_v31  ;;  %v8310_v48 = vpop.eup %8309 }
0x180b   :  { %8319 = vrcp.f32 %v2485_v50  ;;  %v11143_v44 = vmul.f32 %v8310_v48, %v12473_v40  ;;  %v12479_v48 = vld [vmem:[#allocation159_spill] sm:$0xff]  ;;  %v12481_v40 = vld [vmem:[#allocation53_spill] sm:$0xff] }
0x180c   :  { %2804 = vadd.xlane.f32.xlu1 %v2803_v21  ;;  %v3567_v1 = vpack.c.bf16 %v11127_v43, %v11124_v62  ;;  %8321 = vrcp.f32 %v3107_v9  ;;  %v12478_v9 = vld [vmem:[#allocation82_spill] sm:$0xff]  ;;  %v4728_v26 = vsel %vm1462_vm1, %v12479_v48, 0.0  ;;  %v12486_v48 = vld [vmem:[#allocation83_spill] sm:$0xff]  ;;  %v12502_v43 = vld [vmem:[#allocation52_spill] sm:$0xff] }
0x180d   :  { %v8312_v4 = vpop.eup %8311  ;;  %7964 = vmatpush3.bf16.xpose.msra.mxu0 %v6203_v35  ;;  %4395 = vadd.xlane.f32.xlu0 %v4394_v15  ;;  %v1824_v59 = vpop.xlane.xlu1 %1823  ;;  %v2809_v50 = vsel %vm1462_vm1, %v12478_v9, 0.0  ;;  %v5984_v35 = vmul.f32 1.442695, %v5971_v22 }
0x180e   :  { %8055 = vmatprep.subr.msk.bf16.mxu0 %vm1372_vm0, %v10870_v2  ;;  %v3104_v61 = vpop.xlane.xlu0 %3103  ;;  %v11140_v55 = vmul.f32 %v8312_v4, %v12472_v27  ;;  %v8314_v33 = vpop.eup %8313 }
0x180f   :  { %8323 = vrcp.f32 %v3104_v61  ;;  %v11156_v11 = vmul.f32 %v8314_v33, %v12477_v45  ;;  %v12480_v61 = vld [vmem:[#allocation30_spill] sm:$0xff]  ;;  %v12484_v45 = vld [vmem:[#allocation95_spill] sm:$0xff] }
0x1810   :  { %1521 = vadd.xlane.f32.xlu1 %v1520_v17  ;;  %v2285_v58 = vpack.c.bf16 %v11143_v44, %v11140_v55  ;;  %v1526_v27 = vsel %vm1462_vm1, %v12480_v61, 0.0  ;;  %8325 = vpow2.f32 %v5984_v35  ;;  %v12488_v61 = vld [vmem:[#allocation28_spill] sm:$0xff] }
0x1811   :  { %v8316_v51 = vpop.eup %8315  ;;  %1512 = vadd.xlane.f32.xlu0 %v1511_v41  ;;  %v3441_v42 = vpop.xlane.xlu1 %3440 }
0x1812   :  { %v5962_v37 = vpop.xlane.xlu0 %5961  ;;  %v11153_v7 = vmul.f32 %v8316_v51, %v12476_v3  ;;  %v8318_v31 = vpop.eup %8317 }
0x1813   :  { %v5972_v13 = vsub.f32 %v10909_v18, %v5962_v37  ;;  %v11176_v17 = vmul.f32 %v8318_v31, %v12482_v30  ;;  %v5062_v18 = vsel %vm1462_vm1, %v12483_v29, 0.0 }
0x1814   :  { %2810 = vadd.xlane.f32.xlu1 %v2809_v50  ;;  %v3901_v49 = vpack.c.bf16 %v11156_v11, %v11153_v7  ;;  %v12485_v50 = vld [vmem:[#allocation97_spill] sm:$0xff] }
0x1815   :  { %7966 = vmatpush3.bf16.xpose.msra.mxu0 %v6206_v28  ;;  %4729 = vadd.xlane.f32.xlu0 %v4728_v26  ;;  %v2159_v63 = vpop.xlane.xlu1 %2158  ;;  %v8320_v21 = vpop.eup %8319  ;;  %v5986_v37 = vmul.f32 1.442695, %v5972_v13  ;;  %v2815_v26 = vsel %vm1462_vm1, %v12486_v48, 0.0 }
0x1816   :  { %8056 = vmatprep.subr.msk.bf16.mxu0 %vm1372_vm0, %v10873_v32  ;;  %v5956_v15 = vpop.xlane.xlu0 %5955  ;;  %v8322_v4 = vpop.eup %8321  ;;  %v11173_v33 = vmul.f32 %v8320_v21, %v12481_v40  ;;  %v6209_v21 = vsel %vm1372_vm0, %v10873_v32, 0  ;;  %v12489_v32 = vld [vmem:[#allocation23_spill] sm:$0xff] }
0x1817   :  { %v5970_v2 = vsub.f32 %v10913_v0, %v5956_v15  ;;  %v11186_v31 = vmul.f32 %v8322_v4, %v12485_v50  ;;  %v12487_v15 = vld [vmem:[#allocation76_spill] sm:$0xff]  ;;  %v1517_v40 = vsel %vm1462_vm1, %v12489_v32, 0.0 }
0x1818   :  { %1527 = vadd.xlane.f32.xlu1 %v1526_v27  ;;  %v2800_v35 = vsel %vm1462_vm1, %v12487_v15, 0.0  ;;  %v1532_v27 = vsel %vm1462_vm1, %v12488_v61, 0.0 }
0x1819   :  { %v8324_v41 = vpop.eup %8323  ;;  %v5982_v51 = vmul.f32 1.442695, %v5970_v2  ;;  %5063 = vadd.xlane.f32.xlu0 %v5062_v18  ;;  %v3775_v22 = vpop.xlane.xlu1 %3774  ;;  %v12490_v18 = vld [vmem:[#allocation81_spill] sm:$0xff] }
0x181a   :  { %v5965_v3 = vpop.xlane.xlu0 %5964  ;;  %v11183_v9 = vmul.f32 %v8324_v41, %v12484_v45  ;;  %v2806_v41 = vsel %vm1462_vm1, %v12490_v18, 0.0 }
0x181b   :  { %8327 = vpow2.f32 %v5982_v51  ;;  %v5973_v28 = vsub.f32 %v10917_v20, %v5965_v3 }
0x181c   :  { %2816 = vadd.xlane.f32.xlu1 %v2815_v26  ;;  %8329 = vrcp.f32 %v1824_v59  ;;  %v11201_v59 = vpop.eup %8325 }
0x181d   :  { %v5988_v2 = vmul.f32 1.442695, %v5973_v28  ;;  %7968 = vmatpush3.bf16.xpose.msra.mxu0 %v6209_v21  ;;  %2801 = vadd.xlane.f32.xlu0 %v2800_v35  ;;  %v2494_v4 = vpop.xlane.xlu1 %2493  ;;  %8331 = vpow2.f32 %v5986_v37  ;;  %v12491_v28 = vld [vmem:[#allocation29_spill] sm:$0xff] }
0x181e   :  { %v1821_v20 = vpop.xlane.xlu0 %1820  ;;  %v1523_v48 = vsel %vm1462_vm1, %v12491_v28, 0.0 }
0x181f   :  { %8333 = vpow2.f32 %v5988_v2 }
0x1820   :  { %8335 = vrcp.f32 %v1821_v20  ;;  %1533 = vadd.xlane.f32.xlu1 %v1532_v27  ;;  %v12492_v20 = vld [vmem:[#allocation60_spill] sm:$0xff]  ;;  %v12493_v27 = vld [vmem:[#allocation62_spill] sm:$0xff] }
0x1821   :  { %8337 = vrcp.f32 %v3441_v42  ;;  %1518 = vadd.xlane.f32.xlu0 %v1517_v40  ;;  %v3113_v30 = vpop.xlane.xlu1 %3112  ;;  %v12494_v40 = vld [vmem:[#allocation80_spill] sm:$0xff] }
0x1822   :  { %v3438_v29 = vpop.xlane.xlu0 %3437 }
0x1823   :  { %8339 = vrcp.f32 %v3438_v29 }
0x1824   :  { %8341 = vrcp.f32 %v2159_v63 }
0x1825   :  { %v11205_v51 = vpop.eup %8327  ;;  %2807 = vadd.xlane.f32.xlu0 %v2806_v41  ;;  %v1830_v37 = vpop.xlane.xlu1 %1829 }
0x1826   :  { %v2156_v3 = vpop.xlane.xlu0 %2155  ;;  %v6024_v45 = vpack.c.bf16 %v11201_v59, %v11205_v51  ;;  %v8330_v50 = vpop.eup %8329 }
0x1827   :  { %8343 = vrcp.f32 %v2156_v3  ;;  %v11209_v42 = vpop.eup %8331  ;;  %v11222_v32 = vmul.f32 %v8330_v50, %v12493_v27  ;;  %v12496_v50 = vld [vmem:[#allocation109_spill] sm:$0xff] }
0x1828   :  { %7957 = vmatprep.mubr.msk.bf16.mxu0 %vm1462_vm1, %v6024_v45  ;;  %8345 = vrcp.f32 %v3775_v22  ;;  %v2812_v22 = vsel %vm1462_vm1, %v12494_v40, 0.0  ;;  %v12495_v45 = vld [vmem:[#allocation107_spill] sm:$0xff] }
0x1829   :  { %v11214_v26 = vpop.eup %8333  ;;  %1524 = vadd.xlane.f32.xlu0 %v1523_v48  ;;  %v3447_v63 = vpop.xlane.xlu1 %3446 }
0x182a   :  { %v8336_v21 = vpop.eup %8335  ;;  %v3772_v15 = vpop.xlane.xlu0 %3771  ;;  %v6025_v35 = vpack.c.bf16 %v11214_v26, %v11209_v42 }
0x182b   :  { %v8338_v2 = vpop.eup %8337  ;;  %8347 = vrcp.f32 %v3772_v15  ;;  %v11219_v61 = vmul.f32 %v8336_v21, %v12492_v20  ;;  %v12497_v15 = vld [vmem:[#allocation27_spill] sm:$0xff] }
0x182c   :  { %7958 = vmatmul.mubr.msk.bf16.gmra.mrb[196].mxu0 %vm1462_vm1, %v6025_v35  ;;  %8349 = vrcp.f32 %v2494_v4  ;;  %v11235_v48 = vmul.f32 %v8338_v2, %v12496_v50  ;;  %v1529_v4 = vsel %vm1462_vm1, %v12497_v15, 0.0  ;;  %v12498_v2 = vld [vmem:[#allocation68_spill] sm:$0xff] }
0x182d   :  { %v8340_v29 = vpop.eup %8339  ;;  %2813 = vadd.xlane.f32.xlu0 %v2812_v22  ;;  %7969 = vmatprep.mubr.msk.bf16.mxu0 %vm1372_vm0, %v10847_v5  ;;  %v2165_v18 = vpop.xlane.xlu1 %2164  ;;  %v12499_v22 = vld [vmem:[#allocation70_spill] sm:$0xff] }
0x182e   :  { %v2491_v3 = vpop.xlane.xlu0 %2490  ;;  %v11232_v28 = vmul.f32 %v8340_v29, %v12495_v45  ;;  %v8342_v21 = vpop.eup %8341 }
0x182f   :  { %8351 = vrcp.f32 %v2491_v3  ;;  %v11249_v29 = vmul.f32 %v8342_v21, %v12499_v22  ;;  %v12501_v21 = vld [vmem:[#allocation121_spill] sm:$0xff] }
0x1830   :  { %8353 = vrcp.f32 %v3113_v30 }
0x1831   :  { %v8344_v5 = vpop.eup %8343  ;;  %1530 = vadd.xlane.f32.xlu0 %v1529_v4  ;;  %1958 = vrot.lane.b32.xlu1 %v1950_v23, %s8627_s26  ;;  %v3781_v20 = vpop.xlane.xlu1 %3780  ;;  %v12500_v23 = vld [vmem:[#allocation17_spill] sm:$0xff] }
0x1832   :  { %v3110_v27 = vpop.xlane.xlu0 %3109  ;;  %v11246_v40 = vmul.f32 %v8344_v5, %v12498_v2  ;;  %v8346_v3 = vpop.eup %8345  ;;  %v12503_v5 = vld [vmem:[#allocation54_spill] sm:$0xff] }
0x1833   :  { %8355 = vrcp.f32 %v3110_v27 }
0x1834   :  { %7970 = vmatmul.mubr.msk.bf16.vlgmr.msra.gmra.mrb[200].mxu0 %vm1372_vm0, %v10875_v12  ;;  %8357 = vrcp.f32 %v1830_v37  ;;  %v11265_v12 = vmul.f32 %v8346_v3, %v12501_v21 }
0x1835   :  { %v8348_v45 = vpop.eup %8347  ;;  %7973 = vmatprep.mubr.msk.bf16.mxu0 %vm1372_vm0, %v10850_v54  ;;  %3575 = vrot.lane.b32.xlu1 %v3567_v1, %s8629_s14  ;;  %v2500_v16 = vpop.xlane.xlu1 %2499 }
0x1836   :  { %v1827_v52 = vpop.xlane.xlu0 %1826  ;;  %v11262_v50 = vmul.f32 %v8348_v45, %v12500_v23  ;;  %v8350_v15 = vpop.eup %8349  ;;  %v12505_v45 = vld [vmem:[#allocation102_spill] sm:$0xff] }
0x1837   :  { %8359 = vrcp.f32 %v1827_v52  ;;  %v11277_v27 = vmul.f32 %v8350_v15, %v12503_v5 }
0x1838   :  { %8361 = vrcp.f32 %v3447_v63  ;;  %v12508_v63 = vld [vmem:[#allocation112_spill] sm:$0xff] }
0x1839   :  { %v8352_v4 = vpop.eup %8351  ;;  %2293 = vrot.lane.b32.xlu1 %v2285_v58, %s8629_s14  ;;  %v3119_v54 = vpop.xlane.xlu1 %3118  ;;  %v12504_v58 = vld [vmem:[#allocation100_spill] sm:$0xff] }
0x183a   :  { %v3444_v62 = vpop.xlane.xlu0 %3443  ;;  %v11274_v1 = vmul.f32 %v8352_v4, %v12502_v43  ;;  %v8354_v2 = vpop.eup %8353 }
0x183b   :  { %8363 = vrcp.f32 %v3444_v62  ;;  %v11287_v52 = vmul.f32 %v8354_v2, %v12505_v45  ;;  %v12506_v62 = vld [vmem:[#allocation65_spill] sm:$0xff] }
0x183c   :  { %7974 = vmatmul.mubr.msk.bf16.gmra.mrb[204].mxu0 %vm1372_vm0, %v10877_v10  ;;  %8365 = vrcp.f32 %v2165_v18  ;;  %v12507_v18 = vld [vmem:[#allocation67_spill] sm:$0xff] }
0x183d   :  { %v8356_v22 = vpop.eup %8355  ;;  %v1836_v55 = vpop.xlane.xlu1 %1835 }
0x183e   :  { %v2162_v44 = vpop.xlane.xlu0 %2161  ;;  %v11284_v3 = vmul.f32 %v8356_v22, %v12504_v58  ;;  %v8358_v23 = vpop.eup %8357 }
0x183f   :  { %8367 = vrcp.f32 %v2162_v44  ;;  %v11295_v5 = vmul.f32 %v8358_v23, %v12507_v18  ;;  %v12510_v18 = vld [vmem:[#allocation73_spill] sm:$0xff] }
0x1840   :  { %8369 = vrcp.f32 %v3781_v20  ;;  %v12509_v20 = vld [vmem:[#allocation114_spill] sm:$0xff]  ;;  %v12514_v23 = vld [vmem:[#allocation57_spill] sm:$0xff] }
0x1841   :  { %v8360_v15 = vpop.eup %8359  ;;  %v3453_v10 = vpop.xlane.xlu1 %3452 }
0x1842   :  { %v3778_v4 = vpop.xlane.xlu0 %3777  ;;  %v11292_v43 = vmul.f32 %v8360_v15, %v12506_v62  ;;  %v8362_v22 = vpop.eup %8361 }
0x1843   :  { %8371 = vrcp.f32 %v3778_v4  ;;  %v11303_v37 = vmul.f32 %v8362_v22, %v12509_v20 }
0x1844   :  { %8373 = vrcp.f32 %v2500_v16 }
0x1845   :  { %v8364_v58 = vpop.eup %8363  ;;  %v2171_v44 = vpop.xlane.xlu1 %2170 }
0x1846   :  { %v2497_v45 = vpop.xlane.xlu0 %2496  ;;  %v11300_v21 = vmul.f32 %v8364_v58, %v12508_v63  ;;  %v8366_v15 = vpop.eup %8365  ;;  %v12511_v58 = vld [vmem:[#allocation75_spill] sm:$0xff] }
0x1847   :  { %8375 = vrcp.f32 %v2497_v45  ;;  %3241 = vrot.lane.b32.xlu0 %v3233_v8, %s8627_s26  ;;  %v11315_v22 = vmul.f32 %v8366_v15, %v12511_v58  ;;  %v12512_v45 = vld [vmem:[#allocation124_spill] sm:$0xff] }
0x1848   :  { %8377 = vrcp.f32 %v3119_v54 }
0x1849   :  { %v8368_v4 = vpop.eup %8367  ;;  %v3787_v16 = vpop.xlane.xlu1 %3786 }
0x184a   :  { %v3116_v62 = vpop.xlane.xlu0 %3115  ;;  %v11312_v63 = vmul.f32 %v8368_v4, %v12510_v18  ;;  %v8370_v20 = vpop.eup %8369  ;;  %v12513_v18 = vld [vmem:[#allocation126_spill] sm:$0xff] }
0x184b   :  { %8379 = vrcp.f32 %v3116_v62  ;;  %3909 = vrot.lane.b32.xlu0 %v3901_v49, %s8628_s13  ;;  %v11327_v15 = vmul.f32 %v8370_v20, %v12513_v18  ;;  %v12516_v62 = vld [vmem:[#allocation99_spill] sm:$0xff]  ;;  %v12518_v20 = vld [vmem:[#allocation64_spill] sm:$0xff] }
0x184c   :  { %8381 = vrcp.f32 %v1836_v55  ;;  %v12515_v55 = vld [vmem:[#allocation59_spill] sm:$0xff] }
0x184d   :  { %v8372_v47 = vpop.eup %8371  ;;  %v2506_v8 = vpop.xlane.xlu1 %2505 }
0x184e   :  { %v1833_v54 = vpop.xlane.xlu0 %1832  ;;  %v11324_v4 = vmul.f32 %v8372_v47, %v12512_v45  ;;  %v8374_v58 = vpop.eup %8373 }
0x184f   :  { %8383 = vrcp.f32 %v1833_v54  ;;  %v11335_v14 = vmul.f32 %v8374_v58, %v12515_v55  ;;  %v12522_v58 = vld [vmem:[#allocation111_spill] sm:$0xff] }
0x1850   :  { %8385 = vrcp.f32 %v3453_v10  ;;  %v12517_v10 = vld [vmem:[#allocation101_spill] sm:$0xff] }
0x1851   :  { %v8376_v7 = vpop.eup %8375  ;;  %v5661_v11 = vpop.xlane.xlu1 %5660 }
0x1852   :  { %v3450_v49 = vpop.xlane.xlu0 %3449  ;;  %v11332_v2 = vmul.f32 %v8376_v7, %v12514_v23  ;;  %v8378_v47 = vpop.eup %8377 }
0x1853   :  { %8387 = vrcp.f32 %v3450_v49  ;;  %v11343_v35 = vmul.f32 %v8378_v47, %v12517_v10  ;;  %v5354_v47 = vsel %vm1462_vm1, %v10698_v53, 0.0 }
0x1854   :  { %8389 = vrcp.f32 %v2171_v44  ;;  %v12520_v44 = vld [vmem:[#allocation66_spill] sm:$0xff] }
0x1855   :  { %v8380_v45 = vpop.eup %8379  ;;  %v4381_v54 = vpop.xlane.xlu1 %4380 }
0x1856   :  { %v2168_v18 = vpop.xlane.xlu0 %2167  ;;  %v11340_v30 = vmul.f32 %v8380_v45, %v12516_v62  ;;  %v8382_v23 = vpop.eup %8381 }
0x1857   :  { %8391 = vrcp.f32 %v2168_v18  ;;  %v11351_v0 = vmul.f32 %v8382_v23, %v12520_v44 }
0x1858   :  { %8393 = vrcp.f32 %v3787_v16 }
0x1859   :  { %v8384_v7 = vpop.eup %8383  ;;  %v4715_v49 = vpop.xlane.xlu1 %4714  ;;  %12521 = vst [vmem:[#allocation106_spill] sm:$0xff] %v11351_v0 }
0x185a   :  { %v3784_v55 = vpop.xlane.xlu0 %3783  ;;  %v11348_v41 = vmul.f32 %v8384_v7, %v12518_v20  ;;  %v8386_v62 = vpop.eup %8385  ;;  %v12524_v20 = vld [vmem:[#allocation113_spill] sm:$0xff] }
0x185b   :  { %8395 = vrcp.f32 %v3784_v55  ;;  %v11361_v7 = vmul.f32 %v8386_v62, %v12524_v20  ;;  %v12526_v55 = vld [vmem:[#allocation129_spill] sm:$0xff] }
0x185c   :  { %12519 = vst [vmem:[#allocation47_spill] sm:$0xff] %v11348_v41  ;;  %8397 = vrcp.f32 %v2506_v8  ;;  %v4074_v44 = vsel %vm1462_vm1, %v12526_v55, 0.0  ;;  %v12527_v41 = vld [vmem:[#allocation72_spill] sm:$0xff] }
0x185d   :  { %v8388_v18 = vpop.eup %8387  ;;  %5355 = vadd.xlane.f32.xlu1 %v5354_v47  ;;  %v5049_v16 = vpop.xlane.xlu1 %5048  ;;  %12525 = vst [vmem:[#allocation48_spill] sm:$0xff] %v11361_v7  ;;  %v12534_v55 = vld [vmem:[#allocation56_spill] sm:$0xff] }
0x185e   :  { %v2503_v10 = vpop.xlane.xlu0 %2502  ;;  %v11358_v13 = vmul.f32 %v8388_v18, %v12522_v58  ;;  %v8390_v23 = vpop.eup %8389  ;;  %v12529_v58 = vld [vmem:[#allocation74_spill] sm:$0xff] }
0x185f   :  { %8399 = vrcp.f32 %v2503_v10  ;;  %v11371_v18 = vmul.f32 %v8390_v23, %v12529_v58  ;;  %v12530_v10 = vld [vmem:[#allocation130_spill] sm:$0xff] }
0x1860   :  { %12523 = vst [vmem:[#allocation115_spill] sm:$0xff] %v11358_v13  ;;  %8401 = vrcp.f32 %v5661_v11  ;;  %v4077_v20 = vsel %vm1462_vm1, %v12530_v10, 0.0  ;;  %v12531_v13 = vld [vmem:[#allocation123_spill] sm:$0xff] }
0x1861   :  { %v8392_v45 = vpop.eup %8391  ;;  %4075 = vadd.xlane.f32.xlu1 %v4074_v44  ;;  %v5667_v8 = vpop.xlane.xlu1 %5666 }
0x1862   :  { %v5658_v47 = vpop.xlane.xlu0 %5657  ;;  %v11368_v0 = vmul.f32 %v8392_v45, %v12527_v41  ;;  %v8394_v62 = vpop.eup %8393  ;;  %v12533_v41 = vld [vmem:[#allocation125_spill] sm:$0xff] }
0x1863   :  { %8403 = vrcp.f32 %v5658_v47  ;;  %v11381_v45 = vmul.f32 %v8394_v62, %v12533_v41 }
0x1864   :  { %12528 = vst [vmem:[#allocation39_spill] sm:$0xff] %v11368_v0  ;;  %8405 = vrcp.f32 %v4381_v54  ;;  %v5357_v54 = vsel %vm1462_vm1, %v10700_v6, 0.0 }
0x1865   :  { %v8396_v53 = vpop.eup %8395  ;;  %4078 = vadd.xlane.f32.xlu1 %v4077_v20  ;;  %v4387_v11 = vpop.xlane.xlu1 %4386 }
0x1866   :  { %v4378_v44 = vpop.xlane.xlu0 %4377  ;;  %v11378_v7 = vmul.f32 %v8396_v53, %v12531_v13  ;;  %v8398_v23 = vpop.eup %8397  ;;  %v12536_v13 = vld [vmem:[#allocation58_spill] sm:$0xff] }
0x1867   :  { %8407 = vrcp.f32 %v4378_v44  ;;  %v11391_v53 = vmul.f32 %v8398_v23, %v12536_v13  ;;  %v12538_v13 = vld [vmem:[#allocation149_spill] sm:$0xff]  ;;  %v12543_v23 = vld [vmem:[#allocation164_spill] sm:$0xff] }
0x1868   :  { %12532 = vst [vmem:[#allocation116_spill] sm:$0xff] %v11378_v7  ;;  %8409 = vrcp.f32 %v4715_v49 }
0x1869   :  { %v8400_v58 = vpop.eup %8399  ;;  %v4721_v10 = vpop.xlane.xlu1 %4720  ;;  %12537 = vst [vmem:[#allocation40_spill] sm:$0xff] %v11391_v53 }
0x186a   :  { %v4712_v20 = vpop.xlane.xlu0 %4711  ;;  %5358 = vadd.xlane.f32.xlu0 %v5357_v54  ;;  %v11388_v0 = vmul.f32 %v8400_v58, %v12534_v55  ;;  %v8402_v62 = vpop.eup %8401 }
0x186b   :  { %8411 = vrcp.f32 %v4712_v20  ;;  %v11399_v6 = vmul.f32 %v8402_v62, %v10885_v24 }
0x186c   :  { %12535 = vst [vmem:[#allocation94_spill] sm:$0xff] %v11388_v0  ;;  %8413 = vrcp.f32 %v5049_v16  ;;  %v12540_v16 = vld [vmem:[#allocation151_spill] sm:$0xff] }
0x186d   :  { %v8404_v41 = vpop.eup %8403  ;;  %v5055_v49 = vpop.xlane.xlu1 %5054 }
0x186e   :  { %v5046_v47 = vpop.xlane.xlu0 %5045  ;;  %v11396_v7 = vmul.f32 %v8404_v41, %v10881_v39  ;;  %v8406_v55 = vpop.eup %8405 }
0x186f   :  { %8415 = vrcp.f32 %v5046_v47  ;;  %v11407_v0 = vmul.f32 %v8406_v55, %v12540_v16 }
0x1870   :  { %8417 = vrcp.f32 %v5667_v8  ;;  %v12542_v8 = vpack.c.bf16 %v11186_v31, %v11183_v9  ;;  %v12546_v9 = vld [vmem:[#allocation18_spill] sm:$0xff] }
0x1871   :  { %v8408_v58 = vpop.eup %8407  ;;  %v5673_v54 = vpop.xlane.xlu1 %5672  ;;  %12541 = vst [vmem:[#allocation93_spill] sm:$0xff] %v11407_v0  ;;  %v12545_v0 = vld [vmem:[#allocation15_spill] sm:$0xff] }
0x1872   :  { %v5664_v20 = vpop.xlane.xlu0 %5663  ;;  %v11404_v44 = vmul.f32 %v8408_v58, %v12538_v13  ;;  %v8410_v39 = vpop.eup %8409  ;;  %v12544_v13 = vld [vmem:[#allocation166_spill] sm:$0xff] }
0x1873   :  { %8419 = vrcp.f32 %v5664_v20  ;;  %v11419_v55 = vmul.f32 %v8410_v39, %v12544_v13  ;;  %v12550_v39 = vld [vmem:[#allocation148_spill] sm:$0xff] }
0x1874   :  { %12539 = vst [vmem:[#allocation44_spill] sm:$0xff] %v11404_v44  ;;  %8421 = vrcp.f32 %v4387_v11 }
0x1875   :  { %v8412_v62 = vpop.eup %8411  ;;  %v4393_v47 = vpop.xlane.xlu1 %4392 }
0x1876   :  { %v4384_v41 = vpop.xlane.xlu0 %4383  ;;  %3243 = vrot.lane.b32.xlu1 %v12542_v8, %s8627_s26  ;;  %v11416_v58 = vmul.f32 %v8412_v62, %v12543_v23  ;;  %v8414_v16 = vpop.eup %8413 }
0x1877   :  { %8423 = vrcp.f32 %v4384_v41  ;;  %v11427_v31 = vmul.f32 %v8414_v16, %v12546_v9 }
0x1878   :  { %8425 = vrcp.f32 %v4721_v10 }
0x1879   :  { %v8416_v24 = vpop.eup %8415  ;;  %v4727_v11 = vpop.xlane.xlu1 %4726 }
0x187a   :  { %v4718_v44 = vpop.xlane.xlu0 %4717  ;;  %v11424_v53 = vmul.f32 %v8416_v24, %v12545_v0  ;;  %v8418_v23 = vpop.eup %8417  ;;  %v12549_v24 = vpack.c.bf16 %v11176_v17, %v11173_v33  ;;  %v12552_v33 = vpack.c.bf16 %v11222_v32, %v11219_v61  ;;  %v12555_v17 = vld [vmem:[#allocation14_spill] sm:$0xff] }
0x187b   :  { %8427 = vrcp.f32 %v4718_v44  ;;  %v11435_v10 = vmul.f32 %v8418_v23, %v10883_v34  ;;  %v12553_v44 = vld [vmem:[#allocation163_spill] sm:$0xff] }
0x187c   :  { %8429 = vrcp.f32 %v5055_v49 }
0x187d   :  { %v8420_v62 = vpop.eup %8419  ;;  %v5061_v41 = vpop.xlane.xlu1 %5060  ;;  %12548 = vst [vmem:[#allocation45_spill] sm:$0xff] %v11435_v10 }
0x187e   :  { %v5052_v8 = vpop.xlane.xlu0 %5051  ;;  %v11432_v13 = vmul.f32 %v8420_v62, %v10879_v60  ;;  %v8422_v0 = vpop.eup %8421  ;;  %v12551_v62 = vld [vmem:[#allocation150_spill] sm:$0xff] }
0x187f   :  { %8431 = vrcp.f32 %v5052_v8  ;;  %v11447_v34 = vmul.f32 %v8422_v0, %v12551_v62 }
0x1880   :  { %12547 = vst [vmem:[#allocation105_spill] sm:$0xff] %v11432_v13  ;;  %2628 = vrot.lane.b32.xlu0 %v12549_v24, %s8628_s13  ;;  %8433 = vrcp.f32 %v5673_v54 }
0x1881   :  { %v8424_v16 = vpop.eup %8423  ;;  %v5679_v49 = vpop.xlane.xlu1 %5678 }
0x1882   :  { %v5670_v9 = vpop.xlane.xlu0 %5669  ;;  %v11444_v60 = vmul.f32 %v8424_v16, %v12550_v39  ;;  %v8426_v23 = vpop.eup %8425  ;;  %v12554_v16 = vld [vmem:[#allocation165_spill] sm:$0xff] }
0x1883   :  { %8435 = vrcp.f32 %v5670_v9  ;;  %v11459_v0 = vmul.f32 %v8426_v23, %v12554_v16  ;;  %v12560_v23 = vld [vmem:[#allocation153_spill] sm:$0xff] }
0x1884   :  { %1960 = vrot.lane.b32.xlu0 %v12552_v33, %s8627_s26  ;;  %8437 = vrcp.f32 %v4393_v47  ;;  %v12557_v47 = vld [vmem:[#allocation16_spill] sm:$0xff] }
0x1885   :  { %v8428_v8 = vpop.eup %8427  ;;  %v2799_v54 = vpop.xlane.xlu1 %2798 }
0x1886   :  { %v4390_v24 = vpop.xlane.xlu0 %4389  ;;  %v11456_v39 = vmul.f32 %v8428_v8, %v12553_v44  ;;  %v8430_v62 = vpop.eup %8429 }
0x1887   :  { %8439 = vrcp.f32 %v4390_v24  ;;  %v11467_v13 = vmul.f32 %v8430_v62, %v12557_v47  ;;  %v12563_v62 = vld [vmem:[#allocation168_spill] sm:$0xff] }
0x1888   :  { %8441 = vrcp.f32 %v4727_v11 }
0x1889   :  { %v8432_v61 = vpop.eup %8431  ;;  %v4399_v32 = vpop.xlane.xlu1 %4398 }
0x188a   :  { %v4724_v33 = vpop.xlane.xlu0 %4723  ;;  %v11464_v20 = vmul.f32 %v8432_v61, %v12555_v17  ;;  %v8434_v44 = vpop.eup %8433 }
0x188b   :  { %8443 = vrcp.f32 %v4724_v33  ;;  %v11475_v11 = vmul.f32 %v8434_v44, %v10893_v38  ;;  %v12565_v38 = vld [vmem:[#allocation175_spill] sm:$0xff] }
0x188c   :  { %12556 = vst [vmem:[#allocation49_spill] sm:$0xff] %v11464_v20  ;;  %8445 = vrcp.f32 %v5061_v41  ;;  %v12562_v41 = vld [vmem:[#allocation155_spill] sm:$0xff] }
0x188d   :  { %v8436_v8 = vpop.eup %8435  ;;  %v1516_v24 = vpop.xlane.xlu1 %1515  ;;  %12559 = vst [vmem:[#allocation117_spill] sm:$0xff] %v11475_v11 }
0x188e   :  { %v5058_v16 = vpop.xlane.xlu0 %5057  ;;  %v11472_v9 = vmul.f32 %v8436_v8, %v10889_v19  ;;  %v8438_v17 = vpop.eup %8437 }
0x188f   :  { %8447 = vrcp.f32 %v5058_v16  ;;  %v11483_v20 = vmul.f32 %v8438_v17, %v12562_v41  ;;  %v5999_v41 = vsel %vm1462_vm1, %v11096_v56, 0.0  ;;  %v5993_v17 = vsel %vm1462_vm1, %v11075_v46, 0.0  ;;  %v12572_v46 = vld [vmem:[#allocation87_spill] sm:$0xff] }
0x1890   :  { %12558 = vst [vmem:[#allocation104_spill] sm:$0xff] %v11472_v9  ;;  %8449 = vrcp.f32 %v5679_v49  ;;  %v12564_v49 = vld [vmem:[#allocation170_spill] sm:$0xff] }
0x1891   :  { %v8440_v61 = vpop.eup %8439  ;;  %v4733_v33 = vpop.xlane.xlu1 %4732 }
0x1892   :  { %v5676_v47 = vpop.xlane.xlu0 %5675  ;;  %v11480_v10 = vmul.f32 %v8440_v61, %v12560_v23  ;;  %v8442_v19 = vpop.eup %8441 }
0x1893   :  { %8451 = vrcp.f32 %v5676_v47  ;;  %v11491_v11 = vmul.f32 %v8442_v19, %v12564_v49 }
0x1894   :  { %12561 = vst [vmem:[#allocation51_spill] sm:$0xff] %v11480_v10  ;;  %8453 = vrcp.f32 %v2799_v54 }
0x1895   :  { %v8444_v44 = vpop.eup %8443  ;;  %v5067_v8 = vpop.xlane.xlu1 %5066 }
0x1896   :  { %v2796_v16 = vpop.xlane.xlu0 %2795  ;;  %v11488_v9 = vmul.f32 %v8444_v44, %v12563_v62  ;;  %v8446_v23 = vpop.eup %8445  ;;  %v12567_v62 = vld [vmem:[#allocation177_spill] sm:$0xff] }
0x1897   :  { %8455 = vrcp.f32 %v2796_v16  ;;  %v11501_v44 = vmul.f32 %v8446_v23, %v12567_v62  ;;  %v6011_v16 = vsel %vm1462_vm1, %v11214_v26, 0.0 }
0x1898   :  { %8457 = vrcp.f32 %v4399_v32 }
0x1899   :  { %v8448_v61 = vpop.eup %8447  ;;  %v2805_v47 = vpop.xlane.xlu1 %2804  ;;  %12568 = vst [vmem:[#allocation119_spill] sm:$0xff] %v11501_v44 }
0x189a   :  { %v4396_v54 = vpop.xlane.xlu0 %4395  ;;  %6000 = vadd.xlane.f32.xlu1 %v5999_v41  ;;  %v11498_v10 = vmul.f32 %v8448_v61, %v12565_v38  ;;  %v8450_v19 = vpop.eup %8449  ;;  %v12570_v38 = vld [vmem:[#allocation192_spill] sm:$0xff] }
0x189b   :  { %8459 = vrcp.f32 %v4396_v54  ;;  %v11511_v61 = vmul.f32 %v8450_v19, %v12570_v38  ;;  %v5996_v19 = vsel %vm1462_vm1, %v11091_v57, 0.0  ;;  %v6005_v54 = vsel %vm1462_vm1, %v11201_v59, 0.0  ;;  %v12576_v57 = vld [vmem:[#allocation154_spill] sm:$0xff] }
0x189c   :  { %12566 = vst [vmem:[#allocation41_spill] sm:$0xff] %v11498_v10  ;;  %8461 = vrcp.f32 %v1516_v24 }
0x189d   :  { %v8452_v49 = vpop.eup %8451  ;;  %v1522_v32 = vpop.xlane.xlu1 %1521  ;;  %12571 = vst [vmem:[#allocation43_spill] sm:$0xff] %v11511_v61 }
0x189e   :  { %v1513_v56 = vpop.xlane.xlu0 %1512  ;;  %5994 = vadd.xlane.f32.xlu1 %v5993_v17  ;;  %v11508_v41 = vmul.f32 %v8452_v49, %v10887_v36  ;;  %v8454_v23 = vpop.eup %8453  ;;  %v12573_v17 = vld [vmem:[#allocation85_spill] sm:$0xff] }
0x189f   :  { %8463 = vrcp.f32 %v1513_v56  ;;  %v2908_v10 = vmul.f32 %v8454_v23, %v12572_v46  ;;  %v5990_v23 = vsel %vm1462_vm1, %v11079_v25, 0.0  ;;  %v12579_v25 = vld [vmem:[#allocation32_spill] sm:$0xff] }
0x18a0   :  { %12569 = vst [vmem:[#allocation92_spill] sm:$0xff] %v11508_v41  ;;  %8465 = vrcp.f32 %v4733_v33  ;;  %v12591_v41 = vld [vmem:[#allocation31_spill] sm:$0xff] }
0x18a1   :  { %v8456_v62 = vpop.eup %8455  ;;  %v2811_v24 = vpop.xlane.xlu1 %2810 }
0x18a2   :  { %v2907_v44 = vmul.f32 %v8456_v62, %v12573_v17  ;;  %v4730_v36 = vpop.xlane.xlu0 %4729  ;;  %6012 = vadd.xlane.f32.xlu1 %v6011_v16  ;;  %v8458_v49 = vpop.eup %8457  ;;  %v12574_v16 = vld [vmem:[#allocation152_spill] sm:$0xff] }
0x18a3   :  { %8467 = vrcp.f32 %v4730_v36  ;;  %5997 = vadd.xlane.f32.xlu0 %v5996_v19  ;;  %v11530_v46 = vmul.f32 %v8458_v49, %v12576_v57  ;;  %v12580_v57 = vld [vmem:[#allocation167_spill] sm:$0xff] }
0x18a4   :  { %v2915_v56 = vpack.c.bf16 %v2908_v10, %v2907_v44  ;;  %8469 = vrcp.f32 %v5067_v8 }
0x18a5   :  { %v8460_v38 = vpop.eup %8459  ;;  %v1528_v33 = vpop.xlane.xlu1 %1527  ;;  %12577 = vst [vmem:[#allocation103_spill] sm:$0xff] %v11530_v46 }
0x18a6   :  { %v5064_v26 = vpop.xlane.xlu0 %5063  ;;  %6006 = vadd.xlane.f32.xlu1 %v6005_v54  ;;  %2919 = vst.msk [vmem:[#allocation5 + $0x8] sm:$0xff] %vm1372_vm0, %v2915_v56  ;;  %v11527_v62 = vmul.f32 %v8460_v38, %v12574_v16  ;;  %v8462_v10 = vpop.eup %8461  ;;  %v12578_v54 = vld [vmem:[#allocation34_spill] sm:$0xff]  ;;  %v6008_v56 = vsel %vm1462_vm1, %v11209_v42, 0.0 }
0x18a7   :  { %8471 = vrcp.f32 %v5064_v26  ;;  %5991 = vadd.xlane.f32.xlu0 %v5990_v23  ;;  %v1625_v17 = vmul.f32 %v8462_v10, %v12578_v54 }
0x18a8   :  { %12575 = vst [vmem:[#allocation46_spill] sm:$0xff] %v11527_v62  ;;  %8473 = vrcp.f32 %v2805_v47  ;;  %v6002_v47 = vsel %vm1462_vm1, %v11205_v51, 0.0 }
0x18a9   :  { %v8464_v59 = vpop.eup %8463  ;;  %v2817_v44 = vpop.xlane.xlu1 %2816 }
0x18aa   :  { %v1624_v36 = vmul.f32 %v8464_v59, %v12579_v25  ;;  %v2802_v19 = vpop.xlane.xlu0 %2801  ;;  %v8466_v38 = vpop.eup %8465  ;;  %v12582_v59 = vld [vmem:[#allocation169_spill] sm:$0xff] }
0x18ab   :  { %8475 = vrcp.f32 %v2802_v19  ;;  %6009 = vadd.xlane.f32.xlu0 %v6008_v56  ;;  %v11545_v54 = vmul.f32 %v8466_v38, %v12582_v59  ;;  %v12586_v56 = vld [vmem:[#allocation176_spill] sm:$0xff] }
0x18ac   :  { %v1632_v49 = vpack.c.bf16 %v1625_v17, %v1624_v36  ;;  %8477 = vrcp.f32 %v1522_v32  ;;  %v12584_v36 = vld [vmem:[#allocation174_spill] sm:$0xff]  ;;  %v12589_v59 = vld [vmem:[#allocation84_spill] sm:$0xff] }
0x18ad   :  { %v8468_v26 = vpop.eup %8467  ;;  %v1534_v23 = vpop.xlane.xlu1 %1533  ;;  %12583 = vst [vmem:[#allocation118_spill] sm:$0xff] %v11545_v54 }
0x18ae   :  { %v1519_v16 = vpop.xlane.xlu0 %1518  ;;  %1636 = vst.msk [vmem:[#allocation5] sm:$0xff] %vm1372_vm0, %v1632_v49  ;;  %v11542_v10 = vmul.f32 %v8468_v26, %v12580_v57  ;;  %v8470_v42 = vpop.eup %8469  ;;  %v12588_v57 = vld [vmem:[#allocation86_spill] sm:$0xff]  ;;  %v12595_v26 = vld [vmem:[#allocation36_spill] sm:$0xff] }
0x18af   :  { %8479 = vrcp.f32 %v1519_v16  ;;  %6003 = vadd.xlane.f32.xlu0 %v6002_v47  ;;  %v11554_v49 = vmul.f32 %v8470_v42, %v12586_v56  ;;  %v12590_v56 = vld [vmem:[#allocation33_spill] sm:$0xff] }
0x18b0   :  { %12581 = vst [vmem:[#allocation50_spill] sm:$0xff] %v11542_v10  ;;  %8481 = vrcp.f32 %v2811_v24  ;;  %v11641_v10 = vld [vmem:[#allocation6 + $0x18] sm:$0xff] }
0x18b1   :  { %v8472_v17 = vpop.eup %8471  ;;  %v1959_v25 = vpop.permute.xlu1 %1958  ;;  %12587 = vst [vmem:[#allocation158_spill] sm:$0xff] %v11554_v49 }
0x18b2   :  { %1971 = vst.msk [vmem:[#allocation5] sm:$0xff] %vm1970_vm2, %v1959_v25  ;;  %v2808_v51 = vpop.xlane.xlu0 %2807  ;;  %v11551_v19 = vmul.f32 %v8472_v17, %v12584_v36  ;;  %v8474_v38 = vpop.eup %8473 }
0x18b3   :  { %8483 = vrcp.f32 %v2808_v51  ;;  %v2910_v24 = vmul.f32 %v8474_v38, %v12588_v57 }
0x18b4   :  { %12585 = vst [vmem:[#allocation42_spill] sm:$0xff] %v11551_v19  ;;  %8485 = vrcp.f32 %v1528_v33 }
0x18b5   :  { %v8476_v16 = vpop.eup %8475  ;;  %v3576_v47 = vpop.permute.xlu1 %3575 }
0x18b6   :  { %v2909_v32 = vmul.f32 %v8476_v16, %v12589_v59  ;;  %v1525_v25 = vpop.xlane.xlu0 %1524  ;;  %v8478_v8 = vpop.eup %8477  ;;  %v12592_v59 = vld [vmem:[#allocation91_spill] sm:$0xff] }
0x18b7   :  { %8487 = vrcp.f32 %v1525_v25  ;;  %v1627_v51 = vmul.f32 %v8478_v8, %v12590_v56 }
0x18b8   :  { %v2916_v17 = vpack.c.bf16 %v2910_v24, %v2909_v32  ;;  %8489 = vrcp.f32 %v2817_v44  ;;  %v12593_v32 = vld [vmem:[#allocation89_spill] sm:$0xff] }
0x18b9   :  { %v8480_v36 = vpop.eup %8479  ;;  %v2294_v42 = vpop.permute.xlu1 %2293 }
0x18ba   :  { %v1626_v61 = vmul.f32 %v8480_v36, %v12591_v41  ;;  %2306 = vst.msk [vmem:[#allocation5] sm:$0xff] %vm2305_vm3, %v2294_v42  ;;  %v2814_v33 = vpop.xlane.xlu0 %2813  ;;  %v8482_v38 = vpop.eup %8481  ;;  %v12594_v42 = vld [vmem:[#allocation38_spill] sm:$0xff] }
0x18bb   :  { %2920 = vst.msk [vmem:[#allocation5 + $0x18] sm:$0xff] %vm1372_vm0, %v2916_v17  ;;  %8491 = vrcp.f32 %v2814_v33  ;;  %v2912_v25 = vmul.f32 %v8482_v38, %v12592_v59  ;;  %v12596_v33 = vld [vmem:[#allocation90_spill] sm:$0xff] }
0x18bc   :  { %v1633_v16 = vpack.c.bf16 %v1627_v51, %v1626_v61  ;;  %8493 = vrcp.f32 %v1534_v23 }
0x18bd   :  { %v8484_v57 = vpop.eup %8483 }
0x18be   :  { %v2911_v24 = vmul.f32 %v8484_v57, %v12593_v32  ;;  %v1531_v44 = vpop.xlane.xlu0 %1530  ;;  %1637 = vst.msk [vmem:[#allocation5 + $0x10] sm:$0xff] %vm1372_vm0, %v1633_v16  ;;  %v8486_v8 = vpop.eup %8485  ;;  %v12597_v16 = vld [vmem:[#allocation88_spill] sm:$0xff] }
0x18bf   :  { %8495 = vrcp.f32 %v1531_v44  ;;  %v1629_v56 = vmul.f32 %v8486_v8, %v12594_v42 }
0x18c0   :  { %v2917_v41 = vpack.c.bf16 %v2912_v25, %v2911_v24  ;;  %v12598_v24 = vld [vmem:[#allocation37_spill] sm:$0xff] }
0x18c1   :  { %v8488_v36 = vpop.eup %8487 }
0x18c2   :  { %v1628_v17 = vmul.f32 %v8488_v36, %v12595_v26  ;;  %v3242_v19 = vpop.permute.xlu0 %3241  ;;  %2921 = vst.msk [vmem:[#allocation5 + $0x28] sm:$0xff] %vm1372_vm0, %v2917_v41  ;;  %v8490_v61 = vpop.eup %8489 }
0x18c3   :  { %3253 = vst.msk [vmem:[#allocation5 + $0x8] sm:$0xff] %vm1970_vm2, %v3242_v19  ;;  %v2914_v38 = vmul.f32 %v8490_v61, %v12596_v33  ;;  %v12599_v19 = vld [vmem:[#allocation35_spill] sm:$0xff] }
0x18c4   :  { %3587 = vst.msk [vmem:[#allocation5 + $0x8] sm:$0xff] %vm2305_vm3, %v3576_v47  ;;  %v1634_v23 = vpack.c.bf16 %v1629_v56, %v1628_v17 }
0x18c5   :  { %v8492_v51 = vpop.eup %8491 }
0x18c6   :  { %v2913_v57 = vmul.f32 %v8492_v51, %v12597_v16  ;;  %v3910_v59 = vpop.permute.xlu0 %3909  ;;  %1638 = vst.msk [vmem:[#allocation5 + $0x20] sm:$0xff] %vm1372_vm0, %v1634_v23  ;;  %v8494_v25 = vpop.eup %8493 }
0x18c7   :  { %3921 = vst.msk [vmem:[#allocation5 + $0x8] sm:$0xff] %vm2640_vm4, %v3910_v59  ;;  %v1631_v44 = vmul.f32 %v8494_v25, %v12598_v24  ;;  %v12600_v59 = vld [vmem:[#allocation136_spill] sm:$0xff] }
0x18c8   :  { %v2918_v26 = vpack.c.bf16 %v2914_v38, %v2913_v57 }
0x18c9   :  { %v8496_v32 = vpop.eup %8495 }
0x18ca   :  { %v1630_v8 = vmul.f32 %v8496_v32, %v12599_v19  ;;  %2922 = vst.msk [vmem:[#allocation5 + $0x38] sm:$0xff] %vm1372_vm0, %v2918_v26  ;;  %v12601_v26 = vld [vmem:[#allocation138_spill] sm:$0xff] }
0x18cc   :  { %v1635_v47 = vpack.c.bf16 %v1631_v44, %v1630_v8 }
0x18ce   :  { %1639 = vst.msk [vmem:[#allocation5 + $0x30] sm:$0xff] %vm1372_vm0, %v1635_v47 }
0x18d7   :  { %v11580_v41 = vpop.f32.mrb[192].mxu0 }
0x18d8   :  { %v11582_v36 = vpop.f32.mrb[193].mxu0 }
0x18d9   :  { %v11584_v42 = vpop.f32.mrb[194].mxu0 }
0x18da   :  { %v11586_v56 = vpop.f32.mrb[195].mxu0 }
0x18ea   :  { %v5356_v17 = vpop.xlane.xlu1 %5355 }
0x18ee   :  { %v4076_v61 = vpop.xlane.xlu1 %4075 }
0x18ef   :  { %8497 = vrcp.f32 %v4076_v61 }
0x18f2   :  { %v4079_v23 = vpop.xlane.xlu1 %4078 }
0x18f3   :  { %8499 = vrcp.f32 %v4079_v23 }
0x18f4   :  { %8501 = vrcp.f32 %v5356_v17 }
0x18f6   :  { %v3244_v51 = vpop.permute.xlu1 %3243 }
0x18f7   :  { %3254 = vst.msk [vmem:[#allocation5 + $0x18] sm:$0xff] %vm1970_vm2, %v3244_v51  ;;  %v5359_v33 = vpop.xlane.xlu0 %5358  ;;  %v12602_v51 = vld [vmem:[#allocation185_spill] sm:$0xff] }
0x18f8   :  { %8503 = vrcp.f32 %v5359_v33 }
0x18f9   :  { %v8498_v38 = vpop.eup %8497 }
0x18fa   :  { %v4187_v25 = vmul.f32 %v8498_v38, %v12600_v59  ;;  %v12603_v38 = vld [vmem:[#allocation187_spill] sm:$0xff] }
0x18fb   :  { %v2629_v16 = vpop.permute.xlu0 %2628 }
0x18fc   :  { %2641 = vst.msk [vmem:[#allocation5] sm:$0xff] %vm2640_vm4, %v2629_v16 }
0x18fd   :  { %v8500_v57 = vpop.eup %8499 }
0x18fe   :  { %v4188_v32 = vmul.f32 %v8500_v57, %v12601_v26  ;;  %v8502_v19 = vpop.eup %8501 }
0x18ff   :  { %v11592_v24 = vpop.f32.mrb[196].mxu0  ;;  %v1961_v44 = vpop.permute.xlu0 %1960  ;;  %v5467_v33 = vmul.f32 %v8502_v19, %v12602_v51 }
0x1900   :  { %1972 = vst.msk [vmem:[#allocation5 + $0x10] sm:$0xff] %vm1970_vm2, %v1961_v44  ;;  %v11595_v8 = vpop.f32.mrb[197].mxu0  ;;  %v4195_v47 = vpack.c.bf16 %v4188_v32, %v4187_v25 }
0x1901   :  { %v7960_v17 = vpop.f32.mrb[198].mxu0 }
0x1902   :  { %v8504_v61 = vpop.eup %8503  ;;  %v11597_v23 = vpop.f32.mrb[199].mxu0  ;;  %4199 = vst.msk [vmem:[#allocation5 + $0x40] sm:$0xff] %vm1372_vm0, %v4195_v47 }
0x1903   :  { %v5468_v16 = vmul.f32 %v8504_v61, %v12603_v38 }
0x1905   :  { %v5475_v57 = vpack.c.bf16 %v5468_v16, %v5467_v33 }
0x1907   :  { %v11602_v59 = vpop.f32.mrb[200].mxu0  ;;  %5479 = vst.msk [vmem:[#allocation5 + $0x48] sm:$0xff] %vm1372_vm0, %v5475_v57 }
0x1908   :  { %v11605_v26 = vpop.f32.mrb[201].mxu0  ;;  %v6282_v25 = vsel %vm1462_vm1, %v11602_v59, -inf }
0x1909   :  { %v11609_v32 = vpop.f32.mrb[202].mxu0  ;;  %6283 = vmax.xlane.f32.xlu0 %v6282_v25  ;;  %v6276_v47 = vsel %vm1462_vm1, %v11605_v26, -inf }
0x190a   :  { %v11611_v44 = vpop.f32.mrb[203].mxu0  ;;  %v6285_v33 = vsel %vm1462_vm1, %v11609_v32, -inf }
0x190b   :  { %v6279_v19 = vsel %vm1462_vm1, %v11611_v44, -inf }
0x190c   :  { %6280 = vmax.xlane.f32.xlu1 %v6279_v19 }
0x190d   :  { %6277 = vmax.xlane.f32.xlu0 %v6276_v47  ;;  %v12604_v47 = vpack.c.bf16 %v11235_v48, %v11232_v28 }
0x190f   :  { %v11617_v61 = vpop.f32.mrb[204].mxu0 }
0x1910   :  { %v11619_v51 = vpop.f32.mrb[205].mxu0  ;;  %v6294_v38 = vsel %vm1462_vm1, %v11617_v61, -inf }
0x1911   :  { %v11625_v16 = vpop.f32.mrb[206].mxu0  ;;  %6286 = vmax.xlane.f32.xlu0 %v6285_v33  ;;  %6295 = vmax.xlane.f32.xlu1 %v6294_v38  ;;  %v12605_v33 = vpack.c.bf16 %v11249_v29, %v11246_v40 }
0x1912   :  { %v11627_v57 = vpop.f32.mrb[207].mxu0  ;;  %v6297_v25 = vsel %vm1462_vm1, %v11625_v16, -inf }
0x1913   :  { %v6291_v19 = vsel %vm1462_vm1, %v11627_v57, -inf }
0x1915   :  { %6298 = vmax.xlane.f32.xlu1 %v6297_v25  ;;  %v11643_v25 = vld [vmem:[#allocation6 + $0x38] sm:$0xff] }
0x1916   :  { %v7194_v28 = vcombine.high %v11641_v10, %v11643_v25 }
0x1918   :  { %6704 = vmatprep.subr.bf16.mxu1 %v7194_v28 }
0x1919   :  { %6292 = vmax.xlane.f32.xlu1 %v6291_v19 }
0x1927   :  { %3577 = vrot.lane.b32.xlu0 %v12604_v47, %s8629_s14  ;;  %v6001_v49 = vpop.xlane.xlu1 %6000 }
0x1928   :  { %8505 = vrcp.f32 %v6001_v49 }
0x192a   :  { %2295 = vrot.lane.b32.xlu1 %v12605_v33, %s8629_s14 }
0x192b   :  { %v5995_v38 = vpop.xlane.xlu1 %5994 }
0x192c   :  { %8507 = vrcp.f32 %v5995_v38 }
0x192f   :  { %v6013_v54 = vpop.xlane.xlu1 %6012 }
0x1930   :  { %8509 = vrcp.f32 %v6013_v54  ;;  %v5998_v48 = vpop.xlane.xlu0 %5997 }
0x1931   :  { %8511 = vrcp.f32 %v5998_v48 }
0x1932   :  { %v8506_v49 = vpop.eup %8505 }
0x1933   :  { %v11650_v40 = vmul.f32 %v8506_v49, %v11584_v42  ;;  %v6007_v38 = vpop.xlane.xlu1 %6006  ;;  %v12608_v42 = vld [vmem:[#allocation128_spill] sm:$0xff] }
0x1934   :  { %v5992_v29 = vpop.xlane.xlu0 %5991 }
0x1935   :  { %8513 = vrcp.f32 %v5992_v29 }
0x1936   :  { %v8508_v47 = vpop.eup %8507 }
0x1937   :  { %v11653_v33 = vmul.f32 %v8508_v47, %v11586_v56 }
0x1938   :  { %v6010_v62 = vpop.xlane.xlu0 %6009 }
0x1939   :  { %8515 = vrcp.f32 %v6010_v62 }
0x193a   :  { %v8510_v19 = vpop.eup %8509  ;;  %8517 = vrcp.f32 %v6007_v38 }
0x193b   :  { %v8512_v46 = vpop.eup %8511  ;;  %v11655_v54 = vmul.f32 %v8510_v19, %v7960_v17 }
0x193c   :  { %v6004_v48 = vpop.xlane.xlu0 %6003  ;;  %v11658_v28 = vmul.f32 %v8512_v46, %v11580_v41  ;;  %v6288_v46 = vsel %vm1462_vm1, %v11619_v51, -inf  ;;  %v4083_v41 = vsel %vm1462_vm1, %v12608_v42, 0.0  ;;  %v12613_v42 = vld [vmem:[#allocation182_spill] sm:$0xff] }
0x193d   :  { %8519 = vrcp.f32 %v6004_v48 }
0x193f   :  { %v8514_v49 = vpop.eup %8513 }
0x1940   :  { %v11663_v56 = vmul.f32 %v8514_v49, %v11582_v36 }
0x1942   :  { %v6127_v62 = vpack.c.bf16 %v11653_v33, %v11663_v56 }
0x1943   :  { %v8516_v29 = vpop.eup %8515 }
0x1944   :  { %v11668_v47 = vmul.f32 %v8516_v29, %v11592_v24  ;;  %v8518_v17 = vpop.eup %8517  ;;  %v12606_v24 = vld [vmem:[#allocation178_spill] sm:$0xff]  ;;  %v12607_v29 = vld [vmem:[#allocation127_spill] sm:$0xff] }
0x1945   :  { %v11678_v36 = vmul.f32 %v8518_v17, %v11597_v23  ;;  %v5360_v49 = vsel %vm1462_vm1, %v12606_v24, 0.0  ;;  %v12610_v23 = vpack.c.bf16 %v11287_v52, %v11284_v3  ;;  %v12611_v17 = vpack.c.bf16 %v11315_v22, %v11312_v63  ;;  %v12617_v22 = vld [vmem:[#allocation134_spill] sm:$0xff] }
0x1946   :  { %6289 = vmax.xlane.f32.xlu0 %v6288_v46  ;;  %v4080_v46 = vsel %vm1462_vm1, %v12607_v29, 0.0  ;;  %v12616_v52 = vpack.c.bf16 %v11295_v5, %v11292_v43  ;;  %v12618_v29 = vpack.c.bf16 %v11303_v37, %v11300_v21 }
0x1947   :  { %v8520_v19 = vpop.eup %8519 }
0x1948   :  { %v11675_v38 = vmul.f32 %v8520_v19, %v11595_v8  ;;  %v12609_v8 = vpack.c.bf16 %v11265_v12, %v11262_v50  ;;  %v12612_v19 = vld [vmem:[#allocation179_spill] sm:$0xff]  ;;  %v12614_v50 = vpack.c.bf16 %v11277_v27, %v11274_v1  ;;  %v12615_v12 = vld [vmem:[#allocation133_spill] sm:$0xff] }
0x1949   :  { %v5363_v24 = vsel %vm1462_vm1, %v12612_v19, 0.0  ;;  %v4086_v3 = vsel %vm1462_vm1, %v12615_v12, 0.0 }
0x194a   :  { %v6129_v48 = vpack.c.bf16 %v11678_v36, %v11675_v38 }
0x194e   :  { %5361 = vadd.xlane.f32.xlu1 %v5360_v49  ;;  %v4089_v49 = vsel %vm1462_vm1, %v12617_v22, 0.0 }
0x1952   :  { %4081 = vadd.xlane.f32.xlu1 %v4080_v46 }
0x1956   :  { %4084 = vadd.xlane.f32.xlu1 %v4083_v41  ;;  %v5366_v41 = vsel %vm1462_vm1, %v12613_v42, 0.0 }
0x195c   :  { %3911 = vrot.lane.b32.xlu0 %v12609_v8, %s8628_s13 }
0x1967   :  { %3245 = vrot.lane.b32.xlu1 %v12610_v23, %s8627_s26 }
0x196b   :  { %2297 = vrot.lane.b32.xlu1 %v12611_v17, %s8629_s14  ;;  %v12619_v17 = vpack.c.bf16 %v11327_v15, %v11324_v4 }
0x197b   :  { %5364 = vadd.xlane.f32.xlu0 %v5363_v24 }
0x198f   :  { %5367 = vadd.xlane.f32.xlu1 %v5366_v41 }
0x1991   :  { %2630 = vrot.lane.b32.xlu0 %v12614_v50, %s8628_s13 }
0x1993   :  { %4087 = vadd.xlane.f32.xlu1 %v4086_v3 }
0x1995   :  { %1962 = vrot.lane.b32.xlu0 %v12616_v52, %s8627_s26 }
0x1996   :  { %v6284_v63 = vpop.xlane.xlu0 %6283 }
0x1997   :  { %4090 = vadd.xlane.f32.xlu1 %v4089_v49  ;;  %v6302_v27 = vsub.f32 %v11602_v59, %v6284_v63  ;;  %v6504_v63 = vld [vmem:[#allocation6 + $0x78] sm:$0xff] }
0x1999   :  { %3579 = vrot.lane.b32.xlu0 %v12618_v29, %s8629_s14  ;;  %v6281_v1 = vpop.xlane.xlu1 %6280  ;;  %v6312_v19 = vmul.f32 1.442695, %v6302_v27 }
0x199a   :  { %v6301_v46 = vsub.f32 %v11611_v44, %v6281_v1  ;;  %v6278_v8 = vpop.xlane.xlu0 %6277 }
0x199b   :  { %v6300_v23 = vsub.f32 %v11605_v26, %v6278_v8  ;;  %v12621_v8 = vcombine.low %v11641_v10, %v11643_v25  ;;  %v12622_v10 = vld [vmem:[#allocation183_spill] sm:$0xff] }
0x199c   :  { %v6310_v43 = vmul.f32 1.442695, %v6301_v46  ;;  %v5369_v25 = vsel %vm1462_vm1, %v12622_v10, 0.0 }
0x199d   :  { %v6308_v5 = vmul.f32 1.442695, %v6300_v23  ;;  %3913 = vrot.lane.b32.xlu0 %v12619_v17, %s8628_s13  ;;  %v6507_v17 = vld [vmem:[#allocation6 + $0xd8] sm:$0xff] }
0x199e   :  { %8521 = vpow2.f32 %v6310_v43  ;;  %v6287_v24 = vpop.xlane.xlu0 %6286  ;;  %v6296_v37 = vpop.xlane.xlu1 %6295 }
0x199f   :  { %8523 = vpow2.f32 %v6308_v5  ;;  %v6303_v21 = vsub.f32 %v11609_v32, %v6287_v24  ;;  %v6306_v59 = vsub.f32 %v11617_v61, %v6296_v37  ;;  %v12620_v32 = vpack.c.bf16 %v11343_v35, %v11340_v30  ;;  %v6505_v35 = vld [vmem:[#allocation6 + $0x98] sm:$0xff] }
0x19a0   :  { %8525 = vpow2.f32 %v6312_v19  ;;  %v6506_v30 = vld [vmem:[#allocation6 + $0xb8] sm:$0xff] }
0x19a1   :  { %v6314_v44 = vmul.f32 1.442695, %v6303_v21  ;;  %v6320_v42 = vmul.f32 1.442695, %v6306_v59  ;;  %v7198_v43 = vcombine.high %v6505_v35, %v6506_v30  ;;  %v6508_v19 = vld [vmem:[#allocation6 + $0xf8] sm:$0xff]  ;;  %v7197_v24 = vcombine.low %v6505_v35, %v6506_v30 }
0x19a2   :  { %v3578_v26 = vpop.permute.xlu0 %3577  ;;  %v6299_v41 = vpop.xlane.xlu1 %6298  ;;  %v7200_v37 = vcombine.high %v6507_v17, %v6508_v19  ;;  %v6509_v21 = vld [vmem:[#allocation6 + $0x118] sm:$0xff] }
0x19a3   :  { %8527 = vpow2.f32 %v6314_v44  ;;  %3588 = vst.msk [vmem:[#allocation5 + $0x18] sm:$0xff] %vm2305_vm3, %v3578_v26  ;;  %v6307_v4 = vsub.f32 %v11625_v16, %v6299_v41  ;;  %v6503_v16 = vld [vmem:[#allocation6 + $0x58] sm:$0xff]  ;;  %v7199_v44 = vcombine.low %v6507_v17, %v6508_v19 }
0x19a4   :  { %8529 = vpow2.f32 %v6320_v42  ;;  %v7196_v1 = vcombine.high %v6503_v16, %v6504_v63  ;;  %v7195_v23 = vcombine.low %v6503_v16, %v6504_v63  ;;  %v6510_v59 = vld [vmem:[#allocation6 + $0x138] sm:$0xff] }
0x19a5   :  { %v6322_v15 = vmul.f32 1.442695, %v6307_v4  ;;  %v7202_v42 = vcombine.high %v6509_v21, %v6510_v59  ;;  %v6511_v26 = vld [vmem:[#allocation6 + $0x158] sm:$0xff]  ;;  %v7201_v4 = vcombine.low %v6509_v21, %v6510_v59 }
0x19a6   :  { %v6293_v50 = vpop.xlane.xlu1 %6292  ;;  %v6512_v41 = vld [vmem:[#allocation6 + $0x178] sm:$0xff] }
0x19a7   :  { %8531 = vpow2.f32 %v6322_v15  ;;  %v7204_v15 = vcombine.high %v6511_v26, %v6512_v41  ;;  %v6305_v16 = vsub.f32 %v11627_v57, %v6293_v50  ;;  %v6520_v57 = vld [vmem:[#allocation6 + $0x278] sm:$0xff] }
0x19a8   :  { %v11731_v12 = vpop.eup %8521  ;;  %3247 = vrot.lane.b32.xlu1 %v12620_v32, %s8627_s26  ;;  %v6513_v32 = vld [vmem:[#allocation6 + $0x198] sm:$0xff] }
0x19a9   :  { %v11737_v61 = vpop.eup %8523  ;;  %v6318_v30 = vmul.f32 1.442695, %v6305_v16  ;;  %v6327_v59 = vsel %vm1462_vm1, %v11731_v12, 0.0  ;;  %v12624_v16 = vld [vmem:[#allocation106_spill] sm:$0xff] }
0x19aa   :  { %v2296_v3 = vpop.permute.xlu1 %2295  ;;  %v6356_v52 = vpack.c.bf16 %v11731_v12, %v11737_v61  ;;  %v11742_v22 = vpop.eup %8525 }
0x19ab   :  { %2307 = vst.msk [vmem:[#allocation5 + $0x10] sm:$0xff] %vm2305_vm3, %v2296_v3  ;;  %v6514_v3 = vld [vmem:[#allocation6 + $0x1b8] sm:$0xff]  ;;  %8533 = vpow2.f32 %v6318_v30 }
0x19ac   :  { %7985 = vmatprep.mubr.msk.bf16.mxu1 %vm1462_vm1, %v6356_v52  ;;  %v7203_v52 = vcombine.low %v6511_v26, %v6512_v41  ;;  %v7206_v63 = vcombine.high %v6513_v32, %v6514_v3  ;;  %v7205_v35 = vcombine.low %v6513_v32, %v6514_v3  ;;  %v6526_v30 = vld [vmem:[#allocation6 + $0x338] sm:$0xff] }
0x19ad   :  { %v8528_v49 = vpop.eup %8527 }
0x19ae   :  { %v6357_v29 = vpack.c.bf16 %v8528_v49, %v11742_v22  ;;  %v11746_v27 = vpop.eup %8529 }
0x19b0   :  { %7986 = vmatmul.mubr.msk.bf16.vlgmr.msra.gmra.mrb[136].mxu1 %vm1462_vm1, %v6357_v29  ;;  %v6515_v29 = vld [vmem:[#allocation6 + $0x1d8] sm:$0xff] }
0x19b1   :  { %v11749_v46 = vpop.eup %8531  ;;  %6705 = vmatpush1.bf16.msra.mxu1 %v12621_v8 }
0x19b2   :  { %6706 = vmatprep.subr.bf16.mxu1 %v7196_v1  ;;  %v6359_v5 = vpack.c.bf16 %v11749_v46, %v11746_v27  ;;  %v6516_v1 = vld [vmem:[#allocation6 + $0x1f8] sm:$0xff]  ;;  %v6345_v41 = vsel %vm1462_vm1, %v11749_v46, 0.0 }
0x19b3   :  { %v7208_v8 = vcombine.high %v6515_v29, %v6516_v1  ;;  %v7207_v17 = vcombine.low %v6515_v29, %v6516_v1 }
0x19b5   :  { %6707 = vmatpush1.bf16.msra.mxu1 %v7195_v23  ;;  %v6517_v23 = vld [vmem:[#allocation6 + $0x218] sm:$0xff]  ;;  %v8534_v32 = vpop.eup %8533 }
0x19b6   :  { %6708 = vmatprep.subr.bf16.mxu1 %v7198_v43  ;;  %v6518_v43 = vld [vmem:[#allocation6 + $0x238] sm:$0xff]  ;;  %v6339_v1 = vsel %vm1462_vm1, %v8534_v32, 0.0 }
0x19b7   :  { %v7210_v19 = vcombine.high %v6517_v23, %v6518_v43  ;;  %v7209_v50 = vcombine.low %v6517_v23, %v6518_v43  ;;  %v12628_v23 = vld [vmem:[#allocation115_spill] sm:$0xff] }
0x19b9   :  { %6709 = vmatpush1.bf16.msra.mxu1 %v7197_v24  ;;  %v6333_v24 = vsel %vm1462_vm1, %v8528_v49, 0.0 }
0x19ba   :  { %6710 = vmatprep.subr.bf16.mxu1 %v7200_v37  ;;  %v6519_v37 = vld [vmem:[#allocation6 + $0x258] sm:$0xff] }
0x19bb   :  { %v7212_v21 = vcombine.high %v6519_v37, %v6520_v57  ;;  %v7211_v10 = vcombine.low %v6519_v37, %v6520_v57  ;;  %v6528_v37 = vld [vmem:[#allocation6 + $0x378] sm:$0xff] }
0x19bc   :  { %5370 = vadd.xlane.f32.xlu0 %v5369_v25  ;;  %v12623_v25 = vpack.c.bf16 %v11335_v14, %v11332_v2 }
0x19bd   :  { %6711 = vmatpush1.bf16.msra.mxu1 %v7199_v44  ;;  %v6521_v44 = vld [vmem:[#allocation6 + $0x298] sm:$0xff] }
0x19be   :  { %6712 = vmatprep.subr.bf16.mxu1 %v7202_v42  ;;  %v6522_v42 = vld [vmem:[#allocation6 + $0x2b8] sm:$0xff] }
0x19bf   :  { %v7214_v49 = vcombine.high %v6521_v44, %v6522_v42  ;;  %v7213_v3 = vcombine.low %v6521_v44, %v6522_v42  ;;  %v6530_v44 = vld [vmem:[#allocation6 + $0x3b8] sm:$0xff] }
0x19c1   :  { %6713 = vmatpush1.bf16.msra.mxu1 %v7201_v4  ;;  %v6523_v4 = vld [vmem:[#allocation6 + $0x2d8] sm:$0xff] }
0x19c2   :  { %6714 = vmatprep.subr.bf16.mxu1 %v7204_v15  ;;  %v6524_v15 = vld [vmem:[#allocation6 + $0x2f8] sm:$0xff] }
0x19c3   :  { %v7216_v14 = vcombine.high %v6523_v4, %v6524_v15 }
0x19c5   :  { %6715 = vmatpush1.bf16.msra.mxu1 %v7203_v52 }
0x19c6   :  { %6716 = vmatprep.subr.bf16.mxu1 %v7206_v63  ;;  %v12625_v63 = vld [vmem:[#allocation47_spill] sm:$0xff] }
0x19c7   :  { %v12626_v2 = vpack.c.bf16 %v12624_v16, %v12625_v63 }
0x19c9   :  { %6717 = vmatpush1.bf16.msra.mxu1 %v7205_v35  ;;  %v6525_v35 = vld [vmem:[#allocation6 + $0x318] sm:$0xff] }
0x19ca   :  { %6718 = vmatprep.subr.bf16.mxu1 %v7208_v8  ;;  %v12627_v8 = vld [vmem:[#allocation48_spill] sm:$0xff]  ;;  %v7217_v57 = vcombine.low %v6525_v35, %v6526_v30 }
0x19cb   :  { %v12629_v43 = vpack.c.bf16 %v12627_v8, %v12628_v23  ;;  %v6324_v8 = vsel %vm1462_vm1, %v11737_v61, 0.0  ;;  %v6342_v23 = vsel %vm1462_vm1, %v11746_v27, 0.0  ;;  %v12635_v61 = vld [vmem:[#allocation131_spill] sm:$0xff] }
0x19cc   :  { %6334 = vadd.xlane.f32.xlu1 %v6333_v24  ;;  %v6527_v24 = vld [vmem:[#allocation6 + $0x358] sm:$0xff] }
0x19cd   :  { %6719 = vmatpush1.bf16.msra.mxu1 %v7207_v17  ;;  %v7218_v17 = vcombine.high %v6525_v35, %v6526_v30  ;;  %v7219_v42 = vcombine.low %v6527_v24, %v6528_v37  ;;  %v6485_v35 = vld [vmem:[#allocation5] sm:$0xff] }
0x19ce   :  { %6720 = vmatprep.subr.bf16.mxu1 %v7210_v19 }
0x19d0   :  { %6328 = vadd.xlane.f32.xlu1 %v6327_v59  ;;  %v6529_v59 = vld [vmem:[#allocation6 + $0x398] sm:$0xff] }
0x19d1   :  { %6721 = vmatpush1.bf16.msra.mxu1 %v7209_v50  ;;  %v7220_v50 = vcombine.high %v6527_v24, %v6528_v37  ;;  %v12634_v37 = vld [vmem:[#allocation180_spill] sm:$0xff] }
0x19d2   :  { %2632 = vrot.lane.b32.xlu0 %v12623_v25, %s8628_s13  ;;  %6722 = vmatprep.subr.bf16.mxu1 %v7212_v21  ;;  %v7222_v25 = vcombine.high %v6529_v59, %v6530_v44 }
0x19d3   :  { %v6290_v26 = vpop.xlane.xlu0 %6289 }
0x19d4   :  { %v6304_v12 = vsub.f32 %v11619_v51, %v6290_v26  ;;  %6346 = vadd.xlane.f32.xlu1 %v6345_v41  ;;  %v7215_v51 = vcombine.low %v6523_v4, %v6524_v15  ;;  %v6531_v41 = vld [vmem:[#allocation6 + $0x3d8] sm:$0xff]  ;;  %v7221_v15 = vcombine.low %v6529_v59, %v6530_v44  ;;  %v12636_v59 = vld [vmem:[#allocation184_spill] sm:$0xff] }
0x19d5   :  { %6723 = vmatpush1.bf16.msra.mxu1 %v7211_v10  ;;  %v6532_v4 = vld [vmem:[#allocation6 + $0x3f8] sm:$0xff] }
0x19d6   :  { %v6316_v52 = vmul.f32 1.442695, %v6304_v12  ;;  %1964 = vrot.lane.b32.xlu0 %v12626_v2, %s8627_s26  ;;  %6724 = vmatprep.subr.bf16.mxu1 %v7214_v49  ;;  %v6486_v12 = vld [vmem:[#allocation5 + $0x8] sm:$0xff]  ;;  %v7223_v63 = vcombine.low %v6531_v41, %v6532_v4 }
0x19d7   :  { %v3912_v29 = vpop.permute.xlu0 %3911 }
0x19d8   :  { %8535 = vpow2.f32 %v6316_v52  ;;  %3922 = vst.msk [vmem:[#allocation5 + $0x18] sm:$0xff] %vm2640_vm4, %v3912_v29  ;;  %6340 = vadd.xlane.f32.xlu1 %v6339_v1  ;;  %v12633_v29 = vld [vmem:[#allocation137_spill] sm:$0xff] }
0x19d9   :  { %6725 = vmatpush1.bf16.msra.mxu1 %v7213_v3  ;;  %v7224_v3 = vcombine.high %v6531_v41, %v6532_v4 }
0x19da   :  { %3581 = vrot.lane.b32.xlu0 %v12629_v43, %s8629_s14  ;;  %6726 = vmatprep.subr.bf16.mxu1 %v7216_v14  ;;  %v12632_v14 = vld [vmem:[#allocation135_spill] sm:$0xff] }
0x19db   :  { %v5362_v19 = vpop.xlane.xlu1 %5361 }
0x19dd   :  { %6727 = vmatpush1.bf16.msra.mxu1 %v7215_v51 }
0x19de   :  { %6728 = vmatprep.subr.bf16.mxu1 %v7218_v17 }
0x19df   :  { %v4082_v21 = vpop.xlane.xlu1 %4081  ;;  %v6488_v30 = vld [vmem:[#allocation5 + $0x18] sm:$0xff] }
0x19e0   :  { %8537 = vrcp.f32 %v4082_v21 }
0x19e1   :  { %6729 = vmatpush1.bf16.msra.mxu1 %v7217_v57  ;;  %v5372_v57 = vsel %vm1462_vm1, %v12634_v37, 0.0  ;;  %v12660_v37 = vld [vmem:[#allocation118_spill] sm:$0xff] }
0x19e2   :  { %v8536_v10 = vpop.eup %8535  ;;  %6730 = vmatprep.subr.bf16.mxu1 %v7220_v50  ;;  %v4092_v50 = vsel %vm1462_vm1, %v12635_v61, 0.0 }
0x19e3   :  { %v4085_v49 = vpop.xlane.xlu1 %4084  ;;  %v6358_v26 = vpack.c.bf16 %v8534_v32, %v8536_v10  ;;  %v12630_v32 = vld [vmem:[#allocation39_spill] sm:$0xff]  ;;  %v6336_v43 = vsel %vm1462_vm1, %v8536_v10, 0.0 }
0x19e4   :  { %8539 = vrcp.f32 %v4085_v49  ;;  %v12631_v16 = vpack.c.bf16 %v11371_v18, %v12630_v32  ;;  %v6330_v18 = vsel %vm1462_vm1, %v11742_v22, 0.0  ;;  %v12638_v49 = vld [vmem:[#allocation132_spill] sm:$0xff] }
0x19e5   :  { %6731 = vmatpush1.bf16.msra.mxu1 %v7219_v42  ;;  %7989 = vmatprep.mubr.msk.bf16.mxu1 %vm1462_vm1, %v6358_v26  ;;  %8541 = vrcp.f32 %v5362_v19  ;;  %v12637_v42 = vld [vmem:[#allocation186_spill] sm:$0xff]  ;;  %v4095_v26 = vsel %vm1462_vm1, %v12638_v49, 0.0  ;;  %v12672_v49 = vld [vmem:[#allocation189_spill] sm:$0xff] }
0x19e6   :  { %7990 = vmatmul.mubr.msk.bf16.gmra.mrb[140].mxu1 %vm1462_vm1, %v6359_v5  ;;  %6732 = vmatprep.subr.bf16.mxu1 %v7222_v25 }
0x19e7   :  { %6736 = vmatprep.mubr.bf16.mxu1 %v6486_v12  ;;  %v3246_v52 = vpop.permute.xlu1 %3245  ;;  %v12639_v12 = vld [vmem:[#allocation116_spill] sm:$0xff] }
0x19e8   :  { %3255 = vst.msk [vmem:[#allocation5 + $0x28] sm:$0xff] %vm1970_vm2, %v3246_v52 }
0x19e9   :  { %6733 = vmatpush1.bf16.msra.mxu1 %v7221_v15  ;;  %2299 = vrot.lane.b32.xlu1 %v12631_v16, %s8629_s14 }
0x19ea   :  { %6734 = vmatprep.subr.bf16.mxu1 %v7224_v3  ;;  %v8538_v2 = vpop.eup %8537  ;;  %v12640_v3 = vpack.c.bf16 %v11381_v45, %v12639_v12  ;;  %v12642_v45 = vpack.c.bf16 %v11419_v55, %v11416_v58  ;;  %v12647_v58 = vpack.c.bf16 %v11459_v0, %v11456_v39  ;;  %v12654_v39 = vld [vmem:[#allocation119_spill] sm:$0xff]  ;;  %v12655_v0 = vld [vmem:[#allocation41_spill] sm:$0xff] }
0x19eb   :  { %v4189_v5 = vmul.f32 %v8538_v2, %v12632_v14  ;;  %v2298_v27 = vpop.permute.xlu1 %2297  ;;  %v12641_v2 = vpack.c.bf16 %v11399_v6, %v11396_v7  ;;  %v12646_v6 = vpack.c.bf16 %v11447_v34, %v11444_v60  ;;  %v12651_v60 = vld [vmem:[#allocation51_spill] sm:$0xff] }
0x19ec   :  { %v12652_v34 = vpack.c.bf16 %v11483_v20, %v12651_v60 }
0x19ed   :  { %6735 = vmatpush1.bf16.msra.mxu1 %v7223_v63 }
0x19ee   :  { %v8540_v46 = vpop.eup %8539 }
0x19ef   :  { %v4190_v1 = vmul.f32 %v8540_v46, %v12633_v29  ;;  %v8542_v21 = vpop.eup %8541 }
0x19f0   :  { %6737 = vmatmul.mubr.bf16.vlgmr.msra.gmra.mrb[144].mxu1 %v6485_v35  ;;  %v5469_v44 = vmul.f32 %v8542_v21, %v12636_v59 }
0x19f1   :  { %6746 = vmatprep.mubr.bf16.mxu1 %v6488_v30  ;;  %v4196_v51 = vpack.c.bf16 %v4190_v1, %v4189_v5  ;;  %v12643_v5 = vpack.c.bf16 %v11427_v31, %v11424_v53  ;;  %v12644_v1 = vld [vmem:[#allocation140_spill] sm:$0xff]  ;;  %v12645_v30 = vld [vmem:[#allocation142_spill] sm:$0xff]  ;;  %v12648_v53 = vld [vmem:[#allocation181_spill] sm:$0xff] }
0x19f2   :  { %v5375_v55 = vsel %vm1462_vm1, %v12648_v53, 0.0  ;;  %v12649_v31 = vld [vmem:[#allocation49_spill] sm:$0xff] }
0x19f3   :  { %4200 = vst.msk [vmem:[#allocation5 + $0x50] sm:$0xff] %vm1372_vm0, %v4196_v51 }
0x19f9   :  { %6331 = vadd.xlane.f32.xlu0 %v6330_v18  ;;  %v12650_v18 = vpack.c.bf16 %v11467_v13, %v12649_v31  ;;  %v12657_v13 = vld [vmem:[#allocation103_spill] sm:$0xff] }
0x19fd   :  { %6325 = vadd.xlane.f32.xlu0 %v6324_v8  ;;  %v12653_v8 = vpack.c.bf16 %v11491_v11, %v11488_v9  ;;  %v12661_v9 = vld [vmem:[#allocation50_spill] sm:$0xff] }
0x19fe   :  { %v12662_v11 = vpack.c.bf16 %v12660_v37, %v12661_v9 }
0x1a01   :  { %6343 = vadd.xlane.f32.xlu0 %v6342_v23  ;;  %v12656_v23 = vpack.c.bf16 %v12654_v39, %v12655_v0  ;;  %v12678_v39 = vld [vmem:[#allocation117_spill] sm:$0xff]  ;;  %v12679_v0 = vld [vmem:[#allocation104_spill] sm:$0xff] }
0x1a05   :  { %6337 = vadd.xlane.f32.xlu0 %v6336_v43 }
0x1a08   :  { %v5365_v17 = vpop.xlane.xlu0 %5364 }
0x1a09   :  { %8543 = vrcp.f32 %v5365_v17  ;;  %v12658_v17 = vld [vmem:[#allocation46_spill] sm:$0xff] }
0x1a0c   :  { %v2631_v24 = vpop.permute.xlu0 %2630 }
0x1a0d   :  { %2642 = vst.msk [vmem:[#allocation5 + $0x10] sm:$0xff] %vm2640_vm4, %v2631_v24  ;;  %5373 = vadd.xlane.f32.xlu1 %v5372_v57  ;;  %v12659_v24 = vpack.c.bf16 %v12657_v13, %v12658_v17  ;;  %v12663_v57 = vld [vmem:[#allocation40_spill] sm:$0xff] }
0x1a10   :  { %v1963_v22 = vpop.permute.xlu0 %1962 }
0x1a11   :  { %1973 = vst.msk [vmem:[#allocation5 + $0x20] sm:$0xff] %vm1970_vm2, %v1963_v22  ;;  %4093 = vadd.xlane.f32.xlu1 %v4092_v50  ;;  %v12664_v22 = vld [vmem:[#allocation94_spill] sm:$0xff] }
0x1a12   :  { %2308 = vst.msk [vmem:[#allocation5 + $0x20] sm:$0xff] %vm2305_vm3, %v2298_v27  ;;  %v12665_v61 = vpack.c.bf16 %v12663_v57, %v12664_v22  ;;  %v12666_v27 = vld [vmem:[#allocation158_spill] sm:$0xff] }
0x1a13   :  { %v8544_v19 = vpop.eup %8543 }
0x1a14   :  { %v5470_v10 = vmul.f32 %v8544_v19, %v12637_v42  ;;  %v3580_v25 = vpop.permute.xlu0 %3579  ;;  %v6487_v41 = vld [vmem:[#allocation5 + $0x10] sm:$0xff]  ;;  %v12669_v42 = vld [vmem:[#allocation93_spill] sm:$0xff] }
0x1a15   :  { %3589 = vst.msk [vmem:[#allocation5 + $0x28] sm:$0xff] %vm2305_vm3, %v3580_v25  ;;  %4096 = vadd.xlane.f32.xlu1 %v4095_v26  ;;  %6747 = vmatmul.mubr.bf16.gmra.mrb[148].mxu1 %v6487_v41  ;;  %v12667_v19 = vld [vmem:[#allocation42_spill] sm:$0xff]  ;;  %v12673_v41 = vld [vmem:[#allocation191_spill] sm:$0xff] }
0x1a16   :  { %v5476_v4 = vpack.c.bf16 %v5470_v10, %v5469_v44  ;;  %v12668_v59 = vpack.c.bf16 %v12666_v27, %v12667_v19  ;;  %v12670_v10 = vld [vmem:[#allocation44_spill] sm:$0xff] }
0x1a17   :  { %v12671_v25 = vpack.c.bf16 %v12669_v42, %v12670_v10 }
0x1a18   :  { %v3914_v15 = vpop.permute.xlu0 %3913  ;;  %5480 = vst.msk [vmem:[#allocation5 + $0x58] sm:$0xff] %vm1372_vm0, %v5476_v4 }
0x1a19   :  { %3923 = vst.msk [vmem:[#allocation5 + $0x28] sm:$0xff] %vm2640_vm4, %v3914_v15 }
0x1a1b   :  { %3915 = vrot.lane.b32.xlu0 %v12640_v3, %s8628_s13 }
0x1a1c   :  { %v5368_v52 = vpop.xlane.xlu1 %5367 }
0x1a20   :  { %v4088_v32 = vpop.xlane.xlu1 %4087  ;;  %v6490_v16 = vld [vmem:[#allocation5 + $0x28] sm:$0xff] }
0x1a21   :  { %6756 = vmatprep.mubr.bf16.mxu1 %v6490_v16  ;;  %8545 = vrcp.f32 %v4088_v32  ;;  %v12674_v32 = vld [vmem:[#allocation45_spill] sm:$0xff] }
0x1a22   :  { %v12675_v16 = vld [vmem:[#allocation105_spill] sm:$0xff] }
0x1a24   :  { %v4091_v63 = vpop.xlane.xlu1 %4090 }
0x1a25   :  { %8547 = vrcp.f32 %v4091_v63  ;;  %v12676_v63 = vpack.c.bf16 %v12674_v32, %v12675_v16  ;;  %v6968_v32 = vld [vmem:[%s12107_s2 + $0x7] ss:$8 sm:$0x3] }
0x1a26   :  { %5801 = vrot.lane.b32.xlu1 %v12641_v2, %s8627_s26  ;;  %8549 = vrcp.f32 %v5368_v52 }
0x1a28   :  { %v3248_v46 = vpop.permute.xlu1 %3247 }
0x1a29   :  { %3256 = vst.msk [vmem:[#allocation5 + $0x38] sm:$0xff] %vm1970_vm2, %v3248_v46  ;;  %v12677_v46 = vpack.c.bf16 %v11650_v40, %v11658_v28 }
0x1a2a   :  { %4855 = vrot.lane.b32.xlu1 %v12642_v45, %s8629_s14 }
0x1a2b   :  { %v8546_v14 = vpop.eup %8545 }
0x1a2c   :  { %v4191_v35 = vmul.f32 %v8546_v14, %v12644_v1 }
0x1a2e   :  { %5189 = vrot.lane.b32.xlu1 %v12643_v5, %s8628_s13 }
0x1a2f   :  { %v8548_v29 = vpop.eup %8547 }
0x1a30   :  { %v4192_v7 = vmul.f32 %v8548_v29, %v12645_v30  ;;  %v8550_v21 = vpop.eup %8549 }
0x1a31   :  { %v5471_v26 = vmul.f32 %v8550_v21, %v12672_v49  ;;  %v12685_v21 = vld [vmem:[#allocation141_spill] sm:$0xff] }
0x1a32   :  { %4523 = vrot.lane.b32.xlu1 %v12646_v6, %s8627_s26  ;;  %v4197_v51 = vpack.c.bf16 %v4192_v7, %v4191_v35 }
0x1a34   :  { %4201 = vst.msk [vmem:[#allocation5 + $0x60] sm:$0xff] %vm1372_vm0, %v4197_v51 }
0x1a36   :  { %4857 = vrot.lane.b32.xlu1 %v12647_v58, %s8629_s14 }
0x1a3a   :  { %5376 = vadd.xlane.f32.xlu0 %v5375_v55  ;;  %5191 = vrot.lane.b32.xlu1 %v12650_v18, %s8628_s13 }
0x1a3e   :  { %4525 = vrot.lane.b32.xlu1 %v12652_v34, %s8627_s26 }
0x1a42   :  { %4859 = vrot.lane.b32.xlu1 %v12653_v8, %s8629_s14 }
0x1a46   :  { %5193 = vrot.lane.b32.xlu1 %v12656_v23, %s8628_s13  ;;  %v12680_v23 = vpack.c.bf16 %v12678_v39, %v12679_v0 }
0x1a49   :  { %v5371_v43 = vpop.xlane.xlu0 %5370 }
0x1a4a   :  { %8551 = vrcp.f32 %v5371_v43  ;;  %4527 = vrot.lane.b32.xlu1 %v12659_v24, %s8627_s26  ;;  %v12681_v24 = vld [vmem:[#allocation43_spill] sm:$0xff] }
0x1a4d   :  { %v2633_v20 = vpop.permute.xlu0 %2632 }
0x1a4e   :  { %2643 = vst.msk [vmem:[#allocation5 + $0x20] sm:$0xff] %vm2640_vm4, %v2633_v20  ;;  %4861 = vrot.lane.b32.xlu1 %v12662_v11, %s8629_s14  ;;  %v12682_v20 = vld [vmem:[#allocation92_spill] sm:$0xff] }
0x1a4f   :  { %v12683_v37 = vpack.c.bf16 %v12681_v24, %v12682_v20 }
0x1a50   :  { %2634 = vrot.lane.b32.xlu0 %v12665_v61, %s8628_s13  ;;  %v12684_v61 = vld [vmem:[#allocation139_spill] sm:$0xff] }
0x1a51   :  { %v1965_v50 = vpop.permute.xlu0 %1964 }
0x1a52   :  { %1974 = vst.msk [vmem:[#allocation5 + $0x30] sm:$0xff] %vm1970_vm2, %v1965_v50  ;;  %5195 = vrot.lane.b32.xlu1 %v12668_v59, %s8628_s13 }
0x1a54   :  { %v8552_v44 = vpop.eup %8551  ;;  %4521 = vrot.lane.b32.xlu0 %v12671_v25, %s8627_s26 }
0x1a55   :  { %v5472_v4 = vmul.f32 %v8552_v44, %v12673_v41  ;;  %v3582_v15 = vpop.permute.xlu0 %3581  ;;  %v6489_v12 = vld [vmem:[#allocation5 + $0x20] sm:$0xff] }
0x1a56   :  { %3590 = vst.msk [vmem:[#allocation5 + $0x38] sm:$0xff] %vm2305_vm3, %v3582_v15  ;;  %6757 = vmatmul.mubr.bf16.gmra.mrb[152].mxu1 %v6489_v12 }
0x1a57   :  { %v5477_v3 = vpack.c.bf16 %v5472_v4, %v5471_v26 }
0x1a58   :  { %6135 = vrot.lane.b32.xlu0 %v6127_v62, %s8629_s14 }
0x1a59   :  { %v6335_v52 = vpop.xlane.xlu1 %6334  ;;  %5481 = vst.msk [vmem:[#allocation5 + $0x68] sm:$0xff] %vm1372_vm0, %v5477_v3 }
0x1a5a   :  { %8553 = vrcp.f32 %v6335_v52 }
0x1a5c   :  { %5803 = vrot.lane.b32.xlu0 %v12676_v63, %s8627_s26 }
0x1a5d   :  { %v6329_v2 = vpop.xlane.xlu1 %6328 }
0x1a60   :  { %6137 = vrot.lane.b32.xlu0 %v12677_v46, %s8629_s14  ;;  %v12686_v46 = vld [vmem:[#allocation13_spill] sm:$0xff] }
0x1a61   :  { %v6347_v45 = vpop.xlane.xlu1 %6346 }
0x1a64   :  { %v8554_v7 = vpop.eup %8553 }
0x1a65   :  { %v6341_v14 = vpop.xlane.xlu1 %6340 }
0x1a69   :  { %v2300_v5 = vpop.permute.xlu1 %2299 }
0x1a6a   :  { %2309 = vst.msk [vmem:[#allocation5 + $0x30] sm:$0xff] %vm2305_vm3, %v2300_v5 }
0x1a83   :  { %v7987_v33 = vpop.f32.mrb[136].mxu1 }
0x1a84   :  { %v6422_v56 = vpop.f32.mrb[137].mxu1 }
0x1a85   :  { %v7988_v62 = vpop.f32.mrb[138].mxu1 }
0x1a86   :  { %v6332_v29 = vpop.xlane.xlu0 %6331  ;;  %v6425_v1 = vpop.f32.mrb[139].mxu1  ;;  %v6456_v40 = vmul.f32 %v8554_v7, %v7988_v62  ;;  %v6817_v62 = vld [vmem:[%s12105_s0] sm:$0xff] }
0x1a87   :  { %8555 = vrcp.f32 %v6332_v29 }
0x1a88   :  { %8557 = vrcp.f32 %v6329_v2 }
0x1a8a   :  { %v6326_v35 = vpop.xlane.xlu0 %6325 }
0x1a8b   :  { %8559 = vrcp.f32 %v6326_v35  ;;  %v6818_v35 = vld [vmem:[%s12105_s0 + $0x8] sm:$0xff] }
0x1a8e   :  { %v6344_v30 = vpop.xlane.xlu0 %6343 }
0x1a91   :  { %v8556_v6 = vpop.eup %8555 }
0x1a92   :  { %v6338_v28 = vpop.xlane.xlu0 %6337  ;;  %v6455_v51 = vmul.f32 %v8556_v6, %v7987_v33  ;;  %v8558_v58 = vpop.eup %8557  ;;  %v6819_v6 = vld [vmem:[%s12105_s0 + $0x10] sm:$0xff] }
0x1a93   :  { %v6454_v31 = vmul.f32 %v8558_v58, %v6425_v1 }
0x1a94   :  { %v6462_v53 = vpack.c.bf16 %v6456_v40, %v6455_v51  ;;  %v12688_v40 = vpack.c.bf16 %v11655_v54, %v11668_v47 }
0x1a95   :  { %v8560_v55 = vpop.eup %8559 }
0x1a96   :  { %v3916_v18 = vpop.permute.xlu0 %3915  ;;  %6471 = vrot.lane.b32.xlu0 %v6462_v53, %s8628_s13  ;;  %v6453_v60 = vmul.f32 %v8560_v55, %v6422_v56  ;;  %v6820_v53 = vld [vmem:[%s12105_s0 + $0x18] sm:$0xff] }
0x1a97   :  { %3924 = vst.msk [vmem:[#allocation5 + $0x38] sm:$0xff] %vm2640_vm4, %v3916_v18 }
0x1a98   :  { %v6461_v34 = vpack.c.bf16 %v6454_v31, %v6453_v60 }
0x1a9a   :  { %6469 = vrot.lane.b32.xlu0 %v6461_v34, %s8628_s13  ;;  %v5374_v8 = vpop.xlane.xlu1 %5373 }
0x1a9e   :  { %5805 = vrot.lane.b32.xlu0 %v12680_v23, %s8627_s26  ;;  %v4094_v43 = vpop.xlane.xlu1 %4093  ;;  %v6492_v13 = vld [vmem:[#allocation5 + $0x38] sm:$0xff] }
0x1a9f   :  { %6766 = vmatprep.mubr.bf16.mxu1 %v6492_v13  ;;  %8561 = vrcp.f32 %v4094_v43 }
0x1aa2   :  { %6139 = vrot.lane.b32.xlu0 %v6129_v48, %s8629_s14  ;;  %v4097_v17 = vpop.xlane.xlu1 %4096 }
0x1aa3   :  { %8563 = vrcp.f32 %v4097_v17 }
0x1aa4   :  { %8565 = vrcp.f32 %v6347_v45  ;;  %v11929_v45 = vrot.slane %v6968_v32, %v12686_v46 }
0x1aa5   :  { %8567 = vrcp.f32 %v6341_v14  ;;  %v12687_v14 = vld [vmem:[#allocation12_spill] sm:$0xff] }
0x1aa6   :  { %5807 = vrot.lane.b32.xlu0 %v12683_v37, %s8627_s26  ;;  %v5802_v9 = vpop.permute.xlu1 %5801  ;;  %8569 = vrcp.f32 %v6344_v30  ;;  %v11933_v5 = vrot.slane %v6968_v32, %v12687_v14 }
0x1aa7   :  { %5813 = vst.msk [vmem:[#allocation5 + $0x48] sm:$0xff] %vm1970_vm2, %v5802_v9  ;;  %8571 = vrcp.f32 %v6338_v28  ;;  %v12689_v9 = vld [vmem:[#allocation188_spill] sm:$0xff] }
0x1aa8   :  { %8573 = vrcp.f32 %v5374_v8 }
0x1aa9   :  { %v8562_v57 = vpop.eup %8561 }
0x1aaa   :  { %v11914_v11 = vpop.permute.xlu1 %4855  ;;  %v4193_v50 = vmul.f32 %v8562_v57, %v12684_v61 }
0x1aad   :  { %v8564_v22 = vpop.eup %8563 }
0x1aae   :  { %v4194_v27 = vmul.f32 %v8564_v22, %v12685_v21  ;;  %v11918_v38 = vpop.permute.xlu1 %5189  ;;  %v8566_v59 = vpop.eup %8565  ;;  %v12690_v22 = vld [vmem:[#allocation190_spill] sm:$0xff] }
0x1aaf   :  { %v8568_v42 = vpop.eup %8567 }
0x1ab0   :  { %v4198_v36 = vpack.c.bf16 %v4194_v27, %v4193_v50  ;;  %v8570_v49 = vpop.eup %8569 }
0x1ab1   :  { %v8572_v41 = vpop.eup %8571 }
0x1ab2   :  { %v4524_v48 = vpop.permute.xlu1 %4523  ;;  %4202 = vst.msk [vmem:[#allocation5 + $0x70] sm:$0xff] %vm1372_vm0, %v4198_v36  ;;  %v8574_v24 = vpop.eup %8573 }
0x1ab3   :  { %4534 = vst.msk [vmem:[#allocation5 + $0x50] sm:$0xff] %vm1970_vm2, %v4524_v48  ;;  %v5473_v57 = vmul.f32 %v8574_v24, %v12689_v9  ;;  %v6821_v48 = vld [vmem:[%s12105_s0 + $0x20] sm:$0xff] }
0x1ab6   :  { %v4858_v19 = vpop.permute.xlu1 %4857 }
0x1ab7   :  { %4868 = vst.msk [vmem:[#allocation5 + $0x50] sm:$0xff] %vm2305_vm3, %v4858_v19 }
0x1ab9   :  { %v7991_v44 = vpop.f32.mrb[140].mxu1 }
0x1aba   :  { %v6438_v10 = vpop.f32.mrb[141].mxu1  ;;  %v5192_v25 = vpop.permute.xlu1 %5191  ;;  %v6459_v4 = vmul.f32 %v8570_v49, %v7991_v44  ;;  %v6822_v44 = vld [vmem:[%s12105_s0 + $0x28] sm:$0xff] }
0x1abb   :  { %5202 = vst.msk [vmem:[#allocation5 + $0x50] sm:$0xff] %vm2640_vm4, %v5192_v25  ;;  %v7992_v26 = vpop.f32.mrb[142].mxu1  ;;  %v6457_v3 = vmul.f32 %v8572_v41, %v6438_v10  ;;  %v6823_v25 = vld [vmem:[%s12105_s0 + $0x30] sm:$0xff] }
0x1abc   :  { %v6460_v15 = vmul.f32 %v8566_v59, %v7992_v26  ;;  %v6441_v12 = vpop.f32.mrb[143].mxu1 }
0x1abd   :  { %v6458_v52 = vmul.f32 %v8568_v42, %v6441_v12 }
0x1abe   :  { %v6464_v16 = vpack.c.bf16 %v6460_v15, %v6459_v4  ;;  %v4526_v63 = vpop.permute.xlu1 %4525  ;;  %v6824_v4 = vld [vmem:[%s12105_s0 + $0x38] sm:$0xff] }
0x1abf   :  { %v6463_v2 = vpack.c.bf16 %v6458_v52, %v6457_v3  ;;  %4535 = vst.msk [vmem:[#allocation5 + $0x60] sm:$0xff] %vm1970_vm2, %v4526_v63 }
0x1ac1   :  { %6473 = vrot.lane.b32.xlu0 %v6463_v2, %s8628_s13 }
0x1ac2   :  { %v4860_v33 = vpop.permute.xlu1 %4859 }
0x1ac3   :  { %v6738_v56 = vpop.f32.mrb[144].mxu1  ;;  %4869 = vst.msk [vmem:[#allocation5 + $0x60] sm:$0xff] %vm2305_vm3, %v4860_v33 }
0x1ac4   :  { %v6739_v29 = vadd.f32 %v6738_v56, %v11929_v45  ;;  %v6740_v1 = vpop.f32.mrb[145].mxu1 }
0x1ac5   :  { %v6741_v30 = vadd.f32 %v6740_v1, %v11933_v5  ;;  %v6742_v7 = vpop.f32.mrb[146].mxu1  ;;  %6141 = vrot.lane.b32.xlu0 %v12688_v40, %s8629_s14 }
0x1ac6   :  { %v6849_v28 = vadd.f32 %v6817_v62, %v6739_v29  ;;  %v6743_v51 = vadd.f32 %v6742_v7, %v11929_v45  ;;  %v6744_v58 = vpop.f32.mrb[147].mxu1  ;;  %v5194_v55 = vpop.permute.xlu1 %5193 }
0x1ac7   :  { %v6850_v31 = vadd.f32 %v6818_v35, %v6741_v30  ;;  %v6745_v18 = vadd.f32 %v6744_v58, %v11933_v5  ;;  %5203 = vst.msk [vmem:[#allocation5 + $0x60] sm:$0xff] %vm2640_vm4, %v5194_v55  ;;  %v5377_v60 = vpop.xlane.xlu0 %5376  ;;  %v6495_v30 = vld [vmem:[#allocation5 + $0x50] sm:$0xff] }
0x1ac8   :  { %v6881_v34 = vmax.f32 %v6849_v28, 0.0  ;;  %v6851_v39 = vadd.f32 %v6819_v6, %v6743_v51  ;;  %8575 = vrcp.f32 %v5377_v60  ;;  %v6825_v6 = vld [vmem:[%s12105_s0 + $0x40] sm:$0xff]  ;;  %v6826_v51 = vld [vmem:[%s12105_s0 + $0x48] sm:$0xff]  ;;  %v6827_v55 = vld [vmem:[%s12105_s0 + $0x50] sm:$0xff] }
0x1ac9   :  { %v6882_v54 = vmax.f32 %v6850_v31, 0.0  ;;  %v6852_v47 = vadd.f32 %v6820_v53, %v6745_v18  ;;  %6475 = vrot.lane.b32.xlu0 %v6464_v16, %s8628_s13 }
0x1aca   :  { %6913 = vst [vmem:[#allocation9] sm:$0xff] %v6881_v34  ;;  %v6883_v8 = vmax.f32 %v6851_v39, 0.0  ;;  %v4528_v0 = vpop.permute.xlu1 %4527  ;;  %v6828_v34 = vld [vmem:[%s12105_s0 + $0x58] sm:$0xff] }
0x1acb   :  { %6914 = vst [vmem:[#allocation9 + $0x8] sm:$0xff] %v6882_v54  ;;  %v6884_v23 = vmax.f32 %v6852_v47, 0.0  ;;  %4536 = vst.msk [vmem:[#allocation5 + $0x70] sm:$0xff] %vm1970_vm2, %v4528_v0  ;;  %v2635_v43 = vpop.permute.xlu0 %2634 }
0x1acc   :  { %6915 = vst [vmem:[#allocation9 + $0x10] sm:$0xff] %v6883_v8  ;;  %2644 = vst.msk [vmem:[#allocation5 + $0x30] sm:$0xff] %vm2640_vm4, %v2635_v43 }
0x1acd   :  { %6916 = vst [vmem:[#allocation9 + $0x18] sm:$0xff] %v6884_v23 }
0x1ace   :  { %v4862_v13 = vpop.permute.xlu1 %4861  ;;  %v6497_v9 = vld [vmem:[#allocation5 + $0x60] sm:$0xff] }
0x1acf   :  { %4870 = vst.msk [vmem:[#allocation5 + $0x70] sm:$0xff] %vm2305_vm3, %v4862_v13  ;;  %v4522_v17 = vpop.permute.xlu0 %4521 }
0x1ad0   :  { %4533 = vst.msk [vmem:[#allocation5 + $0x40] sm:$0xff] %vm1970_vm2, %v4522_v17 }
0x1ad1   :  { %4867 = vst.msk [vmem:[#allocation5 + $0x40] sm:$0xff] %vm2305_vm3, %v11914_v11 }
0x1ad2   :  { %v8576_v20 = vpop.eup %8575  ;;  %5201 = vst.msk [vmem:[#allocation5 + $0x40] sm:$0xff] %vm2640_vm4, %v11918_v38  ;;  %v5196_v37 = vpop.permute.xlu1 %5195 }
0x1ad3   :  { %v5474_v61 = vmul.f32 %v8576_v20, %v12690_v22  ;;  %5204 = vst.msk [vmem:[#allocation5 + $0x70] sm:$0xff] %vm2640_vm4, %v5196_v37  ;;  %v6136_v50 = vpop.permute.xlu0 %6135  ;;  %v6491_v21 = vld [vmem:[#allocation5 + $0x30] sm:$0xff] }
0x1ad4   :  { %6147 = vst.msk [vmem:[#allocation5 + $0x48] sm:$0xff] %vm2305_vm3, %v6136_v50  ;;  %6767 = vmatmul.mubr.bf16.gmra.mrb[156].mxu1 %v6491_v21  ;;  %v6829_v50 = vld [vmem:[%s12105_s0 + $0x60] sm:$0xff] }
0x1ad5   :  { %v5478_v27 = vpack.c.bf16 %v5474_v61, %v5473_v57 }
0x1ad7   :  { %v5804_v36 = vpop.permute.xlu0 %5803  ;;  %5482 = vst.msk [vmem:[#allocation5 + $0x78] sm:$0xff] %vm1372_vm0, %v5478_v27 }
0x1ad8   :  { %5814 = vst.msk [vmem:[#allocation5 + $0x58] sm:$0xff] %vm1970_vm2, %v5804_v36  ;;  %v6830_v36 = vld [vmem:[%s12105_s0 + $0x68] sm:$0xff] }
0x1ad9   :  { %v6493_v29 = vld [vmem:[#allocation5 + $0x40] sm:$0xff] }
0x1ada   :  { %v6499_v22 = vld [vmem:[#allocation5 + $0x70] sm:$0xff] }
0x1adb   :  { %v6138_v11 = vpop.permute.xlu0 %6137 }
0x1adc   :  { %6148 = vst.msk [vmem:[#allocation5 + $0x58] sm:$0xff] %vm2305_vm3, %v6138_v11 }
0x1ae8   :  { %v6748_v38 = vpop.f32.mrb[148].mxu1 }
0x1ae9   :  { %v6749_v19 = vadd.f32 %v6748_v38, %v11929_v45  ;;  %v6750_v59 = vpop.f32.mrb[149].mxu1 }
0x1aea   :  { %v6751_v42 = vadd.f32 %v6750_v59, %v11933_v5  ;;  %v6752_v10 = vpop.f32.mrb[150].mxu1 }
0x1aeb   :  { %v6853_v49 = vadd.f32 %v6821_v48, %v6749_v19  ;;  %v6753_v26 = vadd.f32 %v6752_v10, %v11929_v45  ;;  %v6754_v41 = vpop.f32.mrb[151].mxu1  ;;  %v6831_v48 = vld [vmem:[%s12105_s0 + $0x70] sm:$0xff] }
0x1aec   :  { %v6854_v15 = vadd.f32 %v6822_v44, %v6751_v42  ;;  %v6755_v12 = vadd.f32 %v6754_v41, %v11933_v5  ;;  %v6832_v42 = vld [vmem:[%s12105_s0 + $0x78] sm:$0xff] }
0x1aed   :  { %v6885_v3 = vmax.f32 %v6853_v49, 0.0  ;;  %v6855_v52 = vadd.f32 %v6823_v25, %v6753_v26 }
0x1aee   :  { %v6886_v32 = vmax.f32 %v6854_v15, 0.0  ;;  %v6856_v16 = vadd.f32 %v6824_v4, %v6755_v12 }
0x1aef   :  { %6917 = vst [vmem:[#allocation9 + $0x20] sm:$0xff] %v6885_v3  ;;  %v6887_v63 = vmax.f32 %v6855_v52, 0.0  ;;  %v6833_v52 = vld [vmem:[%s12105_s0 + $0x80] sm:$0xff] }
0x1af0   :  { %6918 = vst [vmem:[#allocation9 + $0x28] sm:$0xff] %v6886_v32  ;;  %v6888_v2 = vmax.f32 %v6856_v16, 0.0 }
0x1af1   :  { %6919 = vst [vmem:[#allocation9 + $0x30] sm:$0xff] %v6887_v63  ;;  %v6834_v63 = vld [vmem:[%s12105_s0 + $0x88] sm:$0xff] }
0x1af2   :  { %6920 = vst [vmem:[#allocation9 + $0x38] sm:$0xff] %v6888_v2 }
0x1b08   :  { %v6472_v46 = vpop.permute.xlu0 %6471 }
0x1b09   :  { %6482 = vst.msk [vmem:[#allocation5 + $0x58] sm:$0xff] %vm2640_vm4, %v6472_v46 }
0x1b0c   :  { %v6470_v14 = vpop.permute.xlu0 %6469 }
0x1b0d   :  { %6481 = vst.msk [vmem:[#allocation5 + $0x48] sm:$0xff] %vm2640_vm4, %v6470_v14  ;;  %v6835_v14 = vld [vmem:[%s12105_s0 + $0x90] sm:$0xff] }
0x1b10   :  { %v5806_v33 = vpop.permute.xlu0 %5805  ;;  %v6496_v1 = vld [vmem:[#allocation5 + $0x58] sm:$0xff] }
0x1b11   :  { %5815 = vst.msk [vmem:[#allocation5 + $0x68] sm:$0xff] %vm1970_vm2, %v5806_v33 }
0x1b14   :  { %v6140_v56 = vpop.permute.xlu0 %6139  ;;  %v6494_v62 = vld [vmem:[#allocation5 + $0x48] sm:$0xff] }
0x1b15   :  { %6149 = vst.msk [vmem:[#allocation5 + $0x68] sm:$0xff] %vm2305_vm3, %v6140_v56  ;;  %6776 = vmatprep.mubr.bf16.mxu1 %v6494_v62 }
0x1b16   :  { %6777 = vmatmul.mubr.bf16.gmra.mrb[160].mxu1 %v6493_v29  ;;  %v6836_v29 = vld [vmem:[%s12105_s0 + $0x98] sm:$0xff] }
0x1b17   :  { %6786 = vmatprep.mubr.bf16.mxu1 %v6496_v1 }
0x1b18   :  { %v5808_v35 = vpop.permute.xlu0 %5807 }
0x1b19   :  { %5816 = vst.msk [vmem:[#allocation5 + $0x78] sm:$0xff] %vm1970_vm2, %v5808_v35 }
0x1b1e   :  { %6787 = vmatmul.mubr.bf16.gmra.mrb[164].mxu1 %v6495_v30 }
0x1b29   :  { %v6758_v7 = vpop.f32.mrb[152].mxu1 }
0x1b2a   :  { %v6759_v40 = vadd.f32 %v6758_v7, %v11929_v45  ;;  %v6760_v28 = vpop.f32.mrb[153].mxu1 }
0x1b2b   :  { %v6761_v58 = vadd.f32 %v6760_v28, %v11933_v5  ;;  %v6762_v53 = vpop.f32.mrb[154].mxu1 }
0x1b2c   :  { %v6857_v31 = vadd.f32 %v6825_v6, %v6759_v40  ;;  %v6763_v18 = vadd.f32 %v6762_v53, %v11929_v45  ;;  %v6764_v60 = vpop.f32.mrb[155].mxu1  ;;  %v6837_v53 = vld [vmem:[%s12105_s0 + $0xa0] sm:$0xff] }
0x1b2d   :  { %v6858_v39 = vadd.f32 %v6826_v51, %v6761_v58  ;;  %v6765_v54 = vadd.f32 %v6764_v60, %v11933_v5 }
0x1b2e   :  { %v6889_v47 = vmax.f32 %v6857_v31, 0.0  ;;  %v6859_v8 = vadd.f32 %v6827_v55, %v6763_v18  ;;  %v6838_v18 = vld [vmem:[%s12105_s0 + $0xa8] sm:$0xff] }
0x1b2f   :  { %v6890_v0 = vmax.f32 %v6858_v39, 0.0  ;;  %v6860_v23 = vadd.f32 %v6828_v34, %v6765_v54  ;;  %v6839_v39 = vld [vmem:[%s12105_s0 + $0xb0] sm:$0xff] }
0x1b30   :  { %6921 = vst [vmem:[#allocation9 + $0x40] sm:$0xff] %v6889_v47  ;;  %v6891_v43 = vmax.f32 %v6859_v8, 0.0 }
0x1b31   :  { %6922 = vst [vmem:[#allocation9 + $0x48] sm:$0xff] %v6890_v0  ;;  %v6892_v13 = vmax.f32 %v6860_v23, 0.0  ;;  %v6840_v0 = vld [vmem:[%s12105_s0 + $0xb8] sm:$0xff] }
0x1b32   :  { %6923 = vst [vmem:[#allocation9 + $0x50] sm:$0xff] %v6891_v43 }
0x1b33   :  { %6924 = vst [vmem:[#allocation9 + $0x58] sm:$0xff] %v6892_v13  ;;  %v6474_v17 = vpop.permute.xlu0 %6473 }
0x1b34   :  { %6483 = vst.msk [vmem:[#allocation5 + $0x68] sm:$0xff] %vm2640_vm4, %v6474_v17 }
0x1b37   :  { %v6142_v24 = vpop.permute.xlu0 %6141 }
0x1b38   :  { %6150 = vst.msk [vmem:[#allocation5 + $0x78] sm:$0xff] %vm2305_vm3, %v6142_v24 }
0x1b3b   :  { %v6476_v20 = vpop.permute.xlu0 %6475  ;;  %v6498_v37 = vld [vmem:[#allocation5 + $0x68] sm:$0xff] }
0x1b3c   :  { %6484 = vst.msk [vmem:[#allocation5 + $0x78] sm:$0xff] %vm2640_vm4, %v6476_v20  ;;  %6796 = vmatprep.mubr.bf16.mxu1 %v6498_v37 }
0x1b3d   :  { %6797 = vmatmul.mubr.bf16.gmra.mrb[168].mxu1 %v6497_v9 }
0x1b43   :  { %v6500_v57 = vld [vmem:[#allocation5 + $0x78] sm:$0xff] }
0x1b44   :  { %6806 = vmatprep.mubr.bf16.mxu1 %v6500_v57 }
0x1b45   :  { %6807 = vmatmul.mubr.bf16.gmra.mrb[172].mxu1 %v6499_v22  ;;  %v6841_v22 = vld [vmem:[%s12105_s0 + $0xc0] sm:$0xff] }
0x1ba7   :  { %v6768_v61 = vpop.f32.mrb[156].mxu1 }
0x1ba8   :  { %v6769_v21 = vadd.f32 %v6768_v61, %v11929_v45  ;;  %v6770_v27 = vpop.f32.mrb[157].mxu1 }
0x1ba9   :  { %v6771_v11 = vadd.f32 %v6770_v27, %v11933_v5  ;;  %v6772_v38 = vpop.f32.mrb[158].mxu1 }
0x1baa   :  { %v6861_v19 = vadd.f32 %v6829_v50, %v6769_v21  ;;  %v6773_v59 = vadd.f32 %v6772_v38, %v11929_v45  ;;  %v6774_v44 = vpop.f32.mrb[159].mxu1  ;;  %v6842_v21 = vld [vmem:[%s12105_s0 + $0xc8] sm:$0xff] }
0x1bab   :  { %v6862_v10 = vadd.f32 %v6830_v36, %v6771_v11  ;;  %v6775_v25 = vadd.f32 %v6774_v44, %v11933_v5  ;;  %v6843_v11 = vld [vmem:[%s12105_s0 + $0xd0] sm:$0xff] }
0x1bac   :  { %v6893_v49 = vmax.f32 %v6861_v19, 0.0  ;;  %v6863_v26 = vadd.f32 %v6831_v48, %v6773_v59  ;;  %v6844_v59 = vld [vmem:[%s12105_s0 + $0xd8] sm:$0xff] }
0x1bad   :  { %v6894_v41 = vmax.f32 %v6862_v10, 0.0  ;;  %v6864_v4 = vadd.f32 %v6832_v42, %v6775_v25 }
0x1bae   :  { %6925 = vst [vmem:[#allocation9 + $0x60] sm:$0xff] %v6893_v49  ;;  %v6895_v15 = vmax.f32 %v6863_v26, 0.0 }
0x1baf   :  { %6926 = vst [vmem:[#allocation9 + $0x68] sm:$0xff] %v6894_v41  ;;  %v6896_v12 = vmax.f32 %v6864_v4, 0.0 }
0x1bb0   :  { %6927 = vst [vmem:[#allocation9 + $0x70] sm:$0xff] %v6895_v15 }
0x1bb1   :  { %6928 = vst [vmem:[#allocation9 + $0x78] sm:$0xff] %v6896_v12  ;;  %v6845_v12 = vld [vmem:[%s12105_s0 + $0xe0] sm:$0xff] }
0x1be9   :  { %v6778_v3 = vpop.f32.mrb[160].mxu1 }
0x1bea   :  { %v6779_v32 = vadd.f32 %v6778_v3, %v11929_v45  ;;  %v6780_v16 = vpop.f32.mrb[161].mxu1 }
0x1beb   :  { %v6781_v2 = vadd.f32 %v6780_v16, %v11933_v5  ;;  %v6782_v46 = vpop.f32.mrb[162].mxu1 }
0x1bec   :  { %v6865_v33 = vadd.f32 %v6833_v52, %v6779_v32  ;;  %v6783_v56 = vadd.f32 %v6782_v46, %v11929_v45  ;;  %v6784_v62 = vpop.f32.mrb[163].mxu1  ;;  %v6846_v32 = vld [vmem:[%s12105_s0 + $0xe8] sm:$0xff] }
0x1bed   :  { %v6866_v1 = vadd.f32 %v6834_v63, %v6781_v2  ;;  %v6785_v35 = vadd.f32 %v6784_v62, %v11933_v5  ;;  %v6847_v2 = vld [vmem:[%s12105_s0 + $0xf0] sm:$0xff] }
0x1bee   :  { %v6897_v30 = vmax.f32 %v6865_v33, 0.0  ;;  %v6867_v7 = vadd.f32 %v6835_v14, %v6783_v56  ;;  %v6848_v56 = vld [vmem:[%s12105_s0 + $0xf8] sm:$0xff] }
0x1bef   :  { %v6898_v6 = vmax.f32 %v6866_v1, 0.0  ;;  %v6868_v40 = vadd.f32 %v6836_v29, %v6785_v35 }
0x1bf0   :  { %6929 = vst [vmem:[#allocation9 + $0x80] sm:$0xff] %v6897_v30  ;;  %v6899_v28 = vmax.f32 %v6867_v7, 0.0 }
0x1bf1   :  { %6930 = vst [vmem:[#allocation9 + $0x88] sm:$0xff] %v6898_v6  ;;  %v6900_v51 = vmax.f32 %v6868_v40, 0.0  ;;  %v6788_v58 = vpop.f32.mrb[164].mxu1 }
0x1bf2   :  { %6931 = vst [vmem:[#allocation9 + $0x90] sm:$0xff] %v6899_v28  ;;  %v6789_v55 = vadd.f32 %v6788_v58, %v11929_v45  ;;  %v6790_v31 = vpop.f32.mrb[165].mxu1 }
0x1bf3   :  { %6932 = vst [vmem:[#allocation9 + $0x98] sm:$0xff] %v6900_v51  ;;  %v6791_v60 = vadd.f32 %v6790_v31, %v11933_v5  ;;  %v6792_v34 = vpop.f32.mrb[166].mxu1 }
0x1bf4   :  { %v6869_v54 = vadd.f32 %v6837_v53, %v6789_v55  ;;  %v6793_v47 = vadd.f32 %v6792_v34, %v11929_v45  ;;  %v6794_v8 = vpop.f32.mrb[167].mxu1 }
0x1bf5   :  { %v6870_v23 = vadd.f32 %v6838_v18, %v6791_v60  ;;  %v6795_v43 = vadd.f32 %v6794_v8, %v11933_v5 }
0x1bf6   :  { %v6901_v13 = vmax.f32 %v6869_v54, 0.0  ;;  %v6871_v17 = vadd.f32 %v6839_v39, %v6793_v47 }
0x1bf7   :  { %v6902_v24 = vmax.f32 %v6870_v23, 0.0  ;;  %v6872_v20 = vadd.f32 %v6840_v0, %v6795_v43 }
0x1bf8   :  { %6933 = vst [vmem:[#allocation9 + $0xa0] sm:$0xff] %v6901_v13  ;;  %v6903_v37 = vmax.f32 %v6871_v17, 0.0 }
0x1bf9   :  { %6934 = vst [vmem:[#allocation9 + $0xa8] sm:$0xff] %v6902_v24  ;;  %v6904_v9 = vmax.f32 %v6872_v20, 0.0 }
0x1bfa   :  { %6935 = vst [vmem:[#allocation9 + $0xb0] sm:$0xff] %v6903_v37 }
0x1bfb   :  { %6936 = vst [vmem:[#allocation9 + $0xb8] sm:$0xff] %v6904_v9 }
0x1c10   :  { %v6798_v57 = vpop.f32.mrb[168].mxu1 }
0x1c11   :  { %v6799_v61 = vadd.f32 %v6798_v57, %v11929_v45  ;;  %v6800_v50 = vpop.f32.mrb[169].mxu1 }
0x1c12   :  { %v6801_v27 = vadd.f32 %v6800_v50, %v11933_v5  ;;  %v6802_v36 = vpop.f32.mrb[170].mxu1 }
0x1c13   :  { %v6873_v38 = vadd.f32 %v6841_v22, %v6799_v61  ;;  %v6803_v48 = vadd.f32 %v6802_v36, %v11929_v45  ;;  %v6804_v19 = vpop.f32.mrb[171].mxu1 }
0x1c14   :  { %v6874_v44 = vadd.f32 %v6842_v21, %v6801_v27  ;;  %v6805_v42 = vadd.f32 %v6804_v19, %v11933_v5 }
0x1c15   :  { %v6905_v10 = vmax.f32 %v6873_v38, 0.0  ;;  %v6875_v25 = vadd.f32 %v6843_v11, %v6803_v48 }
0x1c16   :  { %v6906_v49 = vmax.f32 %v6874_v44, 0.0  ;;  %v6876_v26 = vadd.f32 %v6844_v59, %v6805_v42 }
0x1c17   :  { %6937 = vst [vmem:[#allocation9 + $0xc0] sm:$0xff] %v6905_v10  ;;  %v6907_v41 = vmax.f32 %v6875_v25, 0.0 }
0x1c18   :  { %6938 = vst [vmem:[#allocation9 + $0xc8] sm:$0xff] %v6906_v49  ;;  %v6908_v4 = vmax.f32 %v6876_v26, 0.0  ;;  %v6808_v15 = vpop.f32.mrb[172].mxu1 }
0x1c19   :  { %6939 = vst [vmem:[#allocation9 + $0xd0] sm:$0xff] %v6907_v41  ;;  %v6809_v3 = vadd.f32 %v6808_v15, %v11929_v45  ;;  %v6810_v52 = vpop.f32.mrb[173].mxu1 }
0x1c1a   :  { %6940 = vst [vmem:[#allocation9 + $0xd8] sm:$0xff] %v6908_v4  ;;  %v6811_v16 = vadd.f32 %v6810_v52, %v11933_v5  ;;  %v6812_v63 = vpop.f32.mrb[174].mxu1 }
0x1c1b   :  { %v6877_v46 = vadd.f32 %v6845_v12, %v6809_v3  ;;  %v6813_v14 = vadd.f32 %v6812_v63, %v11929_v45  ;;  %v6814_v33 = vpop.f32.mrb[175].mxu1 }
0x1c1c   :  { %v6878_v62 = vadd.f32 %v6846_v32, %v6811_v16  ;;  %v6815_v29 = vadd.f32 %v6814_v33, %v11933_v5 }
0x1c1d   :  { %v6909_v1 = vmax.f32 %v6877_v46, 0.0  ;;  %v6879_v35 = vadd.f32 %v6847_v2, %v6813_v14 }
0x1c1e   :  { %v6910_v30 = vmax.f32 %v6878_v62, 0.0  ;;  %v6880_v7 = vadd.f32 %v6848_v56, %v6815_v29 }
0x1c1f   :  { %6941 = vst [vmem:[#allocation9 + $0xe0] sm:$0xff] %v6909_v1  ;;  %v6911_v6 = vmax.f32 %v6879_v35, 0.0 }
0x1c20   :  { %6942 = vst [vmem:[#allocation9 + $0xe8] sm:$0xff] %v6910_v30  ;;  %v6912_v40 = vmax.f32 %v6880_v7, 0.0 }
0x1c21   :  { %6943 = vst [vmem:[#allocation9 + $0xf0] sm:$0xff] %v6911_v6 }
0x1c22   :  { %6944 = vst [vmem:[#allocation9 + $0xf8] sm:$0xff] %v6912_v40 }
0x1c23   :  { %8610 = shalt.err (!%p8607_p12)
}
0x1c24   :  { %s8611_s25 = scalar_lea.hbm %s12109_s4, 4096 }
0x1c25   :  { %p8612_p13 = scmp.ne.s32.totalorder %s12109_s4, %s8611_s25  ;;  %p8615_p0 = scmp.lt.u32.totalorder %s8611_s25, %s12109_s4 }
0x1c27   :  { %p8617_p1 = pnand %p8615_p0, %p8612_p13 }
0x1c29   :  { %8620 = shalt.err (!%p8617_p1)
}
0x1c2a   :  { %s8631_s30 = smov 256   ;;  %s8632_s5 = smov 16  }
0x1c2b   :  { %6956 = dma.vmem_to_hbm [thread:$0]  %s6951_s22, 4096, %s12109_s4, [#allocation8], %s8631_s30, %s8631_s30, %s8632_s5  }
0x1c2c   :  { %8623 = dma.done.wait [#allocation8], 4096  }
0x1c2d   :  { %8624 = vsyncadd [#allocation8], 4294963200 }
0x1c2e   :  { %6960 = vsyncpa [#allocation7], 1 }
0x1c2f   :  { %6961 = vsyncpa [#allocation8], 1 }

</bundles_post_ra>
